<compile_context>
chip_gen: v7x
topology: tpu7x:2x2x1
jax: 0.10.0
libtpu: 0.0.40
codegen_flags: <defaults>
</compile_context>

<pallas_src>
import functools

import jax
import jax.numpy as jnp
from jax.experimental import pallas as pl
from jax.experimental.pallas import tpu as pltpu


# ----------------------------------------------------------------------------
# Pallas kernel: fused conv(4x4, s=2, p=1) + InstanceNorm2d + LeakyReLU(0.4).
# One grid step = one image (instance-norm stats are per image, per channel).
# ----------------------------------------------------------------------------
def _down_block_kernel(s2d_ref, w_ref, o_ref, *, oh, ow, cin,
                       out_channels_first, negative_slope, eps):
    ohw = oh * ow
    acc = None
    for g in range(4):                                    # tap groups (r, s) in {0,1}^2
        r, s = divmod(g, 2)
        xs = s2d_ref[0, r:r + oh, s:s + ow, :]            # (oh, ow, 4*cin)  f32
        if ow % 8 == 0:
            xs2 = xs.reshape(ohw, 4 * cin)
        else:                                             # tiny deep layers (ow = 4, 2)
            xs2 = jnp.concatenate([xs[i] for i in range(oh)], axis=0)
        part = jnp.dot(xs2.astype(jnp.bfloat16), w_ref[g],
                       preferred_element_type=jnp.float32)  # (ohw, cout) f32 on MXU
        acc = part if acc is None else acc + part

    # InstanceNorm2d (affine=False, biased variance, eps): per-channel stats over the
    # spatial axis of this single image, one-pass sum / sum-of-squares.
    mean = jnp.mean(acc, axis=0, keepdims=True)            # (1, cout)
    mean_sq = jnp.mean(acc * acc, axis=0, keepdims=True)   # (1, cout)
    var = mean_sq - mean * mean
    inv = jax.lax.rsqrt(var + eps)
    y = acc * inv - mean * inv

    # LeakyReLU(negative_slope=0.4)
    y = jnp.where(y >= 0.0, y, negative_slope * y)

    if out_channels_first:
        o_ref[0] = y.T.astype(o_ref.dtype)                 # (cout, ohw): lane-dense (small cout)
    else:
        o_ref[0] = y.astype(o_ref.dtype)                   # (ohw, cout): lane-dense (cout >= 128)


# ----------------------------------------------------------------------------
# Host-side (XLA) prep: space-to-depth of the zero-padded input + weight repack.
# ----------------------------------------------------------------------------
def _space_to_depth_pad(x_nhwc):
    """(N,H,W,C) -> (N, H/2+1, W/2+1, 4C), s2d[n,i,j,(a*2+b)*C+c] = xpad[n,2i+a,2j+b,c]."""
    n, h, w, c = x_nhwc.shape
    oh, ow = h // 2, w // 2
    xp = jnp.pad(x_nhwc, ((0, 0), (1, 1), (1, 1), (0, 0)))
    s2d = xp.reshape(n, oh + 1, 2, ow + 1, 2, c)
    s2d = jnp.transpose(s2d, (0, 1, 3, 2, 4, 5))
    return s2d.reshape(n, oh + 1, ow + 1, 4 * c)


def _prep_weight(w_oihw):
    """(Cout,Cin,4,4) -> (4, 4*Cin, Cout) bf16, w4[r*2+s, (a*2+b)*Cin+ci, co] = w[co,ci,2r+a,2s+b]."""
    cout, cin, kh, kw = w_oihw.shape
    assert kh == 4 and kw == 4
    wr = w_oihw.reshape(cout, cin, 2, 2, 2, 2)             # (co, ci, r, a, s, b)
    w4 = jnp.transpose(wr, (2, 4, 3, 5, 1, 0))             # (r, s, a, b, ci, co)
    return w4.reshape(4, 4 * cin, cout).astype(jnp.bfloat16)


def unet_down(x_nhwc, w_oihw, *, negative_slope=0.4, eps=1e-5):
    """One UNetDown block. Returns (d_nchw, d_nhwc)."""
    n, h, w, cin = x_nhwc.shape
    cout = w_oihw.shape[0]
    assert h % 2 == 0 and w % 2 == 0, "spatial dims must be even for k=4, s=2, p=1"
    oh, ow = h // 2, w // 2
    ohw = oh * ow

    s2d = _space_to_depth_pad(x_nhwc).astype(jnp.float32)
    w4 = _prep_weight(w_oihw)

    out_channels_first = cout < 128
    out_shape = (n, cout, ohw) if out_channels_first else (n, ohw, cout)

    kernel = functools.partial(
        _down_block_kernel, oh=oh, ow=ow, cin=cin,
        out_channels_first=out_channels_first,
        negative_slope=negative_slope, eps=eps)

    out = pl.pallas_call(
        kernel,
        out_shape=jax.ShapeDtypeStruct(out_shape, jnp.float32),
        grid=(n,),
        in_specs=[
            pl.BlockSpec((1, oh + 1, ow + 1, 4 * cin), lambda i: (i, 0, 0, 0)),
            pl.BlockSpec((4, 4 * cin, cout), lambda i: (0, 0, 0)),
        ],
        out_specs=pl.BlockSpec((1,) + out_shape[1:], lambda i: (i, 0, 0)),
        compiler_params=pltpu.CompilerParams(
            dimension_semantics=("parallel",)),
    )(s2d, w4)

    if out_channels_first:
        d_nchw = out.reshape(n, cout, oh, ow)
        d_nhwc = jnp.transpose(d_nchw, (0, 2, 3, 1))
    else:
        d_nhwc = out.reshape(n, oh, ow, cout)
        d_nchw = jnp.transpose(d_nhwc, (0, 3, 1, 2))
    return d_nchw, d_nhwc


# ----------------------------------------------------------------------------
# Encoder: 5 UNetDown blocks (6->16->32->64->128->256), each halves H and W.
# ----------------------------------------------------------------------------
def init_encoder_params(key, in_channels=6):
    sizes = [(16, in_channels), (32, 16), (64, 32), (128, 64), (256, 128)]
    params = []
    for i, (co, ci) in enumerate(sizes):
        k = jax.random.fold_in(key, i)
        fan_in = ci * 4 * 4
        wgt = jax.random.normal(k, (co, ci, 4, 4), jnp.float32) * (1.0 / jnp.sqrt(fan_in))
        params.append(wgt)
    return params


@jax.jit
def encoder_forward(x_nchw, params):
    """x_nchw: (N, Cin, H, W). Returns [d1..d5] in NCHW, matching the PyTorch module."""
    outs = []
    h_nhwc = jnp.transpose(x_nchw, (0, 2, 3, 1))
    for wgt in params:
        d_nchw, h_nhwc = unet_down(h_nhwc, wgt)
        outs.append(d_nchw)
    return outs


def _reference_encoder(x_nchw, params, negative_slope=0.4, eps=1e-5):
    """Pure-XLA reference (bf16 conv operands, f32 accumulation) for self-checking."""
    outs = []
    h = x_nchw
    for wgt in params:
        y = jax.lax.conv_general_dilated(
            h.astype(jnp.bfloat16), wgt.astype(jnp.bfloat16),
            window_strides=(2, 2), padding=((1, 1), (1, 1)),
            dimension_numbers=("NCHW", "OIHW", "NCHW"),
            preferred_element_type=jnp.float32)
        mean = jnp.mean(y, axis=(2, 3), keepdims=True)
        var = jnp.var(y, axis=(2, 3), keepdims=True)
        yn = (y - mean) * jax.lax.rsqrt(var + eps)
        h = jnp.where(yn >= 0.0, yn, negative_slope * yn)
        outs.append(h)
    return outs


if __name__ == "__main__":
    key = jax.random.PRNGKey(0)
    k_x, k_p = jax.random.split(key)

    # batch=2, in_channels=6, spatial 64x64 (64 -> 32 -> 16 -> 8 -> 4 -> 2).
    x = jax.random.normal(k_x, (2, 6, 64, 64), jnp.float32)
    params = init_encoder_params(k_p, in_channels=6)

    outs = encoder_forward(x, params)
    outs = [jax.block_until_ready(o) for o in outs]

    expected = [(2, 16, 32, 32), (2, 32, 16, 16), (2, 64, 8, 8),
                (2, 128, 4, 4), (2, 256, 2, 2)]
    assert [tuple(o.shape) for o in outs] == expected, \
        f"unexpected shapes: {[o.shape for o in outs]}"
    assert all(bool(jnp.all(jnp.isfinite(o))) for o in outs)

    # Self-check against a pure-XLA reference of the same module.
    refs = _reference_encoder(x, params)
    for i, (o, r) in enumerate(zip(outs, refs)):
        err = float(jnp.max(jnp.abs(o - r)))
        assert err < 0.2, f"down{i + 1}: max abs diff {err}"

    print("KERNEL_OK")
</pallas_src>

<mosaic_0001>
module attributes {stable_mosaic.version = 11 : i64} {
  func.func @_down_block_kernel(%arg0: i32, %arg1: memref<1x33x33x24xf32, #tpu.memory_space<vmem>>, %arg2: memref<4x24x16xbf16, #tpu.memory_space<vmem>>, %arg3: memref<1x16x1024xf32, #tpu.memory_space<vmem>>) attributes {dimension_semantics = [#tpu.dimension_semantics<parallel>], iteration_bounds = array<i64: 2>, scalar_prefetch = 0 : i64, scratch_operands = 0 : i64, tpu.core_type = #tpu.core_type<tc>, window_params = [{transform_indices = @transform_0, window_bounds = array<i64: 1, 33, 33, 24>}, {pipeline_mode = #tpu.pipeline_mode<synchronous>, transform_indices = @transform_1, window_bounds = array<i64: 4, 24, 16>}, {transform_indices = @transform_2, window_bounds = array<i64: 1, 16, 1024>}]} {
    %c0 = arith.constant 0 : index
    %c0_0 = arith.constant 0 : index
    %c0_1 = arith.constant 0 : index
    %c0_2 = arith.constant 0 : index
    %0 = vector.load %arg1[%c0, %c0_0, %c0_1, %c0_2] : memref<1x33x33x24xf32, #tpu.memory_space<vmem>>, vector<1x32x32x24xf32>
    %1 = vector.shape_cast %0 : vector<1x32x32x24xf32> to vector<32x32x24xf32>
    %2 = vector.shape_cast %1 : vector<32x32x24xf32> to vector<1024x24xf32>
    %3 = arith.truncf %2 : vector<1024x24xf32> to vector<1024x24xbf16>
    %c0_3 = arith.constant 0 : index
    %c0_4 = arith.constant 0 : index
    %c0_5 = arith.constant 0 : index
    %4 = vector.load %arg2[%c0_3, %c0_4, %c0_5] : memref<4x24x16xbf16, #tpu.memory_space<vmem>>, vector<1x24x16xbf16>
    %5 = vector.shape_cast %4 : vector<1x24x16xbf16> to vector<24x16xbf16>
    %cst = arith.constant dense<0.000000e+00> : vector<1024x16xf32>
    %6 = tpu.matmul %3, %5, %cst {dimension_numbers = #tpu.dot_dimension_numbers<[1], [0], [0], [1], [0, 0, 1, 1], [], []>} : vector<1024x24xbf16>, vector<24x16xbf16>, vector<1024x16xf32> -> vector<1024x16xf32>
    %c0_6 = arith.constant 0 : index
    %c0_7 = arith.constant 0 : index
    %c1 = arith.constant 1 : index
    %c0_8 = arith.constant 0 : index
    %7 = vector.load %arg1[%c0_6, %c0_7, %c1, %c0_8] : memref<1x33x33x24xf32, #tpu.memory_space<vmem>>, vector<1x32x32x24xf32>
    %8 = vector.shape_cast %7 : vector<1x32x32x24xf32> to vector<32x32x24xf32>
    %9 = vector.shape_cast %8 : vector<32x32x24xf32> to vector<1024x24xf32>
    %10 = arith.truncf %9 : vector<1024x24xf32> to vector<1024x24xbf16>
    %c1_9 = arith.constant 1 : index
    %c0_10 = arith.constant 0 : index
    %c0_11 = arith.constant 0 : index
    %11 = vector.load %arg2[%c1_9, %c0_10, %c0_11] : memref<4x24x16xbf16, #tpu.memory_space<vmem>>, vector<1x24x16xbf16>
    %12 = vector.shape_cast %11 : vector<1x24x16xbf16> to vector<24x16xbf16>
    %cst_12 = arith.constant dense<0.000000e+00> : vector<1024x16xf32>
    %13 = tpu.matmul %10, %12, %cst_12 {dimension_numbers = #tpu.dot_dimension_numbers<[1], [0], [0], [1], [0, 0, 1, 1], [], []>} : vector<1024x24xbf16>, vector<24x16xbf16>, vector<1024x16xf32> -> vector<1024x16xf32>
    %14 = arith.addf %6, %13 : vector<1024x16xf32>
    %c0_13 = arith.constant 0 : index
    %c1_14 = arith.constant 1 : index
    %c0_15 = arith.constant 0 : index
    %c0_16 = arith.constant 0 : index
    %15 = vector.load %arg1[%c0_13, %c1_14, %c0_15, %c0_16] : memref<1x33x33x24xf32, #tpu.memory_space<vmem>>, vector<1x32x32x24xf32>
    %16 = vector.shape_cast %15 : vector<1x32x32x24xf32> to vector<32x32x24xf32>
    %17 = vector.shape_cast %16 : vector<32x32x24xf32> to vector<1024x24xf32>
    %18 = arith.truncf %17 : vector<1024x24xf32> to vector<1024x24xbf16>
    %c2 = arith.constant 2 : index
    %c0_17 = arith.constant 0 : index
    %c0_18 = arith.constant 0 : index
    %19 = vector.load %arg2[%c2, %c0_17, %c0_18] : memref<4x24x16xbf16, #tpu.memory_space<vmem>>, vector<1x24x16xbf16>
    %20 = vector.shape_cast %19 : vector<1x24x16xbf16> to vector<24x16xbf16>
    %cst_19 = arith.constant dense<0.000000e+00> : vector<1024x16xf32>
    %21 = tpu.matmul %18, %20, %cst_19 {dimension_numbers = #tpu.dot_dimension_numbers<[1], [0], [0], [1], [0, 0, 1, 1], [], []>} : vector<1024x24xbf16>, vector<24x16xbf16>, vector<1024x16xf32> -> vector<1024x16xf32>
    %22 = arith.addf %14, %21 : vector<1024x16xf32>
    %c0_20 = arith.constant 0 : index
    %c1_21 = arith.constant 1 : index
    %c1_22 = arith.constant 1 : index
    %c0_23 = arith.constant 0 : index
    %23 = vector.load %arg1[%c0_20, %c1_21, %c1_22, %c0_23] : memref<1x33x33x24xf32, #tpu.memory_space<vmem>>, vector<1x32x32x24xf32>
    %24 = vector.shape_cast %23 : vector<1x32x32x24xf32> to vector<32x32x24xf32>
    %25 = vector.shape_cast %24 : vector<32x32x24xf32> to vector<1024x24xf32>
    %26 = arith.truncf %25 : vector<1024x24xf32> to vector<1024x24xbf16>
    %c3 = arith.constant 3 : index
    %c0_24 = arith.constant 0 : index
    %c0_25 = arith.constant 0 : index
    %27 = vector.load %arg2[%c3, %c0_24, %c0_25] : memref<4x24x16xbf16, #tpu.memory_space<vmem>>, vector<1x24x16xbf16>
    %28 = vector.shape_cast %27 : vector<1x24x16xbf16> to vector<24x16xbf16>
    %cst_26 = arith.constant dense<0.000000e+00> : vector<1024x16xf32>
    %29 = tpu.matmul %26, %28, %cst_26 {dimension_numbers = #tpu.dot_dimension_numbers<[1], [0], [0], [1], [0, 0, 1, 1], [], []>} : vector<1024x24xbf16>, vector<24x16xbf16>, vector<1024x16xf32> -> vector<1024x16xf32>
    %30 = arith.addf %22, %29 : vector<1024x16xf32>
    %cst_27 = arith.constant dense<0.000000e+00> : vector<16xf32>
    %31 = vector.multi_reduction <add>, %30, %cst_27 [0] : vector<1024x16xf32> to vector<16xf32>
    %32 = vector.shape_cast %31 : vector<16xf32> to vector<1x16xf32>
    %cst_28 = arith.constant 1.024000e+03 : f32
    %33 = vector.broadcast %cst_28 : f32 to vector<1x16xf32>
    %34 = arith.divf %32, %33 : vector<1x16xf32>
    %35 = arith.mulf %30, %30 : vector<1024x16xf32>
    %cst_29 = arith.constant dense<0.000000e+00> : vector<16xf32>
    %36 = vector.multi_reduction <add>, %35, %cst_29 [0] : vector<1024x16xf32> to vector<16xf32>
    %37 = vector.shape_cast %36 : vector<16xf32> to vector<1x16xf32>
    %cst_30 = arith.constant 1.024000e+03 : f32
    %38 = vector.broadcast %cst_30 : f32 to vector<1x16xf32>
    %39 = arith.divf %37, %38 : vector<1x16xf32>
    %40 = arith.mulf %34, %34 : vector<1x16xf32>
    %41 = arith.subf %39, %40 : vector<1x16xf32>
    %cst_31 = arith.constant 9.99999974E-6 : f32
    %42 = vector.broadcast %cst_31 : f32 to vector<1x16xf32>
    %43 = arith.addf %41, %42 : vector<1x16xf32>
    %44 = math.rsqrt %43 : vector<1x16xf32>
    %45 = vector.broadcast %44 : vector<1x16xf32> to vector<1024x16xf32>
    %46 = arith.mulf %30, %45 : vector<1024x16xf32>
    %47 = arith.mulf %34, %44 : vector<1x16xf32>
    %48 = vector.broadcast %47 : vector<1x16xf32> to vector<1024x16xf32>
    %49 = arith.subf %46, %48 : vector<1024x16xf32>
    %cst_32 = arith.constant 0.000000e+00 : f32
    %50 = vector.broadcast %cst_32 : f32 to vector<1024x16xf32>
    %51 = arith.cmpf oge, %49, %50 : vector<1024x16xf32>
    %cst_33 = arith.constant 4.000000e-01 : f32
    %52 = vector.broadcast %cst_33 : f32 to vector<1024x16xf32>
    %53 = arith.mulf %52, %49 : vector<1024x16xf32>
    %54 = arith.select %51, %49, %53 : vector<1024x16xi1>, vector<1024x16xf32>
    %55 = tpu.transpose %54, [1, 0] : vector<1024x16xf32> -> vector<16x1024xf32>
    %c0_34 = arith.constant 0 : index
    %c0_35 = arith.constant 0 : index
    %c0_36 = arith.constant 0 : index
    %56 = vector.load %arg3[%c0_34, %c0_35, %c0_36] : memref<1x16x1024xf32, #tpu.memory_space<vmem>>, vector<1x16x1024xf32>
    %57 = vector.shape_cast %56 : vector<1x16x1024xf32> to vector<16x1024xf32>
    %58 = vector.shape_cast %55 : vector<16x1024xf32> to vector<1x16x1024xf32>
    tpu.vector_store %arg3[%c0_34, %c0_35, %c0_36], %58 {strides = array<i32>} : memref<1x16x1024xf32, #tpu.memory_space<vmem>>, vector<1x16x1024xf32>,
    return
  }
  func.func @transform_0(%arg0: i32) -> (i32, i32, i32, i32) {
    %c0_i32 = arith.constant 0 : i32
    %c0_i32_0 = arith.constant 0 : i32
    %c0_i32_1 = arith.constant 0 : i32
    %c0_i32_2 = arith.constant 0 : i32
    return %arg0, %c0_i32, %c0_i32_0, %c0_i32_1 : i32, i32, i32, i32
  }
  func.func @transform_1(%arg0: i32) -> (i32, i32, i32) {
    %c0_i32 = arith.constant 0 : i32
    %c0_i32_0 = arith.constant 0 : i32
    %c0_i32_1 = arith.constant 0 : i32
    %c0_i32_2 = arith.constant 0 : i32
    return %c0_i32, %c0_i32_0, %c0_i32_1 : i32, i32, i32
  }
  func.func @transform_2(%arg0: i32) -> (i32, i32, i32) {
    %c0_i32 = arith.constant 0 : i32
    %c0_i32_0 = arith.constant 0 : i32
    %c0_i32_1 = arith.constant 0 : i32
    return %arg0, %c0_i32, %c0_i32_0 : i32, i32, i32
  }
}

module attributes {stable_mosaic.version = 11 : i64} {
  func.func @_down_block_kernel(%arg0: i32, %arg1: memref<1x17x17x64xf32, #tpu.memory_space<vmem>>, %arg2: memref<4x64x32xbf16, #tpu.memory_space<vmem>>, %arg3: memref<1x32x256xf32, #tpu.memory_space<vmem>>) attributes {dimension_semantics = [#tpu.dimension_semantics<parallel>], iteration_bounds = array<i64: 2>, scalar_prefetch = 0 : i64, scratch_operands = 0 : i64, tpu.core_type = #tpu.core_type<tc>, window_params = [{transform_indices = @transform_0, window_bounds = array<i64: 1, 17, 17, 64>}, {pipeline_mode = #tpu.pipeline_mode<synchronous>, transform_indices = @transform_1, window_bounds = array<i64: 4, 64, 32>}, {transform_indices = @transform_2, window_bounds = array<i64: 1, 32, 256>}]} {
    %c0 = arith.constant 0 : index
    %c0_0 = arith.constant 0 : index
    %c0_1 = arith.constant 0 : index
    %c0_2 = arith.constant 0 : index
    %0 = vector.load %arg1[%c0, %c0_0, %c0_1, %c0_2] : memref<1x17x17x64xf32, #tpu.memory_space<vmem>>, vector<1x16x16x64xf32>
    %1 = vector.shape_cast %0 : vector<1x16x16x64xf32> to vector<16x16x64xf32>
    %2 = vector.shape_cast %1 : vector<16x16x64xf32> to vector<256x64xf32>
    %3 = arith.truncf %2 : vector<256x64xf32> to vector<256x64xbf16>
    %c0_3 = arith.constant 0 : index
    %c0_4 = arith.constant 0 : index
    %c0_5 = arith.constant 0 : index
    %4 = vector.load %arg2[%c0_3, %c0_4, %c0_5] : memref<4x64x32xbf16, #tpu.memory_space<vmem>>, vector<1x64x32xbf16>
    %5 = vector.shape_cast %4 : vector<1x64x32xbf16> to vector<64x32xbf16>
    %cst = arith.constant dense<0.000000e+00> : vector<256x32xf32>
    %6 = tpu.matmul %3, %5, %cst {dimension_numbers = #tpu.dot_dimension_numbers<[1], [0], [0], [1], [0, 0, 1, 1], [], []>} : vector<256x64xbf16>, vector<64x32xbf16>, vector<256x32xf32> -> vector<256x32xf32>
    %c0_6 = arith.constant 0 : index
    %c0_7 = arith.constant 0 : index
    %c1 = arith.constant 1 : index
    %c0_8 = arith.constant 0 : index
    %7 = vector.load %arg1[%c0_6, %c0_7, %c1, %c0_8] : memref<1x17x17x64xf32, #tpu.memory_space<vmem>>, vector<1x16x16x64xf32>
    %8 = vector.shape_cast %7 : vector<1x16x16x64xf32> to vector<16x16x64xf32>
    %9 = vector.shape_cast %8 : vector<16x16x64xf32> to vector<256x64xf32>
    %10 = arith.truncf %9 : vector<256x64xf32> to vector<256x64xbf16>
    %c1_9 = arith.constant 1 : index
    %c0_10 = arith.constant 0 : index
    %c0_11 = arith.constant 0 : index
    %11 = vector.load %arg2[%c1_9, %c0_10, %c0_11] : memref<4x64x32xbf16, #tpu.memory_space<vmem>>, vector<1x64x32xbf16>
    %12 = vector.shape_cast %11 : vector<1x64x32xbf16> to vector<64x32xbf16>
    %cst_12 = arith.constant dense<0.000000e+00> : vector<256x32xf32>
    %13 = tpu.matmul %10, %12, %cst_12 {dimension_numbers = #tpu.dot_dimension_numbers<[1], [0], [0], [1], [0, 0, 1, 1], [], []>} : vector<256x64xbf16>, vector<64x32xbf16>, vector<256x32xf32> -> vector<256x32xf32>
    %14 = arith.addf %6, %13 : vector<256x32xf32>
    %c0_13 = arith.constant 0 : index
    %c1_14 = arith.constant 1 : index
    %c0_15 = arith.constant 0 : index
    %c0_16 = arith.constant 0 : index
    %15 = vector.load %arg1[%c0_13, %c1_14, %c0_15, %c0_16] : memref<1x17x17x64xf32, #tpu.memory_space<vmem>>, vector<1x16x16x64xf32>
    %16 = vector.shape_cast %15 : vector<1x16x16x64xf32> to vector<16x16x64xf32>
    %17 = vector.shape_cast %16 : vector<16x16x64xf32> to vector<256x64xf32>
    %18 = arith.truncf %17 : vector<256x64xf32> to vector<256x64xbf16>
    %c2 = arith.constant 2 : index
    %c0_17 = arith.constant 0 : index
    %c0_18 = arith.constant 0 : index
    %19 = vector.load %arg2[%c2, %c0_17, %c0_18] : memref<4x64x32xbf16, #tpu.memory_space<vmem>>, vector<1x64x32xbf16>
    %20 = vector.shape_cast %19 : vector<1x64x32xbf16> to vector<64x32xbf16>
    %cst_19 = arith.constant dense<0.000000e+00> : vector<256x32xf32>
    %21 = tpu.matmul %18, %20, %cst_19 {dimension_numbers = #tpu.dot_dimension_numbers<[1], [0], [0], [1], [0, 0, 1, 1], [], []>} : vector<256x64xbf16>, vector<64x32xbf16>, vector<256x32xf32> -> vector<256x32xf32>
    %22 = arith.addf %14, %21 : vector<256x32xf32>
    %c0_20 = arith.constant 0 : index
    %c1_21 = arith.constant 1 : index
    %c1_22 = arith.constant 1 : index
    %c0_23 = arith.constant 0 : index
    %23 = vector.load %arg1[%c0_20, %c1_21, %c1_22, %c0_23] : memref<1x17x17x64xf32, #tpu.memory_space<vmem>>, vector<1x16x16x64xf32>
    %24 = vector.shape_cast %23 : vector<1x16x16x64xf32> to vector<16x16x64xf32>
    %25 = vector.shape_cast %24 : vector<16x16x64xf32> to vector<256x64xf32>
    %26 = arith.truncf %25 : vector<256x64xf32> to vector<256x64xbf16>
    %c3 = arith.constant 3 : index
    %c0_24 = arith.constant 0 : index
    %c0_25 = arith.constant 0 : index
    %27 = vector.load %arg2[%c3, %c0_24, %c0_25] : memref<4x64x32xbf16, #tpu.memory_space<vmem>>, vector<1x64x32xbf16>
    %28 = vector.shape_cast %27 : vector<1x64x32xbf16> to vector<64x32xbf16>
    %cst_26 = arith.constant dense<0.000000e+00> : vector<256x32xf32>
    %29 = tpu.matmul %26, %28, %cst_26 {dimension_numbers = #tpu.dot_dimension_numbers<[1], [0], [0], [1], [0, 0, 1, 1], [], []>} : vector<256x64xbf16>, vector<64x32xbf16>, vector<256x32xf32> -> vector<256x32xf32>
    %30 = arith.addf %22, %29 : vector<256x32xf32>
    %cst_27 = arith.constant dense<0.000000e+00> : vector<32xf32>
    %31 = vector.multi_reduction <add>, %30, %cst_27 [0] : vector<256x32xf32> to vector<32xf32>
    %32 = vector.shape_cast %31 : vector<32xf32> to vector<1x32xf32>
    %cst_28 = arith.constant 2.560000e+02 : f32
    %33 = vector.broadcast %cst_28 : f32 to vector<1x32xf32>
    %34 = arith.divf %32, %33 : vector<1x32xf32>
    %35 = arith.mulf %30, %30 : vector<256x32xf32>
    %cst_29 = arith.constant dense<0.000000e+00> : vector<32xf32>
    %36 = vector.multi_reduction <add>, %35, %cst_29 [0] : vector<256x32xf32> to vector<32xf32>
    %37 = vector.shape_cast %36 : vector<32xf32> to vector<1x32xf32>
    %cst_30 = arith.constant 2.560000e+02 : f32
    %38 = vector.broadcast %cst_30 : f32 to vector<1x32xf32>
    %39 = arith.divf %37, %38 : vector<1x32xf32>
    %40 = arith.mulf %34, %34 : vector<1x32xf32>
    %41 = arith.subf %39, %40 : vector<1x32xf32>
    %cst_31 = arith.constant 9.99999974E-6 : f32
    %42 = vector.broadcast %cst_31 : f32 to vector<1x32xf32>
    %43 = arith.addf %41, %42 : vector<1x32xf32>
    %44 = math.rsqrt %43 : vector<1x32xf32>
    %45 = vector.broadcast %44 : vector<1x32xf32> to vector<256x32xf32>
    %46 = arith.mulf %30, %45 : vector<256x32xf32>
    %47 = arith.mulf %34, %44 : vector<1x32xf32>
    %48 = vector.broadcast %47 : vector<1x32xf32> to vector<256x32xf32>
    %49 = arith.subf %46, %48 : vector<256x32xf32>
    %cst_32 = arith.constant 0.000000e+00 : f32
    %50 = vector.broadcast %cst_32 : f32 to vector<256x32xf32>
    %51 = arith.cmpf oge, %49, %50 : vector<256x32xf32>
    %cst_33 = arith.constant 4.000000e-01 : f32
    %52 = vector.broadcast %cst_33 : f32 to vector<256x32xf32>
    %53 = arith.mulf %52, %49 : vector<256x32xf32>
    %54 = arith.select %51, %49, %53 : vector<256x32xi1>, vector<256x32xf32>
    %55 = tpu.transpose %54, [1, 0] : vector<256x32xf32> -> vector<32x256xf32>
    %c0_34 = arith.constant 0 : index
    %c0_35 = arith.constant 0 : index
    %c0_36 = arith.constant 0 : index
    %56 = vector.load %arg3[%c0_34, %c0_35, %c0_36] : memref<1x32x256xf32, #tpu.memory_space<vmem>>, vector<1x32x256xf32>
    %57 = vector.shape_cast %56 : vector<1x32x256xf32> to vector<32x256xf32>
    %58 = vector.shape_cast %55 : vector<32x256xf32> to vector<1x32x256xf32>
    tpu.vector_store %arg3[%c0_34, %c0_35, %c0_36], %58 {strides = array<i32>} : memref<1x32x256xf32, #tpu.memory_space<vmem>>, vector<1x32x256xf32>,
    return
  }
  func.func @transform_0(%arg0: i32) -> (i32, i32, i32, i32) {
    %c0_i32 = arith.constant 0 : i32
    %c0_i32_0 = arith.constant 0 : i32
    %c0_i32_1 = arith.constant 0 : i32
    %c0_i32_2 = arith.constant 0 : i32
    return %arg0, %c0_i32, %c0_i32_0, %c0_i32_1 : i32, i32, i32, i32
  }
  func.func @transform_1(%arg0: i32) -> (i32, i32, i32) {
    %c0_i32 = arith.constant 0 : i32
    %c0_i32_0 = arith.constant 0 : i32
    %c0_i32_1 = arith.constant 0 : i32
    %c0_i32_2 = arith.constant 0 : i32
    return %c0_i32, %c0_i32_0, %c0_i32_1 : i32, i32, i32
  }
  func.func @transform_2(%arg0: i32) -> (i32, i32, i32) {
    %c0_i32 = arith.constant 0 : i32
    %c0_i32_0 = arith.constant 0 : i32
    %c0_i32_1 = arith.constant 0 : i32
    return %arg0, %c0_i32, %c0_i32_0 : i32, i32, i32
  }
}

module attributes {stable_mosaic.version = 11 : i64} {
  func.func @_down_block_kernel(%arg0: i32, %arg1: memref<1x9x9x128xf32, #tpu.memory_space<vmem>>, %arg2: memref<4x128x64xbf16, #tpu.memory_space<vmem>>, %arg3: memref<1x64x64xf32, #tpu.memory_space<vmem>>) attributes {dimension_semantics = [#tpu.dimension_semantics<parallel>], iteration_bounds = array<i64: 2>, scalar_prefetch = 0 : i64, scratch_operands = 0 : i64, tpu.core_type = #tpu.core_type<tc>, window_params = [{transform_indices = @transform_0, window_bounds = array<i64: 1, 9, 9, 128>}, {pipeline_mode = #tpu.pipeline_mode<synchronous>, transform_indices = @transform_1, window_bounds = array<i64: 4, 128, 64>}, {transform_indices = @transform_2, window_bounds = array<i64: 1, 64, 64>}]} {
    %c0 = arith.constant 0 : index
    %c0_0 = arith.constant 0 : index
    %c0_1 = arith.constant 0 : index
    %c0_2 = arith.constant 0 : index
    %0 = vector.load %arg1[%c0, %c0_0, %c0_1, %c0_2] : memref<1x9x9x128xf32, #tpu.memory_space<vmem>>, vector<1x8x8x128xf32>
    %1 = vector.shape_cast %0 : vector<1x8x8x128xf32> to vector<8x8x128xf32>
    %2 = vector.shape_cast %1 : vector<8x8x128xf32> to vector<64x128xf32>
    %3 = arith.truncf %2 : vector<64x128xf32> to vector<64x128xbf16>
    %c0_3 = arith.constant 0 : index
    %c0_4 = arith.constant 0 : index
    %c0_5 = arith.constant 0 : index
    %4 = vector.load %arg2[%c0_3, %c0_4, %c0_5] : memref<4x128x64xbf16, #tpu.memory_space<vmem>>, vector<1x128x64xbf16>
    %5 = vector.shape_cast %4 : vector<1x128x64xbf16> to vector<128x64xbf16>
    %cst = arith.constant dense<0.000000e+00> : vector<64x64xf32>
    %6 = tpu.matmul %3, %5, %cst {dimension_numbers = #tpu.dot_dimension_numbers<[1], [0], [0], [1], [0, 0, 1, 1], [], []>} : vector<64x128xbf16>, vector<128x64xbf16>, vector<64x64xf32> -> vector<64x64xf32>
    %c0_6 = arith.constant 0 : index
    %c0_7 = arith.constant 0 : index
    %c1 = arith.constant 1 : index
    %c0_8 = arith.constant 0 : index
    %7 = vector.load %arg1[%c0_6, %c0_7, %c1, %c0_8] : memref<1x9x9x128xf32, #tpu.memory_space<vmem>>, vector<1x8x8x128xf32>
    %8 = vector.shape_cast %7 : vector<1x8x8x128xf32> to vector<8x8x128xf32>
    %9 = vector.shape_cast %8 : vector<8x8x128xf32> to vector<64x128xf32>
    %10 = arith.truncf %9 : vector<64x128xf32> to vector<64x128xbf16>
    %c1_9 = arith.constant 1 : index
    %c0_10 = arith.constant 0 : index
    %c0_11 = arith.constant 0 : index
    %11 = vector.load %arg2[%c1_9, %c0_10, %c0_11] : memref<4x128x64xbf16, #tpu.memory_space<vmem>>, vector<1x128x64xbf16>
    %12 = vector.shape_cast %11 : vector<1x128x64xbf16> to vector<128x64xbf16>
    %cst_12 = arith.constant dense<0.000000e+00> : vector<64x64xf32>
    %13 = tpu.matmul %10, %12, %cst_12 {dimension_numbers = #tpu.dot_dimension_numbers<[1], [0], [0], [1], [0, 0, 1, 1], [], []>} : vector<64x128xbf16>, vector<128x64xbf16>, vector<64x64xf32> -> vector<64x64xf32>
    %14 = arith.addf %6, %13 : vector<64x64xf32>
    %c0_13 = arith.constant 0 : index
    %c1_14 = arith.constant 1 : index
    %c0_15 = arith.constant 0 : index
    %c0_16 = arith.constant 0 : index
    %15 = vector.load %arg1[%c0_13, %c1_14, %c0_15, %c0_16] : memref<1x9x9x128xf32, #tpu.memory_space<vmem>>, vector<1x8x8x128xf32>
    %16 = vector.shape_cast %15 : vector<1x8x8x128xf32> to vector<8x8x128xf32>
    %17 = vector.shape_cast %16 : vector<8x8x128xf32> to vector<64x128xf32>
    %18 = arith.truncf %17 : vector<64x128xf32> to vector<64x128xbf16>
    %c2 = arith.constant 2 : index
    %c0_17 = arith.constant 0 : index
    %c0_18 = arith.constant 0 : index
    %19 = vector.load %arg2[%c2, %c0_17, %c0_18] : memref<4x128x64xbf16, #tpu.memory_space<vmem>>, vector<1x128x64xbf16>
    %20 = vector.shape_cast %19 : vector<1x128x64xbf16> to vector<128x64xbf16>
    %cst_19 = arith.constant dense<0.000000e+00> : vector<64x64xf32>
    %21 = tpu.matmul %18, %20, %cst_19 {dimension_numbers = #tpu.dot_dimension_numbers<[1], [0], [0], [1], [0, 0, 1, 1], [], []>} : vector<64x128xbf16>, vector<128x64xbf16>, vector<64x64xf32> -> vector<64x64xf32>
    %22 = arith.addf %14, %21 : vector<64x64xf32>
    %c0_20 = arith.constant 0 : index
    %c1_21 = arith.constant 1 : index
    %c1_22 = arith.constant 1 : index
    %c0_23 = arith.constant 0 : index
    %23 = vector.load %arg1[%c0_20, %c1_21, %c1_22, %c0_23] : memref<1x9x9x128xf32, #tpu.memory_space<vmem>>, vector<1x8x8x128xf32>
    %24 = vector.shape_cast %23 : vector<1x8x8x128xf32> to vector<8x8x128xf32>
    %25 = vector.shape_cast %24 : vector<8x8x128xf32> to vector<64x128xf32>
    %26 = arith.truncf %25 : vector<64x128xf32> to vector<64x128xbf16>
    %c3 = arith.constant 3 : index
    %c0_24 = arith.constant 0 : index
    %c0_25 = arith.constant 0 : index
    %27 = vector.load %arg2[%c3, %c0_24, %c0_25] : memref<4x128x64xbf16, #tpu.memory_space<vmem>>, vector<1x128x64xbf16>
    %28 = vector.shape_cast %27 : vector<1x128x64xbf16> to vector<128x64xbf16>
    %cst_26 = arith.constant dense<0.000000e+00> : vector<64x64xf32>
    %29 = tpu.matmul %26, %28, %cst_26 {dimension_numbers = #tpu.dot_dimension_numbers<[1], [0], [0], [1], [0, 0, 1, 1], [], []>} : vector<64x128xbf16>, vector<128x64xbf16>, vector<64x64xf32> -> vector<64x64xf32>
    %30 = arith.addf %22, %29 : vector<64x64xf32>
    %cst_27 = arith.constant dense<0.000000e+00> : vector<64xf32>
    %31 = vector.multi_reduction <add>, %30, %cst_27 [0] : vector<64x64xf32> to vector<64xf32>
    %32 = vector.shape_cast %31 : vector<64xf32> to vector<1x64xf32>
    %cst_28 = arith.constant 6.400000e+01 : f32
    %33 = vector.broadcast %cst_28 : f32 to vector<1x64xf32>
    %34 = arith.divf %32, %33 : vector<1x64xf32>
    %35 = arith.mulf %30, %30 : vector<64x64xf32>
    %cst_29 = arith.constant dense<0.000000e+00> : vector<64xf32>
    %36 = vector.multi_reduction <add>, %35, %cst_29 [0] : vector<64x64xf32> to vector<64xf32>
    %37 = vector.shape_cast %36 : vector<64xf32> to vector<1x64xf32>
    %cst_30 = arith.constant 6.400000e+01 : f32
    %38 = vector.broadcast %cst_30 : f32 to vector<1x64xf32>
    %39 = arith.divf %37, %38 : vector<1x64xf32>
    %40 = arith.mulf %34, %34 : vector<1x64xf32>
    %41 = arith.subf %39, %40 : vector<1x64xf32>
    %cst_31 = arith.constant 9.99999974E-6 : f32
    %42 = vector.broadcast %cst_31 : f32 to vector<1x64xf32>
    %43 = arith.addf %41, %42 : vector<1x64xf32>
    %44 = math.rsqrt %43 : vector<1x64xf32>
    %45 = vector.broadcast %44 : vector<1x64xf32> to vector<64x64xf32>
    %46 = arith.mulf %30, %45 : vector<64x64xf32>
    %47 = arith.mulf %34, %44 : vector<1x64xf32>
    %48 = vector.broadcast %47 : vector<1x64xf32> to vector<64x64xf32>
    %49 = arith.subf %46, %48 : vector<64x64xf32>
    %cst_32 = arith.constant 0.000000e+00 : f32
    %50 = vector.broadcast %cst_32 : f32 to vector<64x64xf32>
    %51 = arith.cmpf oge, %49, %50 : vector<64x64xf32>
    %cst_33 = arith.constant 4.000000e-01 : f32
    %52 = vector.broadcast %cst_33 : f32 to vector<64x64xf32>
    %53 = arith.mulf %52, %49 : vector<64x64xf32>
    %54 = arith.select %51, %49, %53 : vector<64x64xi1>, vector<64x64xf32>
    %55 = tpu.transpose %54, [1, 0] : vector<64x64xf32> -> vector<64x64xf32>
    %c0_34 = arith.constant 0 : index
    %c0_35 = arith.constant 0 : index
    %c0_36 = arith.constant 0 : index
    %56 = vector.load %arg3[%c0_34, %c0_35, %c0_36] : memref<1x64x64xf32, #tpu.memory_space<vmem>>, vector<1x64x64xf32>
    %57 = vector.shape_cast %56 : vector<1x64x64xf32> to vector<64x64xf32>
    %58 = vector.shape_cast %55 : vector<64x64xf32> to vector<1x64x64xf32>
    tpu.vector_store %arg3[%c0_34, %c0_35, %c0_36], %58 {strides = array<i32>} : memref<1x64x64xf32, #tpu.memory_space<vmem>>, vector<1x64x64xf32>,
    return
  }
  func.func @transform_0(%arg0: i32) -> (i32, i32, i32, i32) {
    %c0_i32 = arith.constant 0 : i32
    %c0_i32_0 = arith.constant 0 : i32
    %c0_i32_1 = arith.constant 0 : i32
    %c0_i32_2 = arith.constant 0 : i32
    return %arg0, %c0_i32, %c0_i32_0, %c0_i32_1 : i32, i32, i32, i32
  }
  func.func @transform_1(%arg0: i32) -> (i32, i32, i32) {
    %c0_i32 = arith.constant 0 : i32
    %c0_i32_0 = arith.constant 0 : i32
    %c0_i32_1 = arith.constant 0 : i32
    %c0_i32_2 = arith.constant 0 : i32
    return %c0_i32, %c0_i32_0, %c0_i32_1 : i32, i32, i32
  }
  func.func @transform_2(%arg0: i32) -> (i32, i32, i32) {
    %c0_i32 = arith.constant 0 : i32
    %c0_i32_0 = arith.constant 0 : i32
    %c0_i32_1 = arith.constant 0 : i32
    return %arg0, %c0_i32, %c0_i32_0 : i32, i32, i32
  }
}

module attributes {stable_mosaic.version = 11 : i64} {
  func.func @_down_block_kernel(%arg0: i32, %arg1: memref<1x5x5x256xf32, #tpu.memory_space<vmem>>, %arg2: memref<4x256x128xbf16, #tpu.memory_space<vmem>>, %arg3: memref<1x16x128xf32, #tpu.memory_space<vmem>>) attributes {dimension_semantics = [#tpu.dimension_semantics<parallel>], iteration_bounds = array<i64: 2>, scalar_prefetch = 0 : i64, scratch_operands = 0 : i64, tpu.core_type = #tpu.core_type<tc>, window_params = [{transform_indices = @transform_0, window_bounds = array<i64: 1, 5, 5, 256>}, {pipeline_mode = #tpu.pipeline_mode<synchronous>, transform_indices = @transform_1, window_bounds = array<i64: 4, 256, 128>}, {transform_indices = @transform_2, window_bounds = array<i64: 1, 16, 128>}]} {
    %c0 = arith.constant 0 : index
    %c0_0 = arith.constant 0 : index
    %c0_1 = arith.constant 0 : index
    %c0_2 = arith.constant 0 : index
    %0 = vector.load %arg1[%c0, %c0_0, %c0_1, %c0_2] : memref<1x5x5x256xf32, #tpu.memory_space<vmem>>, vector<1x4x4x256xf32>
    %1 = vector.shape_cast %0 : vector<1x4x4x256xf32> to vector<4x4x256xf32>
    %2 = vector.extract_strided_slice %1 {offsets = [0, 0, 0], sizes = [1, 4, 256], strides = [1, 1, 1]} : vector<4x4x256xf32> to vector<1x4x256xf32>
    %3 = vector.shape_cast %2 : vector<1x4x256xf32> to vector<4x256xf32>
    %4 = vector.extract_strided_slice %1 {offsets = [1, 0, 0], sizes = [1, 4, 256], strides = [1, 1, 1]} : vector<4x4x256xf32> to vector<1x4x256xf32>
    %5 = vector.shape_cast %4 : vector<1x4x256xf32> to vector<4x256xf32>
    %6 = vector.extract_strided_slice %1 {offsets = [2, 0, 0], sizes = [1, 4, 256], strides = [1, 1, 1]} : vector<4x4x256xf32> to vector<1x4x256xf32>
    %7 = vector.shape_cast %6 : vector<1x4x256xf32> to vector<4x256xf32>
    %8 = vector.extract_strided_slice %1 {offsets = [3, 0, 0], sizes = [1, 4, 256], strides = [1, 1, 1]} : vector<4x4x256xf32> to vector<1x4x256xf32>
    %9 = vector.shape_cast %8 : vector<1x4x256xf32> to vector<4x256xf32>
    %10 = tpu.concatenate %3, %5, %7, %9 in 0 : vector<4x256xf32>, vector<4x256xf32>, vector<4x256xf32>, vector<4x256xf32> -> vector<16x256xf32>
    %11 = arith.truncf %10 : vector<16x256xf32> to vector<16x256xbf16>
    %c0_3 = arith.constant 0 : index
    %c0_4 = arith.constant 0 : index
    %c0_5 = arith.constant 0 : index
    %12 = vector.load %arg2[%c0_3, %c0_4, %c0_5] : memref<4x256x128xbf16, #tpu.memory_space<vmem>>, vector<1x256x128xbf16>
    %13 = vector.shape_cast %12 : vector<1x256x128xbf16> to vector<256x128xbf16>
    %cst = arith.constant dense<0.000000e+00> : vector<16x128xf32>
    %14 = tpu.matmul %11, %13, %cst {dimension_numbers = #tpu.dot_dimension_numbers<[1], [0], [0], [1], [0, 0, 1, 1], [], []>} : vector<16x256xbf16>, vector<256x128xbf16>, vector<16x128xf32> -> vector<16x128xf32>
    %c0_6 = arith.constant 0 : index
    %c0_7 = arith.constant 0 : index
    %c1 = arith.constant 1 : index
    %c0_8 = arith.constant 0 : index
    %15 = vector.load %arg1[%c0_6, %c0_7, %c1, %c0_8] : memref<1x5x5x256xf32, #tpu.memory_space<vmem>>, vector<1x4x4x256xf32>
    %16 = vector.shape_cast %15 : vector<1x4x4x256xf32> to vector<4x4x256xf32>
    %17 = vector.extract_strided_slice %16 {offsets = [0, 0, 0], sizes = [1, 4, 256], strides = [1, 1, 1]} : vector<4x4x256xf32> to vector<1x4x256xf32>
    %18 = vector.shape_cast %17 : vector<1x4x256xf32> to vector<4x256xf32>
    %19 = vector.extract_strided_slice %16 {offsets = [1, 0, 0], sizes = [1, 4, 256], strides = [1, 1, 1]} : vector<4x4x256xf32> to vector<1x4x256xf32>
    %20 = vector.shape_cast %19 : vector<1x4x256xf32> to vector<4x256xf32>
    %21 = vector.extract_strided_slice %16 {offsets = [2, 0, 0], sizes = [1, 4, 256], strides = [1, 1, 1]} : vector<4x4x256xf32> to vector<1x4x256xf32>
    %22 = vector.shape_cast %21 : vector<1x4x256xf32> to vector<4x256xf32>
    %23 = vector.extract_strided_slice %16 {offsets = [3, 0, 0], sizes = [1, 4, 256], strides = [1, 1, 1]} : vector<4x4x256xf32> to vector<1x4x256xf32>
    %24 = vector.shape_cast %23 : vector<1x4x256xf32> to vector<4x256xf32>
    %25 = tpu.concatenate %18, %20, %22, %24 in 0 : vector<4x256xf32>, vector<4x256xf32>, vector<4x256xf32>, vector<4x256xf32> -> vector<16x256xf32>
    %26 = arith.truncf %25 : vector<16x256xf32> to vector<16x256xbf16>
    %c1_9 = arith.constant 1 : index
    %c0_10 = arith.constant 0 : index
    %c0_11 = arith.constant 0 : index
    %27 = vector.load %arg2[%c1_9, %c0_10, %c0_11] : memref<4x256x128xbf16, #tpu.memory_space<vmem>>, vector<1x256x128xbf16>
    %28 = vector.shape_cast %27 : vector<1x256x128xbf16> to vector<256x128xbf16>
    %cst_12 = arith.constant dense<0.000000e+00> : vector<16x128xf32>
    %29 = tpu.matmul %26, %28, %cst_12 {dimension_numbers = #tpu.dot_dimension_numbers<[1], [0], [0], [1], [0, 0, 1, 1], [], []>} : vector<16x256xbf16>, vector<256x128xbf16>, vector<16x128xf32> -> vector<16x128xf32>
    %30 = arith.addf %14, %29 : vector<16x128xf32>
    %c0_13 = arith.constant 0 : index
    %c1_14 = arith.constant 1 : index
    %c0_15 = arith.constant 0 : index
    %c0_16 = arith.constant 0 : index
    %31 = vector.load %arg1[%c0_13, %c1_14, %c0_15, %c0_16] : memref<1x5x5x256xf32, #tpu.memory_space<vmem>>, vector<1x4x4x256xf32>
    %32 = vector.shape_cast %31 : vector<1x4x4x256xf32> to vector<4x4x256xf32>
    %33 = vector.extract_strided_slice %32 {offsets = [0, 0, 0], sizes = [1, 4, 256], strides = [1, 1, 1]} : vector<4x4x256xf32> to vector<1x4x256xf32>
    %34 = vector.shape_cast %33 : vector<1x4x256xf32> to vector<4x256xf32>
    %35 = vector.extract_strided_slice %32 {offsets = [1, 0, 0], sizes = [1, 4, 256], strides = [1, 1, 1]} : vector<4x4x256xf32> to vector<1x4x256xf32>
    %36 = vector.shape_cast %35 : vector<1x4x256xf32> to vector<4x256xf32>
    %37 = vector.extract_strided_slice %32 {offsets = [2, 0, 0], sizes = [1, 4, 256], strides = [1, 1, 1]} : vector<4x4x256xf32> to vector<1x4x256xf32>
    %38 = vector.shape_cast %37 : vector<1x4x256xf32> to vector<4x256xf32>
    %39 = vector.extract_strided_slice %32 {offsets = [3, 0, 0], sizes = [1, 4, 256], strides = [1, 1, 1]} : vector<4x4x256xf32> to vector<1x4x256xf32>
    %40 = vector.shape_cast %39 : vector<1x4x256xf32> to vector<4x256xf32>
    %41 = tpu.concatenate %34, %36, %38, %40 in 0 : vector<4x256xf32>, vector<4x256xf32>, vector<4x256xf32>, vector<4x256xf32> -> vector<16x256xf32>
    %42 = arith.truncf %41 : vector<16x256xf32> to vector<16x256xbf16>
    %c2 = arith.constant 2 : index
    %c0_17 = arith.constant 0 : index
    %c0_18 = arith.constant 0 : index
    %43 = vector.load %arg2[%c2, %c0_17, %c0_18] : memref<4x256x128xbf16, #tpu.memory_space<vmem>>, vector<1x256x128xbf16>
    %44 = vector.shape_cast %43 : vector<1x256x128xbf16> to vector<256x128xbf16>
    %cst_19 = arith.constant dense<0.000000e+00> : vector<16x128xf32>
    %45 = tpu.matmul %42, %44, %cst_19 {dimension_numbers = #tpu.dot_dimension_numbers<[1], [0], [0], [1], [0, 0, 1, 1], [], []>} : vector<16x256xbf16>, vector<256x128xbf16>, vector<16x128xf32> -> vector<16x128xf32>
    %46 = arith.addf %30, %45 : vector<16x128xf32>
    %c0_20 = arith.constant 0 : index
    %c1_21 = arith.constant 1 : index
    %c1_22 = arith.constant 1 : index
    %c0_23 = arith.constant 0 : index
    %47 = vector.load %arg1[%c0_20, %c1_21, %c1_22, %c0_23] : memref<1x5x5x256xf32, #tpu.memory_space<vmem>>, vector<1x4x4x256xf32>
    %48 = vector.shape_cast %47 : vector<1x4x4x256xf32> to vector<4x4x256xf32>
    %49 = vector.extract_strided_slice %48 {offsets = [0, 0, 0], sizes = [1, 4, 256], strides = [1, 1, 1]} : vector<4x4x256xf32> to vector<1x4x256xf32>
    %50 = vector.shape_cast %49 : vector<1x4x256xf32> to vector<4x256xf32>
    %51 = vector.extract_strided_slice %48 {offsets = [1, 0, 0], sizes = [1, 4, 256], strides = [1, 1, 1]} : vector<4x4x256xf32> to vector<1x4x256xf32>
    %52 = vector.shape_cast %51 : vector<1x4x256xf32> to vector<4x256xf32>
    %53 = vector.extract_strided_slice %48 {offsets = [2, 0, 0], sizes = [1, 4, 256], strides = [1, 1, 1]} : vector<4x4x256xf32> to vector<1x4x256xf32>
    %54 = vector.shape_cast %53 : vector<1x4x256xf32> to vector<4x256xf32>
    %55 = vector.extract_strided_slice %48 {offsets = [3, 0, 0], sizes = [1, 4, 256], strides = [1, 1, 1]} : vector<4x4x256xf32> to vector<1x4x256xf32>
    %56 = vector.shape_cast %55 : vector<1x4x256xf32> to vector<4x256xf32>
    %57 = tpu.concatenate %50, %52, %54, %56 in 0 : vector<4x256xf32>, vector<4x256xf32>, vector<4x256xf32>, vector<4x256xf32> -> vector<16x256xf32>
    %58 = arith.truncf %57 : vector<16x256xf32> to vector<16x256xbf16>
    %c3 = arith.constant 3 : index
    %c0_24 = arith.constant 0 : index
    %c0_25 = arith.constant 0 : index
    %59 = vector.load %arg2[%c3, %c0_24, %c0_25] : memref<4x256x128xbf16, #tpu.memory_space<vmem>>, vector<1x256x128xbf16>
    %60 = vector.shape_cast %59 : vector<1x256x128xbf16> to vector<256x128xbf16>
    %cst_26 = arith.constant dense<0.000000e+00> : vector<16x128xf32>
    %61 = tpu.matmul %58, %60, %cst_26 {dimension_numbers = #tpu.dot_dimension_numbers<[1], [0], [0], [1], [0, 0, 1, 1], [], []>} : vector<16x256xbf16>, vector<256x128xbf16>, vector<16x128xf32> -> vector<16x128xf32>
    %62 = arith.addf %46, %61 : vector<16x128xf32>
    %cst_27 = arith.constant dense<0.000000e+00> : vector<128xf32>
    %63 = vector.multi_reduction <add>, %62, %cst_27 [0] : vector<16x128xf32> to vector<128xf32>
    %64 = vector.shape_cast %63 : vector<128xf32> to vector<1x128xf32>
    %cst_28 = arith.constant 1.600000e+01 : f32
    %65 = vector.broadcast %cst_28 : f32 to vector<1x128xf32>
    %66 = arith.divf %64, %65 : vector<1x128xf32>
    %67 = arith.mulf %62, %62 : vector<16x128xf32>
    %cst_29 = arith.constant dense<0.000000e+00> : vector<128xf32>
    %68 = vector.multi_reduction <add>, %67, %cst_29 [0] : vector<16x128xf32> to vector<128xf32>
    %69 = vector.shape_cast %68 : vector<128xf32> to vector<1x128xf32>
    %cst_30 = arith.constant 1.600000e+01 : f32
    %70 = vector.broadcast %cst_30 : f32 to vector<1x128xf32>
    %71 = arith.divf %69, %70 : vector<1x128xf32>
    %72 = arith.mulf %66, %66 : vector<1x128xf32>
    %73 = arith.subf %71, %72 : vector<1x128xf32>
    %cst_31 = arith.constant 9.99999974E-6 : f32
    %74 = vector.broadcast %cst_31 : f32 to vector<1x128xf32>
    %75 = arith.addf %73, %74 : vector<1x128xf32>
    %76 = math.rsqrt %75 : vector<1x128xf32>
    %77 = vector.broadcast %76 : vector<1x128xf32> to vector<16x128xf32>
    %78 = arith.mulf %62, %77 : vector<16x128xf32>
    %79 = arith.mulf %66, %76 : vector<1x128xf32>
    %80 = vector.broadcast %79 : vector<1x128xf32> to vector<16x128xf32>
    %81 = arith.subf %78, %80 : vector<16x128xf32>
    %cst_32 = arith.constant 0.000000e+00 : f32
    %82 = vector.broadcast %cst_32 : f32 to vector<16x128xf32>
    %83 = arith.cmpf oge, %81, %82 : vector<16x128xf32>
    %cst_33 = arith.constant 4.000000e-01 : f32
    %84 = vector.broadcast %cst_33 : f32 to vector<16x128xf32>
    %85 = arith.mulf %84, %81 : vector<16x128xf32>
    %86 = arith.select %83, %81, %85 : vector<16x128xi1>, vector<16x128xf32>
    %c0_34 = arith.constant 0 : index
    %c0_35 = arith.constant 0 : index
    %c0_36 = arith.constant 0 : index
    %87 = vector.load %arg3[%c0_34, %c0_35, %c0_36] : memref<1x16x128xf32, #tpu.memory_space<vmem>>, vector<1x16x128xf32>
    %88 = vector.shape_cast %87 : vector<1x16x128xf32> to vector<16x128xf32>
    %89 = vector.shape_cast %86 : vector<16x128xf32> to vector<1x16x128xf32>
    tpu.vector_store %arg3[%c0_34, %c0_35, %c0_36], %89 {strides = array<i32>} : memref<1x16x128xf32, #tpu.memory_space<vmem>>, vector<1x16x128xf32>,
    return
  }
  func.func @transform_0(%arg0: i32) -> (i32, i32, i32, i32) {
    %c0_i32 = arith.constant 0 : i32
    %c0_i32_0 = arith.constant 0 : i32
    %c0_i32_1 = arith.constant 0 : i32
    %c0_i32_2 = arith.constant 0 : i32
    return %arg0, %c0_i32, %c0_i32_0, %c0_i32_1 : i32, i32, i32, i32
  }
  func.func @transform_1(%arg0: i32) -> (i32, i32, i32) {
    %c0_i32 = arith.constant 0 : i32
    %c0_i32_0 = arith.constant 0 : i32
    %c0_i32_1 = arith.constant 0 : i32
    %c0_i32_2 = arith.constant 0 : i32
    return %c0_i32, %c0_i32_0, %c0_i32_1 : i32, i32, i32
  }
  func.func @transform_2(%arg0: i32) -> (i32, i32, i32) {
    %c0_i32 = arith.constant 0 : i32
    %c0_i32_0 = arith.constant 0 : i32
    %c0_i32_1 = arith.constant 0 : i32
    return %arg0, %c0_i32, %c0_i32_0 : i32, i32, i32
  }
}

module attributes {stable_mosaic.version = 11 : i64} {
  func.func @_down_block_kernel(%arg0: i32, %arg1: memref<1x3x3x512xf32, #tpu.memory_space<vmem>>, %arg2: memref<4x512x256xbf16, #tpu.memory_space<vmem>>, %arg3: memref<1x4x256xf32, #tpu.memory_space<vmem>>) attributes {dimension_semantics = [#tpu.dimension_semantics<parallel>], iteration_bounds = array<i64: 2>, scalar_prefetch = 0 : i64, scratch_operands = 0 : i64, tpu.core_type = #tpu.core_type<tc>, window_params = [{transform_indices = @transform_0, window_bounds = array<i64: 1, 3, 3, 512>}, {pipeline_mode = #tpu.pipeline_mode<synchronous>, transform_indices = @transform_1, window_bounds = array<i64: 4, 512, 256>}, {transform_indices = @transform_2, window_bounds = array<i64: 1, 4, 256>}]} {
    %c0 = arith.constant 0 : index
    %c0_0 = arith.constant 0 : index
    %c0_1 = arith.constant 0 : index
    %c0_2 = arith.constant 0 : index
    %0 = vector.load %arg1[%c0, %c0_0, %c0_1, %c0_2] : memref<1x3x3x512xf32, #tpu.memory_space<vmem>>, vector<1x2x2x512xf32>
    %1 = vector.shape_cast %0 : vector<1x2x2x512xf32> to vector<2x2x512xf32>
    %2 = vector.extract_strided_slice %1 {offsets = [0, 0, 0], sizes = [1, 2, 512], strides = [1, 1, 1]} : vector<2x2x512xf32> to vector<1x2x512xf32>
    %3 = vector.shape_cast %2 : vector<1x2x512xf32> to vector<2x512xf32>
    %4 = vector.extract_strided_slice %1 {offsets = [1, 0, 0], sizes = [1, 2, 512], strides = [1, 1, 1]} : vector<2x2x512xf32> to vector<1x2x512xf32>
    %5 = vector.shape_cast %4 : vector<1x2x512xf32> to vector<2x512xf32>
    %6 = tpu.concatenate %3, %5 in 0 : vector<2x512xf32>, vector<2x512xf32> -> vector<4x512xf32>
    %7 = arith.truncf %6 : vector<4x512xf32> to vector<4x512xbf16>
    %c0_3 = arith.constant 0 : index
    %c0_4 = arith.constant 0 : index
    %c0_5 = arith.constant 0 : index
    %8 = vector.load %arg2[%c0_3, %c0_4, %c0_5] : memref<4x512x256xbf16, #tpu.memory_space<vmem>>, vector<1x512x256xbf16>
    %9 = vector.shape_cast %8 : vector<1x512x256xbf16> to vector<512x256xbf16>
    %cst = arith.constant dense<0.000000e+00> : vector<4x256xf32>
    %10 = tpu.matmul %7, %9, %cst {dimension_numbers = #tpu.dot_dimension_numbers<[1], [0], [0], [1], [0, 0, 1, 1], [], []>} : vector<4x512xbf16>, vector<512x256xbf16>, vector<4x256xf32> -> vector<4x256xf32>
    %c0_6 = arith.constant 0 : index
    %c0_7 = arith.constant 0 : index
    %c1 = arith.constant 1 : index
    %c0_8 = arith.constant 0 : index
    %11 = vector.load %arg1[%c0_6, %c0_7, %c1, %c0_8] : memref<1x3x3x512xf32, #tpu.memory_space<vmem>>, vector<1x2x2x512xf32>
    %12 = vector.shape_cast %11 : vector<1x2x2x512xf32> to vector<2x2x512xf32>
    %13 = vector.extract_strided_slice %12 {offsets = [0, 0, 0], sizes = [1, 2, 512], strides = [1, 1, 1]} : vector<2x2x512xf32> to vector<1x2x512xf32>
    %14 = vector.shape_cast %13 : vector<1x2x512xf32> to vector<2x512xf32>
    %15 = vector.extract_strided_slice %12 {offsets = [1, 0, 0], sizes = [1, 2, 512], strides = [1, 1, 1]} : vector<2x2x512xf32> to vector<1x2x512xf32>
    %16 = vector.shape_cast %15 : vector<1x2x512xf32> to vector<2x512xf32>
    %17 = tpu.concatenate %14, %16 in 0 : vector<2x512xf32>, vector<2x512xf32> -> vector<4x512xf32>
    %18 = arith.truncf %17 : vector<4x512xf32> to vector<4x512xbf16>
    %c1_9 = arith.constant 1 : index
    %c0_10 = arith.constant 0 : index
    %c0_11 = arith.constant 0 : index
    %19 = vector.load %arg2[%c1_9, %c0_10, %c0_11] : memref<4x512x256xbf16, #tpu.memory_space<vmem>>, vector<1x512x256xbf16>
    %20 = vector.shape_cast %19 : vector<1x512x256xbf16> to vector<512x256xbf16>
    %cst_12 = arith.constant dense<0.000000e+00> : vector<4x256xf32>
    %21 = tpu.matmul %18, %20, %cst_12 {dimension_numbers = #tpu.dot_dimension_numbers<[1], [0], [0], [1], [0, 0, 1, 1], [], []>} : vector<4x512xbf16>, vector<512x256xbf16>, vector<4x256xf32> -> vector<4x256xf32>
    %22 = arith.addf %10, %21 : vector<4x256xf32>
    %c0_13 = arith.constant 0 : index
    %c1_14 = arith.constant 1 : index
    %c0_15 = arith.constant 0 : index
    %c0_16 = arith.constant 0 : index
    %23 = vector.load %arg1[%c0_13, %c1_14, %c0_15, %c0_16] : memref<1x3x3x512xf32, #tpu.memory_space<vmem>>, vector<1x2x2x512xf32>
    %24 = vector.shape_cast %23 : vector<1x2x2x512xf32> to vector<2x2x512xf32>
    %25 = vector.extract_strided_slice %24 {offsets = [0, 0, 0], sizes = [1, 2, 512], strides = [1, 1, 1]} : vector<2x2x512xf32> to vector<1x2x512xf32>
    %26 = vector.shape_cast %25 : vector<1x2x512xf32> to vector<2x512xf32>
    %27 = vector.extract_strided_slice %24 {offsets = [1, 0, 0], sizes = [1, 2, 512], strides = [1, 1, 1]} : vector<2x2x512xf32> to vector<1x2x512xf32>
    %28 = vector.shape_cast %27 : vector<1x2x512xf32> to vector<2x512xf32>
    %29 = tpu.concatenate %26, %28 in 0 : vector<2x512xf32>, vector<2x512xf32> -> vector<4x512xf32>
    %30 = arith.truncf %29 : vector<4x512xf32> to vector<4x512xbf16>
    %c2 = arith.constant 2 : index
    %c0_17 = arith.constant 0 : index
    %c0_18 = arith.constant 0 : index
    %31 = vector.load %arg2[%c2, %c0_17, %c0_18] : memref<4x512x256xbf16, #tpu.memory_space<vmem>>, vector<1x512x256xbf16>
    %32 = vector.shape_cast %31 : vector<1x512x256xbf16> to vector<512x256xbf16>
    %cst_19 = arith.constant dense<0.000000e+00> : vector<4x256xf32>
    %33 = tpu.matmul %30, %32, %cst_19 {dimension_numbers = #tpu.dot_dimension_numbers<[1], [0], [0], [1], [0, 0, 1, 1], [], []>} : vector<4x512xbf16>, vector<512x256xbf16>, vector<4x256xf32> -> vector<4x256xf32>
    %34 = arith.addf %22, %33 : vector<4x256xf32>
    %c0_20 = arith.constant 0 : index
    %c1_21 = arith.constant 1 : index
    %c1_22 = arith.constant 1 : index
    %c0_23 = arith.constant 0 : index
    %35 = vector.load %arg1[%c0_20, %c1_21, %c1_22, %c0_23] : memref<1x3x3x512xf32, #tpu.memory_space<vmem>>, vector<1x2x2x512xf32>
    %36 = vector.shape_cast %35 : vector<1x2x2x512xf32> to vector<2x2x512xf32>
    %37 = vector.extract_strided_slice %36 {offsets = [0, 0, 0], sizes = [1, 2, 512], strides = [1, 1, 1]} : vector<2x2x512xf32> to vector<1x2x512xf32>
    %38 = vector.shape_cast %37 : vector<1x2x512xf32> to vector<2x512xf32>
    %39 = vector.extract_strided_slice %36 {offsets = [1, 0, 0], sizes = [1, 2, 512], strides = [1, 1, 1]} : vector<2x2x512xf32> to vector<1x2x512xf32>
    %40 = vector.shape_cast %39 : vector<1x2x512xf32> to vector<2x512xf32>
    %41 = tpu.concatenate %38, %40 in 0 : vector<2x512xf32>, vector<2x512xf32> -> vector<4x512xf32>
    %42 = arith.truncf %41 : vector<4x512xf32> to vector<4x512xbf16>
    %c3 = arith.constant 3 : index
    %c0_24 = arith.constant 0 : index
    %c0_25 = arith.constant 0 : index
    %43 = vector.load %arg2[%c3, %c0_24, %c0_25] : memref<4x512x256xbf16, #tpu.memory_space<vmem>>, vector<1x512x256xbf16>
    %44 = vector.shape_cast %43 : vector<1x512x256xbf16> to vector<512x256xbf16>
    %cst_26 = arith.constant dense<0.000000e+00> : vector<4x256xf32>
    %45 = tpu.matmul %42, %44, %cst_26 {dimension_numbers = #tpu.dot_dimension_numbers<[1], [0], [0], [1], [0, 0, 1, 1], [], []>} : vector<4x512xbf16>, vector<512x256xbf16>, vector<4x256xf32> -> vector<4x256xf32>
    %46 = arith.addf %34, %45 : vector<4x256xf32>
    %cst_27 = arith.constant dense<0.000000e+00> : vector<256xf32>
    %47 = vector.multi_reduction <add>, %46, %cst_27 [0] : vector<4x256xf32> to vector<256xf32>
    %48 = vector.shape_cast %47 : vector<256xf32> to vector<1x256xf32>
    %cst_28 = arith.constant 4.000000e+00 : f32
    %49 = vector.broadcast %cst_28 : f32 to vector<1x256xf32>
    %50 = arith.divf %48, %49 : vector<1x256xf32>
    %51 = arith.mulf %46, %46 : vector<4x256xf32>
    %cst_29 = arith.constant dense<0.000000e+00> : vector<256xf32>
    %52 = vector.multi_reduction <add>, %51, %cst_29 [0] : vector<4x256xf32> to vector<256xf32>
    %53 = vector.shape_cast %52 : vector<256xf32> to vector<1x256xf32>
    %cst_30 = arith.constant 4.000000e+00 : f32
    %54 = vector.broadcast %cst_30 : f32 to vector<1x256xf32>
    %55 = arith.divf %53, %54 : vector<1x256xf32>
    %56 = arith.mulf %50, %50 : vector<1x256xf32>
    %57 = arith.subf %55, %56 : vector<1x256xf32>
    %cst_31 = arith.constant 9.99999974E-6 : f32
    %58 = vector.broadcast %cst_31 : f32 to vector<1x256xf32>
    %59 = arith.addf %57, %58 : vector<1x256xf32>
    %60 = math.rsqrt %59 : vector<1x256xf32>
    %61 = vector.broadcast %60 : vector<1x256xf32> to vector<4x256xf32>
    %62 = arith.mulf %46, %61 : vector<4x256xf32>
    %63 = arith.mulf %50, %60 : vector<1x256xf32>
    %64 = vector.broadcast %63 : vector<1x256xf32> to vector<4x256xf32>
    %65 = arith.subf %62, %64 : vector<4x256xf32>
    %cst_32 = arith.constant 0.000000e+00 : f32
    %66 = vector.broadcast %cst_32 : f32 to vector<4x256xf32>
    %67 = arith.cmpf oge, %65, %66 : vector<4x256xf32>
    %cst_33 = arith.constant 4.000000e-01 : f32
    %68 = vector.broadcast %cst_33 : f32 to vector<4x256xf32>
    %69 = arith.mulf %68, %65 : vector<4x256xf32>
    %70 = arith.select %67, %65, %69 : vector<4x256xi1>, vector<4x256xf32>
    %c0_34 = arith.constant 0 : index
    %c0_35 = arith.constant 0 : index
    %c0_36 = arith.constant 0 : index
    %71 = vector.load %arg3[%c0_34, %c0_35, %c0_36] : memref<1x4x256xf32, #tpu.memory_space<vmem>>, vector<1x4x256xf32>
    %72 = vector.shape_cast %71 : vector<1x4x256xf32> to vector<4x256xf32>
    %73 = vector.shape_cast %70 : vector<4x256xf32> to vector<1x4x256xf32>
    tpu.vector_store %arg3[%c0_34, %c0_35, %c0_36], %73 {strides = array<i32>} : memref<1x4x256xf32, #tpu.memory_space<vmem>>, vector<1x4x256xf32>,
    return
  }
  func.func @transform_0(%arg0: i32) -> (i32, i32, i32, i32) {
    %c0_i32 = arith.constant 0 : i32
    %c0_i32_0 = arith.constant 0 : i32
    %c0_i32_1 = arith.constant 0 : i32
    %c0_i32_2 = arith.constant 0 : i32
    return %arg0, %c0_i32, %c0_i32_0, %c0_i32_1 : i32, i32, i32, i32
  }
  func.func @transform_1(%arg0: i32) -> (i32, i32, i32) {
    %c0_i32 = arith.constant 0 : i32
    %c0_i32_0 = arith.constant 0 : i32
    %c0_i32_1 = arith.constant 0 : i32
    %c0_i32_2 = arith.constant 0 : i32
    return %c0_i32, %c0_i32_0, %c0_i32_1 : i32, i32, i32
  }
  func.func @transform_2(%arg0: i32) -> (i32, i32, i32) {
    %c0_i32 = arith.constant 0 : i32
    %c0_i32_0 = arith.constant 0 : i32
    %c0_i32_1 = arith.constant 0 : i32
    return %arg0, %c0_i32, %c0_i32_0 : i32, i32, i32
  }
}

</mosaic_0001>

<bundles_post_ra>
// kernel: encoder_forward.5
= control target key start
LH: loop header
LB: loop body
LE: loop exit
PB: predicated region body
PF: predicated region fallthrough
CT: control target
= control target key end

     0   :  { %s7571_s9 = smov 0   ;;  %s9804_s0 = inlined_call_operand.vmem [shape: f32[2,33,33,24], index: 0, kind: input, shape index: {}]   ;;  %s9805_s1 = inlined_call_operand.vmem [shape: bf16[4,24,16], index: 1, kind: input, shape index: {}]   ;;  %s9806_s2 = inlined_call_operand.vmem [shape: f32[2,16,1024], index: 2, kind: output, shape index: {}]  }
   0x1 LB: > { %s5809_s10 = sadd.s32 4294967295, %s7554_s9   ;;  %p5813_p0 = scmp.ge.s32.totalorder %s7554_s9, 1  ;;  %s7554_s9 = sphi %s7571_s9, %s12_s9  }
   0x2   : > { %p112_p1 = scmp.lt.s32.totalorder %s7554_s9, 3 }
   0x4   : > { %p113_p2 = pnand %p5813_p0, %p112_p1 }
   0x6   : > { %116 = sbr.rel (%p113_p2) target bundleno = 1116 (0x45c), region = 28 }
   0xd   : > { %v7538_v0 = vld [vmem:[%s9805_s1 + $0xc] sm:$0xff]   ;;  %vm738_vm0 = vcmask 1043456   ;;  %v7539_v1 = vld [vmem:[%s9805_s1 + $0x18] sm:$0xff]   ;;  %p134_p3 = scmp.lt.s32.totalorder %s5809_s10, 1  ;;  %v7540_v2 = vld [vmem:[%s9805_s1 + $0x14] ss:$0 sps:$4 sm:$0xff]  }
   0xe   : > { %6613 = vmatprep.subr.bf16.mxu1 %v7538_v0  ;;  %6877 = vmatprep.subr.bf16.mxu0 %v7539_v1  ;;  %v7541_v3 = vld [vmem:[%s9805_s1 + $0x20] ss:$0 sps:$4 sm:$0xff]   ;;  %v740_v4 = vsel %vm738_vm0, %v7540_v2, 0  ;;  %v7543_v7 = vld [vmem:[%s9805_s1 + $0x24] sm:$0xff]   ;;  %vm545_vm1 = vcmask 195584   ;;  %vm4183_vm2 = vcmask 130048  }
   0xf   : > { %6614 = vmatpush3.bf16.msra.mxu1 %v7538_v0  ;;  %s10090_s10 = smov (!%p134_p3, %s5809_s10), 1  ;;  %6878 = vmatpush3.bf16.msra.mxu0 %v7539_v1  ;;  %v7542_v5 = vld [vmem:[%s9805_s1] sm:$0xff]   ;;  %v2435_v6 = vsel %vm738_vm0, %v7541_v3, 0 }
  0x10   : > { %7525 = vmatprep.subr.msk.bf16.mxu1 %vm738_vm0, %v7540_v2  ;;  %7527 = vmatprep.subr.msk.bf16.mxu0 %vm738_vm0, %v7541_v3  ;;  %s7529_s21 = smul.u32 1320, %s10090_s10  ;;  %s6348_s3 = sshll.u32 %s10090_s10, 7 }
  0x11   : > { %s9611_s6 = scalar_lea.vmem %s9806_s2, %s6348_s3 }
  0x12   : > { %s7607_s26 = scalar_lea.vmem %s9804_s0, %s7529_s21 }
  0x13   : > { %6616 = vmatpush3.bf16.msra.mxu1 %v740_v4  ;;  %6880 = vmatpush3.bf16.msra.mxu0 %v2435_v6  ;;  %v340_v8 = vld [vmem:[%s7607_s26 + $0x1] sm:$0xff]  ;;  %v341_v9 = vld [vmem:[%s7607_s26 + $0x9] sm:$0xff]  ;;  %v342_v13 = vld [vmem:[%s7607_s26 + $0x11] sm:$0xff] }
  0x14   : > { %v5952_v10 = vld [vmem:[%s7607_s26 + $0x28] sm:$0xff]  ;;  %6745 = vmatprep.subr.bf16.mxu1 %v7542_v5  ;;  %v468_v11 = vpack.c.bf16 %v341_v9, %v340_v8  ;;  %v5953_v12 = vld [vmem:[%s7607_s26 + $0x30] sm:$0xff]  ;;  %v343_v14 = vld [vmem:[%s7607_s26 + $0x19] sm:$0xff]  ;;  %7009 = vmatprep.subr.bf16.mxu0 %v7543_v7 }
  0x15   : > { %v2165_v15 = vpack.c.bf16 %v5953_v12, %v5952_v10  ;;  %v469_v16 = vpack.c.bf16 %v343_v14, %v342_v13  ;;  %v5954_v17 = vld [vmem:[%s7607_s26 + $0x38] sm:$0xff]  ;;  %v5955_v18 = vld [vmem:[%s7607_s26 + $0x40] sm:$0xff]  ;;  %v344_v19 = vld [vmem:[%s7607_s26 + $0x29] sm:$0xff] }
  0x16   : > { %6617 = vmatprep.mubr.msk.bf16.mxu1 %vm545_vm1, %v468_v11  ;;  %v2166_v20 = vpack.c.bf16 %v5955_v18, %v5954_v17  ;;  %v345_v21 = vld [vmem:[%s7607_s26 + $0x31] sm:$0xff]  ;;  %v346_v26 = vld [vmem:[%s7607_s26 + $0x39] sm:$0xff]  ;;  %v347_v27 = vld [vmem:[%s7607_s26 + $0x41] sm:$0xff] }
  0x17   : > { %v5956_v22 = vld [vmem:[%s7607_s26 + $0x50] sm:$0xff]  ;;  %v5957_v23 = vld [vmem:[%s7607_s26 + $0x58] sm:$0xff]  ;;  %6881 = vmatprep.mubr.msk.bf16.mxu0 %vm545_vm1, %v2165_v15  ;;  %6618 = vmatmul.mubr.msk.bf16.vlgmr.msra.gmra.mrb[0].mxu1 %vm545_vm1, %v469_v16  ;;  %v7624_v24 = vpack.c.bf16 %v345_v21, %v344_v19  ;;  %v5958_v28 = vld [vmem:[%s7607_s26 + $0x60] sm:$0xff]  ;;  %v7638_v34 = vpack.c.bf16 %v347_v27, %v346_v26 }
  0x18   : > { %v2167_v25 = vpack.c.bf16 %v5957_v23, %v5956_v22  ;;  %6882 = vmatmul.mubr.msk.bf16.vlgmr.msra.gmra.mrb[0].mxu0 %vm545_vm1, %v2166_v20  ;;  %6746 = vmatpush3.bf16.msra.mxu1 %v7542_v5  ;;  %v5959_v29 = vld [vmem:[%s7607_s26 + $0x68] sm:$0xff]  ;;  %v348_v30 = vld [vmem:[%s7607_s26 + $0x51] sm:$0xff]  ;;  %v349_v31 = vld [vmem:[%s7607_s26 + $0x59] sm:$0xff] }
  0x19   : > { %7010 = vmatpush3.bf16.msra.mxu0 %v7543_v7  ;;  %6621 = vmatprep.mubr.msk.bf16.mxu1 %vm545_vm1, %v7624_v24  ;;  %v5960_v32 = vld [vmem:[%s7607_s26 + $0x78] sm:$0xff]  ;;  %v5961_v33 = vld [vmem:[%s7607_s26 + $0x80] sm:$0xff]  ;;  %v2168_v35 = vpack.c.bf16 %v5959_v29, %v5958_v28  ;;  %v7640_v36 = vpack.c.bf16 %v349_v31, %v348_v30  ;;  %v351_v39 = vld [vmem:[%s7607_s26 + $0x69] sm:$0xff] }
  0x1a   : > { %6885 = vmatprep.mubr.msk.bf16.mxu0 %vm545_vm1, %v2167_v25  ;;  %v2169_v37 = vpack.c.bf16 %v5961_v33, %v5960_v32  ;;  %v350_v38 = vld [vmem:[%s7607_s26 + $0x61] sm:$0xff]  ;;  %v5963_v41 = vld [vmem:[%s7607_s26 + $0x90] sm:$0xff]  ;;  %v352_v42 = vld [vmem:[%s7607_s26 + $0x79] sm:$0xff] }
  0x1b   : > { %v5962_v40 = vld [vmem:[%s7607_s26 + $0x88] sm:$0xff]  ;;  %v5964_v44 = vld [vmem:[%s7607_s26 + $0xa0] sm:$0xff]  ;;  %v7656_v46 = vpack.c.bf16 %v351_v39, %v350_v38  ;;  %v355_v51 = vld [vmem:[%s7607_s26 + $0x91] sm:$0xff] }
  0x1c   : > { %v353_v43 = vld [vmem:[%s7607_s26 + $0x81] sm:$0xff]  ;;  %v2170_v47 = vpack.c.bf16 %v5963_v41, %v5962_v40  ;;  %v354_v50 = vld [vmem:[%s7607_s26 + $0x89] sm:$0xff]  ;;  %v5967_v53 = vld [vmem:[%s7607_s26 + $0xb8] sm:$0xff] }
  0x1d   : > { %v5965_v45 = vld [vmem:[%s7607_s26 + $0xa8] sm:$0xff]  ;;  %v7658_v48 = vpack.c.bf16 %v353_v43, %v352_v42  ;;  %v5966_v52 = vld [vmem:[%s7607_s26 + $0xb0] sm:$0xff]  ;;  %v7674_v58 = vpack.c.bf16 %v355_v51, %v354_v50  ;;  %v359_v63 = vld [vmem:[%s7607_s26 + $0xb9] sm:$0xff] }
  0x1e   : > { %v2171_v49 = vpack.c.bf16 %v5965_v45, %v5964_v44  ;;  %v356_v54 = vld [vmem:[%s7607_s26 + $0xa1] sm:$0xff]  ;;  %v357_v55 = vld [vmem:[%s7607_s26 + $0xa9] sm:$0xff]  ;;  %v2172_v59 = vpack.c.bf16 %v5967_v53, %v5966_v52  ;;  %v358_v62 = vld [vmem:[%s7607_s26 + $0xb1] sm:$0xff] }
  0x1f   : > { %6622 = vmatmul.mubr.msk.bf16.gmra.mrb[4].mxu1 %vm545_vm1, %v7638_v34  ;;  %v5968_v56 = vld [vmem:[%s7607_s26 + $0xc8] sm:$0xff]  ;;  %v5969_v57 = vld [vmem:[%s7607_s26 + $0xd0] sm:$0xff]  ;;  %v7676_v60 = vpack.c.bf16 %v357_v55, %v356_v54  ;;  %v5970_v0 = vld [vmem:[%s7607_s26 + $0xd8] sm:$0xff]  ;;  %v7692_v6 = vpack.c.bf16 %v359_v63, %v358_v62 }
  0x20   : > { %6886 = vmatmul.mubr.msk.bf16.gmra.mrb[4].mxu0 %vm545_vm1, %v2168_v35  ;;  %6625 = vmatprep.mubr.msk.bf16.mxu1 %vm545_vm1, %v7640_v36  ;;  %v2173_v61 = vpack.c.bf16 %v5969_v57, %v5968_v56  ;;  %v5971_v1 = vld [vmem:[%s7607_s26 + $0xe0] sm:$0xff]  ;;  %v360_v2 = vld [vmem:[%s7607_s26 + $0xc9] sm:$0xff]  ;;  %v361_v3 = vld [vmem:[%s7607_s26 + $0xd1] sm:$0xff] }
  0x21   : > { %6889 = vmatprep.mubr.msk.bf16.mxu0 %vm545_vm1, %v2169_v37  ;;  %v5972_v4 = vld [vmem:[%s7607_s26 + $0xf0] sm:$0xff]  ;;  %v5973_v5 = vld [vmem:[%s7607_s26 + $0xf8] sm:$0xff]  ;;  %v2174_v7 = vpack.c.bf16 %v5971_v1, %v5970_v0  ;;  %v7694_v8 = vpack.c.bf16 %v361_v3, %v360_v2  ;;  %v363_v11 = vld [vmem:[%s7607_s26 + $0xe1] sm:$0xff] }
  0x22   : > { %v2175_v9 = vpack.c.bf16 %v5973_v5, %v5972_v4  ;;  %v362_v10 = vld [vmem:[%s7607_s26 + $0xd9] sm:$0xff]  ;;  %v5975_v13 = vld [vmem:[%s7607_s26 + $0x108] sm:$0xff]  ;;  %v364_v14 = vld [vmem:[%s7607_s26 + $0xf1] sm:$0xff] }
  0x23   : > { %v5974_v12 = vld [vmem:[%s7607_s26 + $0x100] sm:$0xff]  ;;  %v5976_v16 = vld [vmem:[%s7607_s26 + $0x118] sm:$0xff]  ;;  %v7710_v18 = vpack.c.bf16 %v363_v11, %v362_v10  ;;  %v7544_v23 = vld [vmem:[%s9805_s1 + $0x8] ss:$0 sps:$4 sm:$0xff]  }
  0x24   : > { %v365_v15 = vld [vmem:[%s7607_s26 + $0xf9] sm:$0xff]  ;;  %v2176_v19 = vpack.c.bf16 %v5975_v13, %v5974_v12  ;;  %v366_v22 = vld [vmem:[%s7607_s26 + $0x101] sm:$0xff]  ;;  %v367_v25 = vld [vmem:[%s7607_s26 + $0x109] sm:$0xff]  ;;  %7526 = vmatprep.subr.msk.bf16.mxu1 %vm738_vm0, %v7544_v23  ;;  %v1489_v31 = vsel %vm738_vm0, %v7544_v23, 0 }
  0x25   : > { %v5977_v17 = vld [vmem:[%s7607_s26 + $0x120] sm:$0xff]  ;;  %v7712_v20 = vpack.c.bf16 %v365_v15, %v364_v14  ;;  %v5978_v26 = vld [vmem:[%s7607_s26 + $0x128] sm:$0xff]  ;;  %v5979_v28 = vld [vmem:[%s7607_s26 + $0x130] sm:$0xff]  ;;  %6748 = vmatpush3.bf16.msra.mxu1 %v1489_v31  ;;  %v7738_v37 = vpack.c.bf16 %v367_v25, %v366_v22 }
  0x26   : > { %v2177_v21 = vpack.c.bf16 %v5977_v17, %v5976_v16  ;;  %v7545_v27 = vld [vmem:[%s9805_s1 + $0x2c] ss:$0 sps:$4 sm:$0xff]   ;;  %v368_v29 = vld [vmem:[%s7607_s26 + $0x119] sm:$0xff]  ;;  %v369_v30 = vld [vmem:[%s7607_s26 + $0x121] sm:$0xff]  ;;  %v2178_v38 = vpack.c.bf16 %v5979_v28, %v5978_v26 }
  0x27   : > { %6626 = vmatmul.mubr.msk.bf16.gmra.mrb[8].mxu1 %vm545_vm1, %v7656_v46  ;;  %v5980_v32 = vld [vmem:[%s7607_s26 + $0x140] sm:$0xff]  ;;  %v5981_v33 = vld [vmem:[%s7607_s26 + $0x148] sm:$0xff]  ;;  %7528 = vmatprep.subr.msk.bf16.mxu0 %vm738_vm0, %v7545_v27  ;;  %v3508_v35 = vsel %vm738_vm0, %v7545_v27, 0  ;;  %v7740_v39 = vpack.c.bf16 %v369_v30, %v368_v29  ;;  %v371_v42 = vld [vmem:[%s7607_s26 + $0x131] sm:$0xff] }
  0x28   : > { %6890 = vmatmul.mubr.msk.bf16.gmra.mrb[8].mxu0 %vm545_vm1, %v2170_v47  ;;  %6629 = vmatprep.mubr.msk.bf16.mxu1 %vm545_vm1, %v7658_v48  ;;  %v2179_v40 = vpack.c.bf16 %v5981_v33, %v5980_v32  ;;  %v370_v41 = vld [vmem:[%s7607_s26 + $0x129] sm:$0xff]  ;;  %v5983_v44 = vld [vmem:[%s7607_s26 + $0x158] sm:$0xff]  ;;  %v372_v45 = vld [vmem:[%s7607_s26 + $0x141] sm:$0xff] }
  0x29   : > { %6893 = vmatprep.mubr.msk.bf16.mxu0 %vm545_vm1, %v2171_v49  ;;  %7012 = vmatpush3.bf16.msra.mxu0 %v3508_v35  ;;  %v5982_v43 = vld [vmem:[%s7607_s26 + $0x150] sm:$0xff]  ;;  %v5984_v49 = vld [vmem:[%s7607_s26 + $0x168] sm:$0xff]  ;;  %v7756_v51 = vpack.c.bf16 %v371_v42, %v370_v41  ;;  %v375_v56 = vld [vmem:[%s7607_s26 + $0x159] sm:$0xff] }
  0x2a   : > { %v373_v47 = vld [vmem:[%s7607_s26 + $0x149] sm:$0xff]  ;;  %v2180_v52 = vpack.c.bf16 %v5983_v44, %v5982_v43  ;;  %v374_v55 = vld [vmem:[%s7607_s26 + $0x151] sm:$0xff]  ;;  %v378_v5 = vld [vmem:[%s7607_s26 + $0x179] sm:$0xff] }
  0x2b   : > { %v5985_v50 = vld [vmem:[%s7607_s26 + $0x170] sm:$0xff]  ;;  %v7758_v53 = vpack.c.bf16 %v373_v47, %v372_v45  ;;  %v5986_v57 = vld [vmem:[%s7607_s26 + $0x178] sm:$0xff]  ;;  %v7774_v1 = vpack.c.bf16 %v375_v56, %v374_v55  ;;  %v5991_v10 = vld [vmem:[%s7607_s26 + $0x1a8] sm:$0xff] }
  0x2c   : > { %v2181_v54 = vpack.c.bf16 %v5985_v50, %v5984_v49  ;;  %v377_v62 = vld [vmem:[%s7607_s26 + $0x171] sm:$0xff]  ;;  %v381_v12 = vld [vmem:[%s7607_s26 + $0x199] sm:$0xff]  ;;  %v383_v22 = vld [vmem:[%s7607_s26 + $0x1a9] sm:$0xff] }
  0x2d   : > { %v5988_v63 = vld [vmem:[%s7607_s26 + $0x190] sm:$0xff]  ;;  %v5989_v0 = vld [vmem:[%s7607_s26 + $0x198] sm:$0xff]  ;;  %v5993_v14 = vld [vmem:[%s7607_s26 + $0x1c0] sm:$0xff] }
  0x2e   : > { %v2183_v4 = vpack.c.bf16 %v5989_v0, %v5988_v63  ;;  %v380_v11 = vld [vmem:[%s7607_s26 + $0x191] sm:$0xff]  ;;  %v5994_v23 = vld [vmem:[%s7607_s26 + $0x1c8] sm:$0xff]  ;;  %v384_v26 = vld [vmem:[%s7607_s26 + $0x1b9] sm:$0xff] }
  0x2f   : > { %6630 = vmatmul.mubr.msk.bf16.gmra.mrb[12].mxu1 %vm545_vm1, %v7674_v58  ;;  %v5992_v13 = vld [vmem:[%s7607_s26 + $0x1b8] sm:$0xff]  ;;  %v7794_v17 = vpack.c.bf16 %v381_v12, %v380_v11  ;;  %v5995_v25 = vld [vmem:[%s7607_s26 + $0x1d0] sm:$0xff]  ;;  %v385_v27 = vld [vmem:[%s7607_s26 + $0x1c1] sm:$0xff] }
  0x30   : > { %6894 = vmatmul.mubr.msk.bf16.gmra.mrb[12].mxu0 %vm545_vm1, %v2172_v59  ;;  %6633 = vmatprep.mubr.msk.bf16.mxu1 %vm545_vm1, %v7676_v60  ;;  %v5987_v59 = vld [vmem:[%s7607_s26 + $0x180] sm:$0xff]  ;;  %v5997_v29 = vld [vmem:[%s7607_s26 + $0x1e8] sm:$0xff]  ;;  %v2186_v31 = vpack.c.bf16 %v5995_v25, %v5994_v23  ;;  %v7812_v32 = vpack.c.bf16 %v385_v27, %v384_v26  ;;  %v5999_v41 = vld [vmem:[%s7607_s26 + $0x1f8] sm:$0xff] }
  0x31   : > { %6897 = vmatprep.mubr.msk.bf16.mxu0 %vm545_vm1, %v2173_v61  ;;  %v376_v61 = vld [vmem:[%s7607_s26 + $0x169] sm:$0xff]  ;;  %v2182_v2 = vpack.c.bf16 %v5987_v59, %v5986_v57  ;;  %v5996_v28 = vld [vmem:[%s7607_s26 + $0x1e0] sm:$0xff]  ;;  %v6002_v56 = vld [vmem:[%s7607_s26 + $0x218] sm:$0xff] }
  0x32   : > { %v7776_v3 = vpack.c.bf16 %v377_v62, %v376_v61  ;;  %v2187_v33 = vpack.c.bf16 %v5997_v29, %v5996_v28  ;;  %v386_v35 = vld [vmem:[%s7607_s26 + $0x1c9] sm:$0xff]  ;;  %v388_v42 = vld [vmem:[%s7607_s26 + $0x1e1] sm:$0xff]  ;;  %v391_v55 = vld [vmem:[%s7607_s26 + $0x1f9] sm:$0xff] }
  0x33   : > { %v389_v43 = vld [vmem:[%s7607_s26 + $0x1e9] sm:$0xff]  ;;  %v6003_v57 = vld [vmem:[%s7607_s26 + $0x220] sm:$0xff]  ;;  %v393_v61 = vld [vmem:[%s7607_s26 + $0x211] sm:$0xff] }
  0x34   : > { %v6000_v44 = vld [vmem:[%s7607_s26 + $0x208] sm:$0xff]  ;;  %v6001_v45 = vld [vmem:[%s7607_s26 + $0x210] sm:$0xff]  ;;  %v7830_v50 = vpack.c.bf16 %v389_v43, %v388_v42  ;;  %v6005_v63 = vld [vmem:[%s7607_s26 + $0x238] sm:$0xff] }
  0x35   : > { %v392_v59 = vld [vmem:[%s7607_s26 + $0x209] sm:$0xff]  ;;  %v396_v12 = vld [vmem:[%s7607_s26 + $0x231] sm:$0xff]  ;;  %v398_v25 = vld [vmem:[%s7607_s26 + $0x241] sm:$0xff] }
  0x36   : > { %v6004_v62 = vld [vmem:[%s7607_s26 + $0x230] sm:$0xff]  ;;  %v6007_v11 = vld [vmem:[%s7607_s26 + $0x248] sm:$0xff]  ;;  %v400_v29 = vld [vmem:[%s7607_s26 + $0x259] sm:$0xff] }
  0x37   : > { %6634 = vmatmul.mubr.msk.bf16.gmra.mrb[16].mxu1 %vm545_vm1, %v7692_v6  ;;  %v399_v26 = vld [vmem:[%s7607_s26 + $0x249] sm:$0xff] }
  0x38   : > { %6898 = vmatmul.mubr.msk.bf16.gmra.mrb[16].mxu0 %vm545_vm1, %v2174_v7  ;;  %6637 = vmatprep.mubr.msk.bf16.mxu1 %vm545_vm1, %v7694_v8  ;;  %v379_v7 = vld [vmem:[%s7607_s26 + $0x181] sm:$0xff]  ;;  %v6011_v28 = vld [vmem:[%s7607_s26 + $0x270] sm:$0xff] }
  0x39   : > { %6901 = vmatprep.mubr.msk.bf16.mxu0 %vm545_vm1, %v2175_v9  ;;  %v5990_v9 = vld [vmem:[%s7607_s26 + $0x1a0] sm:$0xff]  ;;  %v7792_v15 = vpack.c.bf16 %v379_v7, %v378_v5  ;;  %v2191_v5 = vpack.c.bf16 %v6005_v63, %v6004_v62  ;;  %v6010_v27 = vld [vmem:[%s7607_s26 + $0x268] sm:$0xff]  ;;  %v406_v63 = vld [vmem:[%s7607_s26 + $0x291] sm:$0xff] }
  0x3a   : > { %v2184_v16 = vpack.c.bf16 %v5991_v10, %v5990_v9  ;;  %v394_v7 = vld [vmem:[%s7607_s26 + $0x219] sm:$0xff]  ;;  %v395_v9 = vld [vmem:[%s7607_s26 + $0x221] sm:$0xff]  ;;  %v402_v43 = vld [vmem:[%s7607_s26 + $0x269] sm:$0xff] }
  0x3b   : > { %v6006_v10 = vld [vmem:[%s7607_s26 + $0x240] sm:$0xff] }
  0x3f   : > { %6638 = vmatmul.mubr.msk.bf16.gmra.mrb[20].mxu1 %vm545_vm1, %v7710_v18 }
  0x40   : > { %6902 = vmatmul.mubr.msk.bf16.gmra.mrb[20].mxu0 %vm545_vm1, %v2176_v19  ;;  %6641 = vmatprep.mubr.msk.bf16.mxu1 %vm545_vm1, %v7712_v20  ;;  %v2185_v19 = vpack.c.bf16 %v5993_v14, %v5992_v13  ;;  %v397_v13 = vld [vmem:[%s7607_s26 + $0x239] sm:$0xff] }
  0x41   : > { %6905 = vmatprep.mubr.msk.bf16.mxu0 %vm545_vm1, %v2177_v21  ;;  %v382_v21 = vld [vmem:[%s7607_s26 + $0x1a1] sm:$0xff]  ;;  %v6008_v14 = vld [vmem:[%s7607_s26 + $0x258] sm:$0xff] }
  0x42   : > { %v7810_v30 = vpack.c.bf16 %v383_v22, %v382_v21  ;;  %v2192_v21 = vpack.c.bf16 %v6007_v11, %v6006_v10  ;;  %v7866_v22 = vpack.c.bf16 %v397_v13, %v396_v12  ;;  %v409_v10 = vld [vmem:[%s7607_s26 + $0x2b1] sm:$0xff] }
  0x43   : > { %v6020_v11 = vld [vmem:[%s7607_s26 + $0x2d0] sm:$0xff]  ;;  %v6021_v12 = vld [vmem:[%s7607_s26 + $0x2d8] sm:$0xff] }
  0x47   : > { %6642 = vmatmul.mubr.msk.bf16.gmra.mrb[24].mxu1 %vm545_vm1, %v7738_v37 }
  0x48   : > { %6906 = vmatmul.mubr.msk.bf16.gmra.mrb[24].mxu0 %vm545_vm1, %v2178_v38  ;;  %6645 = vmatprep.mubr.msk.bf16.mxu1 %vm545_vm1, %v7740_v39  ;;  %v387_v38 = vld [vmem:[%s7607_s26 + $0x1d1] sm:$0xff] }
  0x49   : > { %6909 = vmatprep.mubr.msk.bf16.mxu0 %vm545_vm1, %v2179_v40  ;;  %v5998_v40 = vld [vmem:[%s7607_s26 + $0x1f0] sm:$0xff]  ;;  %v7828_v47 = vpack.c.bf16 %v387_v38, %v386_v35  ;;  %v6013_v35 = vld [vmem:[%s7607_s26 + $0x288] sm:$0xff]  ;;  %v7882_v38 = vpack.c.bf16 %v399_v26, %v398_v25  ;;  %v6022_v26 = vld [vmem:[%s7607_s26 + $0x2e0] sm:$0xff] }
  0x4a   : > { %v2188_v49 = vpack.c.bf16 %v5999_v41, %v5998_v40  ;;  %v2194_v40 = vpack.c.bf16 %v6011_v28, %v6010_v27  ;;  %v411_v25 = vld [vmem:[%s7607_s26 + $0x2c1] sm:$0xff]  ;;  %v412_v28 = vld [vmem:[%s7607_s26 + $0x2d1] sm:$0xff] }
  0x4b   : > { %v6023_v27 = vld [vmem:[%s7607_s26 + $0x2e8] sm:$0xff] }
  0x4f   : > { %6646 = vmatmul.mubr.msk.bf16.gmra.mrb[28].mxu1 %vm545_vm1, %v7756_v51 }
  0x50   : > { %6910 = vmatmul.mubr.msk.bf16.gmra.mrb[28].mxu0 %vm545_vm1, %v2180_v52  ;;  %6649 = vmatprep.mubr.msk.bf16.mxu1 %vm545_vm1, %v7758_v53  ;;  %v2189_v52 = vpack.c.bf16 %v6001_v45, %v6000_v44  ;;  %v403_v44 = vld [vmem:[%s7607_s26 + $0x271] sm:$0xff] }
  0x51   : > { %6913 = vmatprep.mubr.msk.bf16.mxu0 %vm545_vm1, %v2181_v54  ;;  %v390_v54 = vld [vmem:[%s7607_s26 + $0x1f1] sm:$0xff] }
  0x52   : > { %v7846_v0 = vpack.c.bf16 %v391_v55, %v390_v54  ;;  %v6014_v45 = vld [vmem:[%s7607_s26 + $0x290] sm:$0xff]  ;;  %v6016_v55 = vld [vmem:[%s7607_s26 + $0x2a8] sm:$0xff] }
  0x53   : > { %v405_v54 = vld [vmem:[%s7607_s26 + $0x289] sm:$0xff] }
  0x57   : > { %6650 = vmatmul.mubr.msk.bf16.gmra.mrb[32].mxu1 %vm545_vm1, %v7774_v1 }
  0x58   : > { %6914 = vmatmul.mubr.msk.bf16.gmra.mrb[32].mxu0 %vm545_vm1, %v2182_v2  ;;  %6653 = vmatprep.mubr.msk.bf16.mxu1 %vm545_vm1, %v7776_v3  ;;  %v2190_v2 = vpack.c.bf16 %v6003_v57, %v6002_v56  ;;  %v6017_v56 = vld [vmem:[%s7607_s26 + $0x2b0] sm:$0xff]  ;;  %v7900_v57 = vpack.c.bf16 %v403_v44, %v402_v43  ;;  %v414_v44 = vld [vmem:[%s7607_s26 + $0x2e1] sm:$0xff] }
  0x59   : > { %6917 = vmatprep.mubr.msk.bf16.mxu0 %vm545_vm1, %v2183_v4  ;;  %v7848_v4 = vpack.c.bf16 %v393_v61, %v392_v59  ;;  %v2197_v62 = vpack.c.bf16 %v6017_v56, %v6016_v55  ;;  %v417_v55 = vld [vmem:[%s7607_s26 + $0x301] sm:$0xff] }
  0x5a   : > { %v6028_v56 = vld [vmem:[%s7607_s26 + $0x320] sm:$0xff] }
  0x5f   : > { %6654 = vmatmul.mubr.msk.bf16.gmra.mrb[36].mxu1 %vm545_vm1, %v7792_v15 }
  0x60   : > { %6918 = vmatmul.mubr.msk.bf16.gmra.mrb[36].mxu0 %vm545_vm1, %v2184_v16  ;;  %6657 = vmatprep.mubr.msk.bf16.mxu1 %vm545_vm1, %v7794_v17  ;;  %v6009_v16 = vld [vmem:[%s7607_s26 + $0x260] sm:$0xff] }
  0x61   : > { %6921 = vmatprep.mubr.msk.bf16.mxu0 %vm545_vm1, %v2185_v19  ;;  %v7864_v19 = vpack.c.bf16 %v395_v9, %v394_v7  ;;  %v2193_v23 = vpack.c.bf16 %v6009_v16, %v6008_v14  ;;  %v6019_v7 = vld [vmem:[%s7607_s26 + $0x2c0] sm:$0xff]  ;;  %v408_v9 = vld [vmem:[%s7607_s26 + $0x2a9] sm:$0xff] }
  0x62   : > { %v7920_v16 = vpack.c.bf16 %v409_v10, %v408_v9  ;;  %v419_v9 = vld [vmem:[%s7607_s26 + $0x311] sm:$0xff] }
  0x63   : > { %v6030_v10 = vld [vmem:[%s7607_s26 + $0x330] sm:$0xff] }
  0x67   : > { %6658 = vmatmul.mubr.msk.bf16.gmra.mrb[40].mxu1 %vm545_vm1, %v7810_v30 }
  0x68   : > { %6922 = vmatmul.mubr.msk.bf16.gmra.mrb[40].mxu0 %vm545_vm1, %v2186_v31  ;;  %6661 = vmatprep.mubr.msk.bf16.mxu1 %vm545_vm1, %v7812_v32  ;;  %v401_v31 = vld [vmem:[%s7607_s26 + $0x261] sm:$0xff] }
  0x69   : > { %6925 = vmatprep.mubr.msk.bf16.mxu0 %vm545_vm1, %v2187_v33  ;;  %v6012_v33 = vld [vmem:[%s7607_s26 + $0x280] sm:$0xff]  ;;  %v7884_v41 = vpack.c.bf16 %v401_v31, %v400_v29  ;;  %v6024_v31 = vld [vmem:[%s7607_s26 + $0x2f8] sm:$0xff] }
  0x6a   : > { %v2195_v42 = vpack.c.bf16 %v6013_v35, %v6012_v33  ;;  %v413_v29 = vld [vmem:[%s7607_s26 + $0x2d9] sm:$0xff] }
  0x6b   : > { %v6025_v33 = vld [vmem:[%s7607_s26 + $0x300] sm:$0xff] }
  0x6c   : > { %v2201_v43 = vpack.c.bf16 %v6025_v33, %v6024_v31  ;;  %v423_v31 = vld [vmem:[%s7607_s26 + $0x339] sm:$0xff] }
  0x6d   : > { %v6034_v33 = vld [vmem:[%s7607_s26 + $0x358] sm:$0xff] }
  0x6f   : > { %6662 = vmatmul.mubr.msk.bf16.gmra.mrb[44].mxu1 %vm545_vm1, %v7828_v47 }
  0x70   : > { %6926 = vmatmul.mubr.msk.bf16.gmra.mrb[44].mxu0 %vm545_vm1, %v2188_v49  ;;  %6665 = vmatprep.mubr.msk.bf16.mxu1 %vm545_vm1, %v7830_v50  ;;  %v6015_v49 = vld [vmem:[%s7607_s26 + $0x298] sm:$0xff] }
  0x71   : > { %6929 = vmatprep.mubr.msk.bf16.mxu0 %vm545_vm1, %v2189_v52  ;;  %v404_v52 = vld [vmem:[%s7607_s26 + $0x281] sm:$0xff]  ;;  %v2196_v59 = vpack.c.bf16 %v6015_v49, %v6014_v45  ;;  %v415_v45 = vld [vmem:[%s7607_s26 + $0x2e9] sm:$0xff] }
  0x72   : > { %v7902_v61 = vpack.c.bf16 %v405_v54, %v404_v52  ;;  %v6026_v49 = vld [vmem:[%s7607_s26 + $0x308] sm:$0xff]  ;;  %v6027_v52 = vld [vmem:[%s7607_s26 + $0x310] sm:$0xff]  ;;  %v416_v54 = vld [vmem:[%s7607_s26 + $0x2f9] sm:$0xff] }
  0x77   : > { %6666 = vmatmul.mubr.msk.bf16.gmra.mrb[48].mxu1 %vm545_vm1, %v7846_v0 }
  0x78   : > { %6930 = vmatmul.mubr.msk.bf16.gmra.mrb[48].mxu0 %vm545_vm1, %v2190_v2  ;;  %6669 = vmatprep.mubr.msk.bf16.mxu1 %vm545_vm1, %v7848_v4  ;;  %v407_v2 = vld [vmem:[%s7607_s26 + $0x299] sm:$0xff] }
  0x79   : > { %6933 = vmatprep.mubr.msk.bf16.mxu0 %vm545_vm1, %v2191_v5  ;;  %v6018_v5 = vld [vmem:[%s7607_s26 + $0x2b8] sm:$0xff]  ;;  %v7918_v13 = vpack.c.bf16 %v407_v2, %v406_v63  ;;  %v2202_v63 = vpack.c.bf16 %v6027_v52, %v6026_v49  ;;  %v7956_v2 = vpack.c.bf16 %v417_v55, %v416_v54 }
  0x7a   : > { %v2198_v14 = vpack.c.bf16 %v6019_v7, %v6018_v5  ;;  %v418_v7 = vld [vmem:[%s7607_s26 + $0x309] sm:$0xff]  ;;  %v6037_v49 = vld [vmem:[%s7607_s26 + $0x378] sm:$0xff] }
  0x7f   : > { %6670 = vmatmul.mubr.msk.bf16.gmra.mrb[52].mxu1 %vm545_vm1, %v7864_v19 }
  0x80   : > { %6934 = vmatmul.mubr.msk.bf16.gmra.mrb[52].mxu0 %vm545_vm1, %v2192_v21  ;;  %6673 = vmatprep.mubr.msk.bf16.mxu1 %vm545_vm1, %v7866_v22  ;;  %v2199_v21 = vpack.c.bf16 %v6021_v12, %v6020_v11  ;;  %v6031_v11 = vld [vmem:[%s7607_s26 + $0x338] sm:$0xff]  ;;  %v420_v12 = vld [vmem:[%s7607_s26 + $0x321] sm:$0xff] }
  0x81   : > { %6937 = vmatprep.mubr.msk.bf16.mxu0 %vm545_vm1, %v2193_v23  ;;  %v410_v23 = vld [vmem:[%s7607_s26 + $0x2b9] sm:$0xff] }
  0x82   : > { %v7936_v35 = vpack.c.bf16 %v411_v25, %v410_v23  ;;  %v6033_v23 = vld [vmem:[%s7607_s26 + $0x350] sm:$0xff]  ;;  %v7972_v25 = vpack.c.bf16 %v419_v9, %v418_v7  ;;  %v6039_v7 = vld [vmem:[%s7607_s26 + $0x388] sm:$0xff] }
  0x83   : > { %v428_v9 = vld [vmem:[%s7607_s26 + $0x371] sm:$0xff] }
  0x87   : > { %6674 = vmatmul.mubr.msk.bf16.gmra.mrb[56].mxu1 %vm545_vm1, %v7882_v38 }
  0x88   : > { %6938 = vmatmul.mubr.msk.bf16.gmra.mrb[56].mxu0 %vm545_vm1, %v2194_v40  ;;  %6677 = vmatprep.mubr.msk.bf16.mxu1 %vm545_vm1, %v7884_v41  ;;  %v2200_v40 = vpack.c.bf16 %v6023_v27, %v6022_v26  ;;  %v2204_v26 = vpack.c.bf16 %v6031_v11, %v6030_v10  ;;  %v429_v10 = vld [vmem:[%s7607_s26 + $0x379] sm:$0xff] }
  0x89   : > { %6941 = vmatprep.mubr.msk.bf16.mxu0 %vm545_vm1, %v2195_v42  ;;  %v7938_v42 = vpack.c.bf16 %v413_v29, %v412_v28  ;;  %v422_v29 = vld [vmem:[%s7607_s26 + $0x331] sm:$0xff] }
  0x8a   : > { %v7990_v52 = vpack.c.bf16 %v423_v31, %v422_v29  ;;  %v6040_v11 = vld [vmem:[%s7607_s26 + $0x398] sm:$0xff]  ;;  %v431_v29 = vld [vmem:[%s7607_s26 + $0x389] sm:$0xff] }
  0x8b   : > { %v6042_v31 = vld [vmem:[%s7607_s26 + $0x3a8] sm:$0xff] }
  0x8f   : > { %6678 = vmatmul.mubr.msk.bf16.gmra.mrb[60].mxu1 %vm545_vm1, %v7900_v57 }
  0x90   : > { %6942 = vmatmul.mubr.msk.bf16.gmra.mrb[60].mxu0 %vm545_vm1, %v2196_v59  ;;  %6681 = vmatprep.mubr.msk.bf16.mxu1 %vm545_vm1, %v7902_v61  ;;  %v6029_v59 = vld [vmem:[%s7607_s26 + $0x328] sm:$0xff] }
  0x91   : > { %6945 = vmatprep.mubr.msk.bf16.mxu0 %vm545_vm1, %v2197_v62  ;;  %v7954_v62 = vpack.c.bf16 %v415_v45, %v414_v44  ;;  %v2203_v5 = vpack.c.bf16 %v6029_v59, %v6028_v56  ;;  %v425_v44 = vld [vmem:[%s7607_s26 + $0x351] sm:$0xff]  ;;  %v426_v59 = vld [vmem:[%s7607_s26 + $0x359] sm:$0xff] }
  0x92   : > { %v6036_v45 = vld [vmem:[%s7607_s26 + $0x370] sm:$0xff] }
  0x93   : > { %v2207_v56 = vpack.c.bf16 %v6037_v49, %v6036_v45  ;;  %v6045_v45 = vld [vmem:[%s7607_s26 + $0x3c8] sm:$0xff] }
  0x97   : > { %6682 = vmatmul.mubr.msk.bf16.gmra.mrb[64].mxu1 %vm545_vm1, %v7918_v13 }
  0x98   : > { %6946 = vmatmul.mubr.msk.bf16.gmra.mrb[64].mxu0 %vm545_vm1, %v2198_v14  ;;  %6685 = vmatprep.mubr.msk.bf16.mxu1 %vm545_vm1, %v7920_v16  ;;  %v421_v14 = vld [vmem:[%s7607_s26 + $0x329] sm:$0xff] }
  0x99   : > { %6949 = vmatprep.mubr.msk.bf16.mxu0 %vm545_vm1, %v2199_v21  ;;  %v6032_v21 = vld [vmem:[%s7607_s26 + $0x348] sm:$0xff]  ;;  %v7974_v27 = vpack.c.bf16 %v421_v14, %v420_v12  ;;  %v6041_v12 = vld [vmem:[%s7607_s26 + $0x3a0] sm:$0xff] }
  0x9a   : > { %v2205_v28 = vpack.c.bf16 %v6033_v23, %v6032_v21  ;;  %v8010_v23 = vpack.c.bf16 %v429_v10, %v428_v9  ;;  %v6047_v9 = vld [vmem:[%s7607_s26 + $0x3d8] sm:$0xff]  ;;  %v436_v10 = vld [vmem:[%s7607_s26 + $0x3c1] sm:$0xff] }
  0x9f   : > { %6686 = vmatmul.mubr.msk.bf16.gmra.mrb[68].mxu1 %vm545_vm1, %v7936_v35 }
  0xa0   : > { %6950 = vmatmul.mubr.msk.bf16.gmra.mrb[68].mxu0 %vm545_vm1, %v2200_v40  ;;  %6689 = vmatprep.mubr.msk.bf16.mxu1 %vm545_vm1, %v7938_v42  ;;  %v6035_v40 = vld [vmem:[%s7607_s26 + $0x360] sm:$0xff] }
  0xa1   : > { %6953 = vmatprep.mubr.msk.bf16.mxu0 %vm545_vm1, %v2201_v43  ;;  %v424_v43 = vld [vmem:[%s7607_s26 + $0x349] sm:$0xff]  ;;  %v2206_v54 = vpack.c.bf16 %v6035_v40, %v6034_v33  ;;  %v432_v40 = vld [vmem:[%s7607_s26 + $0x399] sm:$0xff] }
  0xa2   : > { %v7992_v55 = vpack.c.bf16 %v425_v44, %v424_v43  ;;  %v6043_v33 = vld [vmem:[%s7607_s26 + $0x3b0] sm:$0xff]  ;;  %v433_v43 = vld [vmem:[%s7607_s26 + $0x3a1] sm:$0xff] }
  0xa3   : > { %v6044_v44 = vld [vmem:[%s7607_s26 + $0x3c0] sm:$0xff] }
  0xa7   : > { %6690 = vmatmul.mubr.msk.bf16.gmra.mrb[72].mxu1 %vm545_vm1, %v7954_v62 }
  0xa8   : > { %6954 = vmatmul.mubr.msk.bf16.gmra.mrb[72].mxu0 %vm545_vm1, %v2202_v63  ;;  %6693 = vmatprep.mubr.msk.bf16.mxu1 %vm545_vm1, %v7956_v2  ;;  %v427_v63 = vld [vmem:[%s7607_s26 + $0x361] sm:$0xff] }
  0xa9   : > { %6957 = vmatprep.mubr.msk.bf16.mxu0 %vm545_vm1, %v2203_v5  ;;  %v6038_v5 = vld [vmem:[%s7607_s26 + $0x380] sm:$0xff]  ;;  %v8008_v14 = vpack.c.bf16 %v427_v63, %v426_v59  ;;  %v2211_v59 = vpack.c.bf16 %v6045_v45, %v6044_v44  ;;  %v434_v63 = vld [vmem:[%s7607_s26 + $0x3a9] sm:$0xff] }
  0xaa   : > { %v2208_v21 = vpack.c.bf16 %v6039_v7, %v6038_v5  ;;  %v435_v5 = vld [vmem:[%s7607_s26 + $0x3b1] sm:$0xff]  ;;  %v6051_v44 = vld [vmem:[%s7607_s26 + $0x400] sm:$0xff]  ;;  %v440_v45 = vld [vmem:[%s7607_s26 + $0x3e9] sm:$0xff] }
  0xab   : > { %v6046_v7 = vld [vmem:[%s7607_s26 + $0x3d0] sm:$0xff] }
  0xaf   : > { %6694 = vmatmul.mubr.msk.bf16.gmra.mrb[76].mxu1 %vm545_vm1, %v7972_v25 }
  0xb0   : > { %6958 = vmatmul.mubr.msk.bf16.gmra.mrb[76].mxu0 %vm545_vm1, %v2204_v26  ;;  %6697 = vmatprep.mubr.msk.bf16.mxu1 %vm545_vm1, %v7974_v27  ;;  %v2209_v26 = vpack.c.bf16 %v6041_v12, %v6040_v11  ;;  %v437_v11 = vld [vmem:[%s7607_s26 + $0x3c9] sm:$0xff] }
  0xb1   : > { %6961 = vmatprep.mubr.msk.bf16.mxu0 %vm545_vm1, %v2205_v28  ;;  %v430_v28 = vld [vmem:[%s7607_s26 + $0x381] sm:$0xff] }
  0xb2   : > { %v8026_v49 = vpack.c.bf16 %v431_v29, %v430_v28  ;;  %v6048_v12 = vld [vmem:[%s7607_s26 + $0x3e8] sm:$0xff]  ;;  %v2212_v28 = vpack.c.bf16 %v6047_v9, %v6046_v7  ;;  %v8046_v29 = vpack.c.bf16 %v437_v11, %v436_v10  ;;  %v442_v11 = vld [vmem:[%s7607_s26 + $0x3f9] sm:$0xff] }
  0xb7   : > { %6698 = vmatmul.mubr.msk.bf16.gmra.mrb[80].mxu1 %vm545_vm1, %v7990_v52 }
  0xb8   : > { %6962 = vmatmul.mubr.msk.bf16.gmra.mrb[80].mxu0 %vm545_vm1, %v2206_v54  ;;  %6701 = vmatprep.mubr.msk.bf16.mxu1 %vm545_vm1, %v7992_v55  ;;  %v2210_v54 = vpack.c.bf16 %v6043_v33, %v6042_v31  ;;  %v438_v33 = vld [vmem:[%s7607_s26 + $0x3d1] sm:$0xff] }
  0xb9   : > { %6965 = vmatprep.mubr.msk.bf16.mxu0 %vm545_vm1, %v2207_v56  ;;  %v8028_v56 = vpack.c.bf16 %v433_v43, %v432_v40  ;;  %v439_v40 = vld [vmem:[%s7607_s26 + $0x3d9] sm:$0xff] }
  0xba   : > { %v6050_v43 = vld [vmem:[%s7607_s26 + $0x3f8] sm:$0xff] }
  0xbb   : > { %v2214_v7 = vpack.c.bf16 %v6051_v44, %v6050_v43  ;;  %v6057_v43 = vld [vmem:[%s7607_s26 + $0x440] sm:$0xff] }
  0xbf   : > { %6702 = vmatmul.mubr.msk.bf16.gmra.mrb[84].mxu1 %vm545_vm1, %v8008_v14 }
  0xc0   : > { %6966 = vmatmul.mubr.msk.bf16.gmra.mrb[84].mxu0 %vm545_vm1, %v2208_v21  ;;  %6705 = vmatprep.mubr.msk.bf16.mxu1 %vm545_vm1, %v8010_v23  ;;  %v6049_v21 = vld [vmem:[%s7607_s26 + $0x3f0] sm:$0xff] }
  0xc1   : > { %6969 = vmatprep.mubr.msk.bf16.mxu0 %vm545_vm1, %v2209_v26  ;;  %v8044_v26 = vpack.c.bf16 %v435_v5, %v434_v63  ;;  %v2213_v31 = vpack.c.bf16 %v6049_v21, %v6048_v12  ;;  %v6053_v63 = vld [vmem:[%s7607_s26 + $0x418] sm:$0xff]  ;;  %v8062_v5 = vpack.c.bf16 %v439_v40, %v438_v33  ;;  %v443_v12 = vld [vmem:[%s7607_s26 + $0x401] sm:$0xff] }
  0xc2   : > { %v6054_v21 = vld [vmem:[%s7607_s26 + $0x420] sm:$0xff]  ;;  %v6056_v40 = vld [vmem:[%s7607_s26 + $0x438] sm:$0xff]  ;;  %v8080_v44 = vpack.c.bf16 %v443_v12, %v442_v11  ;;  %v6059_v11 = vld [vmem:[%s7607_s26 + $0x450] sm:$0xff] }
  0xc3   : > { %v445_v33 = vld [vmem:[%s7607_s26 + $0x419] sm:$0xff] }
  0xc4   : > { %9902 = vst [vmem:[#allocation3_spill] sm:$0xff] %v8080_v44  ;;  %v448_v12 = vld [vmem:[%s7607_s26 + $0x439] sm:$0xff] }
  0xc7   : > { %6706 = vmatmul.mubr.msk.bf16.gmra.mrb[88].mxu1 %vm545_vm1, %v8026_v49 }
  0xc8   : > { %6970 = vmatmul.mubr.msk.bf16.gmra.mrb[88].mxu0 %vm545_vm1, %v2210_v54  ;;  %6709 = vmatprep.mubr.msk.bf16.mxu1 %vm545_vm1, %v8028_v56  ;;  %v441_v54 = vld [vmem:[%s7607_s26 + $0x3f1] sm:$0xff] }
  0xc9   : > { %6973 = vmatprep.mubr.msk.bf16.mxu0 %vm545_vm1, %v2211_v59  ;;  %v6052_v59 = vld [vmem:[%s7607_s26 + $0x410] sm:$0xff]  ;;  %v8064_v9 = vpack.c.bf16 %v441_v54, %v440_v45 }
  0xca   : > { %v2215_v10 = vpack.c.bf16 %v6053_v63, %v6052_v59  ;;  %v2217_v59 = vpack.c.bf16 %v6057_v43, %v6056_v40  ;;  %v446_v63 = vld [vmem:[%s7607_s26 + $0x421] sm:$0xff] }
  0xcb   : > { %9901 = vst [vmem:[#allocation2_spill] sm:$0xff] %v8064_v9 }
  0xcf   : > { %6710 = vmatmul.mubr.msk.bf16.gmra.mrb[92].mxu1 %vm545_vm1, %v8044_v26 }
  0xd0   : > { %6974 = vmatmul.mubr.msk.bf16.gmra.mrb[92].mxu0 %vm545_vm1, %v2212_v28  ;;  %6713 = vmatprep.mubr.msk.bf16.mxu1 %vm545_vm1, %v8046_v29  ;;  %v6055_v28 = vld [vmem:[%s7607_s26 + $0x428] sm:$0xff] }
  0xd1   : > { %6977 = vmatprep.mubr.msk.bf16.mxu0 %vm545_vm1, %v2213_v31  ;;  %v444_v31 = vld [vmem:[%s7607_s26 + $0x411] sm:$0xff]  ;;  %v2216_v45 = vpack.c.bf16 %v6055_v28, %v6054_v21  ;;  %v449_v21 = vld [vmem:[%s7607_s26 + $0x441] sm:$0xff] }
  0xd2   : > { %v8082_v54 = vpack.c.bf16 %v445_v33, %v444_v31  ;;  %v6060_v28 = vld [vmem:[%s7607_s26 + $0x460] sm:$0xff]  ;;  %v6061_v31 = vld [vmem:[%s7607_s26 + $0x468] sm:$0xff]  ;;  %v8100_v43 = vpack.c.bf16 %v449_v21, %v448_v12  ;;  %v6065_v12 = vld [vmem:[%s7607_s26 + $0x490] sm:$0xff] }
  0xd4   : > { %9903 = vst [vmem:[#allocation4_spill] sm:$0xff] %v8082_v54  ;;  %9905 = vst [vmem:[#allocation6_spill] sm:$0xff] %v8100_v43 }
  0xd7   : > { %6714 = vmatmul.mubr.msk.bf16.gmra.mrb[96].mxu1 %vm545_vm1, %v8062_v5 }
  0xd8   : > { %6978 = vmatmul.mubr.msk.bf16.gmra.mrb[96].mxu0 %vm545_vm1, %v2214_v7  ;;  %6717 = vmatprep.mubr.msk.bf16.mxu1 %vm545_vm1, %v8064_v9  ;;  %v447_v7 = vld [vmem:[%s7607_s26 + $0x429] sm:$0xff] }
  0xd9   : > { %6981 = vmatprep.mubr.msk.bf16.mxu0 %vm545_vm1, %v2215_v10  ;;  %v6058_v10 = vld [vmem:[%s7607_s26 + $0x448] sm:$0xff]  ;;  %v8098_v33 = vpack.c.bf16 %v447_v7, %v446_v63  ;;  %v6063_v63 = vld [vmem:[%s7607_s26 + $0x478] sm:$0xff] }
  0xda   : > { %v2218_v40 = vpack.c.bf16 %v6059_v11, %v6058_v10  ;;  %v452_v7 = vld [vmem:[%s7607_s26 + $0x461] sm:$0xff]  ;;  %v453_v10 = vld [vmem:[%s7607_s26 + $0x469] sm:$0xff] }
  0xdb   : > { %9904 = vst [vmem:[#allocation5_spill] sm:$0xff] %v8098_v33  ;;  %v6064_v11 = vld [vmem:[%s7607_s26 + $0x488] sm:$0xff] }
  0xdc   : > { %v6071_v9 = vld [vmem:[%s7607_s26 + $0x4c8] sm:$0xff] }
  0xdf   : > { %6718 = vmatmul.mubr.msk.bf16.gmra.mrb[100].mxu1 %vm545_vm1, %v8080_v44  ;;  %v6062_v44 = vld [vmem:[%s7607_s26 + $0x470] sm:$0xff] }
  0xe0   : > { %6982 = vmatmul.mubr.msk.bf16.gmra.mrb[100].mxu0 %vm545_vm1, %v2216_v45  ;;  %6721 = vmatprep.mubr.msk.bf16.mxu1 %vm545_vm1, %v8082_v54  ;;  %v2219_v45 = vpack.c.bf16 %v6061_v31, %v6060_v28  ;;  %v451_v54 = vld [vmem:[%s7607_s26 + $0x451] sm:$0xff]  ;;  %v2220_v28 = vpack.c.bf16 %v6063_v63, %v6062_v44  ;;  %v524_v31 = vpack.c.bf16 %v453_v10, %v452_v7  ;;  %v456_v44 = vld [vmem:[%s7607_s26 + $0x489] sm:$0xff] }
  0xe1   : > { %6985 = vmatprep.mubr.msk.bf16.mxu0 %vm545_vm1, %v2217_v59  ;;  %v450_v59 = vld [vmem:[%s7607_s26 + $0x449] sm:$0xff]  ;;  %v6069_v7 = vld [vmem:[%s7607_s26 + $0x4b8] sm:$0xff] }
  0xe2   : > { %v8116_v21 = vpack.c.bf16 %v451_v54, %v450_v59  ;;  %v6067_v54 = vld [vmem:[%s7607_s26 + $0x4a0] sm:$0xff]  ;;  %v457_v59 = vld [vmem:[%s7607_s26 + $0x491] sm:$0xff] }
  0xe3   : > { %v6068_v63 = vld [vmem:[%s7607_s26 + $0x4b0] sm:$0xff] }
  0xe4   : > { %9906 = vst [vmem:[#allocation7_spill] sm:$0xff] %v8116_v21 }
  0xe7   : > { %6722 = vmatmul.mubr.msk.bf16.gmra.mrb[104].mxu1 %vm545_vm1, %v8098_v33  ;;  %v6066_v33 = vld [vmem:[%s7607_s26 + $0x498] sm:$0xff] }
  0xe8   : > { %6986 = vmatmul.mubr.msk.bf16.gmra.mrb[104].mxu0 %vm545_vm1, %v2218_v40  ;;  %6725 = vmatprep.mubr.msk.bf16.mxu1 %vm545_vm1, %v8100_v43  ;;  %v2221_v40 = vpack.c.bf16 %v6065_v12, %v6064_v11  ;;  %v455_v43 = vld [vmem:[%s7607_s26 + $0x479] sm:$0xff]  ;;  %v2222_v11 = vpack.c.bf16 %v6067_v54, %v6066_v33  ;;  %v526_v12 = vpack.c.bf16 %v457_v59, %v456_v44 }
  0xe9   : > { %6989 = vmatprep.mubr.msk.bf16.mxu0 %vm545_vm1, %v2219_v45  ;;  %v454_v45 = vld [vmem:[%s7607_s26 + $0x471] sm:$0xff]  ;;  %v461_v33 = vld [vmem:[%s7607_s26 + $0x4b9] sm:$0xff] }
  0xea   : > { %v525_v10 = vpack.c.bf16 %v455_v43, %v454_v45  ;;  %v460_v43 = vld [vmem:[%s7607_s26 + $0x4b1] sm:$0xff]  ;;  %v6073_v54 = vld [vmem:[%s7607_s26 + $0x4e0] sm:$0xff] }
  0xeb   : > { %v6072_v45 = vld [vmem:[%s7607_s26 + $0x4d8] sm:$0xff] }
  0xef   : > { %6726 = vmatmul.mubr.msk.bf16.gmra.mrb[108].mxu1 %vm545_vm1, %v8116_v21  ;;  %v6070_v21 = vld [vmem:[%s7607_s26 + $0x4c0] sm:$0xff] }
  0xf0   : > { %6990 = vmatmul.mubr.msk.bf16.gmra.mrb[108].mxu0 %vm545_vm1, %v2220_v28  ;;  %6729 = vmatprep.mubr.msk.bf16.mxu1 %vm545_vm1, %v524_v31  ;;  %v2223_v28 = vpack.c.bf16 %v6069_v7, %v6068_v63  ;;  %v458_v31 = vld [vmem:[%s7607_s26 + $0x499] sm:$0xff]  ;;  %v2224_v59 = vpack.c.bf16 %v6071_v9, %v6070_v21  ;;  %v528_v63 = vpack.c.bf16 %v461_v33, %v460_v43  ;;  %v465_v9 = vld [vmem:[%s7607_s26 + $0x4e1] sm:$0xff] }
  0xf1   : > { %6993 = vmatprep.mubr.msk.bf16.mxu0 %vm545_vm1, %v2221_v40  ;;  %v459_v40 = vld [vmem:[%s7607_s26 + $0x4a1] sm:$0xff]  ;;  %v2225_v7 = vpack.c.bf16 %v6073_v54, %v6072_v45 }
  0xf2   : > { %v527_v44 = vpack.c.bf16 %v459_v40, %v458_v31  ;;  %v464_v31 = vld [vmem:[%s7607_s26 + $0x4d9] sm:$0xff]  ;;  %v6077_v40 = vld [vmem:[%s7607_s26 + $0x508] sm:$0xff] }
  0xf3   : > { %v6076_v21 = vld [vmem:[%s7607_s26 + $0x500] sm:$0xff]  ;;  %v530_v45 = vpack.c.bf16 %v465_v9, %v464_v31  ;;  %v147_v9 = vld [vmem:[%s7607_s26 + $0x10] sm:$0xff] }
  0xf4   : > { %v2227_v54 = vpack.c.bf16 %v6077_v40, %v6076_v21  ;;  %v148_v21 = vld [vmem:[%s7607_s26 + $0x18] sm:$0xff]  ;;  %v149_v40 = vld [vmem:[%s7607_s26 + $0x28] sm:$0xff] }
  0xf7   : > { %6730 = vmatmul.mubr.msk.bf16.gmra.mrb[112].mxu1 %vm545_vm1, %v525_v10  ;;  %v462_v10 = vld [vmem:[%s7607_s26 + $0x4c1] sm:$0xff] }
  0xf8   : > { %6994 = vmatmul.mubr.msk.bf16.gmra.mrb[112].mxu0 %vm545_vm1, %v2222_v11  ;;  %6733 = vmatprep.mubr.msk.bf16.mxu1 %vm545_vm1, %v526_v12  ;;  %v463_v11 = vld [vmem:[%s7607_s26 + $0x4c9] sm:$0xff] }
  0xf9   : > { %6997 = vmatprep.mubr.msk.bf16.mxu0 %vm545_vm1, %v2223_v28  ;;  %v6074_v12 = vld [vmem:[%s7607_s26 + $0x4e8] sm:$0xff]  ;;  %v6075_v28 = vld [vmem:[%s7607_s26 + $0x4f0] sm:$0xff]  ;;  %v529_v43 = vpack.c.bf16 %v463_v11, %v462_v10  ;;  %v145_v10 = vld [vmem:[%s7607_s26] sm:$0xff] }
  0xfa   : > { %v2226_v33 = vpack.c.bf16 %v6075_v28, %v6074_v12  ;;  %v146_v11 = vld [vmem:[%s7607_s26 + $0x8] sm:$0xff] }
  0xfb   : > { %v273_v31 = vpack.c.bf16 %v146_v11, %v145_v10  ;;  %v156_v10 = vld [vmem:[%s7607_s26 + $0x68] sm:$0xff]  ;;  %v158_v11 = vld [vmem:[%s7607_s26 + $0x80] sm:$0xff] }
  0xff   : > { %6734 = vmatmul.mubr.msk.bf16.gmra.mrb[116].mxu1 %vm545_vm1, %v527_v44  ;;  %v466_v44 = vld [vmem:[%s7607_s26 + $0x4e9] sm:$0xff] }
 0x100   : > { %6998 = vmatmul.mubr.msk.bf16.gmra.mrb[116].mxu0 %vm545_vm1, %v2224_v59  ;;  %6737 = vmatprep.mubr.msk.bf16.mxu1 %vm545_vm1, %v528_v63  ;;  %v467_v59 = vld [vmem:[%s7607_s26 + $0x4f1] sm:$0xff] }
 0x101   : > { %7001 = vmatprep.mubr.msk.bf16.mxu0 %vm545_vm1, %v2225_v7  ;;  %v6078_v63 = vld [vmem:[%s7607_s26 + $0x510] sm:$0xff]  ;;  %v6079_v7 = vld [vmem:[%s7607_s26 + $0x518] sm:$0xff]  ;;  %v531_v12 = vpack.c.bf16 %v467_v59, %v466_v44  ;;  %v152_v44 = vld [vmem:[%s7607_s26 + $0x40] sm:$0xff] }
 0x102   : > { %v2228_v28 = vpack.c.bf16 %v6079_v7, %v6078_v63  ;;  %v154_v59 = vld [vmem:[%s7607_s26 + $0x58] sm:$0xff] }
 0x107   : > { %6738 = vmatmul.mubr.msk.bf16.gmra.mrb[120].mxu1 %vm545_vm1, %v529_v43  ;;  %v150_v43 = vld [vmem:[%s7607_s26 + $0x30] sm:$0xff] }
 0x108   : > { %7002 = vmatmul.mubr.msk.bf16.gmra.mrb[120].mxu0 %vm545_vm1, %v2226_v33  ;;  %6741 = vmatprep.mubr.msk.bf16.mxu1 %vm545_vm1, %v530_v45  ;;  %v274_v33 = vpack.c.bf16 %v148_v21, %v147_v9  ;;  %v275_v45 = vpack.c.bf16 %v150_v43, %v149_v40  ;;  %v162_v9 = vld [vmem:[%s7607_s26 + $0xa8] sm:$0xff]  ;;  %v164_v43 = vld [vmem:[%s7607_s26 + $0xb8] sm:$0xff] }
 0x109   : > { %7005 = vmatprep.mubr.msk.bf16.mxu0 %vm545_vm1, %v2227_v54  ;;  %v151_v54 = vld [vmem:[%s7607_s26 + $0x38] sm:$0xff] }
 0x10a   : > { %v276_v63 = vpack.c.bf16 %v152_v44, %v151_v54  ;;  %v168_v44 = vld [vmem:[%s7607_s26 + $0xe0] sm:$0xff] }
 0x10f   : > { %6742 = vmatmul.mubr.msk.bf16.gmra.mrb[124].mxu1 %vm545_vm1, %v531_v12 }
 0x110   : > { %7006 = vmatmul.mubr.msk.bf16.gmra.mrb[124].mxu0 %vm545_vm1, %v2228_v28  ;;  %6749 = vmatprep.mubr.msk.bf16.mxu1 %vm545_vm1, %v273_v31  ;;  %v160_v31 = vld [vmem:[%s7607_s26 + $0x90] sm:$0xff] }
 0x111   : > { %7013 = vmatprep.mubr.msk.bf16.mxu0 %vm545_vm1, %v7624_v24  ;;  %v153_v24 = vld [vmem:[%s7607_s26 + $0x50] sm:$0xff] }
 0x112   : > { %v277_v7 = vpack.c.bf16 %v154_v59, %v153_v24  ;;  %v170_v24 = vld [vmem:[%s7607_s26 + $0xf8] sm:$0xff] }
 0x117   : > { %6750 = vmatmul.mubr.msk.bf16.vlgmr.msra.gmra.mrb[0].mxu1 %vm545_vm1, %v274_v33  ;;  %v166_v33 = vld [vmem:[%s7607_s26 + $0xd0] sm:$0xff] }
 0x118   : > { %7014 = vmatmul.mubr.msk.bf16.vlgmr.msra.gmra.mrb[0].mxu0 %vm545_vm1, %v7638_v34  ;;  %6753 = vmatprep.mubr.msk.bf16.mxu1 %vm545_vm1, %v275_v45  ;;  %v155_v34 = vld [vmem:[%s7607_s26 + $0x60] sm:$0xff] }
 0x119   : > { %7017 = vmatprep.mubr.msk.bf16.mxu0 %vm545_vm1, %v7640_v36  ;;  %v157_v36 = vld [vmem:[%s7607_s26 + $0x78] sm:$0xff]  ;;  %v278_v12 = vpack.c.bf16 %v156_v10, %v155_v34  ;;  %v174_v34 = vld [vmem:[%s7607_s26 + $0x120] sm:$0xff] }
 0x11a   : > { %v279_v28 = vpack.c.bf16 %v158_v11, %v157_v36  ;;  %v176_v11 = vld [vmem:[%s7607_s26 + $0x130] sm:$0xff] }
 0x11f   : > { %6754 = vmatmul.mubr.msk.bf16.gmra.mrb[4].mxu1 %vm545_vm1, %v276_v63 }
 0x120   : > { %7018 = vmatmul.mubr.msk.bf16.gmra.mrb[4].mxu0 %vm545_vm1, %v7656_v46  ;;  %6757 = vmatprep.mubr.msk.bf16.mxu1 %vm545_vm1, %v277_v7  ;;  %v159_v46 = vld [vmem:[%s7607_s26 + $0x88] sm:$0xff] }
 0x121   : > { %7021 = vmatprep.mubr.msk.bf16.mxu0 %vm545_vm1, %v7658_v48  ;;  %v161_v48 = vld [vmem:[%s7607_s26 + $0xa0] sm:$0xff]  ;;  %v280_v21 = vpack.c.bf16 %v160_v31, %v159_v46  ;;  %v172_v7 = vld [vmem:[%s7607_s26 + $0x108] sm:$0xff]  ;;  %v180_v31 = vld [vmem:[%s7607_s26 + $0x158] sm:$0xff] }
 0x122   : > { %v281_v40 = vpack.c.bf16 %v162_v9, %v161_v48  ;;  %v182_v48 = vld [vmem:[%s7607_s26 + $0x170] sm:$0xff] }
 0x127   : > { %6758 = vmatmul.mubr.msk.bf16.gmra.mrb[8].mxu1 %vm545_vm1, %v278_v12  ;;  %v178_v12 = vld [vmem:[%s7607_s26 + $0x148] sm:$0xff] }
 0x128   : > { %7022 = vmatmul.mubr.msk.bf16.gmra.mrb[8].mxu0 %vm545_vm1, %v7674_v58  ;;  %6761 = vmatprep.mubr.msk.bf16.mxu1 %vm545_vm1, %v279_v28  ;;  %v163_v58 = vld [vmem:[%s7607_s26 + $0xb0] sm:$0xff] }
 0x129   : > { %7025 = vmatprep.mubr.msk.bf16.mxu0 %vm545_vm1, %v7676_v60  ;;  %v165_v60 = vld [vmem:[%s7607_s26 + $0xc8] sm:$0xff]  ;;  %v282_v45 = vpack.c.bf16 %v164_v43, %v163_v58  ;;  %v186_v58 = vld [vmem:[%s7607_s26 + $0x198] sm:$0xff] }
 0x12a   : > { %v283_v54 = vpack.c.bf16 %v166_v33, %v165_v60  ;;  %v188_v33 = vld [vmem:[%s7607_s26 + $0x1a8] sm:$0xff] }
 0x12f   : > { %6762 = vmatmul.mubr.msk.bf16.gmra.mrb[12].mxu1 %vm545_vm1, %v280_v21 }
 0x130   : > { %7026 = vmatmul.mubr.msk.bf16.gmra.mrb[12].mxu0 %vm545_vm1, %v7692_v6  ;;  %6765 = vmatprep.mubr.msk.bf16.mxu1 %vm545_vm1, %v281_v40  ;;  %v167_v6 = vld [vmem:[%s7607_s26 + $0xd8] sm:$0xff]  ;;  %v184_v40 = vld [vmem:[%s7607_s26 + $0x180] sm:$0xff] }
 0x131   : > { %7029 = vmatprep.mubr.msk.bf16.mxu0 %vm545_vm1, %v7694_v8  ;;  %v169_v8 = vld [vmem:[%s7607_s26 + $0xf0] sm:$0xff]  ;;  %v284_v59 = vpack.c.bf16 %v168_v44, %v167_v6 }
 0x132   : > { %v285_v63 = vpack.c.bf16 %v170_v24, %v169_v8  ;;  %v192_v44 = vld [vmem:[%s7607_s26 + $0x1d0] sm:$0xff]  ;;  %v194_v8 = vld [vmem:[%s7607_s26 + $0x1e8] sm:$0xff] }
 0x137   : > { %6766 = vmatmul.mubr.msk.bf16.gmra.mrb[16].mxu1 %vm545_vm1, %v282_v45  ;;  %v190_v45 = vld [vmem:[%s7607_s26 + $0x1c0] sm:$0xff] }
 0x138   : > { %7030 = vmatmul.mubr.msk.bf16.gmra.mrb[16].mxu0 %vm545_vm1, %v7710_v18  ;;  %6769 = vmatprep.mubr.msk.bf16.mxu1 %vm545_vm1, %v283_v54  ;;  %v171_v18 = vld [vmem:[%s7607_s26 + $0x100] sm:$0xff] }
 0x139   : > { %7033 = vmatprep.mubr.msk.bf16.mxu0 %vm545_vm1, %v7712_v20  ;;  %v173_v20 = vld [vmem:[%s7607_s26 + $0x118] sm:$0xff]  ;;  %v286_v10 = vpack.c.bf16 %v172_v7, %v171_v18  ;;  %v198_v18 = vld [vmem:[%s7607_s26 + $0x210] sm:$0xff] }
 0x13a   : > { %v287_v36 = vpack.c.bf16 %v174_v34, %v173_v20  ;;  %v200_v34 = vld [vmem:[%s7607_s26 + $0x220] sm:$0xff] }
 0x13f   : > { %6770 = vmatmul.mubr.msk.bf16.gmra.mrb[20].mxu1 %vm545_vm1, %v284_v59 }
 0x140   : > { %7034 = vmatmul.mubr.msk.bf16.gmra.mrb[20].mxu0 %vm545_vm1, %v7738_v37  ;;  %6773 = vmatprep.mubr.msk.bf16.mxu1 %vm545_vm1, %v285_v63  ;;  %v175_v37 = vld [vmem:[%s7607_s26 + $0x128] sm:$0xff]  ;;  %v196_v63 = vld [vmem:[%s7607_s26 + $0x1f8] sm:$0xff] }
 0x141   : > { %7037 = vmatprep.mubr.msk.bf16.mxu0 %vm545_vm1, %v7740_v39  ;;  %v177_v39 = vld [vmem:[%s7607_s26 + $0x140] sm:$0xff]  ;;  %v288_v28 = vpack.c.bf16 %v176_v11, %v175_v37  ;;  %v204_v11 = vld [vmem:[%s7607_s26 + $0x248] sm:$0xff] }
 0x142   : > { %v289_v46 = vpack.c.bf16 %v178_v12, %v177_v39  ;;  %v206_v39 = vld [vmem:[%s7607_s26 + $0x260] sm:$0xff] }
 0x147   : > { %6774 = vmatmul.mubr.msk.bf16.gmra.mrb[24].mxu1 %vm545_vm1, %v286_v10  ;;  %v202_v10 = vld [vmem:[%s7607_s26 + $0x238] sm:$0xff] }
 0x148   : > { %7038 = vmatmul.mubr.msk.bf16.gmra.mrb[24].mxu0 %vm545_vm1, %v7756_v51  ;;  %6777 = vmatprep.mubr.msk.bf16.mxu1 %vm545_vm1, %v287_v36  ;;  %v179_v51 = vld [vmem:[%s7607_s26 + $0x150] sm:$0xff] }
 0x149   : > { %7041 = vmatprep.mubr.msk.bf16.mxu0 %vm545_vm1, %v7758_v53  ;;  %v181_v53 = vld [vmem:[%s7607_s26 + $0x168] sm:$0xff]  ;;  %v290_v9 = vpack.c.bf16 %v180_v31, %v179_v51 }
 0x14a   : > { %v291_v21 = vpack.c.bf16 %v182_v48, %v181_v53  ;;  %v210_v51 = vld [vmem:[%s7607_s26 + $0x288] sm:$0xff]  ;;  %v212_v48 = vld [vmem:[%s7607_s26 + $0x298] sm:$0xff] }
 0x14f   : > { %6778 = vmatmul.mubr.msk.bf16.gmra.mrb[28].mxu1 %vm545_vm1, %v288_v28 }
 0x150   : > { %7042 = vmatmul.mubr.msk.bf16.gmra.mrb[28].mxu0 %vm545_vm1, %v7774_v1  ;;  %6781 = vmatprep.mubr.msk.bf16.mxu1 %vm545_vm1, %v289_v46  ;;  %v183_v1 = vld [vmem:[%s7607_s26 + $0x178] sm:$0xff]  ;;  %v208_v46 = vld [vmem:[%s7607_s26 + $0x270] sm:$0xff] }
 0x151   : > { %7045 = vmatprep.mubr.msk.bf16.mxu0 %vm545_vm1, %v7776_v3  ;;  %v185_v3 = vld [vmem:[%s7607_s26 + $0x190] sm:$0xff]  ;;  %v292_v43 = vpack.c.bf16 %v184_v40, %v183_v1  ;;  %v216_v40 = vld [vmem:[%s7607_s26 + $0x2c0] sm:$0xff] }
 0x152   : > { %v293_v60 = vpack.c.bf16 %v186_v58, %v185_v3  ;;  %v218_v3 = vld [vmem:[%s7607_s26 + $0x2d8] sm:$0xff] }
 0x157   : > { %6782 = vmatmul.mubr.msk.bf16.gmra.mrb[32].mxu1 %vm545_vm1, %v290_v9  ;;  %v214_v9 = vld [vmem:[%s7607_s26 + $0x2b0] sm:$0xff] }
 0x158   : > { %7046 = vmatmul.mubr.msk.bf16.gmra.mrb[32].mxu0 %vm545_vm1, %v7792_v15  ;;  %6785 = vmatprep.mubr.msk.bf16.mxu1 %vm545_vm1, %v291_v21  ;;  %v187_v15 = vld [vmem:[%s7607_s26 + $0x1a0] sm:$0xff] }
 0x159   : > { %7049 = vmatprep.mubr.msk.bf16.mxu0 %vm545_vm1, %v7794_v17  ;;  %v189_v17 = vld [vmem:[%s7607_s26 + $0x1b8] sm:$0xff]  ;;  %v294_v54 = vpack.c.bf16 %v188_v33, %v187_v15  ;;  %v222_v15 = vld [vmem:[%s7607_s26 + $0x300] sm:$0xff] }
 0x15a   : > { %v295_v6 = vpack.c.bf16 %v190_v45, %v189_v17  ;;  %v224_v45 = vld [vmem:[%s7607_s26 + $0x310] sm:$0xff] }
 0x15f   : > { %6786 = vmatmul.mubr.msk.bf16.gmra.mrb[36].mxu1 %vm545_vm1, %v292_v43 }
 0x160   : > { %7050 = vmatmul.mubr.msk.bf16.gmra.mrb[36].mxu0 %vm545_vm1, %v7810_v30  ;;  %6789 = vmatprep.mubr.msk.bf16.mxu1 %vm545_vm1, %v293_v60  ;;  %v191_v30 = vld [vmem:[%s7607_s26 + $0x1c8] sm:$0xff] }
 0x161   : > { %7053 = vmatprep.mubr.msk.bf16.mxu0 %vm545_vm1, %v7812_v32  ;;  %v193_v32 = vld [vmem:[%s7607_s26 + $0x1e0] sm:$0xff]  ;;  %v296_v24 = vpack.c.bf16 %v192_v44, %v191_v30  ;;  %v220_v60 = vld [vmem:[%s7607_s26 + $0x2e8] sm:$0xff]  ;;  %v228_v44 = vld [vmem:[%s7607_s26 + $0x338] sm:$0xff] }
 0x162   : > { %v297_v59 = vpack.c.bf16 %v194_v8, %v193_v32  ;;  %v230_v32 = vld [vmem:[%s7607_s26 + $0x350] sm:$0xff] }
 0x167   : > { %6790 = vmatmul.mubr.msk.bf16.gmra.mrb[40].mxu1 %vm545_vm1, %v294_v54  ;;  %v226_v54 = vld [vmem:[%s7607_s26 + $0x328] sm:$0xff] }
 0x168   : > { %7054 = vmatmul.mubr.msk.bf16.gmra.mrb[40].mxu0 %vm545_vm1, %v7828_v47  ;;  %6793 = vmatprep.mubr.msk.bf16.mxu1 %vm545_vm1, %v295_v6  ;;  %v195_v47 = vld [vmem:[%s7607_s26 + $0x1f0] sm:$0xff] }
 0x169   : > { %7057 = vmatprep.mubr.msk.bf16.mxu0 %vm545_vm1, %v7830_v50  ;;  %v197_v50 = vld [vmem:[%s7607_s26 + $0x208] sm:$0xff]  ;;  %v298_v7 = vpack.c.bf16 %v196_v63, %v195_v47  ;;  %v234_v47 = vld [vmem:[%s7607_s26 + $0x378] sm:$0xff] }
 0x16a   : > { %v299_v20 = vpack.c.bf16 %v198_v18, %v197_v50  ;;  %v236_v18 = vld [vmem:[%s7607_s26 + $0x388] sm:$0xff] }
 0x16f   : > { %6794 = vmatmul.mubr.msk.bf16.gmra.mrb[44].mxu1 %vm545_vm1, %v296_v24 }
 0x170   : > { %7058 = vmatmul.mubr.msk.bf16.gmra.mrb[44].mxu0 %vm545_vm1, %v7846_v0  ;;  %6797 = vmatprep.mubr.msk.bf16.mxu1 %vm545_vm1, %v297_v59  ;;  %v199_v0 = vld [vmem:[%s7607_s26 + $0x218] sm:$0xff]  ;;  %v232_v59 = vld [vmem:[%s7607_s26 + $0x360] sm:$0xff] }
 0x171   : > { %7061 = vmatprep.mubr.msk.bf16.mxu0 %vm545_vm1, %v7848_v4  ;;  %v201_v4 = vld [vmem:[%s7607_s26 + $0x230] sm:$0xff]  ;;  %v300_v36 = vpack.c.bf16 %v200_v34, %v199_v0 }
 0x172   : > { %v301_v37 = vpack.c.bf16 %v202_v10, %v201_v4  ;;  %v240_v34 = vld [vmem:[%s7607_s26 + $0x3b0] sm:$0xff]  ;;  %v242_v4 = vld [vmem:[%s7607_s26 + $0x3c8] sm:$0xff] }
 0x177   : > { %6798 = vmatmul.mubr.msk.bf16.gmra.mrb[48].mxu1 %vm545_vm1, %v298_v7  ;;  %v238_v7 = vld [vmem:[%s7607_s26 + $0x3a0] sm:$0xff] }
 0x178   : > { %7062 = vmatmul.mubr.msk.bf16.gmra.mrb[48].mxu0 %vm545_vm1, %v7864_v19  ;;  %6801 = vmatprep.mubr.msk.bf16.mxu1 %vm545_vm1, %v299_v20  ;;  %v203_v19 = vld [vmem:[%s7607_s26 + $0x240] sm:$0xff] }
 0x179   : > { %7065 = vmatprep.mubr.msk.bf16.mxu0 %vm545_vm1, %v7866_v22  ;;  %v205_v22 = vld [vmem:[%s7607_s26 + $0x258] sm:$0xff]  ;;  %v302_v12 = vpack.c.bf16 %v204_v11, %v203_v19  ;;  %v9907_v19 = vld [vmem:[#allocation2_spill] sm:$0xff]  ;;  %v246_v11 = vld [vmem:[%s7607_s26 + $0x3f0] sm:$0xff] }
 0x17a   : > { %v303_v28 = vpack.c.bf16 %v206_v39, %v205_v22 }
 0x17f   : > { %6802 = vmatmul.mubr.msk.bf16.gmra.mrb[52].mxu1 %vm545_vm1, %v300_v36 }
 0x180   : > { %7066 = vmatmul.mubr.msk.bf16.gmra.mrb[52].mxu0 %vm545_vm1, %v7882_v38  ;;  %6805 = vmatprep.mubr.msk.bf16.mxu1 %vm545_vm1, %v301_v37  ;;  %v207_v38 = vld [vmem:[%s7607_s26 + $0x268] sm:$0xff]  ;;  %v244_v37 = vld [vmem:[%s7607_s26 + $0x3d8] sm:$0xff] }
 0x181   : > { %7069 = vmatprep.mubr.msk.bf16.mxu0 %vm545_vm1, %v7884_v41  ;;  %v209_v41 = vld [vmem:[%s7607_s26 + $0x280] sm:$0xff]  ;;  %v304_v31 = vpack.c.bf16 %v208_v46, %v207_v38  ;;  %v9909_v38 = vld [vmem:[#allocation4_spill] sm:$0xff] }
 0x182   : > { %v305_v53 = vpack.c.bf16 %v210_v51, %v209_v41  ;;  %v249_v46 = vld [vmem:[%s7607_s26 + $0x410] sm:$0xff]  ;;  %v250_v41 = vld [vmem:[%s7607_s26 + $0x418] sm:$0xff] }
 0x187   : > { %6806 = vmatmul.mubr.msk.bf16.gmra.mrb[56].mxu1 %vm545_vm1, %v302_v12  ;;  %v9908_v12 = vld [vmem:[#allocation3_spill] sm:$0xff] }
 0x188   : > { %7070 = vmatmul.mubr.msk.bf16.gmra.mrb[56].mxu0 %vm545_vm1, %v7900_v57  ;;  %6809 = vmatprep.mubr.msk.bf16.mxu1 %vm545_vm1, %v303_v28  ;;  %v211_v57 = vld [vmem:[%s7607_s26 + $0x290] sm:$0xff]  ;;  %v248_v28 = vld [vmem:[%s7607_s26 + $0x400] sm:$0xff] }
 0x189   : > { %7073 = vmatprep.mubr.msk.bf16.mxu0 %vm545_vm1, %v7902_v61  ;;  %v213_v61 = vld [vmem:[%s7607_s26 + $0x2a8] sm:$0xff]  ;;  %v306_v21 = vpack.c.bf16 %v212_v48, %v211_v57  ;;  %v251_v57 = vld [vmem:[%s7607_s26 + $0x420] sm:$0xff] }
 0x18a   : > { %v307_v1 = vpack.c.bf16 %v214_v9, %v213_v61  ;;  %v252_v48 = vld [vmem:[%s7607_s26 + $0x428] sm:$0xff]  ;;  %v9911_v61 = vld [vmem:[#allocation6_spill] sm:$0xff]  ;;  %v253_v9 = vld [vmem:[%s7607_s26 + $0x438] sm:$0xff] }
 0x18f   : > { %6810 = vmatmul.mubr.msk.bf16.gmra.mrb[60].mxu1 %vm545_vm1, %v304_v31  ;;  %v325_v31 = vpack.c.bf16 %v250_v41, %v249_v46 }
 0x190   : > { %7074 = vmatmul.mubr.msk.bf16.gmra.mrb[60].mxu0 %vm545_vm1, %v7918_v13  ;;  %6813 = vmatprep.mubr.msk.bf16.mxu1 %vm545_vm1, %v305_v53  ;;  %v215_v13 = vld [vmem:[%s7607_s26 + $0x2b8] sm:$0xff] }
 0x191   : > { %7077 = vmatprep.mubr.msk.bf16.mxu0 %vm545_vm1, %v7920_v16  ;;  %v217_v16 = vld [vmem:[%s7607_s26 + $0x2d0] sm:$0xff]  ;;  %v308_v58 = vpack.c.bf16 %v216_v40, %v215_v13  ;;  %v9910_v53 = vld [vmem:[#allocation5_spill] sm:$0xff]  ;;  %v326_v40 = vpack.c.bf16 %v252_v48, %v251_v57 }
 0x192   : > { %v309_v43 = vpack.c.bf16 %v218_v3, %v217_v16  ;;  %v6258_v13 = vld [vmem:[%s7607_s26 + $0x469] sm:$0xff] }
 0x197   : > { %6814 = vmatmul.mubr.msk.bf16.gmra.mrb[64].mxu1 %vm545_vm1, %v306_v21  ;;  %v254_v21 = vld [vmem:[%s7607_s26 + $0x440] sm:$0xff] }
 0x198   : > { %7078 = vmatmul.mubr.msk.bf16.gmra.mrb[64].mxu0 %vm545_vm1, %v7936_v35  ;;  %6817 = vmatprep.mubr.msk.bf16.mxu1 %vm545_vm1, %v307_v1  ;;  %v219_v35 = vld [vmem:[%s7607_s26 + $0x2e0] sm:$0xff]  ;;  %v327_v16 = vpack.c.bf16 %v254_v21, %v253_v9 }
 0x199   : > { %7081 = vmatprep.mubr.msk.bf16.mxu0 %vm545_vm1, %v7938_v42  ;;  %v221_v42 = vld [vmem:[%s7607_s26 + $0x2f8] sm:$0xff]  ;;  %v310_v33 = vpack.c.bf16 %v220_v60, %v219_v35  ;;  %v6257_v1 = vld [vmem:[%s7607_s26 + $0x461] sm:$0xff]  ;;  %v256_v35 = vld [vmem:[%s7607_s26 + $0x450] sm:$0xff] }
 0x19a   : > { %v311_v17 = vpack.c.bf16 %v222_v15, %v221_v42  ;;  %v3292_v3 = vpack.c.bf16 %v6258_v13, %v6257_v1  ;;  %v6259_v60 = vld [vmem:[%s7607_s26 + $0x471] sm:$0xff]  ;;  %v6260_v42 = vld [vmem:[%s7607_s26 + $0x479] sm:$0xff] }
 0x19b   : > { %v257_v15 = vld [vmem:[%s7607_s26 + $0x460] sm:$0xff] }
 0x19f   : > { %6818 = vmatmul.mubr.msk.bf16.gmra.mrb[68].mxu1 %vm545_vm1, %v308_v58  ;;  %v9912_v58 = vld [vmem:[#allocation7_spill] sm:$0xff] }
 0x1a0   : > { %7082 = vmatmul.mubr.msk.bf16.gmra.mrb[68].mxu0 %vm545_vm1, %v7954_v62  ;;  %6821 = vmatprep.mubr.msk.bf16.mxu1 %vm545_vm1, %v309_v43  ;;  %v223_v62 = vld [vmem:[%s7607_s26 + $0x308] sm:$0xff] }
 0x1a1   : > { %7085 = vmatprep.mubr.msk.bf16.mxu0 %vm545_vm1, %v7956_v2  ;;  %v225_v2 = vld [vmem:[%s7607_s26 + $0x320] sm:$0xff]  ;;  %v312_v6 = vpack.c.bf16 %v224_v45, %v223_v62  ;;  %v255_v43 = vld [vmem:[%s7607_s26 + $0x448] sm:$0xff]  ;;  %v6262_v45 = vld [vmem:[%s7607_s26 + $0x491] sm:$0xff] }
 0x1a2   : > { %v313_v30 = vpack.c.bf16 %v226_v54, %v225_v2  ;;  %v6261_v62 = vld [vmem:[%s7607_s26 + $0x489] sm:$0xff] }
 0x1a7   : > { %6822 = vmatmul.mubr.msk.bf16.gmra.mrb[72].mxu1 %vm545_vm1, %v310_v33  ;;  %v258_v33 = vld [vmem:[%s7607_s26 + $0x468] sm:$0xff] }
 0x1a8   : > { %7086 = vmatmul.mubr.msk.bf16.gmra.mrb[72].mxu0 %vm545_vm1, %v7972_v25  ;;  %6825 = vmatprep.mubr.msk.bf16.mxu1 %vm545_vm1, %v311_v17  ;;  %v227_v25 = vld [vmem:[%s7607_s26 + $0x330] sm:$0xff] }
 0x1a9   : > { %7089 = vmatprep.mubr.msk.bf16.mxu0 %vm545_vm1, %v7974_v27  ;;  %v229_v27 = vld [vmem:[%s7607_s26 + $0x348] sm:$0xff]  ;;  %v314_v8 = vpack.c.bf16 %v228_v44, %v227_v25 }
 0x1aa   : > { %v315_v24 = vpack.c.bf16 %v230_v32, %v229_v27  ;;  %v3293_v27 = vpack.c.bf16 %v6260_v42, %v6259_v60  ;;  %v329_v32 = vpack.c.bf16 %v258_v33, %v257_v15  ;;  %v263_v42 = vld [vmem:[%s7607_s26 + $0x498] sm:$0xff]  ;;  %v264_v15 = vld [vmem:[%s7607_s26 + $0x4a0] sm:$0xff] }
 0x1ab   : > { %v6267_v33 = vld [vmem:[%s7607_s26 + $0x4c1] sm:$0xff] }
 0x1af   : > { %6826 = vmatmul.mubr.msk.bf16.gmra.mrb[76].mxu1 %vm545_vm1, %v312_v6  ;;  %v328_v6 = vpack.c.bf16 %v256_v35, %v255_v43 }
 0x1b0   : > { %7090 = vmatmul.mubr.msk.bf16.gmra.mrb[76].mxu0 %vm545_vm1, %v7990_v52  ;;  %6829 = vmatprep.mubr.msk.bf16.mxu1 %vm545_vm1, %v313_v30  ;;  %v231_v52 = vld [vmem:[%s7607_s26 + $0x358] sm:$0xff] }
 0x1b1   : > { %7093 = vmatprep.mubr.msk.bf16.mxu0 %vm545_vm1, %v7992_v55  ;;  %v233_v55 = vld [vmem:[%s7607_s26 + $0x370] sm:$0xff]  ;;  %v316_v63 = vpack.c.bf16 %v232_v59, %v231_v52  ;;  %v3294_v59 = vpack.c.bf16 %v6262_v45, %v6261_v62 }
 0x1b2   : > { %v317_v50 = vpack.c.bf16 %v234_v47, %v233_v55  ;;  %v6268_v45 = vld [vmem:[%s7607_s26 + $0x4c9] sm:$0xff] }
 0x1b7   : > { %6830 = vmatmul.mubr.msk.bf16.gmra.mrb[80].mxu1 %vm545_vm1, %v314_v8 }
 0x1b8   : > { %7094 = vmatmul.mubr.msk.bf16.gmra.mrb[80].mxu0 %vm545_vm1, %v8008_v14  ;;  %6833 = vmatprep.mubr.msk.bf16.mxu1 %vm545_vm1, %v315_v24  ;;  %v235_v14 = vld [vmem:[%s7607_s26 + $0x380] sm:$0xff] }
 0x1b9   : > { %7097 = vmatprep.mubr.msk.bf16.mxu0 %vm545_vm1, %v8010_v23  ;;  %v237_v23 = vld [vmem:[%s7607_s26 + $0x398] sm:$0xff]  ;;  %v318_v20 = vpack.c.bf16 %v236_v18, %v235_v14  ;;  %v259_v14 = vld [vmem:[%s7607_s26 + $0x470] sm:$0xff] }
 0x1ba   : > { %v319_v0 = vpack.c.bf16 %v238_v7, %v237_v23  ;;  %v260_v18 = vld [vmem:[%s7607_s26 + $0x478] sm:$0xff]  ;;  %v6264_v7 = vld [vmem:[%s7607_s26 + $0x4a1] sm:$0xff] }
 0x1bb   : > { %v6263_v23 = vld [vmem:[%s7607_s26 + $0x499] sm:$0xff] }
 0x1bf   : > { %6834 = vmatmul.mubr.msk.bf16.gmra.mrb[84].mxu1 %vm545_vm1, %v316_v63 }
 0x1c0   : > { %7098 = vmatmul.mubr.msk.bf16.gmra.mrb[84].mxu0 %vm545_vm1, %v8026_v49  ;;  %6837 = vmatprep.mubr.msk.bf16.mxu1 %vm545_vm1, %v317_v50  ;;  %v239_v49 = vld [vmem:[%s7607_s26 + $0x3a8] sm:$0xff] }
 0x1c1   : > { %7101 = vmatprep.mubr.msk.bf16.mxu0 %vm545_vm1, %v8028_v56  ;;  %v241_v56 = vld [vmem:[%s7607_s26 + $0x3c0] sm:$0xff]  ;;  %v320_v10 = vpack.c.bf16 %v240_v34, %v239_v49 }
 0x1c2   : > { %v321_v36 = vpack.c.bf16 %v242_v4, %v241_v56  ;;  %v261_v56 = vld [vmem:[%s7607_s26 + $0x488] sm:$0xff]  ;;  %v262_v4 = vld [vmem:[%s7607_s26 + $0x490] sm:$0xff] }
 0x1c7   : > { %6838 = vmatmul.mubr.msk.bf16.gmra.mrb[88].mxu1 %vm545_vm1, %v318_v20 }
 0x1c8   : > { %7102 = vmatmul.mubr.msk.bf16.gmra.mrb[88].mxu0 %vm545_vm1, %v8044_v26  ;;  %6841 = vmatprep.mubr.msk.bf16.mxu1 %vm545_vm1, %v319_v0  ;;  %v243_v26 = vld [vmem:[%s7607_s26 + $0x3d0] sm:$0xff] }
 0x1c9   : > { %7105 = vmatprep.mubr.msk.bf16.mxu0 %vm545_vm1, %v8046_v29  ;;  %v245_v29 = vld [vmem:[%s7607_s26 + $0x3e8] sm:$0xff]  ;;  %v322_v22 = vpack.c.bf16 %v244_v37, %v243_v26  ;;  %v330_v37 = vpack.c.bf16 %v260_v18, %v259_v14 }
 0x1ca   : > { %v323_v39 = vpack.c.bf16 %v246_v11, %v245_v29  ;;  %v6266_v29 = vld [vmem:[%s7607_s26 + $0x4b9] sm:$0xff] }
 0x1cf   : > { %6842 = vmatmul.mubr.msk.bf16.gmra.mrb[92].mxu1 %vm545_vm1, %v320_v10 }
 0x1d0   : > { %7106 = vmatmul.mubr.msk.bf16.gmra.mrb[92].mxu0 %vm545_vm1, %v8062_v5  ;;  %6845 = vmatprep.mubr.msk.bf16.mxu1 %vm545_vm1, %v321_v36  ;;  %v247_v5 = vld [vmem:[%s7607_s26 + $0x3f8] sm:$0xff] }
 0x1d1   : > { %7109 = vmatprep.mubr.msk.bf16.mxu0 %vm545_vm1, %v9907_v19  ;;  %v324_v51 = vpack.c.bf16 %v248_v28, %v247_v5  ;;  %v6265_v19 = vld [vmem:[%s7607_s26 + $0x4b1] sm:$0xff]  ;;  %v3295_v28 = vpack.c.bf16 %v6264_v7, %v6263_v23  ;;  %v332_v23 = vpack.c.bf16 %v264_v15, %v263_v42  ;;  %v3297_v7 = vpack.c.bf16 %v6268_v45, %v6267_v33 }
 0x1d2   : > { %v3296_v1 = vpack.c.bf16 %v6266_v29, %v6265_v19 }
 0x1d7   : > { %6846 = vmatmul.mubr.msk.bf16.gmra.mrb[96].mxu1 %vm545_vm1, %v322_v22 }
 0x1d8   : > { %7110 = vmatmul.mubr.msk.bf16.gmra.mrb[96].mxu0 %vm545_vm1, %v9908_v12  ;;  %6849 = vmatprep.mubr.msk.bf16.mxu1 %vm545_vm1, %v323_v39 }
 0x1d9   : > { %7113 = vmatprep.mubr.msk.bf16.mxu0 %vm545_vm1, %v9909_v38 }
 0x1df   : > { %6850 = vmatmul.mubr.msk.bf16.gmra.mrb[100].mxu1 %vm545_vm1, %v324_v51 }
 0x1e0   : > { %7114 = vmatmul.mubr.msk.bf16.gmra.mrb[100].mxu0 %vm545_vm1, %v9910_v53  ;;  %6853 = vmatprep.mubr.msk.bf16.mxu1 %vm545_vm1, %v325_v31  ;;  %v331_v53 = vpack.c.bf16 %v262_v4, %v261_v56 }
 0x1e1   : > { %7117 = vmatprep.mubr.msk.bf16.mxu0 %vm545_vm1, %v9911_v61 }
 0x1e7   : > { %6854 = vmatmul.mubr.msk.bf16.gmra.mrb[104].mxu1 %vm545_vm1, %v326_v40 }
 0x1e8   : > { %7118 = vmatmul.mubr.msk.bf16.gmra.mrb[104].mxu0 %vm545_vm1, %v9912_v58  ;;  %6857 = vmatprep.mubr.msk.bf16.mxu1 %vm545_vm1, %v327_v16 }
 0x1e9   : > { %7121 = vmatprep.mubr.msk.bf16.mxu0 %vm545_vm1, %v3292_v3 }
 0x1ea   : > { %v6751_v17 = vpop.f32.mrb[0].mxu1 }
 0x1eb   : > { %v7015_v2 = vpop.f32.mrb[0].mxu0  ;;  %v1525_v54 = vpop.f32.mrb[1].mxu1 }
 0x1ec   : > { %v8449_v30 = vadd.f32 %v7015_v2, %v6751_v17  ;;  %v3544_v25 = vpop.f32.mrb[1].mxu0  ;;  %v6752_v44 = vpop.f32.mrb[2].mxu1  ;;  %v265_v2 = vld [vmem:[%s7607_s26 + $0x4b0] sm:$0xff] }
 0x1ed   : > { %v8451_v8 = vadd.f32 %v3544_v25, %v1525_v54  ;;  %v7016_v24 = vpop.f32.mrb[2].mxu0  ;;  %v1528_v52 = vpop.f32.mrb[3].mxu1  ;;  %v266_v54 = vld [vmem:[%s7607_s26 + $0x4b8] sm:$0xff] }
 0x1ee   : > { %v8453_v55 = vadd.f32 %v7016_v24, %v6752_v44  ;;  %v3547_v47 = vpop.f32.mrb[3].mxu0  ;;  %v4449_v20 = vmul.f32 %v8449_v30, %v8449_v30  ;;  %v4187_v11 = vsel %vm4183_vm2, %v8449_v30, 0.0 }
 0x1ef   : > { %v4447_v63 = vmul.f32 %v8451_v8, %v8451_v8  ;;  %v8457_v50 = vadd.f32 %v3547_v47, %v1528_v52  ;;  %6858 = vmatmul.mubr.msk.bf16.gmra.mrb[108].mxu1 %vm545_vm1, %v328_v6  ;;  %v4184_v0 = vsel %vm4183_vm2, %v8451_v8, 0.0  ;;  %v6270_v47 = vld [vmem:[%s7607_s26 + $0x4e1] sm:$0xff] }
 0x1f0   : > { %7122 = vmatmul.mubr.msk.bf16.gmra.mrb[108].mxu0 %vm545_vm1, %v3293_v27  ;;  %6861 = vmatprep.mubr.msk.bf16.mxu1 %vm545_vm1, %v329_v32  ;;  %v4450_v10 = vmul.f32 %v8453_v55, %v8453_v55  ;;  %v4578_v57 = vsel %vm4183_vm2, %v4449_v20, 0.0  ;;  %v4189_v48 = vsel %vm4183_vm2, %v8453_v55, 0.0  ;;  %v333_v20 = vpack.c.bf16 %v266_v54, %v265_v2 }
 0x1f1   : > { %v4185_v49 = vsel %vm4183_vm2, %v8457_v50, 0.0  ;;  %v4448_v34 = vmul.f32 %v8457_v50, %v8457_v50  ;;  %7125 = vmatprep.mubr.msk.bf16.mxu0 %vm545_vm1, %v3294_v59  ;;  %v4575_v22 = vsel %vm4183_vm2, %v4447_v63, 0.0  ;;  %v6269_v59 = vld [vmem:[%s7607_s26 + $0x4d9] sm:$0xff] }
 0x1f2   : > { %v4186_v36 = vadd.f32 %v4185_v49, %v4184_v0  ;;  %v6755_v26 = vpop.f32.mrb[4].mxu1  ;;  %v4580_v13 = vsel %vm4183_vm2, %v4450_v10, 0.0 }
 0x1f3   : > { %v4576_v39 = vsel %vm4183_vm2, %v4448_v34, 0.0  ;;  %v7019_v12 = vpop.f32.mrb[4].mxu0  ;;  %v1541_v5 = vpop.f32.mrb[5].mxu1 }
 0x1f4   : > { %v4188_v38 = vadd.f32 %v4187_v11, %v4186_v36  ;;  %v4577_v46 = vadd.f32 %v4576_v39, %v4575_v22  ;;  %v8485_v41 = vadd.f32 %v7019_v12, %v6755_v26  ;;  %v3560_v51 = vpop.f32.mrb[5].mxu0  ;;  %v6756_v31 = vpop.f32.mrb[6].mxu1  ;;  %v3298_v11 = vpack.c.bf16 %v6270_v47, %v6269_v59 }
 0x1f5   : > { %v8490_v61 = vadd.f32 %v3560_v51, %v1541_v5  ;;  %v7020_v9 = vpop.f32.mrb[6].mxu0  ;;  %v1544_v21 = vpop.f32.mrb[7].mxu1 }
 0x1f6   : > { %v4190_v40 = vadd.f32 %v4189_v48, %v4188_v38  ;;  %v4579_v16 = vadd.f32 %v4578_v57, %v4577_v46  ;;  %v3563_v3 = vpop.f32.mrb[7].mxu0  ;;  %v8497_v35 = vadd.f32 %v7020_v9, %v6756_v31  ;;  %v4453_v44 = vmul.f32 %v8485_v41, %v8485_v41  ;;  %v267_v31 = vld [vmem:[%s7607_s26 + $0x4c0] sm:$0xff]  ;;  %v6271_v9 = vld [vmem:[%s7607_s26 + $0x4e9] sm:$0xff] }
 0x1f7   : > { %v4191_v58 = vsel %vm4183_vm2, %v8490_v61, 0.0  ;;  %v4451_v43 = vmul.f32 %v8490_v61, %v8490_v61  ;;  %v8499_v60 = vadd.f32 %v3563_v3, %v1544_v21  ;;  %6862 = vmatmul.mubr.msk.bf16.gmra.mrb[112].mxu1 %vm545_vm1, %v330_v37  ;;  %v4195_v63 = vsel %vm4183_vm2, %v8485_v41, 0.0  ;;  %v6272_v21 = vld [vmem:[%s7607_s26 + $0x4f1] sm:$0xff] }
 0x1f8   : > { %v4581_v17 = vadd.f32 %v4580_v13, %v4579_v16  ;;  %v4192_v62 = vadd.f32 %v4191_v58, %v4190_v40  ;;  %7126 = vmatmul.mubr.msk.bf16.gmra.mrb[112].mxu0 %vm545_vm1, %v3295_v28  ;;  %6865 = vmatprep.mubr.msk.bf16.mxu1 %vm545_vm1, %v331_v53  ;;  %v4454_v0 = vmul.f32 %v8497_v35, %v8497_v35  ;;  %v4197_v36 = vsel %vm4183_vm2, %v8497_v35, 0.0  ;;  %v268_v53 = vld [vmem:[%s7607_s26 + $0x4c8] sm:$0xff]  ;;  %v269_v3 = vld [vmem:[%s7607_s26 + $0x4d8] sm:$0xff]  ;;  %v270_v58 = vld [vmem:[%s7607_s26 + $0x4e0] sm:$0xff] }
 0x1f9   : > { %v4582_v6 = vsel %vm4183_vm2, %v4451_v43, 0.0  ;;  %v4193_v25 = vsel %vm4183_vm2, %v8499_v60, 0.0  ;;  %7129 = vmatprep.mubr.msk.bf16.mxu0 %vm545_vm1, %v3296_v1  ;;  %v4452_v24 = vmul.f32 %v8499_v60, %v8499_v60  ;;  %v4586_v22 = vsel %vm4183_vm2, %v4453_v44, 0.0 }
 0x1fa   : > { %v4583_v27 = vadd.f32 %v4582_v6, %v4581_v17  ;;  %v4194_v32 = vadd.f32 %v4193_v25, %v4192_v62  ;;  %v6759_v52 = vpop.f32.mrb[8].mxu1  ;;  %v4588_v57 = vsel %vm4183_vm2, %v4454_v0, 0.0  ;;  %v334_v33 = vpack.c.bf16 %v268_v53, %v267_v31  ;;  %v6273_v17 = vld [vmem:[%s7607_s26 + $0x501] sm:$0xff]  ;;  %v6274_v62 = vld [vmem:[%s7607_s26 + $0x509] sm:$0xff]  ;;  %v6275_v31 = vld [vmem:[%s7607_s26 + $0x511] sm:$0xff] }
 0x1fb   : > { %v7023_v14 = vpop.f32.mrb[8].mxu0  ;;  %v1557_v18 = vpop.f32.mrb[9].mxu1  ;;  %v4584_v34 = vsel %vm4183_vm2, %v4452_v24, 0.0  ;;  %v3299_v44 = vpack.c.bf16 %v6272_v21, %v6271_v9  ;;  %v335_v47 = vpack.c.bf16 %v270_v58, %v269_v3  ;;  %v6276_v53 = vld [vmem:[%s7607_s26 + $0x519] sm:$0xff] }
 0x1fc   : > { %v4196_v49 = vadd.f32 %v4195_v63, %v4194_v32  ;;  %v8525_v56 = vadd.f32 %v7023_v14, %v6759_v52  ;;  %v3576_v4 = vpop.f32.mrb[9].mxu0  ;;  %v6760_v10 = vpop.f32.mrb[10].mxu1  ;;  %v4585_v26 = vadd.f32 %v4584_v34, %v4583_v27 }
 0x1fd   : > { %v8529_v37 = vadd.f32 %v3576_v4, %v1557_v18  ;;  %v7024_v19 = vpop.f32.mrb[10].mxu0  ;;  %v1560_v29 = vpop.f32.mrb[11].mxu1 }
 0x1fe   : > { %v4198_v39 = vadd.f32 %v4197_v36, %v4196_v49  ;;  %v8532_v12 = vadd.f32 %v7024_v19, %v6760_v10  ;;  %v3579_v5 = vpop.f32.mrb[11].mxu0  ;;  %v4587_v28 = vadd.f32 %v4586_v22, %v4585_v26  ;;  %v4457_v43 = vmul.f32 %v8525_v56, %v8525_v56  ;;  %v271_v22 = vld [vmem:[%s7607_s26 + $0x4e8] sm:$0xff] }
 0x1ff   : > { %v4199_v38 = vsel %vm4183_vm2, %v8529_v37, 0.0  ;;  %v4455_v46 = vmul.f32 %v8529_v37, %v8529_v37  ;;  %v8538_v51 = vadd.f32 %v3579_v5, %v1560_v29  ;;  %6866 = vmatmul.mubr.msk.bf16.gmra.mrb[116].mxu1 %vm545_vm1, %v332_v23  ;;  %v4203_v45 = vsel %vm4183_vm2, %v8525_v56, 0.0 }
 0x200   : > { %v4200_v48 = vadd.f32 %v4199_v38, %v4198_v39  ;;  %7130 = vmatmul.mubr.msk.bf16.gmra.mrb[116].mxu0 %vm545_vm1, %v3297_v7  ;;  %6869 = vmatprep.mubr.msk.bf16.mxu1 %vm545_vm1, %v333_v20  ;;  %v4589_v1 = vadd.f32 %v4588_v57, %v4587_v28  ;;  %v4458_v27 = vmul.f32 %v8532_v12, %v8532_v12  ;;  %v4205_v63 = vsel %vm4183_vm2, %v8532_v12, 0.0  ;;  %v272_v39 = vld [vmem:[%s7607_s26 + $0x4f0] sm:$0xff] }
 0x201   : > { %v4590_v13 = vsel %vm4183_vm2, %v4455_v46, 0.0  ;;  %v4201_v40 = vsel %vm4183_vm2, %v8538_v51, 0.0  ;;  %v4456_v16 = vmul.f32 %v8538_v51, %v8538_v51  ;;  %7133 = vmatprep.mubr.msk.bf16.mxu0 %vm545_vm1, %v3298_v11  ;;  %v3300_v20 = vpack.c.bf16 %v6274_v62, %v6273_v17 }
 0x202   : > { %v4202_v42 = vadd.f32 %v4201_v40, %v4200_v48  ;;  %v6763_v15 = vpop.f32.mrb[12].mxu1  ;;  %v4591_v2 = vadd.f32 %v4590_v13, %v4589_v1  ;;  %v4594_v0 = vsel %vm4183_vm2, %v4457_v43, 0.0  ;;  %v4596_v29 = vsel %vm4183_vm2, %v4458_v27, 0.0 }
 0x203   : > { %v4592_v54 = vsel %vm4183_vm2, %v4456_v16, 0.0  ;;  %v7027_v6 = vpop.f32.mrb[12].mxu0  ;;  %v1573_v25 = vpop.f32.mrb[13].mxu1  ;;  %v336_v3 = vpack.c.bf16 %v272_v39, %v271_v22  ;;  %v3301_v17 = vpack.c.bf16 %v6276_v53, %v6275_v31 }
 0x204   : > { %v4204_v32 = vadd.f32 %v4203_v45, %v4202_v42  ;;  %v8565_v24 = vadd.f32 %v7027_v6, %v6763_v15  ;;  %v3592_v52 = vpop.f32.mrb[13].mxu0  ;;  %v6764_v59 = vpop.f32.mrb[14].mxu1  ;;  %v4593_v14 = vadd.f32 %v4592_v54, %v4591_v2 }
 0x205   : > { %v8569_v18 = vadd.f32 %v3592_v52, %v1573_v25  ;;  %v7028_v23 = vpop.f32.mrb[14].mxu0  ;;  %v1576_v7 = vpop.f32.mrb[15].mxu1 }
 0x206   : > { %v4206_v49 = vadd.f32 %v4205_v63, %v4204_v32  ;;  %v8572_v34 = vadd.f32 %v7028_v23, %v6764_v59  ;;  %v3595_v4 = vpop.f32.mrb[15].mxu0  ;;  %v4595_v10 = vadd.f32 %v4594_v0, %v4593_v14  ;;  %v4461_v57 = vmul.f32 %v8565_v24, %v8565_v24 }
 0x207   : > { %v4207_v36 = vsel %vm4183_vm2, %v8569_v18, 0.0  ;;  %v4459_v26 = vmul.f32 %v8569_v18, %v8569_v18  ;;  %v8578_v19 = vadd.f32 %v3595_v4, %v1576_v7  ;;  %6870 = vmatmul.mubr.msk.bf16.gmra.mrb[120].mxu1 %vm545_vm1, %v334_v33  ;;  %v4211_v21 = vsel %vm4183_vm2, %v8565_v24, 0.0 }
 0x208   : > { %v4208_v11 = vadd.f32 %v4207_v36, %v4206_v49  ;;  %7134 = vmatmul.mubr.msk.bf16.gmra.mrb[120].mxu0 %vm545_vm1, %v3299_v44  ;;  %6873 = vmatprep.mubr.msk.bf16.mxu1 %vm545_vm1, %v335_v47  ;;  %v4597_v5 = vadd.f32 %v4596_v29, %v4595_v10  ;;  %v4462_v58 = vmul.f32 %v8572_v34, %v8572_v34  ;;  %v4213_v62 = vsel %vm4183_vm2, %v8572_v34, 0.0 }
 0x209   : > { %v4598_v28 = vsel %vm4183_vm2, %v4459_v26, 0.0  ;;  %v4209_v38 = vsel %vm4183_vm2, %v8578_v19, 0.0  ;;  %v4460_v46 = vmul.f32 %v8578_v19, %v8578_v19  ;;  %7137 = vmatprep.mubr.msk.bf16.mxu0 %vm545_vm1, %v3300_v20  ;;  %v4602_v25 = vsel %vm4183_vm2, %v4461_v57, 0.0 }
 0x20a   : > { %v4210_v48 = vadd.f32 %v4209_v38, %v4208_v11  ;;  %v6767_v9 = vpop.f32.mrb[16].mxu1  ;;  %v4599_v1 = vadd.f32 %v4598_v28, %v4597_v5  ;;  %v4604_v14 = vsel %vm4183_vm2, %v4462_v58, 0.0 }
 0x20b   : > { %v4600_v13 = vsel %vm4183_vm2, %v4460_v46, 0.0  ;;  %v7031_v40 = vpop.f32.mrb[16].mxu0  ;;  %v1589_v16 = vpop.f32.mrb[17].mxu1 }
 0x20c   : > { %v4212_v43 = vadd.f32 %v4211_v21, %v4210_v48  ;;  %v8601_v42 = vadd.f32 %v7031_v40, %v6767_v9  ;;  %v3608_v15 = vpop.f32.mrb[17].mxu0  ;;  %v6768_v33 = vpop.f32.mrb[18].mxu1  ;;  %v4601_v45 = vadd.f32 %v4600_v13, %v4599_v1 }
 0x20d   : > { %v8605_v2 = vadd.f32 %v3608_v15, %v1589_v16  ;;  %v7032_v54 = vpop.f32.mrb[18].mxu0  ;;  %v1592_v6 = vpop.f32.mrb[19].mxu1 }
 0x20e   : > { %v4214_v44 = vadd.f32 %v4213_v62, %v4212_v43  ;;  %v8608_v27 = vadd.f32 %v7032_v54, %v6768_v33  ;;  %v3611_v32 = vpop.f32.mrb[19].mxu0  ;;  %v4603_v52 = vadd.f32 %v4602_v25, %v4601_v45  ;;  %v4465_v4 = vmul.f32 %v8601_v42, %v8601_v42 }
 0x20f   : > { %v4215_v59 = vsel %vm4183_vm2, %v8605_v2, 0.0  ;;  %v4463_v47 = vmul.f32 %v8605_v2, %v8605_v2  ;;  %v8614_v63 = vadd.f32 %v3611_v32, %v1592_v6  ;;  %6874 = vmatmul.mubr.msk.bf16.gmra.mrb[124].mxu1 %vm545_vm1, %v336_v3  ;;  %v4219_v26 = vsel %vm4183_vm2, %v8601_v42, 0.0 }
 0x210   : > { %v4216_v23 = vadd.f32 %v4215_v59, %v4214_v44  ;;  %7138 = vmatmul.mubr.msk.bf16.gmra.mrb[124].mxu0 %vm545_vm1, %v3301_v17  ;;  %v4605_v7 = vadd.f32 %v4604_v14, %v4603_v52  ;;  %v4466_v5 = vmul.f32 %v8608_v27, %v8608_v27  ;;  %v4221_v53 = vsel %vm4183_vm2, %v8608_v27, 0.0 }
 0x211   : > { %v4606_v20 = vsel %vm4183_vm2, %v4463_v47, 0.0  ;;  %v4217_v0 = vsel %vm4183_vm2, %v8614_v63, 0.0  ;;  %v4464_v49 = vmul.f32 %v8614_v63, %v8614_v63  ;;  %v4610_v1 = vsel %vm4183_vm2, %v4465_v4, 0.0 }
 0x212   : > { %v4218_v10 = vadd.f32 %v4217_v0, %v4216_v23  ;;  %v6771_v36 = vpop.f32.mrb[20].mxu1  ;;  %v4607_v29 = vadd.f32 %v4606_v20, %v4605_v7  ;;  %v4612_v33 = vsel %vm4183_vm2, %v4466_v5, 0.0 }
 0x213   : > { %v4608_v11 = vsel %vm4183_vm2, %v4464_v49, 0.0  ;;  %v7035_v22 = vpop.f32.mrb[20].mxu0  ;;  %v1605_v39 = vpop.f32.mrb[21].mxu1 }
 0x214   : > { %v4220_v28 = vadd.f32 %v4219_v26, %v4218_v10  ;;  %v8631_v38 = vadd.f32 %v7035_v22, %v6771_v36  ;;  %v3624_v46 = vpop.f32.mrb[21].mxu0  ;;  %v6772_v31 = vpop.f32.mrb[22].mxu1  ;;  %v4609_v57 = vadd.f32 %v4608_v11, %v4607_v29 }
 0x215   : > { %v8635_v48 = vadd.f32 %v3624_v46, %v1605_v39  ;;  %v7036_v9 = vpop.f32.mrb[22].mxu0  ;;  %v1608_v21 = vpop.f32.mrb[23].mxu1 }
 0x216   : > { %v4222_v13 = vadd.f32 %v4221_v53, %v4220_v28  ;;  %v8638_v40 = vadd.f32 %v7036_v9, %v6772_v31  ;;  %v3627_v16 = vpop.f32.mrb[23].mxu0  ;;  %v4611_v3 = vadd.f32 %v4610_v1, %v4609_v57  ;;  %v4469_v25 = vmul.f32 %v8631_v38, %v8631_v38 }
 0x217   : > { %v4223_v58 = vsel %vm4183_vm2, %v8635_v48, 0.0  ;;  %v4467_v43 = vmul.f32 %v8635_v48, %v8635_v48  ;;  %v8644_v15 = vadd.f32 %v3627_v16, %v1608_v21  ;;  %v4227_v52 = vsel %vm4183_vm2, %v8631_v38, 0.0 }
 0x218   : > { %v4224_v17 = vadd.f32 %v4223_v58, %v4222_v13  ;;  %v4613_v62 = vadd.f32 %v4612_v33, %v4611_v3  ;;  %v4470_v7 = vmul.f32 %v8638_v40, %v8638_v40  ;;  %v4229_v10 = vsel %vm4183_vm2, %v8638_v40, 0.0 }
 0x219   : > { %v4614_v45 = vsel %vm4183_vm2, %v4467_v43, 0.0  ;;  %v4225_v54 = vsel %vm4183_vm2, %v8644_v15, 0.0  ;;  %v4468_v6 = vmul.f32 %v8644_v15, %v8644_v15  ;;  %v4618_v22 = vsel %vm4183_vm2, %v4469_v25, 0.0 }
 0x21a   : > { %v4226_v44 = vadd.f32 %v4225_v54, %v4224_v17  ;;  %v6775_v32 = vpop.f32.mrb[24].mxu1  ;;  %v4615_v59 = vadd.f32 %v4614_v45, %v4613_v62  ;;  %v4620_v9 = vsel %vm4183_vm2, %v4470_v7, 0.0 }
 0x21b   : > { %v4616_v47 = vsel %vm4183_vm2, %v4468_v6, 0.0  ;;  %v7039_v14 = vpop.f32.mrb[24].mxu0  ;;  %v1621_v23 = vpop.f32.mrb[25].mxu1 }
 0x21c   : > { %v4228_v20 = vadd.f32 %v4227_v52, %v4226_v44  ;;  %v8659_v0 = vadd.f32 %v7039_v14, %v6775_v32  ;;  %v3640_v49 = vpop.f32.mrb[25].mxu0  ;;  %v6776_v4 = vpop.f32.mrb[26].mxu1  ;;  %v4617_v36 = vadd.f32 %v4616_v47, %v4615_v59 }
 0x21d   : > { %v8663_v26 = vadd.f32 %v3640_v49, %v1621_v23  ;;  %v7040_v29 = vpop.f32.mrb[26].mxu0  ;;  %v1624_v11 = vpop.f32.mrb[27].mxu1 }
 0x21e   : > { %v4230_v39 = vadd.f32 %v4229_v10, %v4228_v20  ;;  %v8666_v5 = vadd.f32 %v7040_v29, %v6776_v4  ;;  %v3643_v28 = vpop.f32.mrb[27].mxu0  ;;  %v4619_v46 = vadd.f32 %v4618_v22, %v4617_v36  ;;  %v4473_v58 = vmul.f32 %v8659_v0, %v8659_v0 }
 0x21f   : > { %v4231_v31 = vsel %vm4183_vm2, %v8663_v26, 0.0  ;;  %v4471_v53 = vmul.f32 %v8663_v26, %v8663_v26  ;;  %v8672_v57 = vadd.f32 %v3643_v28, %v1624_v11  ;;  %v4235_v17 = vsel %vm4183_vm2, %v8659_v0, 0.0 }
 0x220   : > { %v4232_v21 = vadd.f32 %v4231_v31, %v4230_v39  ;;  %v4621_v1 = vadd.f32 %v4620_v9, %v4619_v46  ;;  %v4474_v25 = vmul.f32 %v8666_v5, %v8666_v5  ;;  %v4237_v47 = vsel %vm4183_vm2, %v8666_v5, 0.0 }
 0x221   : > { %v4622_v13 = vsel %vm4183_vm2, %v4471_v53, 0.0  ;;  %v4233_v16 = vsel %vm4183_vm2, %v8672_v57, 0.0  ;;  %v4472_v3 = vmul.f32 %v8672_v57, %v8672_v57  ;;  %v4626_v49 = vsel %vm4183_vm2, %v4473_v58, 0.0 }
 0x222   : > { %v4234_v43 = vadd.f32 %v4233_v16, %v4232_v21  ;;  %v6779_v33 = vpop.f32.mrb[28].mxu1  ;;  %v4623_v62 = vadd.f32 %v4622_v13, %v4621_v1  ;;  %v4628_v28 = vsel %vm4183_vm2, %v4474_v25, 0.0 }
 0x223   : > { %v4624_v45 = vsel %vm4183_vm2, %v4472_v3, 0.0  ;;  %v7043_v54 = vpop.f32.mrb[28].mxu0  ;;  %v1637_v6 = vpop.f32.mrb[29].mxu1 }
 0x224   : > { %v4236_v44 = vadd.f32 %v4235_v17, %v4234_v43  ;;  %v8687_v32 = vadd.f32 %v7043_v54, %v6779_v33  ;;  %v3656_v52 = vpop.f32.mrb[29].mxu0  ;;  %v6780_v59 = vpop.f32.mrb[30].mxu1  ;;  %v4625_v14 = vadd.f32 %v4624_v45, %v4623_v62 }
 0x225   : > { %v8691_v23 = vadd.f32 %v3656_v52, %v1637_v6  ;;  %v7044_v7 = vpop.f32.mrb[30].mxu0  ;;  %v1640_v20 = vpop.f32.mrb[31].mxu1 }
 0x226   : > { %v4238_v4 = vadd.f32 %v4237_v47, %v4236_v44  ;;  %v8694_v10 = vadd.f32 %v7044_v7, %v6780_v59  ;;  %v3659_v36 = vpop.f32.mrb[31].mxu0  ;;  %v4627_v29 = vadd.f32 %v4626_v49, %v4625_v14  ;;  %v4477_v1 = vmul.f32 %v8687_v32, %v8687_v32 }
 0x227   : > { %v4239_v11 = vsel %vm4183_vm2, %v8691_v23, 0.0  ;;  %v4475_v22 = vmul.f32 %v8691_v23, %v8691_v23  ;;  %v8700_v39 = vadd.f32 %v3659_v36, %v1640_v20  ;;  %v4243_v3 = vsel %vm4183_vm2, %v8687_v32, 0.0 }
 0x228   : > { %v4240_v46 = vadd.f32 %v4239_v11, %v4238_v4  ;;  %v4629_v31 = vadd.f32 %v4628_v28, %v4627_v29  ;;  %v4478_v62 = vmul.f32 %v8694_v10, %v8694_v10  ;;  %v4245_v44 = vsel %vm4183_vm2, %v8694_v10, 0.0 }
 0x229   : > { %v4630_v53 = vsel %vm4183_vm2, %v4475_v22, 0.0  ;;  %v4241_v9 = vsel %vm4183_vm2, %v8700_v39, 0.0  ;;  %v4476_v21 = vmul.f32 %v8700_v39, %v8700_v39  ;;  %v4634_v7 = vsel %vm4183_vm2, %v4477_v1, 0.0 }
 0x22a   : > { %v4242_v13 = vadd.f32 %v4241_v9, %v4240_v46  ;;  %v6783_v16 = vpop.f32.mrb[32].mxu1  ;;  %v4631_v58 = vadd.f32 %v4630_v53, %v4629_v31  ;;  %v4636_v28 = vsel %vm4183_vm2, %v4478_v62, 0.0 }
 0x22b   : > { %v4632_v43 = vsel %vm4183_vm2, %v4476_v21, 0.0  ;;  %v7047_v33 = vpop.f32.mrb[32].mxu0  ;;  %v1653_v17 = vpop.f32.mrb[33].mxu1 }
 0x22c   : > { %v4244_v45 = vadd.f32 %v4243_v3, %v4242_v13  ;;  %v8715_v54 = vadd.f32 %v7047_v33, %v6783_v16  ;;  %v3672_v6 = vpop.f32.mrb[33].mxu0  ;;  %v6784_v25 = vpop.f32.mrb[34].mxu1  ;;  %v4633_v52 = vadd.f32 %v4632_v43, %v4631_v58 }
 0x22d   : > { %v8719_v59 = vadd.f32 %v3672_v6, %v1653_v17  ;;  %v7048_v47 = vpop.f32.mrb[34].mxu0  ;;  %v1656_v14 = vpop.f32.mrb[35].mxu1 }
 0x22e   : > { %v4246_v20 = vadd.f32 %v4245_v44, %v4244_v45  ;;  %v8722_v49 = vadd.f32 %v7048_v47, %v6784_v25  ;;  %v3675_v4 = vpop.f32.mrb[35].mxu0  ;;  %v4635_v36 = vadd.f32 %v4634_v7, %v4633_v52  ;;  %v4481_v1 = vmul.f32 %v8715_v54, %v8715_v54 }
 0x22f   : > { %v4247_v29 = vsel %vm4183_vm2, %v8719_v59, 0.0  ;;  %v4479_v11 = vmul.f32 %v8719_v59, %v8719_v59  ;;  %v8728_v22 = vadd.f32 %v3675_v4, %v1656_v14  ;;  %v4251_v3 = vsel %vm4183_vm2, %v8715_v54, 0.0 }
 0x230   : > { %v4248_v46 = vadd.f32 %v4247_v29, %v4246_v20  ;;  %v4637_v31 = vadd.f32 %v4636_v28, %v4635_v36  ;;  %v4482_v62 = vmul.f32 %v8722_v49, %v8722_v49  ;;  %v4253_v52 = vsel %vm4183_vm2, %v8722_v49, 0.0 }
 0x231   : > { %v4638_v53 = vsel %vm4183_vm2, %v4479_v11, 0.0  ;;  %v4249_v9 = vsel %vm4183_vm2, %v8728_v22, 0.0  ;;  %v4480_v21 = vmul.f32 %v8728_v22, %v8728_v22  ;;  %v4642_v4 = vsel %vm4183_vm2, %v4481_v1, 0.0 }
 0x232   : > { %v4250_v13 = vadd.f32 %v4249_v9, %v4248_v46  ;;  %v6787_v16 = vpop.f32.mrb[36].mxu1  ;;  %v4639_v58 = vadd.f32 %v4638_v53, %v4637_v31  ;;  %v4644_v9 = vsel %vm4183_vm2, %v4482_v62, 0.0 }
 0x233   : > { %v4640_v43 = vsel %vm4183_vm2, %v4480_v21, 0.0  ;;  %v7051_v33 = vpop.f32.mrb[36].mxu0  ;;  %v1669_v17 = vpop.f32.mrb[37].mxu1 }
 0x234   : > { %v4252_v45 = vadd.f32 %v4251_v3, %v4250_v13  ;;  %v8743_v6 = vadd.f32 %v7051_v33, %v6787_v16  ;;  %v3688_v25 = vpop.f32.mrb[37].mxu0  ;;  %v6788_v44 = vpop.f32.mrb[38].mxu1  ;;  %v4641_v47 = vadd.f32 %v4640_v43, %v4639_v58 }
 0x235   : > { %v8747_v14 = vadd.f32 %v3688_v25, %v1669_v17  ;;  %v7052_v7 = vpop.f32.mrb[38].mxu0  ;;  %v1672_v20 = vpop.f32.mrb[39].mxu1 }
 0x236   : > { %9913 = vst [vmem:[#allocation2_spill] sm:$0xff] %v8743_v6  ;;  %v4254_v36 = vadd.f32 %v4253_v52, %v4252_v45  ;;  %v8750_v29 = vadd.f32 %v7052_v7, %v6788_v44  ;;  %v3691_v11 = vpop.f32.mrb[39].mxu0  ;;  %v4643_v28 = vadd.f32 %v4642_v4, %v4641_v47  ;;  %v4485_v58 = vmul.f32 %v8743_v6, %v8743_v6 }
 0x237   : > { %9914 = vst [vmem:[#allocation3_spill] sm:$0xff] %v8747_v14  ;;  %v4255_v46 = vsel %vm4183_vm2, %v8747_v14, 0.0  ;;  %v4483_v31 = vmul.f32 %v8747_v14, %v8747_v14  ;;  %v8756_v53 = vadd.f32 %v3691_v11, %v1672_v20  ;;  %v4259_v17 = vsel %vm4183_vm2, %v8743_v6, 0.0 }
 0x238   : > { %9915 = vst [vmem:[#allocation4_spill] sm:$0xff] %v8750_v29  ;;  %v4256_v21 = vadd.f32 %v4255_v46, %v4254_v36  ;;  %v4645_v13 = vadd.f32 %v4644_v9, %v4643_v28  ;;  %v4486_v52 = vmul.f32 %v8750_v29, %v8750_v29  ;;  %v4261_v36 = vsel %vm4183_vm2, %v8750_v29, 0.0 }
 0x239   : > { %9916 = vst [vmem:[#allocation5_spill] sm:$0xff] %v8756_v53  ;;  %v4646_v16 = vsel %vm4183_vm2, %v4483_v31, 0.0  ;;  %v4257_v1 = vsel %vm4183_vm2, %v8756_v53, 0.0  ;;  %v4484_v3 = vmul.f32 %v8756_v53, %v8756_v53  ;;  %v4650_v9 = vsel %vm4183_vm2, %v4485_v58, 0.0 }
 0x23a   : > { %v4258_v43 = vadd.f32 %v4257_v1, %v4256_v21  ;;  %v6791_v33 = vpop.f32.mrb[40].mxu1  ;;  %v4647_v45 = vadd.f32 %v4646_v16, %v4645_v13 }
 0x23b   : > { %v4648_v62 = vsel %vm4183_vm2, %v4484_v3, 0.0  ;;  %v7055_v25 = vpop.f32.mrb[40].mxu0  ;;  %v1685_v44 = vpop.f32.mrb[41].mxu1 }
 0x23c   : > { %v4260_v47 = vadd.f32 %v4259_v17, %v4258_v43  ;;  %v8771_v7 = vadd.f32 %v7055_v25, %v6791_v33  ;;  %v3704_v20 = vpop.f32.mrb[41].mxu0  ;;  %v6792_v4 = vpop.f32.mrb[42].mxu1  ;;  %v4649_v11 = vadd.f32 %v4648_v62, %v4647_v45  ;;  %v4652_v17 = vsel %vm4183_vm2, %v4486_v52, 0.0 }
 0x23d   : > { %v8775_v28 = vadd.f32 %v3704_v20, %v1685_v44  ;;  %v7056_v46 = vpop.f32.mrb[42].mxu0  ;;  %v1688_v31 = vpop.f32.mrb[43].mxu1 }
 0x23e   : > { %9917 = vst [vmem:[#allocation6_spill] sm:$0xff] %v8771_v7  ;;  %v4262_v21 = vadd.f32 %v4261_v36, %v4260_v47  ;;  %v8778_v13 = vadd.f32 %v7056_v46, %v6792_v4  ;;  %v3707_v16 = vpop.f32.mrb[43].mxu0  ;;  %v4651_v1 = vadd.f32 %v4650_v9, %v4649_v11  ;;  %v4489_v47 = vmul.f32 %v8771_v7, %v8771_v7 }
 0x23f   : > { %9918 = vst [vmem:[#allocation7_spill] sm:$0xff] %v8775_v28  ;;  %v4263_v3 = vsel %vm4183_vm2, %v8775_v28, 0.0  ;;  %v4487_v43 = vmul.f32 %v8775_v28, %v8775_v28  ;;  %v8784_v33 = vadd.f32 %v3707_v16, %v1688_v31  ;;  %v4267_v36 = vsel %vm4183_vm2, %v8771_v7, 0.0 }
 0x240   : > { %9919 = vst [vmem:[#allocation8_spill] sm:$0xff] %v8778_v13  ;;  %v4264_v45 = vadd.f32 %v4263_v3, %v4262_v21  ;;  %v4653_v62 = vadd.f32 %v4652_v17, %v4651_v1  ;;  %v4490_v9 = vmul.f32 %v8778_v13, %v8778_v13 }
 0x241   : > { %9920 = vst [vmem:[#allocation9_spill] sm:$0xff] %v8784_v33  ;;  %v4654_v25 = vsel %vm4183_vm2, %v4487_v43, 0.0  ;;  %v4265_v58 = vsel %vm4183_vm2, %v8784_v33, 0.0  ;;  %v4488_v44 = vmul.f32 %v8784_v33, %v8784_v33  ;;  %v4269_v43 = vsel %vm4183_vm2, %v8778_v13, 0.0 }
 0x242   : > { %v4266_v20 = vadd.f32 %v4265_v58, %v4264_v45  ;;  %v6795_v4 = vpop.f32.mrb[44].mxu1  ;;  %v4655_v11 = vadd.f32 %v4654_v25, %v4653_v62  ;;  %v4658_v25 = vsel %vm4183_vm2, %v4489_v47, 0.0 }
 0x243   : > { %v4656_v52 = vsel %vm4183_vm2, %v4488_v44, 0.0  ;;  %v7059_v46 = vpop.f32.mrb[44].mxu0  ;;  %v1701_v31 = vpop.f32.mrb[45].mxu1 }
 0x244   : > { %v4268_v21 = vadd.f32 %v4267_v36, %v4266_v20  ;;  %v8799_v16 = vadd.f32 %v7059_v46, %v6795_v4  ;;  %v3720_v1 = vpop.f32.mrb[45].mxu0  ;;  %v6796_v3 = vpop.f32.mrb[46].mxu1  ;;  %v4657_v17 = vadd.f32 %v4656_v52, %v4655_v11  ;;  %v4660_v11 = vsel %vm4183_vm2, %v4490_v9, 0.0 }
 0x245   : > { %v8803_v45 = vadd.f32 %v3720_v1, %v1701_v31  ;;  %v7060_v58 = vpop.f32.mrb[46].mxu0  ;;  %v1704_v62 = vpop.f32.mrb[47].mxu1 }
 0x246   : > { %9921 = vst [vmem:[#allocation10_spill] sm:$0xff] %v8799_v16  ;;  %v4270_v44 = vadd.f32 %v4269_v43, %v4268_v21  ;;  %v8806_v7 = vadd.f32 %v7060_v58, %v6796_v3  ;;  %v3723_v33 = vpop.f32.mrb[47].mxu0  ;;  %v4659_v28 = vadd.f32 %v4658_v25, %v4657_v17  ;;  %v4493_v1 = vmul.f32 %v8799_v16, %v8799_v16 }
 0x247   : > { %9922 = vst [vmem:[#allocation11_spill] sm:$0xff] %v8803_v45  ;;  %v4271_v20 = vsel %vm4183_vm2, %v8803_v45, 0.0  ;;  %v4491_v4 = vmul.f32 %v8803_v45, %v8803_v45  ;;  %v8812_v36 = vadd.f32 %v3723_v33, %v1704_v62  ;;  %v4275_v33 = vsel %vm4183_vm2, %v8799_v16, 0.0 }
 0x248   : > { %9923 = vst [vmem:[#allocation12_spill] sm:$0xff] %v8806_v7  ;;  %v4272_v52 = vadd.f32 %v4271_v20, %v4270_v44  ;;  %v4661_v46 = vadd.f32 %v4660_v11, %v4659_v28  ;;  %v4494_v62 = vmul.f32 %v8806_v7, %v8806_v7  ;;  %v4277_v11 = vsel %vm4183_vm2, %v8806_v7, 0.0 }
 0x249   : > { %9924 = vst [vmem:[#allocation13_spill] sm:$0xff] %v8812_v36  ;;  %v4662_v31 = vsel %vm4183_vm2, %v4491_v4, 0.0  ;;  %v4273_v47 = vsel %vm4183_vm2, %v8812_v36, 0.0  ;;  %v4492_v21 = vmul.f32 %v8812_v36, %v8812_v36 }
 0x24a   : > { %v4274_v3 = vadd.f32 %v4273_v47, %v4272_v52  ;;  %v6799_v43 = vpop.f32.mrb[48].mxu1  ;;  %v4663_v17 = vadd.f32 %v4662_v31, %v4661_v46  ;;  %v4666_v31 = vsel %vm4183_vm2, %v4493_v1, 0.0 }
 0x24b   : > { %v4664_v9 = vsel %vm4183_vm2, %v4492_v21, 0.0  ;;  %v7063_v28 = vpop.f32.mrb[48].mxu0  ;;  %v1717_v58 = vpop.f32.mrb[49].mxu1 }
 0x24c   : > { %v4276_v25 = vadd.f32 %v4275_v33, %v4274_v3  ;;  %v8827_v44 = vadd.f32 %v7063_v28, %v6799_v43  ;;  %v3736_v20 = vpop.f32.mrb[49].mxu0  ;;  %v6800_v4 = vpop.f32.mrb[50].mxu1  ;;  %v4665_v52 = vadd.f32 %v4664_v9, %v4663_v17  ;;  %v4668_v17 = vsel %vm4183_vm2, %v4494_v62, 0.0 }
 0x24d   : > { %v8831_v47 = vadd.f32 %v3736_v20, %v1717_v58  ;;  %v7064_v16 = vpop.f32.mrb[50].mxu0  ;;  %v1720_v46 = vpop.f32.mrb[51].mxu1 }
 0x24e   : > { %v4278_v21 = vadd.f32 %v4277_v11, %v4276_v25  ;;  %v8834_v36 = vadd.f32 %v7064_v16, %v6800_v4  ;;  %v3739_v45 = vpop.f32.mrb[51].mxu0  ;;  %v4667_v13 = vadd.f32 %v4666_v31, %v4665_v52  ;;  %v4497_v25 = vmul.f32 %v8827_v44, %v8827_v44 }
 0x24f   : > { %v4279_v3 = vsel %vm4183_vm2, %v8831_v47, 0.0  ;;  %v4495_v43 = vmul.f32 %v8831_v47, %v8831_v47  ;;  %v8840_v33 = vadd.f32 %v3739_v45, %v1720_v46  ;;  %v4283_v45 = vsel %vm4183_vm2, %v8827_v44, 0.0 }
 0x250   : > { %9925 = vst [vmem:[#allocation14_spill] sm:$0xff] %v8834_v36  ;;  %v4280_v9 = vadd.f32 %v4279_v3, %v4278_v21  ;;  %v4669_v28 = vadd.f32 %v4668_v17, %v4667_v13  ;;  %v4498_v46 = vmul.f32 %v8834_v36, %v8834_v36  ;;  %v4285_v17 = vsel %vm4183_vm2, %v8834_v36, 0.0 }
 0x251   : > { %v4670_v58 = vsel %vm4183_vm2, %v4495_v43, 0.0  ;;  %v4281_v16 = vsel %vm4183_vm2, %v8840_v33, 0.0  ;;  %v4496_v1 = vmul.f32 %v8840_v33, %v8840_v33 }
 0x252   : > { %v4282_v20 = vadd.f32 %v4281_v16, %v4280_v9  ;;  %v6803_v4 = vpop.f32.mrb[52].mxu1  ;;  %v4671_v11 = vadd.f32 %v4670_v58, %v4669_v28  ;;  %v4674_v58 = vsel %vm4183_vm2, %v4497_v25, 0.0 }
 0x253   : > { %v4672_v62 = vsel %vm4183_vm2, %v4496_v1, 0.0  ;;  %v7067_v13 = vpop.f32.mrb[52].mxu0  ;;  %v1733_v52 = vpop.f32.mrb[53].mxu1 }
 0x254   : > { %v4284_v31 = vadd.f32 %v4283_v45, %v4282_v20  ;;  %v8855_v21 = vadd.f32 %v7067_v13, %v6803_v4  ;;  %v3752_v3 = vpop.f32.mrb[53].mxu0  ;;  %v6804_v43 = vpop.f32.mrb[54].mxu1  ;;  %v4673_v9 = vadd.f32 %v4672_v62, %v4671_v11  ;;  %v4676_v11 = vsel %vm4183_vm2, %v4498_v46, 0.0 }
 0x255   : > { %v8859_v16 = vadd.f32 %v3752_v3, %v1733_v52  ;;  %v7068_v7 = vpop.f32.mrb[54].mxu0  ;;  %v1736_v28 = vpop.f32.mrb[55].mxu1 }
 0x256   : > { %9926 = vst [vmem:[#allocation15_spill] sm:$0xff] %v8855_v21  ;;  %v4286_v1 = vadd.f32 %v4285_v17, %v4284_v31  ;;  %v8862_v29 = vadd.f32 %v7068_v7, %v6804_v43  ;;  %v3755_v6 = vpop.f32.mrb[55].mxu0  ;;  %v4675_v53 = vadd.f32 %v4674_v58, %v4673_v9  ;;  %v4501_v31 = vmul.f32 %v8855_v21, %v8855_v21 }
 0x257   : > { %9927 = vst [vmem:[#allocation16_spill] sm:$0xff] %v8859_v16  ;;  %v4287_v20 = vsel %vm4183_vm2, %v8859_v16, 0.0  ;;  %v4499_v4 = vmul.f32 %v8859_v16, %v8859_v16  ;;  %v8868_v45 = vadd.f32 %v3755_v6, %v1736_v28  ;;  %v4291_v6 = vsel %vm4183_vm2, %v8855_v21, 0.0 }
 0x258   : > { %9928 = vst [vmem:[#allocation17_spill] sm:$0xff] %v8862_v29  ;;  %v4288_v62 = vadd.f32 %v4287_v20, %v4286_v1  ;;  %v4677_v13 = vadd.f32 %v4676_v11, %v4675_v53  ;;  %v4502_v28 = vmul.f32 %v8862_v29, %v8862_v29  ;;  %v4293_v11 = vsel %vm4183_vm2, %v8862_v29, 0.0 }
 0x259   : > { %9929 = vst [vmem:[#allocation18_spill] sm:$0xff] %v8868_v45  ;;  %v4678_v52 = vsel %vm4183_vm2, %v4499_v4, 0.0  ;;  %v4289_v7 = vsel %vm4183_vm2, %v8868_v45, 0.0  ;;  %v4500_v25 = vmul.f32 %v8868_v45, %v8868_v45 }
 0x25a   : > { %v4290_v3 = vadd.f32 %v4289_v7, %v4288_v62  ;;  %v6807_v43 = vpop.f32.mrb[56].mxu1  ;;  %v4679_v17 = vadd.f32 %v4678_v52, %v4677_v13  ;;  %v4682_v52 = vsel %vm4183_vm2, %v4501_v31, 0.0 }
 0x25b   : > { %v4680_v46 = vsel %vm4183_vm2, %v4500_v25, 0.0  ;;  %v7071_v53 = vpop.f32.mrb[56].mxu0  ;;  %v1749_v9 = vpop.f32.mrb[57].mxu1 }
 0x25c   : > { %v4292_v58 = vadd.f32 %v4291_v6, %v4290_v3  ;;  %v8883_v1 = vadd.f32 %v7071_v53, %v6807_v43  ;;  %v3768_v20 = vpop.f32.mrb[57].mxu0  ;;  %v6808_v4 = vpop.f32.mrb[58].mxu1  ;;  %v4681_v62 = vadd.f32 %v4680_v46, %v4679_v17  ;;  %v4684_v17 = vsel %vm4183_vm2, %v4502_v28, 0.0 }
 0x25d   : > { %v8887_v7 = vadd.f32 %v3768_v20, %v1749_v9  ;;  %v7072_v21 = vpop.f32.mrb[58].mxu0  ;;  %v1752_v13 = vpop.f32.mrb[59].mxu1 }
 0x25e   : > { %9930 = vst [vmem:[#allocation19_spill] sm:$0xff] %v8883_v1  ;;  %v4294_v25 = vadd.f32 %v4293_v11, %v4292_v58  ;;  %v8890_v45 = vadd.f32 %v7072_v21, %v6808_v4  ;;  %v3771_v16 = vpop.f32.mrb[59].mxu0  ;;  %v4683_v14 = vadd.f32 %v4682_v52, %v4681_v62  ;;  %v4505_v58 = vmul.f32 %v8883_v1, %v8883_v1 }
 0x25f   : > { %9931 = vst [vmem:[#allocation20_spill] sm:$0xff] %v8887_v7  ;;  %v4295_v3 = vsel %vm4183_vm2, %v8887_v7, 0.0  ;;  %v4503_v43 = vmul.f32 %v8887_v7, %v8887_v7  ;;  %v8896_v6 = vadd.f32 %v3771_v16, %v1752_v13  ;;  %v4299_v16 = vsel %vm4183_vm2, %v8883_v1, 0.0 }
 0x260   : > { %9932 = vst [vmem:[#allocation21_spill] sm:$0xff] %v8890_v45  ;;  %v4296_v46 = vadd.f32 %v4295_v3, %v4294_v25  ;;  %v4685_v53 = vadd.f32 %v4684_v17, %v4683_v14  ;;  %v4506_v13 = vmul.f32 %v8890_v45, %v8890_v45  ;;  %v4301_v17 = vsel %vm4183_vm2, %v8890_v45, 0.0 }
 0x261   : > { %9933 = vst [vmem:[#allocation22_spill] sm:$0xff] %v8896_v6  ;;  %v4686_v9 = vsel %vm4183_vm2, %v4503_v43, 0.0  ;;  %v4297_v21 = vsel %vm4183_vm2, %v8896_v6, 0.0  ;;  %v4504_v31 = vmul.f32 %v8896_v6, %v8896_v6 }
 0x262   : > { %v4298_v20 = vadd.f32 %v4297_v21, %v4296_v46  ;;  %v6811_v4 = vpop.f32.mrb[60].mxu1  ;;  %v4687_v11 = vadd.f32 %v4686_v9, %v4685_v53  ;;  %v4690_v9 = vsel %vm4183_vm2, %v4505_v58, 0.0 }
 0x263   : > { %v4688_v28 = vsel %vm4183_vm2, %v4504_v31, 0.0  ;;  %v7075_v14 = vpop.f32.mrb[60].mxu0  ;;  %v1765_v62 = vpop.f32.mrb[61].mxu1 }
 0x264   : > { %v4300_v52 = vadd.f32 %v4299_v16, %v4298_v20  ;;  %v8911_v25 = vadd.f32 %v7075_v14, %v6811_v4  ;;  %v3784_v3 = vpop.f32.mrb[61].mxu0  ;;  %v6812_v43 = vpop.f32.mrb[62].mxu1  ;;  %v4689_v46 = vadd.f32 %v4688_v28, %v4687_v11  ;;  %v4692_v11 = vsel %vm4183_vm2, %v4506_v13, 0.0 }
 0x265   : > { %v8915_v21 = vadd.f32 %v3784_v3, %v1765_v62  ;;  %v7076_v1 = vpop.f32.mrb[62].mxu0  ;;  %v1768_v53 = vpop.f32.mrb[63].mxu1 }
 0x266   : > { %9934 = vst [vmem:[#allocation23_spill] sm:$0xff] %v8911_v25  ;;  %v4302_v31 = vadd.f32 %v4301_v17, %v4300_v52  ;;  %v8918_v6 = vadd.f32 %v7076_v1, %v6812_v43  ;;  %v3787_v7 = vpop.f32.mrb[63].mxu0  ;;  %v4691_v29 = vadd.f32 %v4690_v9, %v4689_v46  ;;  %v4509_v52 = vmul.f32 %v8911_v25, %v8911_v25 }
 0x267   : > { %9935 = vst [vmem:[#allocation24_spill] sm:$0xff] %v8915_v21  ;;  %v4303_v20 = vsel %vm4183_vm2, %v8915_v21, 0.0  ;;  %v4507_v4 = vmul.f32 %v8915_v21, %v8915_v21  ;;  %v8924_v16 = vadd.f32 %v3787_v7, %v1768_v53  ;;  %v4307_v7 = vsel %vm4183_vm2, %v8911_v25, 0.0 }
 0x268   : > { %9936 = vst [vmem:[#allocation25_spill] sm:$0xff] %v8918_v6  ;;  %v4304_v28 = vadd.f32 %v4303_v20, %v4302_v31  ;;  %v4693_v14 = vadd.f32 %v4692_v11, %v4691_v29  ;;  %v4510_v53 = vmul.f32 %v8918_v6, %v8918_v6  ;;  %v4309_v11 = vsel %vm4183_vm2, %v8918_v6, 0.0 }
 0x269   : > { %9937 = vst [vmem:[#allocation26_spill] sm:$0xff] %v8924_v16  ;;  %v4694_v62 = vsel %vm4183_vm2, %v4507_v4, 0.0  ;;  %v4305_v1 = vsel %vm4183_vm2, %v8924_v16, 0.0  ;;  %v4508_v58 = vmul.f32 %v8924_v16, %v8924_v16 }
 0x26a   : > { %v4306_v3 = vadd.f32 %v4305_v1, %v4304_v28  ;;  %v6815_v43 = vpop.f32.mrb[64].mxu1  ;;  %v4695_v17 = vadd.f32 %v4694_v62, %v4693_v14  ;;  %v4698_v62 = vsel %vm4183_vm2, %v4509_v52, 0.0 }
 0x26b   : > { %v4696_v13 = vsel %vm4183_vm2, %v4508_v58, 0.0  ;;  %v7079_v29 = vpop.f32.mrb[64].mxu0  ;;  %v1781_v46 = vpop.f32.mrb[65].mxu1 }
 0x26c   : > { %v4308_v9 = vadd.f32 %v4307_v7, %v4306_v3  ;;  %v8939_v31 = vadd.f32 %v7079_v29, %v6815_v43  ;;  %v3800_v20 = vpop.f32.mrb[65].mxu0  ;;  %v6816_v4 = vpop.f32.mrb[66].mxu1  ;;  %v4697_v28 = vadd.f32 %v4696_v13, %v4695_v17  ;;  %v4700_v17 = vsel %vm4183_vm2, %v4510_v53, 0.0 }
 0x26d   : > { %v8943_v1 = vadd.f32 %v3800_v20, %v1781_v46  ;;  %v7080_v25 = vpop.f32.mrb[66].mxu0  ;;  %v1784_v14 = vpop.f32.mrb[67].mxu1 }
 0x26e   : > { %9938 = vst [vmem:[#allocation27_spill] sm:$0xff] %v8939_v31  ;;  %v4310_v58 = vadd.f32 %v4309_v11, %v4308_v9  ;;  %v8946_v16 = vadd.f32 %v7080_v25, %v6816_v4  ;;  %v3803_v21 = vpop.f32.mrb[67].mxu0  ;;  %v4699_v45 = vadd.f32 %v4698_v62, %v4697_v28  ;;  %v4513_v9 = vmul.f32 %v8939_v31, %v8939_v31 }
 0x26f   : > { %9939 = vst [vmem:[#allocation28_spill] sm:$0xff] %v8943_v1  ;;  %v4311_v3 = vsel %vm4183_vm2, %v8943_v1, 0.0  ;;  %v4511_v43 = vmul.f32 %v8943_v1, %v8943_v1  ;;  %v8952_v7 = vadd.f32 %v3803_v21, %v1784_v14  ;;  %v4315_v21 = vsel %vm4183_vm2, %v8939_v31, 0.0 }
 0x270   : > { %9940 = vst [vmem:[#allocation29_spill] sm:$0xff] %v8946_v16  ;;  %v4312_v13 = vadd.f32 %v4311_v3, %v4310_v58  ;;  %v4701_v29 = vadd.f32 %v4700_v17, %v4699_v45  ;;  %v4514_v14 = vmul.f32 %v8946_v16, %v8946_v16  ;;  %v4317_v17 = vsel %vm4183_vm2, %v8946_v16, 0.0 }
 0x271   : > { %9941 = vst [vmem:[#allocation30_spill] sm:$0xff] %v8952_v7  ;;  %v4702_v46 = vsel %vm4183_vm2, %v4511_v43, 0.0  ;;  %v4313_v25 = vsel %vm4183_vm2, %v8952_v7, 0.0  ;;  %v4512_v52 = vmul.f32 %v8952_v7, %v8952_v7 }
 0x272   : > { %v4314_v20 = vadd.f32 %v4313_v25, %v4312_v13  ;;  %v6819_v4 = vpop.f32.mrb[68].mxu1  ;;  %v4703_v11 = vadd.f32 %v4702_v46, %v4701_v29  ;;  %v4706_v46 = vsel %vm4183_vm2, %v4513_v9, 0.0 }
 0x273   : > { %v4704_v53 = vsel %vm4183_vm2, %v4512_v52, 0.0  ;;  %v7083_v45 = vpop.f32.mrb[68].mxu0  ;;  %v1797_v28 = vpop.f32.mrb[69].mxu1 }
 0x274   : > { %v4316_v62 = vadd.f32 %v4315_v21, %v4314_v20  ;;  %v8967_v58 = vadd.f32 %v7083_v45, %v6819_v4  ;;  %v3816_v3 = vpop.f32.mrb[69].mxu0  ;;  %v6820_v43 = vpop.f32.mrb[70].mxu1  ;;  %v4705_v13 = vadd.f32 %v4704_v53, %v4703_v11  ;;  %v4708_v11 = vsel %vm4183_vm2, %v4514_v14, 0.0 }
 0x275   : > { %v8971_v25 = vadd.f32 %v3816_v3, %v1797_v28  ;;  %v7084_v31 = vpop.f32.mrb[70].mxu0  ;;  %v1800_v29 = vpop.f32.mrb[71].mxu1 }
 0x276   : > { %9942 = vst [vmem:[#allocation31_spill] sm:$0xff] %v8967_v58  ;;  %v4318_v52 = vadd.f32 %v4317_v17, %v4316_v62  ;;  %v8974_v7 = vadd.f32 %v7084_v31, %v6820_v43  ;;  %v3819_v1 = vpop.f32.mrb[71].mxu0  ;;  %v4707_v6 = vadd.f32 %v4706_v46, %v4705_v13  ;;  %v4517_v62 = vmul.f32 %v8967_v58, %v8967_v58 }
 0x277   : > { %9943 = vst [vmem:[#allocation32_spill] sm:$0xff] %v8971_v25  ;;  %v4319_v20 = vsel %vm4183_vm2, %v8971_v25, 0.0  ;;  %v4515_v4 = vmul.f32 %v8971_v25, %v8971_v25  ;;  %v8980_v21 = vadd.f32 %v3819_v1, %v1800_v29  ;;  %v4323_v1 = vsel %vm4183_vm2, %v8967_v58, 0.0 }
 0x278   : > { %9944 = vst [vmem:[#allocation33_spill] sm:$0xff] %v8974_v7  ;;  %v4320_v53 = vadd.f32 %v4319_v20, %v4318_v52  ;;  %v4709_v45 = vadd.f32 %v4708_v11, %v4707_v6  ;;  %v4518_v29 = vmul.f32 %v8974_v7, %v8974_v7  ;;  %v4325_v11 = vsel %vm4183_vm2, %v8974_v7, 0.0 }
 0x279   : > { %9945 = vst [vmem:[#allocation34_spill] sm:$0xff] %v8980_v21  ;;  %v4710_v28 = vsel %vm4183_vm2, %v4515_v4, 0.0  ;;  %v4321_v31 = vsel %vm4183_vm2, %v8980_v21, 0.0  ;;  %v4516_v9 = vmul.f32 %v8980_v21, %v8980_v21 }
 0x27a   : > { %v4322_v3 = vadd.f32 %v4321_v31, %v4320_v53  ;;  %v6823_v43 = vpop.f32.mrb[72].mxu1  ;;  %v4711_v17 = vadd.f32 %v4710_v28, %v4709_v45  ;;  %v4714_v28 = vsel %vm4183_vm2, %v4517_v62, 0.0 }
 0x27b   : > { %v4712_v14 = vsel %vm4183_vm2, %v4516_v9, 0.0  ;;  %v7087_v6 = vpop.f32.mrb[72].mxu0  ;;  %v1813_v13 = vpop.f32.mrb[73].mxu1 }
 0x27c   : > { %v4324_v46 = vadd.f32 %v4323_v1, %v4322_v3  ;;  %v8995_v52 = vadd.f32 %v7087_v6, %v6823_v43  ;;  %v3832_v20 = vpop.f32.mrb[73].mxu0  ;;  %v6824_v4 = vpop.f32.mrb[74].mxu1  ;;  %v4713_v53 = vadd.f32 %v4712_v14, %v4711_v17  ;;  %v4716_v17 = vsel %vm4183_vm2, %v4518_v29, 0.0 }
 0x27d   : > { %v8999_v31 = vadd.f32 %v3832_v20, %v1813_v13  ;;  %v7088_v58 = vpop.f32.mrb[74].mxu0  ;;  %v1816_v45 = vpop.f32.mrb[75].mxu1 }
 0x27e   : > { %9946 = vst [vmem:[#allocation35_spill] sm:$0xff] %v8995_v52  ;;  %v4326_v9 = vadd.f32 %v4325_v11, %v4324_v46  ;;  %v9002_v21 = vadd.f32 %v7088_v58, %v6824_v4  ;;  %v3835_v25 = vpop.f32.mrb[75].mxu0  ;;  %v4715_v16 = vadd.f32 %v4714_v28, %v4713_v53  ;;  %v4521_v46 = vmul.f32 %v8995_v52, %v8995_v52 }
 0x27f   : > { %9947 = vst [vmem:[#allocation36_spill] sm:$0xff] %v8999_v31  ;;  %v4327_v3 = vsel %vm4183_vm2, %v8999_v31, 0.0  ;;  %v4519_v43 = vmul.f32 %v8999_v31, %v8999_v31  ;;  %v9008_v1 = vadd.f32 %v3835_v25, %v1816_v45  ;;  %v4331_v25 = vsel %vm4183_vm2, %v8995_v52, 0.0 }
 0x280   : > { %9948 = vst [vmem:[#allocation37_spill] sm:$0xff] %v9002_v21  ;;  %v4328_v14 = vadd.f32 %v4327_v3, %v4326_v9  ;;  %v4717_v6 = vadd.f32 %v4716_v17, %v4715_v16  ;;  %v4522_v45 = vmul.f32 %v9002_v21, %v9002_v21  ;;  %v4333_v17 = vsel %vm4183_vm2, %v9002_v21, 0.0 }
 0x281   : > { %9949 = vst [vmem:[#allocation38_spill] sm:$0xff] %v9008_v1  ;;  %v4718_v13 = vsel %vm4183_vm2, %v4519_v43, 0.0  ;;  %v4329_v58 = vsel %vm4183_vm2, %v9008_v1, 0.0  ;;  %v4520_v62 = vmul.f32 %v9008_v1, %v9008_v1 }
 0x282   : > { %v4330_v20 = vadd.f32 %v4329_v58, %v4328_v14  ;;  %v6827_v4 = vpop.f32.mrb[76].mxu1  ;;  %v4719_v11 = vadd.f32 %v4718_v13, %v4717_v6  ;;  %v4722_v13 = vsel %vm4183_vm2, %v4521_v46, 0.0 }
 0x283   : > { %v4720_v29 = vsel %vm4183_vm2, %v4520_v62, 0.0  ;;  %v7091_v16 = vpop.f32.mrb[76].mxu0  ;;  %v1829_v53 = vpop.f32.mrb[77].mxu1 }
 0x284   : > { %v4332_v28 = vadd.f32 %v4331_v25, %v4330_v20  ;;  %v9023_v9 = vadd.f32 %v7091_v16, %v6827_v4  ;;  %v3848_v3 = vpop.f32.mrb[77].mxu0  ;;  %v6828_v43 = vpop.f32.mrb[78].mxu1  ;;  %v4721_v14 = vadd.f32 %v4720_v29, %v4719_v11  ;;  %v4724_v11 = vsel %vm4183_vm2, %v4522_v45, 0.0 }
 0x285   : > { %v9027_v58 = vadd.f32 %v3848_v3, %v1829_v53  ;;  %v7092_v52 = vpop.f32.mrb[78].mxu0  ;;  %v1832_v6 = vpop.f32.mrb[79].mxu1 }
 0x286   : > { %9950 = vst [vmem:[#allocation39_spill] sm:$0xff] %v9023_v9  ;;  %v4334_v62 = vadd.f32 %v4333_v17, %v4332_v28  ;;  %v9030_v1 = vadd.f32 %v7092_v52, %v6828_v43  ;;  %v3851_v31 = vpop.f32.mrb[79].mxu0  ;;  %v4723_v7 = vadd.f32 %v4722_v13, %v4721_v14  ;;  %v4525_v28 = vmul.f32 %v9023_v9, %v9023_v9 }
 0x287   : > { %9951 = vst [vmem:[#allocation40_spill] sm:$0xff] %v9027_v58  ;;  %v4335_v20 = vsel %vm4183_vm2, %v9027_v58, 0.0  ;;  %v4523_v4 = vmul.f32 %v9027_v58, %v9027_v58  ;;  %v9036_v25 = vadd.f32 %v3851_v31, %v1832_v6  ;;  %v4339_v31 = vsel %vm4183_vm2, %v9023_v9, 0.0 }
 0x288   : > { %9952 = vst [vmem:[#allocation41_spill] sm:$0xff] %v9030_v1  ;;  %v4336_v29 = vadd.f32 %v4335_v20, %v4334_v62  ;;  %v4725_v16 = vadd.f32 %v4724_v11, %v4723_v7  ;;  %v4526_v6 = vmul.f32 %v9030_v1, %v9030_v1  ;;  %v4341_v11 = vsel %vm4183_vm2, %v9030_v1, 0.0 }
 0x289   : > { %9953 = vst [vmem:[#allocation42_spill] sm:$0xff] %v9036_v25  ;;  %v4726_v53 = vsel %vm4183_vm2, %v4523_v4, 0.0  ;;  %v4337_v52 = vsel %vm4183_vm2, %v9036_v25, 0.0  ;;  %v4524_v46 = vmul.f32 %v9036_v25, %v9036_v25 }
 0x28a   : > { %v4338_v3 = vadd.f32 %v4337_v52, %v4336_v29  ;;  %v6831_v43 = vpop.f32.mrb[80].mxu1  ;;  %v4727_v17 = vadd.f32 %v4726_v53, %v4725_v16  ;;  %v4730_v53 = vsel %vm4183_vm2, %v4525_v28, 0.0 }
 0x28b   : > { %v4728_v45 = vsel %vm4183_vm2, %v4524_v46, 0.0  ;;  %v7095_v7 = vpop.f32.mrb[80].mxu0  ;;  %v1845_v14 = vpop.f32.mrb[81].mxu1 }
 0x28c   : > { %v4340_v13 = vadd.f32 %v4339_v31, %v4338_v3  ;;  %v9051_v62 = vadd.f32 %v7095_v7, %v6831_v43  ;;  %v3864_v20 = vpop.f32.mrb[81].mxu0  ;;  %v6832_v4 = vpop.f32.mrb[82].mxu1  ;;  %v4729_v29 = vadd.f32 %v4728_v45, %v4727_v17  ;;  %v4732_v17 = vsel %vm4183_vm2, %v4526_v6, 0.0 }
 0x28d   : > { %v9055_v52 = vadd.f32 %v3864_v20, %v1845_v14  ;;  %v7096_v9 = vpop.f32.mrb[82].mxu0  ;;  %v1848_v16 = vpop.f32.mrb[83].mxu1 }
 0x28e   : > { %9954 = vst [vmem:[#allocation43_spill] sm:$0xff] %v9051_v62  ;;  %v4342_v46 = vadd.f32 %v4341_v11, %v4340_v13  ;;  %v9058_v25 = vadd.f32 %v7096_v9, %v6832_v4  ;;  %v3867_v58 = vpop.f32.mrb[83].mxu0  ;;  %v4731_v21 = vadd.f32 %v4730_v53, %v4729_v29  ;;  %v4529_v13 = vmul.f32 %v9051_v62, %v9051_v62 }
 0x28f   : > { %9955 = vst [vmem:[#allocation44_spill] sm:$0xff] %v9055_v52  ;;  %v4343_v3 = vsel %vm4183_vm2, %v9055_v52, 0.0  ;;  %v4527_v43 = vmul.f32 %v9055_v52, %v9055_v52  ;;  %v9064_v31 = vadd.f32 %v3867_v58, %v1848_v16  ;;  %v4347_v58 = vsel %vm4183_vm2, %v9051_v62, 0.0 }
 0x290   : > { %9956 = vst [vmem:[#allocation45_spill] sm:$0xff] %v9058_v25  ;;  %v4344_v45 = vadd.f32 %v4343_v3, %v4342_v46  ;;  %v4733_v7 = vadd.f32 %v4732_v17, %v4731_v21  ;;  %v4530_v16 = vmul.f32 %v9058_v25, %v9058_v25  ;;  %v4349_v17 = vsel %vm4183_vm2, %v9058_v25, 0.0 }
 0x291   : > { %9957 = vst [vmem:[#allocation46_spill] sm:$0xff] %v9064_v31  ;;  %v4734_v14 = vsel %vm4183_vm2, %v4527_v43, 0.0  ;;  %v4345_v9 = vsel %vm4183_vm2, %v9064_v31, 0.0  ;;  %v4528_v28 = vmul.f32 %v9064_v31, %v9064_v31 }
 0x292   : > { %v4346_v20 = vadd.f32 %v4345_v9, %v4344_v45  ;;  %v6835_v4 = vpop.f32.mrb[84].mxu1  ;;  %v4735_v11 = vadd.f32 %v4734_v14, %v4733_v7  ;;  %v4738_v14 = vsel %vm4183_vm2, %v4529_v13, 0.0 }
 0x293   : > { %v4736_v6 = vsel %vm4183_vm2, %v4528_v28, 0.0  ;;  %v7099_v21 = vpop.f32.mrb[84].mxu0  ;;  %v1861_v29 = vpop.f32.mrb[85].mxu1 }
 0x294   : > { %v4348_v53 = vadd.f32 %v4347_v58, %v4346_v20  ;;  %v9079_v46 = vadd.f32 %v7099_v21, %v6835_v4  ;;  %v3880_v3 = vpop.f32.mrb[85].mxu0  ;;  %v6836_v43 = vpop.f32.mrb[86].mxu1  ;;  %v4737_v45 = vadd.f32 %v4736_v6, %v4735_v11  ;;  %v4740_v11 = vsel %vm4183_vm2, %v4530_v16, 0.0 }
 0x295   : > { %v9083_v9 = vadd.f32 %v3880_v3, %v1861_v29  ;;  %v7100_v1 = vpop.f32.mrb[86].mxu0  ;;  %v1864_v7 = vpop.f32.mrb[87].mxu1 }
 0x296   : > { %9958 = vst [vmem:[#allocation47_spill] sm:$0xff] %v9079_v46  ;;  %v4350_v28 = vadd.f32 %v4349_v17, %v4348_v53  ;;  %v9086_v62 = vadd.f32 %v7100_v1, %v6836_v43  ;;  %v3883_v31 = vpop.f32.mrb[87].mxu0  ;;  %v4739_v52 = vadd.f32 %v4738_v14, %v4737_v45  ;;  %v4533_v53 = vmul.f32 %v9079_v46, %v9079_v46 }
 0x297   : > { %9959 = vst [vmem:[#allocation48_spill] sm:$0xff] %v9083_v9  ;;  %v4351_v20 = vsel %vm4183_vm2, %v9083_v9, 0.0  ;;  %v4531_v4 = vmul.f32 %v9083_v9, %v9083_v9  ;;  %v9092_v58 = vadd.f32 %v3883_v31, %v1864_v7  ;;  %v4355_v31 = vsel %vm4183_vm2, %v9079_v46, 0.0 }
 0x298   : > { %9960 = vst [vmem:[#allocation49_spill] sm:$0xff] %v9086_v62  ;;  %v4352_v6 = vadd.f32 %v4351_v20, %v4350_v28  ;;  %v4741_v21 = vadd.f32 %v4740_v11, %v4739_v52  ;;  %v4534_v7 = vmul.f32 %v9086_v62, %v9086_v62  ;;  %v4357_v11 = vsel %vm4183_vm2, %v9086_v62, 0.0 }
 0x299   : > { %9961 = vst [vmem:[#allocation50_spill] sm:$0xff] %v9092_v58  ;;  %v4742_v29 = vsel %vm4183_vm2, %v4531_v4, 0.0  ;;  %v4353_v1 = vsel %vm4183_vm2, %v9092_v58, 0.0  ;;  %v4532_v13 = vmul.f32 %v9092_v58, %v9092_v58 }
 0x29a   : > { %v4354_v3 = vadd.f32 %v4353_v1, %v4352_v6  ;;  %v6839_v43 = vpop.f32.mrb[88].mxu1  ;;  %v4743_v17 = vadd.f32 %v4742_v29, %v4741_v21  ;;  %v4746_v29 = vsel %vm4183_vm2, %v4533_v53, 0.0 }
 0x29b   : > { %v4744_v16 = vsel %vm4183_vm2, %v4532_v13, 0.0  ;;  %v7103_v52 = vpop.f32.mrb[88].mxu0  ;;  %v1877_v45 = vpop.f32.mrb[89].mxu1 }
 0x29c   : > { %v4356_v14 = vadd.f32 %v4355_v31, %v4354_v3  ;;  %v9107_v28 = vadd.f32 %v7103_v52, %v6839_v43  ;;  %v3896_v20 = vpop.f32.mrb[89].mxu0  ;;  %v6840_v4 = vpop.f32.mrb[90].mxu1  ;;  %v4745_v6 = vadd.f32 %v4744_v16, %v4743_v17  ;;  %v4748_v17 = vsel %vm4183_vm2, %v4534_v7, 0.0 }
 0x29d   : > { %v9111_v1 = vadd.f32 %v3896_v20, %v1877_v45  ;;  %v7104_v46 = vpop.f32.mrb[90].mxu0  ;;  %v1880_v21 = vpop.f32.mrb[91].mxu1 }
 0x29e   : > { %9962 = vst [vmem:[#allocation51_spill] sm:$0xff] %v9107_v28  ;;  %v4358_v13 = vadd.f32 %v4357_v11, %v4356_v14  ;;  %v9114_v58 = vadd.f32 %v7104_v46, %v6840_v4  ;;  %v3899_v9 = vpop.f32.mrb[91].mxu0  ;;  %v4747_v25 = vadd.f32 %v4746_v29, %v4745_v6  ;;  %v4537_v14 = vmul.f32 %v9107_v28, %v9107_v28 }
 0x29f   : > { %9963 = vst [vmem:[#allocation52_spill] sm:$0xff] %v9111_v1  ;;  %v4359_v3 = vsel %vm4183_vm2, %v9111_v1, 0.0  ;;  %v4535_v43 = vmul.f32 %v9111_v1, %v9111_v1  ;;  %v9120_v31 = vadd.f32 %v3899_v9, %v1880_v21  ;;  %v4363_v9 = vsel %vm4183_vm2, %v9107_v28, 0.0 }
 0x2a0   : > { %9964 = vst [vmem:[#allocation53_spill] sm:$0xff] %v9114_v58  ;;  %v4360_v16 = vadd.f32 %v4359_v3, %v4358_v13  ;;  %v4749_v52 = vadd.f32 %v4748_v17, %v4747_v25  ;;  %v4538_v21 = vmul.f32 %v9114_v58, %v9114_v58  ;;  %v4365_v17 = vsel %vm4183_vm2, %v9114_v58, 0.0 }
 0x2a1   : > { %9965 = vst [vmem:[#allocation54_spill] sm:$0xff] %v9120_v31  ;;  %v4750_v45 = vsel %vm4183_vm2, %v4535_v43, 0.0  ;;  %v4361_v46 = vsel %vm4183_vm2, %v9120_v31, 0.0  ;;  %v4536_v53 = vmul.f32 %v9120_v31, %v9120_v31 }
 0x2a2   : > { %v4362_v20 = vadd.f32 %v4361_v46, %v4360_v16  ;;  %v6843_v4 = vpop.f32.mrb[92].mxu1  ;;  %v4751_v11 = vadd.f32 %v4750_v45, %v4749_v52  ;;  %v4754_v45 = vsel %vm4183_vm2, %v4537_v14, 0.0 }
 0x2a3   : > { %v4752_v7 = vsel %vm4183_vm2, %v4536_v53, 0.0  ;;  %v7107_v25 = vpop.f32.mrb[92].mxu0  ;;  %v1893_v6 = vpop.f32.mrb[93].mxu1 }
 0x2a4   : > { %v4364_v29 = vadd.f32 %v4363_v9, %v4362_v20  ;;  %v9135_v13 = vadd.f32 %v7107_v25, %v6843_v4  ;;  %v3912_v3 = vpop.f32.mrb[93].mxu0  ;;  %v6844_v43 = vpop.f32.mrb[94].mxu1  ;;  %v4753_v16 = vadd.f32 %v4752_v7, %v4751_v11  ;;  %v4756_v11 = vsel %vm4183_vm2, %v4538_v21, 0.0 }
 0x2a5   : > { %v9139_v46 = vadd.f32 %v3912_v3, %v1893_v6  ;;  %v7108_v28 = vpop.f32.mrb[94].mxu0  ;;  %v1896_v52 = vpop.f32.mrb[95].mxu1 }
 0x2a6   : > { %9966 = vst [vmem:[#allocation55_spill] sm:$0xff] %v9135_v13  ;;  %v4366_v53 = vadd.f32 %v4365_v17, %v4364_v29  ;;  %v9142_v31 = vadd.f32 %v7108_v28, %v6844_v43  ;;  %v3915_v1 = vpop.f32.mrb[95].mxu0  ;;  %v4755_v62 = vadd.f32 %v4754_v45, %v4753_v16  ;;  %v4541_v29 = vmul.f32 %v9135_v13, %v9135_v13 }
 0x2a7   : > { %9967 = vst [vmem:[#allocation56_spill] sm:$0xff] %v9139_v46  ;;  %v4367_v20 = vsel %vm4183_vm2, %v9139_v46, 0.0  ;;  %v4539_v4 = vmul.f32 %v9139_v46, %v9139_v46  ;;  %v9148_v9 = vadd.f32 %v3915_v1, %v1896_v52  ;;  %v4371_v1 = vsel %vm4183_vm2, %v9135_v13, 0.0 }
 0x2a8   : > { %9968 = vst [vmem:[#allocation57_spill] sm:$0xff] %v9142_v31  ;;  %v4368_v7 = vadd.f32 %v4367_v20, %v4366_v53  ;;  %v4757_v25 = vadd.f32 %v4756_v11, %v4755_v62  ;;  %v4542_v52 = vmul.f32 %v9142_v31, %v9142_v31  ;;  %v4373_v11 = vsel %vm4183_vm2, %v9142_v31, 0.0 }
 0x2a9   : > { %9969 = vst [vmem:[#allocation58_spill] sm:$0xff] %v9148_v9  ;;  %v4758_v6 = vsel %vm4183_vm2, %v4539_v4, 0.0  ;;  %v4369_v28 = vsel %vm4183_vm2, %v9148_v9, 0.0  ;;  %v4540_v14 = vmul.f32 %v9148_v9, %v9148_v9 }
 0x2aa   : > { %v4370_v3 = vadd.f32 %v4369_v28, %v4368_v7  ;;  %v6847_v43 = vpop.f32.mrb[96].mxu1  ;;  %v4759_v17 = vadd.f32 %v4758_v6, %v4757_v25  ;;  %v4762_v6 = vsel %vm4183_vm2, %v4541_v29, 0.0 }
 0x2ab   : > { %v4760_v21 = vsel %vm4183_vm2, %v4540_v14, 0.0  ;;  %v7111_v62 = vpop.f32.mrb[96].mxu0  ;;  %v1909_v16 = vpop.f32.mrb[97].mxu1 }
 0x2ac   : > { %v4372_v45 = vadd.f32 %v4371_v1, %v4370_v3  ;;  %v9163_v53 = vadd.f32 %v7111_v62, %v6847_v43  ;;  %v3928_v20 = vpop.f32.mrb[97].mxu0  ;;  %v6848_v4 = vpop.f32.mrb[98].mxu1  ;;  %v4761_v7 = vadd.f32 %v4760_v21, %v4759_v17  ;;  %v4764_v17 = vsel %vm4183_vm2, %v4542_v52, 0.0 }
 0x2ad   : > { %v9167_v28 = vadd.f32 %v3928_v20, %v1909_v16  ;;  %v7112_v13 = vpop.f32.mrb[98].mxu0  ;;  %v1912_v25 = vpop.f32.mrb[99].mxu1 }
 0x2ae   : > { %9970 = vst [vmem:[#allocation59_spill] sm:$0xff] %v9163_v53  ;;  %v4374_v14 = vadd.f32 %v4373_v11, %v4372_v45  ;;  %v9170_v9 = vadd.f32 %v7112_v13, %v6848_v4  ;;  %v3931_v46 = vpop.f32.mrb[99].mxu0  ;;  %v4763_v58 = vadd.f32 %v4762_v6, %v4761_v7  ;;  %v4545_v45 = vmul.f32 %v9163_v53, %v9163_v53 }
 0x2af   : > { %9971 = vst [vmem:[#allocation60_spill] sm:$0xff] %v9167_v28  ;;  %v4375_v3 = vsel %vm4183_vm2, %v9167_v28, 0.0  ;;  %v4543_v43 = vmul.f32 %v9167_v28, %v9167_v28  ;;  %v9176_v1 = vadd.f32 %v3931_v46, %v1912_v25  ;;  %v4379_v46 = vsel %vm4183_vm2, %v9163_v53, 0.0 }
 0x2b0   : > { %9972 = vst [vmem:[#allocation61_spill] sm:$0xff] %v9170_v9  ;;  %v4376_v21 = vadd.f32 %v4375_v3, %v4374_v14  ;;  %v4765_v62 = vadd.f32 %v4764_v17, %v4763_v58  ;;  %v4546_v25 = vmul.f32 %v9170_v9, %v9170_v9  ;;  %v4381_v17 = vsel %vm4183_vm2, %v9170_v9, 0.0 }
 0x2b1   : > { %9973 = vst [vmem:[#allocation62_spill] sm:$0xff] %v9176_v1  ;;  %v4766_v16 = vsel %vm4183_vm2, %v4543_v43, 0.0  ;;  %v4377_v13 = vsel %vm4183_vm2, %v9176_v1, 0.0  ;;  %v4544_v29 = vmul.f32 %v9176_v1, %v9176_v1 }
 0x2b2   : > { %v4378_v20 = vadd.f32 %v4377_v13, %v4376_v21  ;;  %v6851_v4 = vpop.f32.mrb[100].mxu1  ;;  %v4767_v11 = vadd.f32 %v4766_v16, %v4765_v62  ;;  %v4770_v16 = vsel %vm4183_vm2, %v4545_v45, 0.0 }
 0x2b3   : > { %v4768_v52 = vsel %vm4183_vm2, %v4544_v29, 0.0  ;;  %v7115_v58 = vpop.f32.mrb[100].mxu0  ;;  %v1925_v7 = vpop.f32.mrb[101].mxu1 }
 0x2b4   : > { %v4380_v6 = vadd.f32 %v4379_v46, %v4378_v20  ;;  %v9191_v14 = vadd.f32 %v7115_v58, %v6851_v4  ;;  %v3944_v3 = vpop.f32.mrb[101].mxu0  ;;  %v6852_v43 = vpop.f32.mrb[102].mxu1  ;;  %v4769_v21 = vadd.f32 %v4768_v52, %v4767_v11  ;;  %v4772_v11 = vsel %vm4183_vm2, %v4546_v25, 0.0 }
 0x2b5   : > { %v9195_v13 = vadd.f32 %v3944_v3, %v1925_v7  ;;  %v7116_v53 = vpop.f32.mrb[102].mxu0  ;;  %v1928_v62 = vpop.f32.mrb[103].mxu1 }
 0x2b6   : > { %9974 = vst [vmem:[#allocation63_spill] sm:$0xff] %v9191_v14  ;;  %v4382_v29 = vadd.f32 %v4381_v17, %v4380_v6  ;;  %v9198_v1 = vadd.f32 %v7116_v53, %v6852_v43  ;;  %v3947_v28 = vpop.f32.mrb[103].mxu0  ;;  %v4771_v31 = vadd.f32 %v4770_v16, %v4769_v21  ;;  %v4549_v6 = vmul.f32 %v9191_v14, %v9191_v14 }
 0x2b7   : > { %9975 = vst [vmem:[#allocation64_spill] sm:$0xff] %v9195_v13  ;;  %v4383_v20 = vsel %vm4183_vm2, %v9195_v13, 0.0  ;;  %v4547_v4 = vmul.f32 %v9195_v13, %v9195_v13  ;;  %v9204_v46 = vadd.f32 %v3947_v28, %v1928_v62  ;;  %v4387_v28 = vsel %vm4183_vm2, %v9191_v14, 0.0 }
 0x2b8   : > { %9976 = vst [vmem:[#allocation65_spill] sm:$0xff] %v9198_v1  ;;  %v4384_v52 = vadd.f32 %v4383_v20, %v4382_v29  ;;  %v4773_v58 = vadd.f32 %v4772_v11, %v4771_v31  ;;  %v4550_v62 = vmul.f32 %v9198_v1, %v9198_v1  ;;  %v4389_v11 = vsel %vm4183_vm2, %v9198_v1, 0.0 }
 0x2b9   : > { %9977 = vst [vmem:[#allocation66_spill] sm:$0xff] %v9204_v46  ;;  %v4774_v7 = vsel %vm4183_vm2, %v4547_v4, 0.0  ;;  %v4385_v53 = vsel %vm4183_vm2, %v9204_v46, 0.0  ;;  %v4548_v45 = vmul.f32 %v9204_v46, %v9204_v46 }
 0x2ba   : > { %v4386_v3 = vadd.f32 %v4385_v53, %v4384_v52  ;;  %v6855_v43 = vpop.f32.mrb[104].mxu1  ;;  %v4775_v17 = vadd.f32 %v4774_v7, %v4773_v58  ;;  %v4778_v7 = vsel %vm4183_vm2, %v4549_v6, 0.0 }
 0x2bb   : > { %v4776_v25 = vsel %vm4183_vm2, %v4548_v45, 0.0  ;;  %v7119_v31 = vpop.f32.mrb[104].mxu0  ;;  %v1941_v21 = vpop.f32.mrb[105].mxu1 }
 0x2bc   : > { %v4388_v16 = vadd.f32 %v4387_v28, %v4386_v3  ;;  %v9219_v29 = vadd.f32 %v7119_v31, %v6855_v43  ;;  %v3960_v20 = vpop.f32.mrb[105].mxu0  ;;  %v6856_v4 = vpop.f32.mrb[106].mxu1  ;;  %v4777_v52 = vadd.f32 %v4776_v25, %v4775_v17  ;;  %v4780_v17 = vsel %vm4183_vm2, %v4550_v62, 0.0 }
 0x2bd   : > { %v9223_v53 = vadd.f32 %v3960_v20, %v1941_v21  ;;  %v7120_v14 = vpop.f32.mrb[106].mxu0  ;;  %v1944_v58 = vpop.f32.mrb[107].mxu1 }
 0x2be   : > { %9978 = vst [vmem:[#allocation67_spill] sm:$0xff] %v9219_v29  ;;  %v4390_v45 = vadd.f32 %v4389_v11, %v4388_v16  ;;  %v9226_v46 = vadd.f32 %v7120_v14, %v6856_v4  ;;  %v3963_v13 = vpop.f32.mrb[107].mxu0  ;;  %v4779_v9 = vadd.f32 %v4778_v7, %v4777_v52  ;;  %v4553_v16 = vmul.f32 %v9219_v29, %v9219_v29 }
 0x2bf   : > { %9979 = vst [vmem:[#allocation68_spill] sm:$0xff] %v9223_v53  ;;  %v4391_v3 = vsel %vm4183_vm2, %v9223_v53, 0.0  ;;  %v4551_v43 = vmul.f32 %v9223_v53, %v9223_v53  ;;  %v9232_v28 = vadd.f32 %v3963_v13, %v1944_v58  ;;  %v4395_v13 = vsel %vm4183_vm2, %v9219_v29, 0.0 }
 0x2c0   : > { %9980 = vst [vmem:[#allocation69_spill] sm:$0xff] %v9226_v46  ;;  %v4392_v25 = vadd.f32 %v4391_v3, %v4390_v45  ;;  %v4781_v31 = vadd.f32 %v4780_v17, %v4779_v9  ;;  %v4554_v58 = vmul.f32 %v9226_v46, %v9226_v46  ;;  %v4397_v17 = vsel %vm4183_vm2, %v9226_v46, 0.0 }
 0x2c1   : > { %9981 = vst [vmem:[#allocation70_spill] sm:$0xff] %v9232_v28  ;;  %v4782_v21 = vsel %vm4183_vm2, %v4551_v43, 0.0  ;;  %v4393_v14 = vsel %vm4183_vm2, %v9232_v28, 0.0  ;;  %v4552_v6 = vmul.f32 %v9232_v28, %v9232_v28 }
 0x2c2   : > { %v4394_v20 = vadd.f32 %v4393_v14, %v4392_v25  ;;  %v6859_v4 = vpop.f32.mrb[108].mxu1  ;;  %v4783_v11 = vadd.f32 %v4782_v21, %v4781_v31  ;;  %v4786_v21 = vsel %vm4183_vm2, %v4553_v16, 0.0 }
 0x2c3   : > { %v4784_v62 = vsel %vm4183_vm2, %v4552_v6, 0.0  ;;  %v7123_v9 = vpop.f32.mrb[108].mxu0  ;;  %v1957_v52 = vpop.f32.mrb[109].mxu1 }
 0x2c4   : > { %v4396_v7 = vadd.f32 %v4395_v13, %v4394_v20  ;;  %v9247_v45 = vadd.f32 %v7123_v9, %v6859_v4  ;;  %v3976_v3 = vpop.f32.mrb[109].mxu0  ;;  %v6860_v43 = vpop.f32.mrb[110].mxu1  ;;  %v4785_v25 = vadd.f32 %v4784_v62, %v4783_v11  ;;  %v4788_v11 = vsel %vm4183_vm2, %v4554_v58, 0.0 }
 0x2c5   : > { %v9251_v14 = vadd.f32 %v3976_v3, %v1957_v52  ;;  %v7124_v29 = vpop.f32.mrb[110].mxu0  ;;  %v1960_v31 = vpop.f32.mrb[111].mxu1 }
 0x2c6   : > { %9982 = vst [vmem:[#allocation71_spill] sm:$0xff] %v9247_v45  ;;  %v4398_v6 = vadd.f32 %v4397_v17, %v4396_v7  ;;  %v9254_v28 = vadd.f32 %v7124_v29, %v6860_v43  ;;  %v3979_v53 = vpop.f32.mrb[111].mxu0  ;;  %v4787_v1 = vadd.f32 %v4786_v21, %v4785_v25  ;;  %v4557_v7 = vmul.f32 %v9247_v45, %v9247_v45 }
 0x2c7   : > { %9983 = vst [vmem:[#allocation72_spill] sm:$0xff] %v9251_v14  ;;  %v4399_v20 = vsel %vm4183_vm2, %v9251_v14, 0.0  ;;  %v4555_v4 = vmul.f32 %v9251_v14, %v9251_v14  ;;  %v9260_v13 = vadd.f32 %v3979_v53, %v1960_v31  ;;  %v4403_v53 = vsel %vm4183_vm2, %v9247_v45, 0.0 }
 0x2c8   : > { %9984 = vst [vmem:[#allocation73_spill] sm:$0xff] %v9254_v28  ;;  %v4400_v62 = vadd.f32 %v4399_v20, %v4398_v6  ;;  %v4789_v9 = vadd.f32 %v4788_v11, %v4787_v1  ;;  %v4558_v31 = vmul.f32 %v9254_v28, %v9254_v28  ;;  %v4405_v11 = vsel %vm4183_vm2, %v9254_v28, 0.0 }
 0x2c9   : > { %9985 = vst [vmem:[#allocation74_spill] sm:$0xff] %v9260_v13  ;;  %v4790_v52 = vsel %vm4183_vm2, %v4555_v4, 0.0  ;;  %v4401_v29 = vsel %vm4183_vm2, %v9260_v13, 0.0  ;;  %v4556_v16 = vmul.f32 %v9260_v13, %v9260_v13 }
 0x2ca   : > { %v4402_v3 = vadd.f32 %v4401_v29, %v4400_v62  ;;  %v6863_v43 = vpop.f32.mrb[112].mxu1  ;;  %v4791_v17 = vadd.f32 %v4790_v52, %v4789_v9  ;;  %v4794_v52 = vsel %vm4183_vm2, %v4557_v7, 0.0 }
 0x2cb   : > { %v4792_v58 = vsel %vm4183_vm2, %v4556_v16, 0.0  ;;  %v7127_v1 = vpop.f32.mrb[112].mxu0  ;;  %v1973_v25 = vpop.f32.mrb[113].mxu1 }
 0x2cc   : > { %v4404_v21 = vadd.f32 %v4403_v53, %v4402_v3  ;;  %v9275_v6 = vadd.f32 %v7127_v1, %v6863_v43  ;;  %v3992_v20 = vpop.f32.mrb[113].mxu0  ;;  %v6864_v4 = vpop.f32.mrb[114].mxu1  ;;  %v4793_v62 = vadd.f32 %v4792_v58, %v4791_v17  ;;  %v4796_v17 = vsel %vm4183_vm2, %v4558_v31, 0.0 }
 0x2cd   : > { %v9279_v29 = vadd.f32 %v3992_v20, %v1973_v25  ;;  %v7128_v45 = vpop.f32.mrb[114].mxu0  ;;  %v1976_v9 = vpop.f32.mrb[115].mxu1 }
 0x2ce   : > { %9986 = vst [vmem:[#allocation75_spill] sm:$0xff] %v9275_v6  ;;  %v4406_v16 = vadd.f32 %v4405_v11, %v4404_v21  ;;  %v9282_v13 = vadd.f32 %v7128_v45, %v6864_v4  ;;  %v3995_v14 = vpop.f32.mrb[115].mxu0  ;;  %v4795_v46 = vadd.f32 %v4794_v52, %v4793_v62  ;;  %v4561_v21 = vmul.f32 %v9275_v6, %v9275_v6 }
 0x2cf   : > { %9987 = vst [vmem:[#allocation76_spill] sm:$0xff] %v9279_v29  ;;  %v4407_v3 = vsel %vm4183_vm2, %v9279_v29, 0.0  ;;  %v4559_v43 = vmul.f32 %v9279_v29, %v9279_v29  ;;  %v9288_v53 = vadd.f32 %v3995_v14, %v1976_v9  ;;  %v4411_v14 = vsel %vm4183_vm2, %v9275_v6, 0.0 }
 0x2d0   : > { %9988 = vst [vmem:[#allocation77_spill] sm:$0xff] %v9282_v13  ;;  %v4408_v58 = vadd.f32 %v4407_v3, %v4406_v16  ;;  %v4797_v1 = vadd.f32 %v4796_v17, %v4795_v46  ;;  %v4562_v9 = vmul.f32 %v9282_v13, %v9282_v13  ;;  %v4413_v17 = vsel %vm4183_vm2, %v9282_v13, 0.0 }
 0x2d1   : > { %9989 = vst [vmem:[#allocation78_spill] sm:$0xff] %v9288_v53  ;;  %v4798_v25 = vsel %vm4183_vm2, %v4559_v43, 0.0  ;;  %v4409_v45 = vsel %vm4183_vm2, %v9288_v53, 0.0  ;;  %v4560_v7 = vmul.f32 %v9288_v53, %v9288_v53 }
 0x2d2   : > { %v4410_v20 = vadd.f32 %v4409_v45, %v4408_v58  ;;  %v6867_v4 = vpop.f32.mrb[116].mxu1  ;;  %v4799_v11 = vadd.f32 %v4798_v25, %v4797_v1  ;;  %v4802_v25 = vsel %vm4183_vm2, %v4561_v21, 0.0 }
 0x2d3   : > { %v4800_v31 = vsel %vm4183_vm2, %v4560_v7, 0.0  ;;  %v7131_v46 = vpop.f32.mrb[116].mxu0  ;;  %v1989_v62 = vpop.f32.mrb[117].mxu1 }
 0x2d4   : > { %v4412_v52 = vadd.f32 %v4411_v14, %v4410_v20  ;;  %v9303_v16 = vadd.f32 %v7131_v46, %v6867_v4  ;;  %v4008_v3 = vpop.f32.mrb[117].mxu0  ;;  %v6868_v43 = vpop.f32.mrb[118].mxu1  ;;  %v4801_v58 = vadd.f32 %v4800_v31, %v4799_v11  ;;  %v4804_v11 = vsel %vm4183_vm2, %v4562_v9, 0.0 }
 0x2d5   : > { %v9307_v45 = vadd.f32 %v4008_v3, %v1989_v62  ;;  %v7132_v28 = vpop.f32.mrb[118].mxu0  ;;  %v1992_v1 = vpop.f32.mrb[119].mxu1 }
 0x2d6   : > { %9990 = vst [vmem:[#allocation79_spill] sm:$0xff] %v9303_v16  ;;  %v4414_v7 = vadd.f32 %v4413_v17, %v4412_v52  ;;  %v9310_v6 = vadd.f32 %v7132_v28, %v6868_v43  ;;  %v4011_v53 = vpop.f32.mrb[119].mxu0  ;;  %v4803_v29 = vadd.f32 %v4802_v25, %v4801_v58  ;;  %v4565_v52 = vmul.f32 %v9303_v16, %v9303_v16 }
 0x2d7   : > { %9991 = vst [vmem:[#allocation80_spill] sm:$0xff] %v9307_v45  ;;  %v4415_v20 = vsel %vm4183_vm2, %v9307_v45, 0.0  ;;  %v4563_v4 = vmul.f32 %v9307_v45, %v9307_v45  ;;  %v9316_v14 = vadd.f32 %v4011_v53, %v1992_v1  ;;  %v4419_v53 = vsel %vm4183_vm2, %v9303_v16, 0.0 }
 0x2d8   : > { %9992 = vst [vmem:[#allocation81_spill] sm:$0xff] %v9310_v6  ;;  %v4416_v31 = vadd.f32 %v4415_v20, %v4414_v7  ;;  %v4805_v46 = vadd.f32 %v4804_v11, %v4803_v29  ;;  %v4566_v1 = vmul.f32 %v9310_v6, %v9310_v6  ;;  %v4421_v11 = vsel %vm4183_vm2, %v9310_v6, 0.0 }
 0x2d9   : > { %9993 = vst [vmem:[#allocation82_spill] sm:$0xff] %v9316_v14  ;;  %v4806_v62 = vsel %vm4183_vm2, %v4563_v4, 0.0  ;;  %v4417_v28 = vsel %vm4183_vm2, %v9316_v14, 0.0  ;;  %v4564_v21 = vmul.f32 %v9316_v14, %v9316_v14 }
 0x2da   : > { %v4418_v3 = vadd.f32 %v4417_v28, %v4416_v31  ;;  %v6871_v43 = vpop.f32.mrb[120].mxu1  ;;  %v4807_v17 = vadd.f32 %v4806_v62, %v4805_v46  ;;  %v4810_v62 = vsel %vm4183_vm2, %v4565_v52, 0.0 }
 0x2db   : > { %v4808_v9 = vsel %vm4183_vm2, %v4564_v21, 0.0  ;;  %v7135_v29 = vpop.f32.mrb[120].mxu0  ;;  %v2005_v58 = vpop.f32.mrb[121].mxu1 }
 0x2dc   : > { %v4420_v25 = vadd.f32 %v4419_v53, %v4418_v3  ;;  %v9331_v7 = vadd.f32 %v7135_v29, %v6871_v43  ;;  %v4024_v20 = vpop.f32.mrb[121].mxu0  ;;  %v6872_v4 = vpop.f32.mrb[122].mxu1  ;;  %v4809_v31 = vadd.f32 %v4808_v9, %v4807_v17  ;;  %v4812_v17 = vsel %vm4183_vm2, %v4566_v1, 0.0 }
 0x2dd   : > { %v9335_v28 = vadd.f32 %v4024_v20, %v2005_v58  ;;  %v7136_v16 = vpop.f32.mrb[122].mxu0  ;;  %v2008_v46 = vpop.f32.mrb[123].mxu1 }
 0x2de   : > { %9994 = vst [vmem:[#allocation83_spill] sm:$0xff] %v9331_v7  ;;  %v4422_v21 = vadd.f32 %v4421_v11, %v4420_v25  ;;  %v9338_v14 = vadd.f32 %v7136_v16, %v6872_v4  ;;  %v4027_v45 = vpop.f32.mrb[123].mxu0  ;;  %v4811_v13 = vadd.f32 %v4810_v62, %v4809_v31  ;;  %v4569_v25 = vmul.f32 %v9331_v7, %v9331_v7 }
 0x2df   : > { %9995 = vst [vmem:[#allocation84_spill] sm:$0xff] %v9335_v28  ;;  %v4423_v3 = vsel %vm4183_vm2, %v9335_v28, 0.0  ;;  %v4567_v43 = vmul.f32 %v9335_v28, %v9335_v28  ;;  %v9344_v53 = vadd.f32 %v4027_v45, %v2008_v46  ;;  %v4427_v45 = vsel %vm4183_vm2, %v9331_v7, 0.0 }
 0x2e0   : > { %9996 = vst [vmem:[#allocation85_spill] sm:$0xff] %v9338_v14  ;;  %v4424_v9 = vadd.f32 %v4423_v3, %v4422_v21  ;;  %v4813_v29 = vadd.f32 %v4812_v17, %v4811_v13  ;;  %v4570_v46 = vmul.f32 %v9338_v14, %v9338_v14  ;;  %v4429_v17 = vsel %vm4183_vm2, %v9338_v14, 0.0 }
 0x2e1   : > { %9997 = vst [vmem:[#allocation86_spill] sm:$0xff] %v9344_v53  ;;  %v4814_v58 = vsel %vm4183_vm2, %v4567_v43, 0.0  ;;  %v4425_v16 = vsel %vm4183_vm2, %v9344_v53, 0.0  ;;  %v4568_v52 = vmul.f32 %v9344_v53, %v9344_v53 }
 0x2e2   : > { %v4426_v20 = vadd.f32 %v4425_v16, %v4424_v9  ;;  %v6875_v4 = vpop.f32.mrb[124].mxu1  ;;  %v4815_v11 = vadd.f32 %v4814_v58, %v4813_v29  ;;  %v4818_v58 = vsel %vm4183_vm2, %v4569_v25, 0.0 }
 0x2e3   : > { %v4816_v1 = vsel %vm4183_vm2, %v4568_v52, 0.0  ;;  %v7139_v13 = vpop.f32.mrb[124].mxu0  ;;  %v2021_v31 = vpop.f32.mrb[125].mxu1 }
 0x2e4   : > { %v4428_v62 = vadd.f32 %v4427_v45, %v4426_v20  ;;  %v9359_v21 = vadd.f32 %v7139_v13, %v6875_v4  ;;  %v4040_v3 = vpop.f32.mrb[125].mxu0  ;;  %v6876_v43 = vpop.f32.mrb[126].mxu1  ;;  %v4817_v9 = vadd.f32 %v4816_v1, %v4815_v11  ;;  %v4820_v11 = vsel %vm4183_vm2, %v4570_v46, 0.0 }
 0x2e5   : > { %v9363_v16 = vadd.f32 %v4040_v3, %v2021_v31  ;;  %v7140_v7 = vpop.f32.mrb[126].mxu0  ;;  %v2024_v29 = vpop.f32.mrb[127].mxu1 }
 0x2e6   : > { %9998 = vst [vmem:[#allocation87_spill] sm:$0xff] %v9359_v21  ;;  %v4430_v52 = vadd.f32 %v4429_v17, %v4428_v62  ;;  %v9366_v53 = vadd.f32 %v7140_v7, %v6876_v43  ;;  %v4043_v28 = vpop.f32.mrb[127].mxu0  ;;  %v4819_v6 = vadd.f32 %v4818_v58, %v4817_v9  ;;  %v4573_v7 = vmul.f32 %v9359_v21, %v9359_v21 }
 0x2e7   : > { %9999 = vst [vmem:[#allocation88_spill] sm:$0xff] %v9363_v16  ;;  %v4431_v20 = vsel %vm4183_vm2, %v9363_v16, 0.0  ;;  %v4571_v4 = vmul.f32 %v9363_v16, %v9363_v16  ;;  %v7268_v45 = vadd.f32 %v4043_v28, %v2024_v29  ;;  %v4435_v43 = vsel %vm4183_vm2, %v9359_v21, 0.0 }
 0x2e8   : > { %10000 = vst [vmem:[#allocation89_spill] sm:$0xff] %v9366_v53  ;;  %v4432_v1 = vadd.f32 %v4431_v20, %v4430_v52  ;;  %v4821_v13 = vadd.f32 %v4820_v11, %v4819_v6  ;;  %v4574_v28 = vmul.f32 %v9366_v53, %v9366_v53  ;;  %v4437_v6 = vsel %vm4183_vm2, %v9366_v53, 0.0 }
 0x2e9   : > { %v4822_v31 = vsel %vm4183_vm2, %v4571_v4, 0.0  ;;  %v4433_v25 = vsel %vm4183_vm2, %v7268_v45, 0.0  ;;  %v4572_v62 = vmul.f32 %v7268_v45, %v7268_v45  ;;  %v4826_v58 = vsel %vm4183_vm2, %v4573_v7, 0.0 }
 0x2ea   : > { %v4434_v3 = vadd.f32 %v4433_v25, %v4432_v1  ;;  %v4823_v17 = vadd.f32 %v4822_v31, %v4821_v13  ;;  %v4828_v4 = vsel %vm4183_vm2, %v4574_v28, 0.0 }
 0x2eb   : > { %v4824_v9 = vsel %vm4183_vm2, %v4572_v62, 0.0 }
 0x2ec   : > { %v4436_v46 = vadd.f32 %v4435_v43, %v4434_v3  ;;  %v4825_v29 = vadd.f32 %v4824_v9, %v4823_v17 }
 0x2ee   : > { %v4438_v52 = vadd.f32 %v4437_v6, %v4436_v46  ;;  %v4827_v20 = vadd.f32 %v4826_v58, %v4825_v29 }
 0x2f0   : > { %v4439_v11 = vrot.slane %v4438_v52, 4  ;;  %v4829_v1 = vadd.f32 %v4828_v4, %v4827_v20 }
 0x2f2   : > { %v4440_v25 = vadd.f32 %v4439_v11, %v4438_v52  ;;  %v4830_v13 = vrot.slane %v4829_v1, 4 }
 0x2f4   : > { %v4441_v31 = vrot.slane %v4440_v25, 2  ;;  %v4831_v62 = vadd.f32 %v4830_v13, %v4829_v1 }
 0x2f6   : > { %v4442_v21 = vadd.f32 %v4441_v31, %v4440_v25  ;;  %v4832_v16 = vrot.slane %v4831_v62, 2 }
 0x2f8   : > { %v4443_v14 = vrot.slane %v4442_v21, 1  ;;  %v4833_v3 = vadd.f32 %v4832_v16, %v4831_v62 }
 0x2fa   : > { %v4444_v43 = vadd.f32 %v4443_v14, %v4442_v21  ;;  %v4834_v36 = vrot.slane %v4833_v3, 1 }
 0x2fc   : > { %v4446_v53 = vmul.f32 0.0009765625, %v4444_v43  ;;  %v4835_v17 = vadd.f32 %v4834_v36, %v4833_v3 }
 0x2fe   : > { %v4837_v9 = vmul.f32 %v4446_v53, %v4446_v53  ;;  %v4836_v7 = vmul.f32 0.0009765625, %v4835_v17 }
 0x300   : > { %v4838_v46 = vsub.f32 %v4836_v7, %v4837_v9 }
 0x302   : > { %v4839_v6 = vadd.f32 1e-05, %v4838_v46 }
 0x304   : > { %7546 = vrsqrt.f32 %v4839_v6 }
 0x30e   : > { %v9386_v28 = vpop.eup %7546 }
 0x30f   : > { %v9389_v29 = vmul.f32 %v9386_v28, %v7268_v45  ;;  %v9392_v58 = vmul.f32 %v9386_v28, %v4446_v53  ;;  %v4841_v16 = vmul.f32 %v9386_v28, %v8451_v8  ;;  %v4857_v14 = vmul.f32 %v9386_v28, %v8605_v2 }
 0x310   : > { %v4858_v36 = vmul.f32 %v9386_v28, %v8614_v63  ;;  %v4842_v21 = vmul.f32 %v9386_v28, %v8457_v50  ;;  %v4843_v52 = vmul.f32 %v9386_v28, %v8449_v30  ;;  %v4859_v45 = vmul.f32 %v9386_v28, %v8601_v42 }
 0x311   : > { %v4986_v53 = vsub.f32 %v4857_v14, %v9392_v58  ;;  %v4970_v20 = vsub.f32 %v4841_v16, %v9392_v58  ;;  %v4844_v50 = vmul.f32 %v9386_v28, %v8453_v55  ;;  %v4860_v30 = vmul.f32 %v9386_v28, %v8608_v27 }
 0x312   : > { %v4987_v8 = vsub.f32 %v4858_v36, %v9392_v58  ;;  %v4971_v2 = vsub.f32 %v4842_v21, %v9392_v58  ;;  %v4988_v42 = vsub.f32 %v4859_v45, %v9392_v58  ;;  %v4972_v11 = vsub.f32 %v4843_v52, %v9392_v58 }
 0x313   : > { %vm5114_vm3 = vcmp.ge.f32.partialorder %v4986_v53, 0.0  ;;  %v5242_v4 = vmul.f32 0.4, %v4986_v53  ;;  %vm5098_vm4 = vcmp.ge.f32.partialorder %v4970_v20, 0.0  ;;  %v5226_v63 = vmul.f32 0.4, %v4970_v20 }
 0x314   : > { %v5243_v13 = vmul.f32 0.4, %v4987_v8  ;;  %v5227_v31 = vmul.f32 0.4, %v4971_v2  ;;  %vm5115_vm5 = vcmp.ge.f32.partialorder %v4987_v8, 0.0  ;;  %vm5099_vm6 = vcmp.ge.f32.partialorder %v4971_v2, 0.0 }
 0x315   : > { %v5370_v1 = vsel %vm5114_vm3, %v4986_v53, %v5242_v4  ;;  %v5354_v25 = vsel %vm5098_vm4, %v4970_v20, %v5226_v63  ;;  %v4845_v62 = vmul.f32 %v9386_v28, %v8490_v61  ;;  %v4861_v55 = vmul.f32 %v9386_v28, %v8635_v48 }
 0x316   : > { %5514 = vxpose.xlu1.b32.start [1/16] (narrow) %v5370_v1, 16  ;;  %5482 = vxpose.xlu0.b32.start [1/16] (narrow) %v5354_v25, 16  ;;  %vm5116_vm7 = vcmp.ge.f32.partialorder %v4988_v42, 0.0  ;;  %v5244_v27 = vmul.f32 0.4, %v4988_v42  ;;  %v4989_v3 = vsub.f32 %v4860_v30, %v9392_v58  ;;  %v5371_v43 = vsel %vm5115_vm5, %v4987_v8, %v5243_v13 }
 0x317   : > { %v5355_v17 = vsel %vm5099_vm6, %v4971_v2, %v5227_v31  ;;  %v5228_v9 = vmul.f32 0.4, %v4972_v11  ;;  %v4973_v7 = vsub.f32 %v4844_v50, %v9392_v58  ;;  %vm5100_vm8 = vcmp.ge.f32.partialorder %v4972_v11, 0.0 }
 0x318   : > { %v4846_v46 = vmul.f32 %v9386_v28, %v8499_v60  ;;  %v4862_v61 = vmul.f32 %v9386_v28, %v8644_v15  ;;  %v5372_v6 = vsel %vm5116_vm7, %v4988_v42, %v5244_v27  ;;  %vm5117_vm9 = vcmp.ge.f32.partialorder %v4989_v3, 0.0 }
 0x319   : > { %v5245_v48 = vmul.f32 0.4, %v4989_v3  ;;  %v5356_v16 = vsel %vm5100_vm8, %v4972_v11, %v5228_v9  ;;  %v5229_v14 = vmul.f32 0.4, %v4973_v7  ;;  %v4990_v36 = vsub.f32 %v4861_v55, %v9392_v58 }
 0x31a   : > { %5515 = vxpose.xlu1.b32.cont [2/16] (narrow) %v5371_v43, 16  ;;  %5483 = vxpose.xlu0.b32.cont [2/16] (narrow) %v5355_v17, 16  ;;  %v4974_v21 = vsub.f32 %v4845_v62, %v9392_v58  ;;  %vm5101_vm10 = vcmp.ge.f32.partialorder %v4973_v7, 0.0  ;;  %v4847_v52 = vmul.f32 %v9386_v28, %v8485_v41  ;;  %v4863_v60 = vmul.f32 %v9386_v28, %v8631_v38 }
 0x31b   : > { %v5373_v45 = vsel %vm5117_vm9, %v4989_v3, %v5245_v48  ;;  %v4991_v15 = vsub.f32 %v4862_v61, %v9392_v58  ;;  %v5357_v53 = vsel %vm5101_vm10, %v4973_v7, %v5229_v14  ;;  %v5246_v20 = vmul.f32 0.4, %v4990_v36 }
 0x31c   : > { %v5230_v8 = vmul.f32 0.4, %v4974_v21  ;;  %v4975_v2 = vsub.f32 %v4846_v46, %v9392_v58  ;;  %vm5118_vm11 = vcmp.ge.f32.partialorder %v4990_v36, 0.0  ;;  %vm5102_vm12 = vcmp.ge.f32.partialorder %v4974_v21, 0.0 }
 0x31d   : > { %v4848_v4 = vmul.f32 %v9386_v28, %v8497_v35  ;;  %v4864_v41 = vmul.f32 %v9386_v28, %v8638_v40  ;;  %vm5119_vm13 = vcmp.ge.f32.partialorder %v4991_v15, 0.0  ;;  %v5247_v38 = vmul.f32 0.4, %v4991_v15 }
 0x31e   : > { %5516 = vxpose.xlu1.b32.cont [3/16] (narrow) %v5372_v6, 16  ;;  %5484 = vxpose.xlu0.b32.cont [3/16] (narrow) %v5356_v16, 16  ;;  %v4992_v63 = vsub.f32 %v4863_v60, %v9392_v58  ;;  %v5374_v50 = vsel %vm5118_vm11, %v4990_v36, %v5246_v20  ;;  %v5358_v30 = vsel %vm5102_vm12, %v4974_v21, %v5230_v8  ;;  %v5231_v42 = vmul.f32 0.4, %v4975_v2 }
 0x31f   : > { %v4976_v11 = vsub.f32 %v4847_v52, %v9392_v58  ;;  %vm5103_vm14 = vcmp.ge.f32.partialorder %v4975_v2, 0.0  ;;  %v4849_v1 = vmul.f32 %v9386_v28, %v8529_v37  ;;  %v4865_v35 = vmul.f32 %v9386_v28, %v8663_v26 }
 0x320   : > { %v5375_v25 = vsel %vm5119_vm13, %v4991_v15, %v5247_v38  ;;  %vm5120_vm15 = vcmp.ge.f32.partialorder %v4992_v63, 0.0  ;;  %v5248_v40 = vmul.f32 0.4, %v4992_v63  ;;  %v5359_v13 = vsel %vm5103_vm14, %v4975_v2, %v5231_v42 }
 0x321   : > { %v5232_v31 = vmul.f32 0.4, %v4976_v11  ;;  %v4993_v62 = vsub.f32 %v4864_v41, %v9392_v58  ;;  %v4977_v55 = vsub.f32 %v4848_v4, %v9392_v58  ;;  %vm5104_vm0 = vcmp.ge.f32.partialorder %v4976_v11, 0.0 }
 0x322   : > { %5517 = vxpose.xlu1.b32.cont [4/16] (narrow) %v5373_v45, 16  ;;  %5485 = vxpose.xlu0.b32.cont [4/16] (narrow) %v5357_v53, 16  ;;  %v4850_v27 = vmul.f32 %v9386_v28, %v8538_v51  ;;  %v4866_v37 = vmul.f32 %v9386_v28, %v8672_v57  ;;  %v5376_v3 = vsel %vm5120_vm15, %v4992_v63, %v5248_v40 }
 0x323   : > { %v4994_v26 = vsub.f32 %v4865_v35, %v9392_v58  ;;  %v5360_v43 = vsel %vm5104_vm0, %v4976_v11, %v5232_v31  ;;  %v5249_v17 = vmul.f32 0.4, %v4993_v62  ;;  %v5233_v9 = vmul.f32 0.4, %v4977_v55 }
 0x324   : > { %v4978_v7 = vsub.f32 %v4849_v1, %v9392_v58  ;;  %vm5121_vm1 = vcmp.ge.f32.partialorder %v4993_v62, 0.0  ;;  %vm5105_vm2 = vcmp.ge.f32.partialorder %v4977_v55, 0.0  ;;  %v4851_v46 = vmul.f32 %v9386_v28, %v8525_v56 }
 0x325   : > { %v4867_v51 = vmul.f32 %v9386_v28, %v8659_v0  ;;  %vm5122_vm3 = vcmp.ge.f32.partialorder %v4994_v26, 0.0  ;;  %v5250_v57 = vmul.f32 0.4, %v4994_v26  ;;  %v4995_v61 = vsub.f32 %v4866_v37, %v9392_v58 }
 0x326   : > { %5518 = vxpose.xlu1.b32.cont [5/16] (narrow) %v5374_v50, 16  ;;  %5486 = vxpose.xlu0.b32.cont [5/16] (narrow) %v5358_v30, 16  ;;  %v5377_v6 = vsel %vm5121_vm1, %v4993_v62, %v5249_v17  ;;  %v5361_v48 = vsel %vm5105_vm2, %v4977_v55, %v5233_v9  ;;  %v5234_v16 = vmul.f32 0.4, %v4978_v7  ;;  %v4979_v14 = vsub.f32 %v4850_v27, %v9392_v58 }
 0x327   : > { %vm5106_vm4 = vcmp.ge.f32.partialorder %v4978_v7, 0.0  ;;  %v4852_v36 = vmul.f32 %v9386_v28, %v8532_v12  ;;  %v4868_v56 = vmul.f32 %v9386_v28, %v8666_v5  ;;  %v5378_v21 = vsel %vm5122_vm3, %v4994_v26, %v5250_v57 }
 0x328   : > { %v5251_v0 = vmul.f32 0.4, %v4995_v61  ;;  %v4996_v52 = vsub.f32 %v4867_v51, %v9392_v58  ;;  %v5362_v60 = vsel %vm5106_vm4, %v4978_v7, %v5234_v16  ;;  %vm5123_vm5 = vcmp.ge.f32.partialorder %v4995_v61, 0.0 }
 0x329   : > { %v5235_v45 = vmul.f32 0.4, %v4979_v14  ;;  %v4980_v15 = vsub.f32 %v4851_v46, %v9392_v58  ;;  %vm5107_vm6 = vcmp.ge.f32.partialorder %v4979_v14, 0.0  ;;  %v4853_v53 = vmul.f32 %v9386_v28, %v8569_v18 }
 0x32a   : > { %5519 = vxpose.xlu1.b32.cont [6/16] (narrow) %v5375_v25, 16  ;;  %5487 = vxpose.xlu0.b32.cont [6/16] (narrow) %v5359_v13, 16  ;;  %v4869_v12 = vmul.f32 %v9386_v28, %v8691_v23  ;;  %v5379_v20 = vsel %vm5123_vm5, %v4995_v61, %v5251_v0  ;;  %v5252_v5 = vmul.f32 0.4, %v4996_v52  ;;  %v4997_v8 = vsub.f32 %v4868_v56, %v9392_v58 }
 0x32b   : > { %v5363_v2 = vsel %vm5107_vm6, %v4979_v14, %v5235_v45  ;;  %vm5124_vm7 = vcmp.ge.f32.partialorder %v4996_v52, 0.0  ;;  %v5236_v4 = vmul.f32 0.4, %v4980_v15  ;;  %v4981_v41 = vsub.f32 %v4852_v36, %v9392_v58 }
 0x32c   : > { %vm5108_vm8 = vcmp.ge.f32.partialorder %v4980_v15, 0.0  ;;  %v4854_v38 = vmul.f32 %v9386_v28, %v8578_v19  ;;  %v4870_v18 = vmul.f32 %v9386_v28, %v8700_v39  ;;  %v5380_v63 = vsel %vm5124_vm7, %v4996_v52, %v5252_v5 }
 0x32d   : > { %vm5125_vm9 = vcmp.ge.f32.partialorder %v4997_v8, 0.0  ;;  %v5253_v23 = vmul.f32 0.4, %v4997_v8  ;;  %v5364_v50 = vsel %vm5108_vm8, %v4980_v15, %v5236_v4  ;;  %v5237_v30 = vmul.f32 0.4, %v4981_v41  ;;  %v10001_v15 = vld [vmem:[#allocation14_spill] sm:$0xff] }
 0x32e   : > { %5520 = vxpose.xlu1.b32.cont [7/16] (narrow) %v5376_v3, 16  ;;  %5488 = vxpose.xlu0.b32.cont [7/16] (narrow) %v5360_v43, 16  ;;  %v4998_v42 = vsub.f32 %v4869_v12, %v9392_v58  ;;  %v4982_v11 = vsub.f32 %v4853_v53, %v9392_v58  ;;  %vm5109_vm10 = vcmp.ge.f32.partialorder %v4981_v41, 0.0  ;;  %v4855_v1 = vmul.f32 %v9386_v28, %v8565_v24 }
 0x32f   : > { %v4871_v19 = vmul.f32 %v9386_v28, %v8687_v32  ;;  %v5381_v35 = vsel %vm5125_vm9, %v4997_v8, %v5253_v23  ;;  %v4999_v39 = vsub.f32 %v4870_v18, %v9392_v58  ;;  %v5365_v25 = vsel %vm5109_vm10, %v4981_v41, %v5237_v30  ;;  %v10003_v41 = vld [vmem:[#allocation16_spill] sm:$0xff] }
 0x330   : > { %v5254_v40 = vmul.f32 0.4, %v4998_v42  ;;  %v5238_v13 = vmul.f32 0.4, %v4982_v11  ;;  %v4983_v31 = vsub.f32 %v4854_v38, %v9392_v58  ;;  %vm5126_vm11 = vcmp.ge.f32.partialorder %v4998_v42, 0.0 }
 0x331   : > { %vm5110_vm12 = vcmp.ge.f32.partialorder %v4982_v11, 0.0  ;;  %v4856_v62 = vmul.f32 %v9386_v28, %v8572_v34  ;;  %v4872_v24 = vmul.f32 %v9386_v28, %v8694_v10  ;;  %vm5127_vm13 = vcmp.ge.f32.partialorder %v4999_v39, 0.0 }
 0x332   : > { %5521 = vxpose.xlu1.b32.cont [8/16] (narrow) %v5377_v6, 16  ;;  %5489 = vxpose.xlu0.b32.cont [8/16] (narrow) %v5361_v48, 16  ;;  %v5255_v32 = vmul.f32 0.4, %v4999_v39  ;;  %v5000_v55 = vsub.f32 %v4871_v19, %v9392_v58  ;;  %v5382_v27 = vsel %vm5126_vm11, %v4998_v42, %v5254_v40  ;;  %v5366_v37 = vsel %vm5110_vm12, %v4982_v11, %v5238_v13  ;;  %v10004_v42 = vld [vmem:[#allocation5_spill] sm:$0xff] }
 0x333   : > { %v5239_v3 = vmul.f32 0.4, %v4983_v31  ;;  %v4984_v26 = vsub.f32 %v4855_v1, %v9392_v58  ;;  %vm5111_vm14 = vcmp.ge.f32.partialorder %v4983_v31, 0.0  ;;  %v4873_v43 = vmul.f32 %v9386_v28, %v8719_v59  ;;  %v10005_v1 = vld [vmem:[#allocation18_spill] sm:$0xff] }
 0x334   : > { %v4889_v34 = vmul.f32 %v9386_v28, %v8831_v47  ;;  %v5383_v17 = vsel %vm5127_vm13, %v4999_v39, %v5255_v32  ;;  %vm5128_vm15 = vcmp.ge.f32.partialorder %v5000_v55, 0.0  ;;  %v5256_v10 = vmul.f32 0.4, %v5000_v55  ;;  %v10007_v32 = vld [vmem:[#allocation15_spill] sm:$0xff] }
 0x335   : > { %v5367_v9 = vsel %vm5111_vm14, %v4983_v31, %v5239_v3  ;;  %v5240_v7 = vmul.f32 0.4, %v4984_v26  ;;  %v5001_v46 = vsub.f32 %v4872_v24, %v9392_v58  ;;  %v4985_v51 = vsub.f32 %v4856_v62, %v9392_v58  ;;  %v10006_v62 = vld [vmem:[#allocation2_spill] sm:$0xff] }
 0x336   : > { %5522 = vxpose.xlu1.b32.cont [9/16] (narrow) %v5378_v21, 16  ;;  %5490 = vxpose.xlu0.b32.cont [9/16] (narrow) %v5362_v60, 16  ;;  %vm5112_vm0 = vcmp.ge.f32.partialorder %v4984_v26, 0.0  ;;  %v4874_v57 = vmul.f32 %v9386_v28, %v8728_v22  ;;  %v4890_v59 = vmul.f32 %v9386_v28, %v8840_v33  ;;  %v5384_v61 = vsel %vm5128_vm15, %v5000_v55, %v5256_v10 }
 0x337   : > { %v5018_v47 = vsub.f32 %v4889_v34, %v9392_v58  ;;  %v5368_v6 = vsel %vm5112_vm0, %v4984_v26, %v5240_v7  ;;  %v5257_v48 = vmul.f32 0.4, %v5001_v46  ;;  %v5241_v16 = vmul.f32 0.4, %v4985_v51 }
 0x338   : > { %v5002_v14 = vsub.f32 %v4873_v43, %v9392_v58  ;;  %vm5129_vm1 = vcmp.ge.f32.partialorder %v5001_v46, 0.0  ;;  %vm5113_vm2 = vcmp.ge.f32.partialorder %v4985_v51, 0.0  ;;  %v4875_v36 = vmul.f32 %v9386_v28, %v8715_v54 }
 0x339   : > { %v4891_v22 = vmul.f32 %v9386_v28, %v8827_v44  ;;  %vm5146_vm3 = vcmp.ge.f32.partialorder %v5018_v47, 0.0  ;;  %v5274_v33 = vmul.f32 0.4, %v5018_v47  ;;  %v5019_v56 = vsub.f32 %v4890_v59, %v9392_v58 }
 0x33a   : > { %5523 = vxpose.xlu1.b32.cont [10/16] (narrow) %v5379_v20, 16  ;;  %5491 = vxpose.xlu0.b32.cont [10/16] (narrow) %v5363_v2, 16  ;;  %v5385_v21 = vsel %vm5129_vm1, %v5001_v46, %v5257_v48  ;;  %v5369_v0 = vsel %vm5113_vm2, %v4985_v51, %v5241_v16  ;;  %v5258_v52 = vmul.f32 0.4, %v5002_v14  ;;  %v5003_v60 = vsub.f32 %v4874_v57, %v9392_v58  ;;  %v10002_v2 = vld [vmem:[#allocation3_spill] sm:$0xff]  ;;  %v10011_v16 = vld [vmem:[#allocation20_spill] sm:$0xff] }
 0x33b   : > { %vm5130_vm4 = vcmp.ge.f32.partialorder %v5002_v14, 0.0  ;;  %v4876_v45 = vmul.f32 %v9386_v28, %v8722_v49  ;;  %v4892_v54 = vmul.f32 %v9386_v28, %v10001_v15  ;;  %v5402_v53 = vsel %vm5146_vm3, %v5018_v47, %v5274_v33 }
 0x33c   : > { %v5275_v44 = vmul.f32 0.4, %v5019_v56  ;;  %v5386_v12 = vsel %vm5130_vm4, %v5002_v14, %v5258_v52  ;;  %v5259_v20 = vmul.f32 0.4, %v5003_v60  ;;  %v5020_v5 = vsub.f32 %v4891_v22, %v9392_v58  ;;  %v10012_v52 = vld [vmem:[#allocation9_spill] sm:$0xff] }
 0x33d   : > { %v5004_v8 = vsub.f32 %v4875_v36, %v9392_v58  ;;  %vm5147_vm5 = vcmp.ge.f32.partialorder %v5019_v56, 0.0  ;;  %vm5131_vm6 = vcmp.ge.f32.partialorder %v5003_v60, 0.0  ;;  %v4877_v4 = vmul.f32 %v9386_v28, %v10002_v2 }
 0x33e   : > { %5524 = vxpose.xlu1.b32.cont [11/16] (narrow) %v5380_v63, 16  ;;  %5492 = vxpose.xlu0.b32.cont [11/16] (narrow) %v5364_v50, 16  ;;  %v4893_v49 = vmul.f32 %v9386_v28, %v10003_v41  ;;  %v5021_v38 = vsub.f32 %v4892_v54, %v9392_v58  ;;  %v5005_v18 = vsub.f32 %v4876_v45, %v9392_v58  ;;  %v5276_v50 = vmul.f32 0.4, %v5020_v5  ;;  %v10013_v45 = vld [vmem:[#allocation22_spill] sm:$0xff] }
 0x33f   : > { %v5403_v63 = vsel %vm5147_vm5, %v5019_v56, %v5275_v44  ;;  %v5387_v23 = vsel %vm5131_vm6, %v5003_v60, %v5259_v20  ;;  %v5260_v30 = vmul.f32 0.4, %v5004_v8  ;;  %vm5148_vm7 = vcmp.ge.f32.partialorder %v5020_v5, 0.0 }
 0x340   : > { %vm5132_vm8 = vcmp.ge.f32.partialorder %v5004_v8, 0.0  ;;  %v4878_v11 = vmul.f32 %v9386_v28, %v10004_v42  ;;  %v4894_v19 = vmul.f32 %v9386_v28, %v10005_v1  ;;  %vm5149_vm9 = vcmp.ge.f32.partialorder %v5021_v38, 0.0 }
 0x341   : > { %v5261_v39 = vmul.f32 0.4, %v5005_v18  ;;  %v5388_v40 = vsel %vm5132_vm8, %v5004_v8, %v5260_v30  ;;  %v5022_v13 = vsub.f32 %v4893_v49, %v9392_v58  ;;  %v5006_v31 = vsub.f32 %v4877_v4, %v9392_v58  ;;  %v10014_v8 = vld [vmem:[#allocation6_spill] sm:$0xff]  ;;  %v10015_v4 = vld [vmem:[#allocation19_spill] sm:$0xff]  ;;  %v10016_v30 = vld [vmem:[#allocation8_spill] sm:$0xff] }
 0x342   : > { %5525 = vxpose.xlu1.b32.cont [12/16] (narrow) %v5381_v35, 16  ;;  %5493 = vxpose.xlu0.b32.cont [12/16] (narrow) %v5365_v25, 16  ;;  %v5277_v35 = vmul.f32 0.4, %v5021_v38  ;;  %v5404_v25 = vsel %vm5148_vm7, %v5020_v5, %v5276_v50  ;;  %vm5133_vm10 = vcmp.ge.f32.partialorder %v5005_v18, 0.0  ;;  %v4879_v24 = vmul.f32 %v9386_v28, %v10006_v62 }
 0x343   : > { %v4895_v55 = vmul.f32 %v9386_v28, %v10007_v32  ;;  %v5389_v3 = vsel %vm5133_vm10, %v5005_v18, %v5261_v39  ;;  %v5278_v26 = vmul.f32 0.4, %v5022_v13  ;;  %v5262_v43 = vmul.f32 0.4, %v5006_v31 }
 0x344   : > { %v5007_v34 = vsub.f32 %v4878_v11, %v9392_v58  ;;  %vm5150_vm11 = vcmp.ge.f32.partialorder %v5022_v13, 0.0  ;;  %vm5134_vm12 = vcmp.ge.f32.partialorder %v5006_v31, 0.0  ;;  %v5008_v47 = vsub.f32 %v4879_v24, %v9392_v58  ;;  %v10017_v11 = vld [vmem:[#allocation21_spill] sm:$0xff]  ;;  %v10019_v24 = vld [vmem:[#allocation24_spill] sm:$0xff] }
 0x345   : > { %v5024_v51 = vsub.f32 %v4895_v55, %v9392_v58  ;;  %v5406_v57 = vsel %vm5150_vm11, %v5022_v13, %v5278_v26  ;;  %v5390_v59 = vsel %vm5134_vm12, %v5006_v31, %v5262_v43  ;;  %v4897_v14 = vmul.f32 %v9386_v28, %v10011_v16  ;;  %v10018_v31 = vld [vmem:[#allocation11_spill] sm:$0xff] }
 0x346   : > { %5526 = vxpose.xlu1.b32.cont [13/16] (narrow) %v5382_v27, 16  ;;  %5494 = vxpose.xlu0.b32.cont [13/16] (narrow) %v5366_v37, 16  ;;  %v5405_v27 = vsel %vm5149_vm9, %v5021_v38, %v5277_v35  ;;  %v5023_v37 = vsub.f32 %v4894_v19, %v9392_v58  ;;  %vm5135_vm14 = vcmp.ge.f32.partialorder %v5007_v34, 0.0  ;;  %vm5136_vm0 = vcmp.ge.f32.partialorder %v5008_v47, 0.0 }
 0x347   : > { %v5280_v56 = vmul.f32 0.4, %v5024_v51  ;;  %vm5152_vm15 = vcmp.ge.f32.partialorder %v5024_v51, 0.0  ;;  %v4882_v60 = vmul.f32 %v9386_v28, %v10012_v52  ;;  %v4898_v15 = vmul.f32 %v9386_v28, %v10013_v45 }
 0x348   : > { %vm5151_vm13 = vcmp.ge.f32.partialorder %v5023_v37, 0.0  ;;  %v5279_v46 = vmul.f32 0.4, %v5023_v37  ;;  %v4883_v2 = vmul.f32 %v9386_v28, %v10014_v8  ;;  %v4899_v41 = vmul.f32 %v9386_v28, %v10015_v4 }
 0x349   : > { %v5408_v44 = vsel %vm5152_vm15, %v5024_v51, %v5280_v56  ;;  %v5027_v38 = vsub.f32 %v4898_v15, %v9392_v58  ;;  %v5011_v50 = vsub.f32 %v4882_v60, %v9392_v58  ;;  %v4884_v42 = vmul.f32 %v9386_v28, %v10016_v30  ;;  %v10025_v60 = vld [vmem:[#allocation25_spill] sm:$0xff] }
 0x34a   : > { %5527 = vxpose.xlu1.b32.cont [14/16] (narrow) %v5383_v17, 16  ;;  %5495 = vxpose.xlu0.b32.cont [14/16] (narrow) %v5367_v9, 16  ;;  %v10008_v17 = vld [vmem:[#allocation4_spill] sm:$0xff]  ;;  %v10009_v9 = vld [vmem:[#allocation17_spill] sm:$0xff]  ;;  %v5407_v36 = vsel %vm5151_vm13, %v5023_v37, %v5279_v46  ;;  %v4900_v1 = vmul.f32 %v9386_v28, %v10017_v11  ;;  %v5028_v35 = vsub.f32 %v4899_v41, %v9392_v58 }
 0x34b   : > { %v4880_v10 = vmul.f32 %v9386_v28, %v10008_v17  ;;  %v4896_v7 = vmul.f32 %v9386_v28, %v10009_v9  ;;  %vm5155_vm5 = vcmp.ge.f32.partialorder %v5027_v38, 0.0  ;;  %v5283_v19 = vmul.f32 0.4, %v5027_v38 }
 0x34c   : > { %v5012_v13 = vsub.f32 %v4883_v2, %v9392_v58  ;;  %vm5139_vm6 = vcmp.ge.f32.partialorder %v5011_v50, 0.0  ;;  %v4885_v62 = vmul.f32 %v9386_v28, %v10018_v31  ;;  %v4901_v32 = vmul.f32 %v9386_v28, %v10019_v24  ;;  %v10027_v2 = vld [vmem:[#allocation44_spill] sm:$0xff] }
 0x34d   : > { %v5025_v22 = vsub.f32 %v4896_v7, %v9392_v58  ;;  %v5411_v55 = vsel %vm5155_vm5, %v5027_v38, %v5283_v19  ;;  %v5013_v43 = vsub.f32 %v4884_v42, %v9392_v58  ;;  %vm5156_vm7 = vcmp.ge.f32.partialorder %v5028_v35, 0.0  ;;  %v10029_v42 = vld [vmem:[#allocation46_spill] sm:$0xff] }
 0x34e   : > { %5528 = vxpose.xlu1.b32.cont [15/16] (narrow) %v5384_v61, 16  ;;  %5496 = vxpose.xlu0.b32.cont [15/16] (narrow) %v5368_v6, 16  ;;  %v5263_v61 = vmul.f32 0.4, %v5007_v34  ;;  %v10010_v6 = vld [vmem:[#allocation7_spill] sm:$0xff]  ;;  %vm5140_vm8 = vcmp.ge.f32.partialorder %v5012_v13, 0.0  ;;  %v5030_v46 = vsub.f32 %v4901_v32, %v9392_v58  ;;  %v4904_v45 = vmul.f32 %v9386_v28, %v10025_v60 }
 0x34f   : > { %v4881_v48 = vmul.f32 %v9386_v28, %v10010_v6  ;;  %vm5153_vm1 = vcmp.ge.f32.partialorder %v5025_v22, 0.0  ;;  %v5281_v54 = vmul.f32 0.4, %v5025_v22  ;;  %v5268_v26 = vmul.f32 0.4, %v5012_v13 }
 0x350   : > { %v5391_v33 = vsel %vm5135_vm14, %v5007_v34, %v5263_v61  ;;  %v10020_v34 = vld [vmem:[#allocation13_spill] sm:$0xff]  ;;  %v5014_v61 = vsub.f32 %v4885_v62, %v9392_v58  ;;  %vm5141_vm10 = vcmp.ge.f32.partialorder %v5013_v43, 0.0  ;;  %vm5158_vm11 = vcmp.ge.f32.partialorder %v5030_v46, 0.0  ;;  %v10031_v62 = vld [vmem:[#allocation43_spill] sm:$0xff] }
 0x351   : > { %v5010_v5 = vsub.f32 %v4881_v48, %v9392_v58  ;;  %v5409_v49 = vsel %vm5153_vm1, %v5025_v22, %v5281_v54  ;;  %v4886_v17 = vmul.f32 %v9386_v28, %v10020_v34  ;;  %v10023_v48 = vld [vmem:[#allocation23_spill] sm:$0xff]  ;;  %v4921_v4 = vmul.f32 %v9386_v28, %v10027_v2 }
 0x352   : > { %5529 = vxpose.xlu1.b32.end [16/16] (narrow) %v5385_v21, 16  ;;  %5497 = vxpose.xlu0.b32.end [16/16] (narrow) %v5369_v0, 16  ;;  %v5264_v21 = vmul.f32 0.4, %v5008_v47  ;;  %v5009_v0 = vsub.f32 %v4880_v10, %v9392_v58  ;;  %v10021_v10 = vld [vmem:[#allocation26_spill] sm:$0xff]  ;;  %v4903_v16 = vmul.f32 %v9386_v28, %v10023_v48  ;;  %vm5142_vm12 = vcmp.ge.f32.partialorder %v5014_v61, 0.0 }
 0x353   : > { %vm5138_vm4 = vcmp.ge.f32.partialorder %v5010_v5, 0.0  ;;  %v4902_v9 = vmul.f32 %v9386_v28, %v10021_v10  ;;  %v5270_v56 = vmul.f32 0.4, %v5014_v61  ;;  %v4922_v11 = vmul.f32 %v9386_v28, %v10029_v42 }
 0x354   : > { %v5265_v20 = vmul.f32 0.4, %v5009_v0  ;;  %vm5137_vm2 = vcmp.ge.f32.partialorder %v5009_v0, 0.0  ;;  %v5032_v54 = vsub.f32 %v4903_v16, %v9392_v58  ;;  %v5050_v19 = vsub.f32 %v4921_v4, %v9392_v58  ;;  %v10035_v16 = vld [vmem:[#allocation48_spill] sm:$0xff]  ;;  %v10038_v4 = vld [vmem:[#allocation31_spill] sm:$0xff] }
 0x355   : > { %v4923_v24 = vmul.f32 %v9386_v28, %v10031_v62 }
 0x356   : > { %5578 = vxpose.xlu1.b32.start [1/16] (narrow) %v5402_v53, 16  ;;  %5546 = vxpose.xlu0.b32.start [1/16] (narrow) %v5386_v12, 16  ;;  %v5026_v53 = vsub.f32 %v4897_v14, %v9392_v58  ;;  %v5392_v12 = vsel %vm5136_vm0, %v5008_v47, %v5264_v21  ;;  %v5393_v18 = vsel %vm5137_vm2, %v5009_v0, %v5265_v20  ;;  %v10022_v47 = vld [vmem:[#allocation10_spill] sm:$0xff]  ;;  %v10024_v0 = vld [vmem:[#allocation12_spill] sm:$0xff]  ;;  %vm5160_vm15 = vcmp.ge.f32.partialorder %v5032_v54, 0.0 }
 0x357   : > { %v4887_v6 = vmul.f32 %v9386_v28, %v10022_v47  ;;  %v5015_v21 = vsub.f32 %v4886_v17, %v9392_v58  ;;  %v4888_v52 = vmul.f32 %v9386_v28, %v10024_v0  ;;  %v10033_v17 = vld [vmem:[#allocation45_spill] sm:$0xff] }
 0x358   : > { %vm5154_vm3 = vcmp.ge.f32.partialorder %v5026_v53, 0.0  ;;  %v4924_v10 = vmul.f32 %v9386_v28, %v10033_v17 }
 0x359   : > { %v5016_v20 = vsub.f32 %v4887_v6, %v9392_v58  ;;  %vm5143_vm14 = vcmp.ge.f32.partialorder %v5015_v21, 0.0  ;;  %v10034_v6 = vld [vmem:[#allocation32_spill] sm:$0xff] }
 0x35a   : > { %5579 = vxpose.xlu1.b32.cont [2/16] (narrow) %v5403_v63, 16  ;;  %5547 = vxpose.xlu0.b32.cont [2/16] (narrow) %v5387_v23, 16  ;;  %v5282_v63 = vmul.f32 0.4, %v5026_v53  ;;  %v5266_v23 = vmul.f32 0.4, %v5010_v5  ;;  %v4909_v48 = vmul.f32 %v9386_v28, %v10034_v6 }
 0x35b   : > { %vm5144_vm0 = vcmp.ge.f32.partialorder %v5016_v20, 0.0 }
 0x35c   : > { %v5410_v39 = vsel %vm5154_vm3, %v5026_v53, %v5282_v63  ;;  %v5272_v63 = vmul.f32 0.4, %v5016_v20  ;;  %vm5178_vm3 = vcmp.ge.f32.partialorder %v5050_v19, 0.0  ;;  %v5038_v2 = vsub.f32 %v4909_v48, %v9392_v58  ;;  %v10046_v48 = vld [vmem:[#allocation35_spill] sm:$0xff] }
 0x35e   : > { %5580 = vxpose.xlu1.b32.cont [3/16] (narrow) %v5404_v25, 16  ;;  %5548 = vxpose.xlu0.b32.cont [3/16] (narrow) %v5388_v40, 16  ;;  %v5394_v25 = vsel %vm5138_vm4, %v5010_v5, %v5266_v23  ;;  %v5267_v40 = vmul.f32 0.4, %v5011_v50  ;;  %v10026_v5 = vld [vmem:[#allocation28_spill] sm:$0xff]  ;;  %v5017_v23 = vsub.f32 %v4888_v52, %v9392_v58 }
 0x35f   : > { %v4905_v8 = vmul.f32 %v9386_v28, %v10026_v5 }
 0x360   : > { %v5395_v37 = vsel %vm5139_vm6, %v5011_v50, %v5267_v40  ;;  %v10028_v50 = vld [vmem:[#allocation30_spill] sm:$0xff]  ;;  %vm5145_vm2 = vcmp.ge.f32.partialorder %v5017_v23, 0.0 }
 0x361   : > { %v4906_v30 = vmul.f32 %v9386_v28, %v10028_v50  ;;  %v5034_v40 = vsub.f32 %v4905_v8, %v9392_v58 }
 0x362   : > { %5581 = vxpose.xlu1.b32.cont [4/16] (narrow) %v5405_v27, 16  ;;  %5549 = vxpose.xlu0.b32.cont [4/16] (narrow) %v5389_v3, 16  ;;  %v5029_v27 = vsub.f32 %v4900_v1, %v9392_v58  ;;  %v5284_v3 = vmul.f32 0.4, %v5028_v35 }
 0x363   : > { %vm5162_vm4 = vcmp.ge.f32.partialorder %v5034_v40, 0.0 }
 0x364   : > { %vm5157_vm9 = vcmp.ge.f32.partialorder %v5029_v27, 0.0  ;;  %v5285_v7 = vmul.f32 0.4, %v5029_v27  ;;  %v5412_v51 = vsel %vm5156_vm7, %v5028_v35, %v5284_v3  ;;  %v5290_v3 = vmul.f32 0.4, %v5034_v40 }
 0x366   : > { %5582 = vxpose.xlu1.b32.cont [5/16] (narrow) %v5406_v57, 16  ;;  %5550 = vxpose.xlu0.b32.cont [5/16] (narrow) %v5390_v59, 16  ;;  %v5396_v57 = vsel %vm5140_vm8, %v5012_v13, %v5268_v26  ;;  %v5269_v59 = vmul.f32 0.4, %v5013_v43  ;;  %v5413_v14 = vsel %vm5157_vm9, %v5029_v27, %v5285_v7  ;;  %v10030_v13 = vld [vmem:[#allocation27_spill] sm:$0xff]  ;;  %v5035_v26 = vsub.f32 %v4906_v30, %v9392_v58 }
 0x367   : > { %v4907_v31 = vmul.f32 %v9386_v28, %v10030_v13  ;;  %v5052_v7 = vsub.f32 %v4923_v24, %v9392_v58  ;;  %v5294_v30 = vmul.f32 0.4, %v5038_v2  ;;  %v10042_v24 = vld [vmem:[#allocation36_spill] sm:$0xff] }
 0x368   : > { %v5397_v22 = vsel %vm5141_vm10, %v5013_v43, %v5269_v59  ;;  %v10032_v43 = vld [vmem:[#allocation29_spill] sm:$0xff]  ;;  %vm5163_vm6 = vcmp.ge.f32.partialorder %v5035_v26, 0.0 }
 0x369   : > { %v4908_v34 = vmul.f32 %v9386_v28, %v10032_v43  ;;  %v5036_v59 = vsub.f32 %v4907_v31, %v9392_v58  ;;  %vm5180_vm7 = vcmp.ge.f32.partialorder %v5052_v7, 0.0 }
 0x36a   : > { %5583 = vxpose.xlu1.b32.cont [6/16] (narrow) %v5407_v36, 16  ;;  %5551 = vxpose.xlu0.b32.cont [6/16] (narrow) %v5391_v33, 16  ;;  %v5031_v36 = vsub.f32 %v4902_v9, %v9392_v58  ;;  %v5286_v33 = vmul.f32 0.4, %v5030_v46 }
 0x36b   : > { %v5037_v0 = vsub.f32 %v4908_v34, %v9392_v58  ;;  %vm5164_vm8 = vcmp.ge.f32.partialorder %v5036_v59, 0.0 }
 0x36c   : > { %vm5159_vm13 = vcmp.ge.f32.partialorder %v5031_v36, 0.0  ;;  %v5287_v15 = vmul.f32 0.4, %v5031_v36  ;;  %v5414_v53 = vsel %vm5158_vm11, %v5030_v46, %v5286_v33 }
 0x36d   : > { %v5293_v8 = vmul.f32 0.4, %v5037_v0  ;;  %vm5165_vm10 = vcmp.ge.f32.partialorder %v5037_v0, 0.0 }
 0x36e   : > { %5584 = vxpose.xlu1.b32.cont [7/16] (narrow) %v5408_v44, 16  ;;  %5552 = vxpose.xlu0.b32.cont [7/16] (narrow) %v5392_v12, 16  ;;  %v5398_v44 = vsel %vm5142_vm12, %v5014_v61, %v5270_v56  ;;  %v5271_v12 = vmul.f32 0.4, %v5015_v21  ;;  %v5415_v41 = vsel %vm5159_vm13, %v5031_v36, %v5287_v15  ;;  %v5308_v56 = vmul.f32 0.4, %v5052_v7 }
 0x36f   : > { %vm5166_vm12 = vcmp.ge.f32.partialorder %v5038_v2, 0.0 }
 0x370   : > { %v5399_v38 = vsel %vm5143_vm14, %v5015_v21, %v5271_v12  ;;  %v5292_v21 = vmul.f32 0.4, %v5036_v59  ;;  %v5422_v13 = vsel %vm5166_vm12, %v5038_v2, %v5294_v30  ;;  %v10050_v2 = vld [vmem:[#allocation40_spill] sm:$0xff] }
 0x372   : > { %5585 = vxpose.xlu1.b32.cont [8/16] (narrow) %v5409_v49, 16  ;;  %5553 = vxpose.xlu0.b32.cont [8/16] (narrow) %v5393_v18, 16  ;;  %v5033_v49 = vsub.f32 %v4904_v45, %v9392_v58  ;;  %v5288_v18 = vmul.f32 0.4, %v5032_v54  ;;  %v10036_v45 = vld [vmem:[#allocation34_spill] sm:$0xff]  ;;  %v5420_v5 = vsel %vm5164_vm8, %v5036_v59, %v5292_v21 }
 0x373   : > { %v4910_v15 = vmul.f32 %v9386_v28, %v10036_v45 }
 0x374   : > { %vm5161_vm1 = vcmp.ge.f32.partialorder %v5033_v49, 0.0  ;;  %v5289_v1 = vmul.f32 0.4, %v5033_v49  ;;  %v5416_v35 = vsel %vm5160_vm15, %v5032_v54, %v5288_v18  ;;  %v10037_v54 = vld [vmem:[#allocation50_spill] sm:$0xff] }
 0x375   : > { %v5039_v42 = vsub.f32 %v4910_v15, %v9392_v58  ;;  %v10049_v15 = vld [vmem:[#allocation53_spill] sm:$0xff] }
 0x376   : > { %5586 = vxpose.xlu1.b32.cont [9/16] (narrow) %v5410_v39, 16  ;;  %5554 = vxpose.xlu0.b32.cont [9/16] (narrow) %v5394_v25, 16  ;;  %v5400_v39 = vsel %vm5144_vm0, %v5016_v20, %v5272_v63  ;;  %v5273_v25 = vmul.f32 0.4, %v5017_v23  ;;  %v5417_v32 = vsel %vm5161_vm1, %v5033_v49, %v5289_v1  ;;  %v5436_v20 = vsel %vm5180_vm7, %v5052_v7, %v5308_v56  ;;  %v10039_v49 = vld [vmem:[#allocation47_spill] sm:$0xff]  ;;  %v10045_v7 = vld [vmem:[#allocation54_spill] sm:$0xff] }
 0x377   : > { %v5295_v31 = vmul.f32 0.4, %v5039_v42  ;;  %vm5167_vm14 = vcmp.ge.f32.partialorder %v5039_v42, 0.0 }
 0x378   : > { %v5401_v27 = vsel %vm5145_vm2, %v5017_v23, %v5273_v25  ;;  %v5421_v23 = vsel %vm5165_vm10, %v5037_v0, %v5293_v8 }
 0x37a   : > { %5587 = vxpose.xlu1.b32.cont [10/16] (narrow) %v5411_v55, 16  ;;  %5555 = vxpose.xlu0.b32.cont [10/16] (narrow) %v5395_v37, 16  ;;  %v5051_v55 = vsub.f32 %v4922_v11, %v9392_v58  ;;  %v5306_v37 = vmul.f32 0.4, %v5050_v19  ;;  %v10040_v11 = vld [vmem:[#allocation33_spill] sm:$0xff] }
 0x37b   : > { %v4912_v1 = vmul.f32 %v9386_v28, %v10040_v11 }
 0x37c   : > { %vm5179_vm5 = vcmp.ge.f32.partialorder %v5051_v55, 0.0  ;;  %v5307_v9 = vmul.f32 0.4, %v5051_v55  ;;  %v5434_v46 = vsel %vm5178_vm3, %v5050_v19, %v5306_v37  ;;  %v10041_v19 = vld [vmem:[#allocation49_spill] sm:$0xff] }
 0x37d   : > { %v5041_v17 = vsub.f32 %v4912_v1, %v9392_v58  ;;  %v10053_v1 = vld [vmem:[#allocation58_spill] sm:$0xff] }
 0x37e   : > { %5588 = vxpose.xlu1.b32.cont [11/16] (narrow) %v5412_v51, 16  ;;  %5556 = vxpose.xlu0.b32.cont [11/16] (narrow) %v5396_v57, 16  ;;  %v5418_v51 = vsel %vm5162_vm4, %v5034_v40, %v5290_v3  ;;  %v5291_v57 = vmul.f32 0.4, %v5035_v26  ;;  %v5435_v36 = vsel %vm5179_vm5, %v5051_v55, %v5307_v9  ;;  %v10043_v55 = vld [vmem:[#allocation52_spill] sm:$0xff] }
 0x37f   : > { %vm5169_vm2 = vcmp.ge.f32.partialorder %v5041_v17, 0.0 }
 0x380   : > { %v5419_v33 = vsel %vm5163_vm6, %v5035_v26, %v5291_v57  ;;  %v5423_v26 = vsel %vm5167_vm14, %v5039_v42, %v5295_v31  ;;  %v10052_v42 = vld [vmem:[#allocation42_spill] sm:$0xff] }
 0x381   : > { %v4918_v11 = vmul.f32 %v9386_v28, %v10052_v42 }
 0x382   : > { %5589 = vxpose.xlu1.b32.cont [12/16] (narrow) %v5413_v14, 16  ;;  %5557 = vxpose.xlu0.b32.cont [12/16] (narrow) %v5397_v22, 16  ;;  %v4925_v14 = vmul.f32 %v9386_v28, %v10035_v16  ;;  %v5053_v22 = vsub.f32 %v4924_v10, %v9392_v58  ;;  %v10044_v10 = vld [vmem:[#allocation38_spill] sm:$0xff]  ;;  %v4915_v16 = vmul.f32 %v9386_v28, %v10046_v48 }
 0x383   : > { %v4914_v9 = vmul.f32 %v9386_v28, %v10044_v10 }
 0x384   : > { %vm5181_vm9 = vcmp.ge.f32.partialorder %v5053_v22, 0.0  ;;  %v5054_v12 = vsub.f32 %v4925_v14, %v9392_v58  ;;  %v10047_v14 = vld [vmem:[#allocation51_spill] sm:$0xff]  ;;  %v5044_v8 = vsub.f32 %v4915_v16, %v9392_v58  ;;  %v10059_v16 = vld [vmem:[#allocation76_spill] sm:$0xff] }
 0x386   : > { %5590 = vxpose.xlu1.b32.cont [13/16] (narrow) %v5414_v53, 16  ;;  %5558 = vxpose.xlu0.b32.cont [13/16] (narrow) %v5398_v44, 16  ;;  %v4926_v53 = vmul.f32 %v9386_v28, %v10037_v54  ;;  %v5309_v44 = vmul.f32 0.4, %v5053_v22  ;;  %v5310_v50 = vmul.f32 0.4, %v5054_v12  ;;  %v4932_v54 = vmul.f32 %v9386_v28, %v10049_v15 }
 0x387   : > { %vm5182_vm11 = vcmp.ge.f32.partialorder %v5054_v12, 0.0  ;;  %vm5172_vm8 = vcmp.ge.f32.partialorder %v5044_v8, 0.0 }
 0x388   : > { %v5437_v18 = vsel %vm5181_vm9, %v5053_v22, %v5309_v44  ;;  %v5055_v63 = vsub.f32 %v4926_v53, %v9392_v58  ;;  %v5438_v40 = vsel %vm5182_vm11, %v5054_v12, %v5310_v50  ;;  %v5300_v50 = vmul.f32 0.4, %v5044_v8 }
 0x38a   : > { %5591 = vxpose.xlu1.b32.cont [14/16] (narrow) %v5415_v41, 16  ;;  %5559 = vxpose.xlu0.b32.cont [14/16] (narrow) %v5399_v38, 16  ;;  %v4911_v41 = vmul.f32 %v9386_v28, %v10038_v4  ;;  %v4927_v38 = vmul.f32 %v9386_v28, %v10039_v49  ;;  %vm5183_vm13 = vcmp.ge.f32.partialorder %v5055_v63, 0.0  ;;  %v4917_v4 = vmul.f32 %v9386_v28, %v10050_v2 }
 0x38c   : > { %v5056_v25 = vsub.f32 %v4927_v38, %v9392_v58  ;;  %v5040_v62 = vsub.f32 %v4911_v41, %v9392_v58  ;;  %v10051_v41 = vld [vmem:[#allocation56_spill] sm:$0xff]  ;;  %v5046_v31 = vsub.f32 %v4917_v4, %v9392_v58  ;;  %v10063_v4 = vld [vmem:[#allocation75_spill] sm:$0xff] }
 0x38d   : > { %v4933_v49 = vmul.f32 %v9386_v28, %v10051_v41  ;;  %v4955_v41 = vmul.f32 %v9386_v28, %v10063_v4 }
 0x38e   : > { %5592 = vxpose.xlu1.b32.cont [15/16] (narrow) %v5416_v35, 16  ;;  %5560 = vxpose.xlu0.b32.cont [15/16] (narrow) %v5400_v39, 16  ;;  %v4928_v35 = vmul.f32 %v9386_v28, %v10041_v19  ;;  %v5311_v39 = vmul.f32 0.4, %v5055_v63  ;;  %v5312_v43 = vmul.f32 0.4, %v5056_v25  ;;  %v4934_v19 = vmul.f32 %v9386_v28, %v10053_v1 }
 0x38f   : > { %v5296_v34 = vmul.f32 0.4, %v5040_v62  ;;  %vm5184_vm15 = vcmp.ge.f32.partialorder %v5056_v25, 0.0  ;;  %vm5168_vm0 = vcmp.ge.f32.partialorder %v5040_v62, 0.0  ;;  %vm5174_vm12 = vcmp.ge.f32.partialorder %v5046_v31, 0.0 }
 0x390   : > { %v5439_v37 = vsel %vm5183_vm13, %v5055_v63, %v5311_v39  ;;  %v5057_v3 = vsub.f32 %v4928_v35, %v9392_v58  ;;  %v5440_v59 = vsel %vm5184_vm15, %v5056_v25, %v5312_v43  ;;  %v5062_v39 = vsub.f32 %v4933_v49, %v9392_v58 }
 0x391   : > { %v5302_v43 = vmul.f32 0.4, %v5046_v31 }
 0x392   : > { %5593 = vxpose.xlu1.b32.end [16/16] (narrow) %v5417_v32, 16  ;;  %5561 = vxpose.xlu0.b32.end [16/16] (narrow) %v5401_v27, 16  ;;  %v4913_v32 = vmul.f32 %v9386_v28, %v10042_v24  ;;  %v4929_v27 = vmul.f32 %v9386_v28, %v10043_v55  ;;  %vm5185_vm1 = vcmp.ge.f32.partialorder %v5057_v3, 0.0  ;;  %vm5190_vm11 = vcmp.ge.f32.partialorder %v5062_v39, 0.0 }
 0x394   : > { %v5058_v57 = vsub.f32 %v4929_v27, %v9392_v58  ;;  %v5042_v6 = vsub.f32 %v4913_v32, %v9392_v58  ;;  %v10055_v32 = vld [vmem:[#allocation55_spill] sm:$0xff] }
 0x395   : > { %v4935_v55 = vmul.f32 %v9386_v28, %v10055_v32 }
 0x396   : > { %5642 = vxpose.xlu1.b32.start [1/16] (narrow) %v5434_v46, 16  ;;  %5610 = vxpose.xlu0.b32.start [1/16] (narrow) %v5418_v51, 16  ;;  %v5530_v61 = vpop.trf.xlu1  ;;  %v5498_v47 = vpop.trf.xlu0  ;;  %v4930_v46 = vmul.f32 %v9386_v28, %v10045_v7  ;;  %v5313_v51 = vmul.f32 0.4, %v5057_v3  ;;  %v5314_v21 = vmul.f32 0.4, %v5058_v57 }
 0x397   : > { %5739 = vst [vmem:[%s9611_s6 + $0x8] sm:$0xff] %v5530_v61  ;;  %5738 = vst [vmem:[%s9611_s6] sm:$0xff] %v5498_v47  ;;  %v5424_v61 = vsel %vm5168_vm0, %v5040_v62, %v5296_v34  ;;  %v5297_v47 = vmul.f32 0.4, %v5041_v17  ;;  %v5298_v0 = vmul.f32 0.4, %v5042_v6  ;;  %vm5186_vm3 = vcmp.ge.f32.partialorder %v5058_v57, 0.0 }
 0x398   : > { %v5441_v22 = vsel %vm5185_vm1, %v5057_v3, %v5313_v51  ;;  %vm5170_vm4 = vcmp.ge.f32.partialorder %v5042_v6, 0.0  ;;  %v5442_v12 = vsel %vm5186_vm3, %v5058_v57, %v5314_v21  ;;  %v10054_v62 = vld [vmem:[#allocation39_spill] sm:$0xff]  ;;  %v5047_v34 = vsub.f32 %v4918_v11, %v9392_v58  ;;  %v10065_v11 = vld [vmem:[#allocation77_spill] sm:$0xff] }
 0x399   : > { %v5425_v56 = vsel %vm5169_vm2, %v5041_v17, %v5297_v47  ;;  %v4919_v24 = vmul.f32 %v9386_v28, %v10054_v62  ;;  %v10056_v17 = vld [vmem:[#allocation41_spill] sm:$0xff]  ;;  %v5064_v51 = vsub.f32 %v4935_v55, %v9392_v58  ;;  %v4956_v1 = vmul.f32 %v9386_v28, %v10065_v11  ;;  %v10067_v55 = vld [vmem:[#allocation80_spill] sm:$0xff] }
 0x39a   : > { %5643 = vxpose.xlu1.b32.cont [2/16] (narrow) %v5435_v36, 16  ;;  %5611 = vxpose.xlu0.b32.cont [2/16] (narrow) %v5419_v33, 16  ;;  %v5531_v52 = vpop.trf.xlu1  ;;  %v5499_v60 = vpop.trf.xlu0  ;;  %v4931_v36 = vmul.f32 %v9386_v28, %v10047_v14  ;;  %v5059_v33 = vsub.f32 %v4930_v46, %v9392_v58  ;;  %v4920_v10 = vmul.f32 %v9386_v28, %v10056_v17  ;;  %vm5175_vm14 = vcmp.ge.f32.partialorder %v5047_v34, 0.0 }
 0x39b   : > { %5747 = vst [vmem:[%s9611_s6 + $0x48] sm:$0xff] %v5531_v52  ;;  %5746 = vst [vmem:[%s9611_s6 + $0x40] sm:$0xff] %v5499_v60  ;;  %v5043_v52 = vsub.f32 %v4914_v9, %v9392_v58  ;;  %v10048_v60 = vld [vmem:[#allocation37_spill] sm:$0xff]  ;;  %v5048_v47 = vsub.f32 %v4919_v24, %v9392_v58  ;;  %v4953_v14 = vmul.f32 %v9386_v28, %v10059_v16  ;;  %vm5192_vm15 = vcmp.ge.f32.partialorder %v5064_v51, 0.0  ;;  %v10066_v24 = vld [vmem:[#allocation64_spill] sm:$0xff] }
 0x39c   : > { %v4916_v45 = vmul.f32 %v9386_v28, %v10048_v60  ;;  %vm5187_vm5 = vcmp.ge.f32.partialorder %v5059_v33, 0.0  ;;  %v5315_v53 = vmul.f32 0.4, %v5059_v33  ;;  %v5060_v44 = vsub.f32 %v4931_v36, %v9392_v58  ;;  %v10057_v9 = vld [vmem:[#allocation57_spill] sm:$0xff] }
 0x39d   : > { %vm5171_vm6 = vcmp.ge.f32.partialorder %v5043_v52, 0.0  ;;  %v4936_v7 = vmul.f32 %v9386_v28, %v10057_v9  ;;  %v5304_v21 = vmul.f32 0.4, %v5048_v47  ;;  %vm5176_vm0 = vcmp.ge.f32.partialorder %v5048_v47, 0.0 }
 0x39e   : > { %5644 = vxpose.xlu1.b32.cont [3/16] (narrow) %v5436_v20, 16  ;;  %5612 = vxpose.xlu0.b32.cont [3/16] (narrow) %v5420_v5, 16  ;;  %v5426_v20 = vsel %vm5170_vm4, %v5042_v6, %v5298_v0  ;;  %v5299_v5 = vmul.f32 0.4, %v5043_v52  ;;  %v5443_v38 = vsel %vm5187_vm5, %v5059_v33, %v5315_v53  ;;  %v5045_v30 = vsub.f32 %v4916_v45, %v9392_v58  ;;  %v10058_v6 = vld [vmem:[#allocation60_spill] sm:$0xff]  ;;  %v10061_v45 = vld [vmem:[#allocation78_spill] sm:$0xff] }
 0x39f   : > { %vm5188_vm7 = vcmp.ge.f32.partialorder %v5060_v44, 0.0  ;;  %v4937_v48 = vmul.f32 %v9386_v28, %v10058_v6  ;;  %v5049_v0 = vsub.f32 %v4920_v10, %v9392_v58  ;;  %v4954_v15 = vmul.f32 %v9386_v28, %v10061_v45 }
 0x3a0   : > { %v5427_v63 = vsel %vm5171_vm6, %v5043_v52, %v5299_v5  ;;  %vm5173_vm10 = vcmp.ge.f32.partialorder %v5045_v30, 0.0  ;;  %v10060_v52 = vld [vmem:[#allocation62_spill] sm:$0xff]  ;;  %v5082_v53 = vsub.f32 %v4953_v14, %v9392_v58  ;;  %v4941_v32 = vmul.f32 %v9386_v28, %v10066_v24  ;;  %v10070_v14 = vld [vmem:[#allocation63_spill] sm:$0xff] }
 0x3a1   : > { %v4938_v60 = vmul.f32 %v9386_v28, %v10060_v52  ;;  %v5066_v5 = vsub.f32 %v4937_v48, %v9392_v58  ;;  %vm5177_vm2 = vcmp.ge.f32.partialorder %v5049_v0, 0.0 }
 0x3a2   : > { %5645 = vxpose.xlu1.b32.cont [4/16] (narrow) %v5437_v18, 16  ;;  %5613 = vxpose.xlu0.b32.cont [4/16] (narrow) %v5421_v23, 16  ;;  %v5061_v18 = vsub.f32 %v4932_v54, %v9392_v58  ;;  %v5316_v23 = vmul.f32 0.4, %v5060_v44  ;;  %vm5210_vm3 = vcmp.ge.f32.partialorder %v5082_v53, 0.0  ;;  %v5070_v16 = vsub.f32 %v4941_v32, %v9392_v58  ;;  %v10078_v32 = vld [vmem:[#allocation67_spill] sm:$0xff] }
 0x3a3   : > { %vm5194_vm4 = vcmp.ge.f32.partialorder %v5066_v5, 0.0 }
 0x3a4   : > { %vm5189_vm9 = vcmp.ge.f32.partialorder %v5061_v18, 0.0  ;;  %v5317_v35 = vmul.f32 0.4, %v5061_v18  ;;  %v5444_v25 = vsel %vm5188_vm7, %v5060_v44, %v5316_v23  ;;  %v5322_v23 = vmul.f32 0.4, %v5066_v5 }
 0x3a6   : > { %5646 = vxpose.xlu1.b32.cont [5/16] (narrow) %v5438_v40, 16  ;;  %5614 = vxpose.xlu0.b32.cont [5/16] (narrow) %v5422_v13, 16  ;;  %v5428_v40 = vsel %vm5172_vm8, %v5044_v8, %v5300_v50  ;;  %v5301_v13 = vmul.f32 0.4, %v5045_v30  ;;  %v5445_v27 = vsel %vm5189_vm9, %v5061_v18, %v5317_v35  ;;  %v10062_v8 = vld [vmem:[#allocation59_spill] sm:$0xff]  ;;  %v5067_v50 = vsub.f32 %v4938_v60, %v9392_v58 }
 0x3a7   : > { %v4939_v2 = vmul.f32 %v9386_v28, %v10062_v8  ;;  %v5084_v35 = vsub.f32 %v4955_v41, %v9392_v58  ;;  %v5326_v60 = vmul.f32 0.4, %v5070_v16  ;;  %v10074_v41 = vld [vmem:[#allocation68_spill] sm:$0xff] }
 0x3a8   : > { %v5429_v3 = vsel %vm5173_vm10, %v5045_v30, %v5301_v13  ;;  %v10064_v30 = vld [vmem:[#allocation61_spill] sm:$0xff]  ;;  %vm5195_vm6 = vcmp.ge.f32.partialorder %v5067_v50, 0.0 }
 0x3a9   : > { %v4940_v42 = vmul.f32 %v9386_v28, %v10064_v30  ;;  %v5068_v13 = vsub.f32 %v4939_v2, %v9392_v58  ;;  %vm5212_vm7 = vcmp.ge.f32.partialorder %v5084_v35, 0.0 }
 0x3aa   : > { %5647 = vxpose.xlu1.b32.cont [6/16] (narrow) %v5439_v37, 16  ;;  %5615 = vxpose.xlu0.b32.cont [6/16] (narrow) %v5423_v26, 16  ;;  %v5063_v37 = vsub.f32 %v4934_v19, %v9392_v58  ;;  %v5318_v26 = vmul.f32 0.4, %v5062_v39 }
 0x3ab   : > { %v5069_v17 = vsub.f32 %v4940_v42, %v9392_v58  ;;  %vm5196_vm8 = vcmp.ge.f32.partialorder %v5068_v13, 0.0 }
 0x3ac   : > { %vm5191_vm13 = vcmp.ge.f32.partialorder %v5063_v37, 0.0  ;;  %v5319_v46 = vmul.f32 0.4, %v5063_v37  ;;  %v5446_v57 = vsel %vm5190_vm11, %v5062_v39, %v5318_v26 }
 0x3ad   : > { %v5325_v48 = vmul.f32 0.4, %v5069_v17  ;;  %vm5197_vm10 = vcmp.ge.f32.partialorder %v5069_v17, 0.0 }
 0x3ae   : > { %5648 = vxpose.xlu1.b32.cont [7/16] (narrow) %v5440_v59, 16  ;;  %5616 = vxpose.xlu0.b32.cont [7/16] (narrow) %v5424_v61, 16  ;;  %v5430_v59 = vsel %vm5174_vm12, %v5046_v31, %v5302_v43  ;;  %v5303_v61 = vmul.f32 0.4, %v5047_v34  ;;  %v5447_v36 = vsel %vm5191_vm13, %v5063_v37, %v5319_v46  ;;  %v5340_v43 = vmul.f32 0.4, %v5084_v35 }
 0x3af   : > { %vm5198_vm12 = vcmp.ge.f32.partialorder %v5070_v16, 0.0 }
 0x3b0   : > { %v5431_v33 = vsel %vm5175_vm14, %v5047_v34, %v5303_v61  ;;  %v5324_v34 = vmul.f32 0.4, %v5068_v13  ;;  %v5454_v8 = vsel %vm5198_vm12, %v5070_v16, %v5326_v60  ;;  %v10082_v16 = vld [vmem:[#allocation72_spill] sm:$0xff] }
 0x3b2   : > { %5649 = vxpose.xlu1.b32.cont [8/16] (narrow) %v5441_v22, 16  ;;  %5617 = vxpose.xlu0.b32.cont [8/16] (narrow) %v5425_v56, 16  ;;  %v5065_v22 = vsub.f32 %v4936_v7, %v9392_v58  ;;  %v5320_v56 = vmul.f32 0.4, %v5064_v51  ;;  %v10068_v7 = vld [vmem:[#allocation66_spill] sm:$0xff]  ;;  %v5452_v6 = vsel %vm5196_vm8, %v5068_v13, %v5324_v34 }
 0x3b3   : > { %v4942_v46 = vmul.f32 %v9386_v28, %v10068_v7 }
 0x3b4   : > { %vm5193_vm1 = vcmp.ge.f32.partialorder %v5065_v22, 0.0  ;;  %v5321_v54 = vmul.f32 0.4, %v5065_v22  ;;  %v5448_v44 = vsel %vm5192_vm15, %v5064_v51, %v5320_v56  ;;  %v10069_v51 = vld [vmem:[#allocation82_spill] sm:$0xff] }
 0x3b5   : > { %v5071_v45 = vsub.f32 %v4942_v46, %v9392_v58  ;;  %v10081_v46 = vld [vmem:[#allocation85_spill] sm:$0xff] }
 0x3b6   : > { %5650 = vxpose.xlu1.b32.cont [9/16] (narrow) %v5442_v12, 16  ;;  %5618 = vxpose.xlu0.b32.cont [9/16] (narrow) %v5426_v20, 16  ;;  %v5432_v12 = vsel %vm5176_vm0, %v5048_v47, %v5304_v21  ;;  %v5305_v20 = vmul.f32 0.4, %v5049_v0  ;;  %v5449_v49 = vsel %vm5193_vm1, %v5065_v22, %v5321_v54  ;;  %v5468_v47 = vsel %vm5212_vm7, %v5084_v35, %v5340_v43  ;;  %v10071_v22 = vld [vmem:[#allocation79_spill] sm:$0xff]  ;;  %v10077_v35 = vld [vmem:[#allocation86_spill] sm:$0xff] }
 0x3b7   : > { %v5327_v2 = vmul.f32 0.4, %v5071_v45  ;;  %vm5199_vm14 = vcmp.ge.f32.partialorder %v5071_v45, 0.0 }
 0x3b8   : > { %v5433_v18 = vsel %vm5177_vm2, %v5049_v0, %v5305_v20  ;;  %v5453_v0 = vsel %vm5197_vm10, %v5069_v17, %v5325_v48 }
 0x3ba   : > { %5651 = vxpose.xlu1.b32.cont [10/16] (narrow) %v5443_v38, 16  ;;  %5619 = vxpose.xlu0.b32.cont [10/16] (narrow) %v5427_v63, 16  ;;  %v5083_v38 = vsub.f32 %v4954_v15, %v9392_v58  ;;  %v5338_v63 = vmul.f32 0.4, %v5082_v53  ;;  %v10072_v15 = vld [vmem:[#allocation65_spill] sm:$0xff] }
 0x3bb   : > { %v4944_v54 = vmul.f32 %v9386_v28, %v10072_v15 }
 0x3bc   : > { %vm5211_vm5 = vcmp.ge.f32.partialorder %v5083_v38, 0.0  ;;  %v5339_v19 = vmul.f32 0.4, %v5083_v38  ;;  %v5466_v39 = vsel %vm5210_vm3, %v5082_v53, %v5338_v63  ;;  %v10073_v53 = vld [vmem:[#allocation81_spill] sm:$0xff] }
 0x3bd   : > { %v5073_v11 = vsub.f32 %v4944_v54, %v9392_v58 }
 0x3be   : > { %5652 = vxpose.xlu1.b32.cont [11/16] (narrow) %v5444_v25, 16  ;;  %5620 = vxpose.xlu0.b32.cont [11/16] (narrow) %v5428_v40, 16  ;;  %v5450_v25 = vsel %vm5194_vm4, %v5066_v5, %v5322_v23  ;;  %v5323_v40 = vmul.f32 0.4, %v5067_v50  ;;  %v5467_v37 = vsel %vm5211_vm5, %v5083_v38, %v5339_v19  ;;  %v10075_v38 = vld [vmem:[#allocation84_spill] sm:$0xff] }
 0x3bf   : > { %vm5201_vm2 = vcmp.ge.f32.partialorder %v5073_v11, 0.0 }
 0x3c0   : > { %v5451_v26 = vsel %vm5195_vm6, %v5067_v50, %v5323_v40  ;;  %v5455_v50 = vsel %vm5199_vm14, %v5071_v45, %v5327_v2  ;;  %v10084_v45 = vld [vmem:[#allocation74_spill] sm:$0xff] }
 0x3c1   : > { %v4950_v15 = vmul.f32 %v9386_v28, %v10084_v45 }
 0x3c2   : > { %5653 = vxpose.xlu1.b32.cont [12/16] (narrow) %v5445_v27, 16  ;;  %5621 = vxpose.xlu0.b32.cont [12/16] (narrow) %v5429_v3, 16  ;;  %v4957_v27 = vmul.f32 %v9386_v28, %v10067_v55  ;;  %v5085_v3 = vsub.f32 %v4956_v1, %v9392_v58  ;;  %v10076_v1 = vld [vmem:[#allocation70_spill] sm:$0xff]  ;;  %v4947_v55 = vmul.f32 %v9386_v28, %v10078_v32 }
 0x3c3   : > { %v4946_v19 = vmul.f32 %v9386_v28, %v10076_v1 }
 0x3c4   : > { %vm5213_vm9 = vcmp.ge.f32.partialorder %v5085_v3, 0.0  ;;  %v5086_v61 = vsub.f32 %v4957_v27, %v9392_v58  ;;  %v10079_v27 = vld [vmem:[#allocation83_spill] sm:$0xff]  ;;  %v5076_v48 = vsub.f32 %v4947_v55, %v9392_v58 }
 0x3c6   : > { %5654 = vxpose.xlu1.b32.cont [13/16] (narrow) %v5446_v57, 16  ;;  %5622 = vxpose.xlu0.b32.cont [13/16] (narrow) %v5430_v59, 16  ;;  %v4958_v57 = vmul.f32 %v9386_v28, %v10069_v51  ;;  %v5341_v59 = vmul.f32 0.4, %v5085_v3  ;;  %v5342_v52 = vmul.f32 0.4, %v5086_v61  ;;  %v4964_v51 = vmul.f32 %v9386_v28, %v10081_v46 }
 0x3c7   : > { %vm5214_vm11 = vcmp.ge.f32.partialorder %v5086_v61, 0.0  ;;  %vm5204_vm8 = vcmp.ge.f32.partialorder %v5076_v48, 0.0 }
 0x3c8   : > { %v5469_v56 = vsel %vm5213_vm9, %v5085_v3, %v5341_v59  ;;  %v5087_v21 = vsub.f32 %v4958_v57, %v9392_v58  ;;  %v5470_v5 = vsel %vm5214_vm11, %v5086_v61, %v5342_v52  ;;  %v5332_v52 = vmul.f32 0.4, %v5076_v48 }
 0x3ca   : > { %5655 = vxpose.xlu1.b32.cont [14/16] (narrow) %v5447_v36, 16  ;;  %5623 = vxpose.xlu0.b32.cont [14/16] (narrow) %v5431_v33, 16  ;;  %v4943_v36 = vmul.f32 %v9386_v28, %v10070_v14  ;;  %v4959_v33 = vmul.f32 %v9386_v28, %v10071_v22  ;;  %vm5215_vm13 = vcmp.ge.f32.partialorder %v5087_v21, 0.0  ;;  %v4949_v14 = vmul.f32 %v9386_v28, %v10082_v16 }
 0x3cc   : > { %v5088_v20 = vsub.f32 %v4959_v33, %v9392_v58  ;;  %v5072_v4 = vsub.f32 %v4943_v36, %v9392_v58  ;;  %v10083_v36 = vld [vmem:[#allocation88_spill] sm:$0xff] }
 0x3cd   : > { %v4965_v22 = vmul.f32 %v9386_v28, %v10083_v36 }
 0x3ce   : > { %5656 = vxpose.xlu1.b32.cont [15/16] (narrow) %v5448_v44, 16  ;;  %5624 = vxpose.xlu0.b32.cont [15/16] (narrow) %v5432_v12, 16  ;;  %v4960_v44 = vmul.f32 %v9386_v28, %v10073_v53  ;;  %v5343_v12 = vmul.f32 0.4, %v5087_v21  ;;  %v5344_v30 = vmul.f32 0.4, %v5088_v20 }
 0x3cf   : > { %v5328_v42 = vmul.f32 0.4, %v5072_v4  ;;  %vm5216_vm15 = vcmp.ge.f32.partialorder %v5088_v20, 0.0  ;;  %vm5200_vm0 = vcmp.ge.f32.partialorder %v5072_v4, 0.0  ;;  %v5094_v53 = vsub.f32 %v4965_v22, %v9392_v58 }
 0x3d0   : > { %v5471_v63 = vsel %vm5215_vm13, %v5087_v21, %v5343_v12  ;;  %v5089_v23 = vsub.f32 %v4960_v44, %v9392_v58  ;;  %v5472_v13 = vsel %vm5216_vm15, %v5088_v20, %v5344_v30  ;;  %v5460_v12 = vsel %vm5204_vm8, %v5076_v48, %v5332_v52  ;;  %v10087_v30 = vld [vmem:[#allocation73_spill] sm:$0xff] }
 0x3d1   : > { %vm5222_vm11 = vcmp.ge.f32.partialorder %v5094_v53, 0.0 }
 0x3d2   : > { %5657 = vxpose.xlu1.b32.end [16/16] (narrow) %v5449_v49, 16  ;;  %5625 = vxpose.xlu0.b32.end [16/16] (narrow) %v5433_v18, 16  ;;  %v4945_v49 = vmul.f32 %v9386_v28, %v10074_v41  ;;  %v4961_v18 = vmul.f32 %v9386_v28, %v10075_v38  ;;  %vm5217_vm1 = vcmp.ge.f32.partialorder %v5089_v23, 0.0  ;;  %v5095_v38 = vsub.f32 %v9389_v29, %v9392_v58 }
 0x3d4   : > { %v5090_v40 = vsub.f32 %v4961_v18, %v9392_v58  ;;  %v5074_v24 = vsub.f32 %v4945_v49, %v9392_v58  ;;  %vm5223_vm13 = vcmp.ge.f32.partialorder %v5095_v38, 0.0 }
 0x3d6   : > { %5706 = vxpose.xlu1.b32.start [1/16] (narrow) %v5466_v39, 16  ;;  %5674 = vxpose.xlu0.b32.start [1/16] (narrow) %v5450_v25, 16  ;;  %v5594_v31 = vpop.trf.xlu1  ;;  %v5562_v62 = vpop.trf.xlu0  ;;  %v4962_v39 = vmul.f32 %v9386_v28, %v10077_v35  ;;  %v5345_v25 = vmul.f32 0.4, %v5089_v23  ;;  %v5346_v34 = vmul.f32 0.4, %v5090_v40 }
 0x3d7   : > { %5741 = vst [vmem:[%s9611_s6 + $0x18] sm:$0xff] %v5594_v31  ;;  %5740 = vst [vmem:[%s9611_s6 + $0x10] sm:$0xff] %v5562_v62  ;;  %v5456_v31 = vsel %vm5200_vm0, %v5072_v4, %v5328_v42  ;;  %v5329_v62 = vmul.f32 0.4, %v5073_v11  ;;  %v5330_v17 = vmul.f32 0.4, %v5074_v24  ;;  %v4952_v42 = vmul.f32 %v9386_v28, %v10087_v30 }
 0x3d8   : > { %v5473_v3 = vsel %vm5217_vm1, %v5089_v23, %v5345_v25  ;;  %vm5218_vm3 = vcmp.ge.f32.partialorder %v5090_v40, 0.0  ;;  %vm5202_vm4 = vcmp.ge.f32.partialorder %v5074_v24, 0.0  ;;  %v10086_v4 = vld [vmem:[#allocation87_spill] sm:$0xff] }
 0x3d9   : > { %v5457_v43 = vsel %vm5201_vm2, %v5073_v11, %v5329_v62  ;;  %v5474_v61 = vsel %vm5218_vm3, %v5090_v40, %v5346_v34  ;;  %v4967_v41 = vmul.f32 %v9386_v28, %v10086_v4  ;;  %v10088_v11 = vld [vmem:[#allocation89_spill] sm:$0xff] }
 0x3da   : > { %5707 = vxpose.xlu1.b32.cont [2/16] (narrow) %v5467_v37, 16  ;;  %5675 = vxpose.xlu0.b32.cont [2/16] (narrow) %v5451_v26, 16  ;;  %v5595_v10 = vpop.trf.xlu1  ;;  %v5563_v9 = vpop.trf.xlu0  ;;  %v4963_v37 = vmul.f32 %v9386_v28, %v10079_v27  ;;  %v5091_v26 = vsub.f32 %v4962_v39, %v9392_v58  ;;  %v4968_v1 = vmul.f32 %v9386_v28, %v10088_v11 }
 0x3db   : > { %5749 = vst [vmem:[%s9611_s6 + $0x58] sm:$0xff] %v5595_v10  ;;  %5748 = vst [vmem:[%s9611_s6 + $0x50] sm:$0xff] %v5563_v9  ;;  %v5075_v10 = vsub.f32 %v4946_v19, %v9392_v58  ;;  %v10080_v9 = vld [vmem:[#allocation69_spill] sm:$0xff]  ;;  %v5351_v19 = vmul.f32 0.4, %v5095_v38  ;;  %v5096_v35 = vsub.f32 %v4967_v41, %v9392_v58 }
 0x3dc   : > { %v4948_v7 = vmul.f32 %v9386_v28, %v10080_v9  ;;  %vm5219_vm5 = vcmp.ge.f32.partialorder %v5091_v26, 0.0  ;;  %v5347_v57 = vmul.f32 0.4, %v5091_v26  ;;  %v5092_v59 = vsub.f32 %v4963_v37, %v9392_v58 }
 0x3dd   : > { %vm5203_vm6 = vcmp.ge.f32.partialorder %v5075_v10, 0.0  ;;  %vm5224_vm15 = vcmp.ge.f32.partialorder %v5096_v35, 0.0 }
 0x3de   : > { %5708 = vxpose.xlu1.b32.cont [3/16] (narrow) %v5468_v47, 16  ;;  %5676 = vxpose.xlu0.b32.cont [3/16] (narrow) %v5452_v6, 16  ;;  %v5458_v47 = vsel %vm5202_vm4, %v5074_v24, %v5330_v17  ;;  %v5331_v6 = vmul.f32 0.4, %v5075_v10  ;;  %v5475_v33 = vsel %vm5219_vm5, %v5091_v26, %v5347_v57  ;;  %v5077_v60 = vsub.f32 %v4948_v7, %v9392_v58 }
 0x3df   : > { %vm5220_vm7 = vcmp.ge.f32.partialorder %v5092_v59, 0.0  ;;  %v5352_v24 = vmul.f32 0.4, %v5096_v35 }
 0x3e0   : > { %v5459_v21 = vsel %vm5203_vm6, %v5075_v10, %v5331_v6  ;;  %v5333_v20 = vmul.f32 0.4, %v5077_v60  ;;  %vm5205_vm10 = vcmp.ge.f32.partialorder %v5077_v60, 0.0 }
 0x3e1   : > { %v5480_v55 = vsel %vm5224_vm15, %v5096_v35, %v5352_v24 }
 0x3e2   : > { %5709 = vxpose.xlu1.b32.cont [4/16] (narrow) %v5469_v56, 16  ;;  %5677 = vxpose.xlu0.b32.cont [4/16] (narrow) %v5453_v0, 16  ;;  %v5093_v56 = vsub.f32 %v4964_v51, %v9392_v58  ;;  %v5348_v0 = vmul.f32 0.4, %v5092_v59  ;;  %v5461_v18 = vsel %vm5205_vm10, %v5077_v60, %v5333_v20 }
 0x3e4   : > { %vm5221_vm9 = vcmp.ge.f32.partialorder %v5093_v56, 0.0  ;;  %v5349_v54 = vmul.f32 0.4, %v5093_v56  ;;  %v5476_v44 = vsel %vm5220_vm7, %v5092_v59, %v5348_v0 }
 0x3e6   : > { %5710 = vxpose.xlu1.b32.cont [5/16] (narrow) %v5470_v5, 16  ;;  %5678 = vxpose.xlu0.b32.cont [5/16] (narrow) %v5454_v8, 16  ;;  %v5078_v5 = vsub.f32 %v4949_v14, %v9392_v58  ;;  %v10085_v8 = vld [vmem:[#allocation71_spill] sm:$0xff]  ;;  %v5477_v49 = vsel %vm5221_vm9, %v5093_v56, %v5349_v54 }
 0x3e7   : > { %v4951_v2 = vmul.f32 %v9386_v28, %v10085_v8  ;;  %v5081_v28 = vsub.f32 %v4952_v42, %v9392_v58 }
 0x3e8   : > { %v5334_v23 = vmul.f32 0.4, %v5078_v5  ;;  %vm5206_vm12 = vcmp.ge.f32.partialorder %v5078_v5, 0.0 }
 0x3e9   : > { %v5080_v40 = vsub.f32 %v4951_v2, %v9392_v58  ;;  %vm5209_vm2 = vcmp.ge.f32.partialorder %v5081_v28, 0.0 }
 0x3ea   : > { %5711 = vxpose.xlu1.b32.cont [6/16] (narrow) %v5471_v63, 16  ;;  %5679 = vxpose.xlu0.b32.cont [6/16] (narrow) %v5455_v50, 16  ;;  %v5350_v63 = vmul.f32 0.4, %v5094_v53  ;;  %v5079_v50 = vsub.f32 %v4950_v15, %v9392_v58  ;;  %v5462_v39 = vsel %vm5206_vm12, %v5078_v5, %v5334_v23 }
 0x3eb   : > { %v5336_v32 = vmul.f32 0.4, %v5080_v40  ;;  %vm5208_vm0 = vcmp.ge.f32.partialorder %v5080_v40, 0.0 }
 0x3ec   : > { %v5478_v29 = vsel %vm5222_vm11, %v5094_v53, %v5350_v63  ;;  %v5335_v25 = vmul.f32 0.4, %v5079_v50  ;;  %vm5207_vm14 = vcmp.ge.f32.partialorder %v5079_v50, 0.0 }
 0x3ed   : > { %v5464_v27 = vsel %vm5208_vm0, %v5080_v40, %v5336_v32 }
 0x3ee   : > { %5712 = vxpose.xlu1.b32.cont [7/16] (narrow) %v5472_v13, 16  ;;  %5680 = vxpose.xlu0.b32.cont [7/16] (narrow) %v5456_v31, 16  ;;  %v5479_v13 = vsel %vm5223_vm13, %v5095_v38, %v5351_v19  ;;  %v5097_v31 = vsub.f32 %v4968_v1, %v9392_v58  ;;  %v5463_v62 = vsel %vm5207_vm14, %v5079_v50, %v5335_v25 }
 0x3f0   : > { %v5353_v37 = vmul.f32 0.4, %v5097_v31  ;;  %vm5225_vm1 = vcmp.ge.f32.partialorder %v5097_v31, 0.0 }
 0x3f2   : > { %5713 = vxpose.xlu1.b32.cont [8/16] (narrow) %v5473_v3, 16  ;;  %5681 = vxpose.xlu0.b32.cont [8/16] (narrow) %v5457_v43, 16  ;;  %v5337_v3 = vmul.f32 0.4, %v5081_v28  ;;  %v5481_v26 = vsel %vm5225_vm1, %v5097_v31, %v5353_v37 }
 0x3f4   : > { %v5465_v58 = vsel %vm5209_vm2, %v5081_v28, %v5337_v3 }
 0x3f6   : > { %5714 = vxpose.xlu1.b32.cont [9/16] (narrow) %v5474_v61, 16  ;;  %5682 = vxpose.xlu0.b32.cont [9/16] (narrow) %v5458_v47, 16 }
 0x3fa   : > { %5715 = vxpose.xlu1.b32.cont [10/16] (narrow) %v5475_v33, 16  ;;  %5683 = vxpose.xlu0.b32.cont [10/16] (narrow) %v5459_v21, 16 }
 0x3fe   : > { %5716 = vxpose.xlu1.b32.cont [11/16] (narrow) %v5476_v44, 16  ;;  %5684 = vxpose.xlu0.b32.cont [11/16] (narrow) %v5460_v12, 16 }
 0x402   : > { %5717 = vxpose.xlu1.b32.cont [12/16] (narrow) %v5477_v49, 16  ;;  %5685 = vxpose.xlu0.b32.cont [12/16] (narrow) %v5461_v18, 16 }
 0x406   : > { %5718 = vxpose.xlu1.b32.cont [13/16] (narrow) %v5478_v29, 16  ;;  %5686 = vxpose.xlu0.b32.cont [13/16] (narrow) %v5462_v39, 16 }
 0x40a   : > { %5719 = vxpose.xlu1.b32.cont [14/16] (narrow) %v5479_v13, 16  ;;  %5687 = vxpose.xlu0.b32.cont [14/16] (narrow) %v5463_v62, 16 }
 0x40e   : > { %5720 = vxpose.xlu1.b32.cont [15/16] (narrow) %v5480_v55, 16  ;;  %5688 = vxpose.xlu0.b32.cont [15/16] (narrow) %v5464_v27, 16 }
 0x412   : > { %5721 = vxpose.xlu1.b32.end [16/16] (narrow) %v5481_v26, 16  ;;  %5689 = vxpose.xlu0.b32.end [16/16] (narrow) %v5465_v58, 16 }
 0x416   : > { %v5658_v43 = vpop.trf.xlu1  ;;  %v5626_v34 = vpop.trf.xlu0 }
 0x417   : > { %5743 = vst [vmem:[%s9611_s6 + $0x28] sm:$0xff] %v5658_v43  ;;  %5742 = vst [vmem:[%s9611_s6 + $0x20] sm:$0xff] %v5626_v34 }
 0x41a   : > { %v5659_v17 = vpop.trf.xlu1  ;;  %v5627_v10 = vpop.trf.xlu0 }
 0x41b   : > { %5751 = vst [vmem:[%s9611_s6 + $0x68] sm:$0xff] %v5659_v17  ;;  %5750 = vst [vmem:[%s9611_s6 + $0x60] sm:$0xff] %v5627_v10 }
 0x456   : > { %v5722_v9 = vpop.trf.xlu1  ;;  %v5690_v7 = vpop.trf.xlu0 }
 0x457   : > { %5745 = vst [vmem:[%s9611_s6 + $0x38] sm:$0xff] %v5722_v9  ;;  %5744 = vst [vmem:[%s9611_s6 + $0x30] sm:$0xff] %v5690_v7 }
 0x45a   : > { %v5723_v46 = vpop.trf.xlu1  ;;  %v5691_v51 = vpop.trf.xlu0 }
 0x45b   : > { %5753 = vst [vmem:[%s9611_s6 + $0x78] sm:$0xff] %v5723_v46  ;;  %5752 = vst [vmem:[%s9611_s6 + $0x70] sm:$0xff] %v5691_v51 }
 0x45c PF: > { %s12_s9 = sadd.s32 1, %s7554_s9  }
 0x45d   : > { %p9_p4 = scmp.ge.s32.totalorder %s12_s9, 4  }
 0x45f   :  { %11 = sbr.rel (!%p9_p4) target bundleno = 1 (0x1), region = 62 }

// kernel: encoder_forward.6
= control target key start
LH: loop header
LB: loop body
LE: loop exit
PB: predicated region body
PF: predicated region fallthrough
CT: control target
= control target key end

     0   :  { %s2401_s9 = smov 0   ;;  %s3074_s0 = inlined_call_operand.vmem [shape: f32[2,17,17,64], index: 0, kind: input, shape index: {}]   ;;  %s3075_s1 = inlined_call_operand.vmem [shape: bf16[4,64,32], index: 1, kind: input, shape index: {}]   ;;  %s3076_s2 = inlined_call_operand.vmem [shape: f32[2,32,256], index: 2, kind: output, shape index: {}]  }
   0x1 LB: > { %s1836_s10 = sadd.s32 4294967295, %s2384_s9   ;;  %p1840_p0 = scmp.ge.s32.totalorder %s2384_s9, 1  ;;  %s2384_s9 = sphi %s2401_s9, %s12_s9  }
   0x2   : > { %p112_p1 = scmp.lt.s32.totalorder %s2384_s9, 3 }
   0x4   : > { %p113_p2 = pnand %p1840_p0, %p112_p1 }
   0x5   : > { %v2360_v0 = vld [vmem:[%s3075_s1 + $0x20] sm:$0xff] (!%p113_p2)   ;;  %p134_p3 = scmp.lt.s32.totalorder (!%p113_p2), %s1836_s10, 1  ;;  %v2362_v2 = vld [vmem:[%s3075_s1 + $0x28] sm:$0xff] (!%p113_p2)   ;;  %v2364_v4 = vld [vmem:[%s3075_s1 + $0x30] sm:$0xff] (!%p113_p2)   ;;  %vm282_vm0 = vcmask (!%p113_p2), 523264   ;;  %vm1370_vm1 = vcmask (!%p113_p2), 261120  }
   0x6   : > { %116 = sbr.rel (%p113_p2) target bundleno = 550 (0x226), region = 28  ;;  %v2361_v1 = vld [vmem:[%s3075_s1 + $0x40] sm:$0xff] (!%p113_p2)   ;;  %2095 = vmatprep.subr.bf16.mxu1 (!%p113_p2), %v2360_v0  ;;  %v2363_v3 = vld [vmem:[%s3075_s1 + $0x48] sm:$0xff] (!%p113_p2)   ;;  %v2365_v5 = vld [vmem:[%s3075_s1 + $0x50] sm:$0xff] (!%p113_p2)  }
   0x7   : > { %2175 = vmatprep.subr.bf16.mxu0 (!%p113_p2), %v2361_v1  ;;  %2096 = vmatpush3.bf16.msra.mxu1 (!%p113_p2), %v2360_v0  ;;  %v2366_v6 = vld [vmem:[%s3075_s1 + $0x38] sm:$0xff] (!%p113_p2)   ;;  %v2368_v16 = vld [vmem:[%s3075_s1] sm:$0xff] (!%p113_p2)   ;;  %v2370_v31 = vld [vmem:[%s3075_s1 + $0x8] sm:$0xff] (!%p113_p2)  }
   0x8   : > { %2176 = vmatpush3.bf16.msra.mxu0 (!%p113_p2), %v2361_v1  ;;  %2097 = vmatprep.subr.bf16.mxu1 (!%p113_p2), %v2362_v2  ;;  %v2367_v10 = vld [vmem:[%s3075_s1 + $0x58] sm:$0xff] (!%p113_p2)   ;;  %v2369_v19 = vld [vmem:[%s3075_s1 + $0x60] sm:$0xff] (!%p113_p2)   ;;  %v2371_v32 = vld [vmem:[%s3075_s1 + $0x68] sm:$0xff] (!%p113_p2)  }
   0x9   : > { %2177 = vmatprep.subr.bf16.mxu0 (!%p113_p2), %v2363_v3  ;;  %v2372_v42 = vld [vmem:[%s3075_s1 + $0x10] sm:$0xff] (!%p113_p2)   ;;  %v2374_v56 = vld [vmem:[%s3075_s1 + $0x18] sm:$0xff] (!%p113_p2)  }
   0xa   : > { %v2373_v46 = vld [vmem:[%s3075_s1 + $0x70] sm:$0xff] (!%p113_p2)   ;;  %v2375_v57 = vld [vmem:[%s3075_s1 + $0x78] sm:$0xff] (!%p113_p2)  }
   0xb   : > { %2098 = vmatpush3.bf16.msra.mxu1 (!%p113_p2), %v2362_v2 }
   0xc   : > { %2178 = vmatpush3.bf16.msra.mxu0 (!%p113_p2), %v2363_v3  ;;  %2099 = vmatprep.subr.bf16.mxu1 (!%p113_p2), %v2364_v4 }
   0xd   : > { %s3078_s10 = smov (!%p134_p3, %s1836_s10), 1  ;;  %2179 = vmatprep.subr.bf16.mxu0 %v2365_v5 }
   0xe   : > { %s2351_s21 = smul.u32 408, %s3078_s10 }
   0xf   : > { %2100 = vmatpush3.bf16.msra.mxu1 %v2364_v4 }
  0x10   : > { %s2433_s26 = scalar_lea.vmem %s3074_s0, %s2351_s21  ;;  %2180 = vmatpush3.bf16.msra.mxu0 %v2365_v5  ;;  %2101 = vmatprep.subr.bf16.mxu1 %v2366_v6  ;;  %s2014_s21 = sshll.u32 %s3078_s10, 6 }
  0x11   : > { %v201_v7 = vld [vmem:[%s2433_s26 + $0x1] sm:$0xff]  ;;  %v202_v8 = vld [vmem:[%s2433_s26 + $0x9] sm:$0xff]  ;;  %v1892_v9 = vld [vmem:[%s2433_s26 + $0x18] sm:$0xff]  ;;  %2181 = vmatprep.subr.bf16.mxu0 %v2367_v10  ;;  %s143_s24 = scalar_lea.vmem %s3076_s2, %s2014_s21 }
  0x12   : > { %v233_v11 = vpack.c.bf16 %v202_v8, %v201_v7  ;;  %v1893_v12 = vld [vmem:[%s2433_s26 + $0x20] sm:$0xff]  ;;  %v1894_v17 = vld [vmem:[%s2433_s26 + $0x30] sm:$0xff]  ;;  %v1895_v18 = vld [vmem:[%s2433_s26 + $0x38] sm:$0xff] }
  0x13   : > { %v2445_v13 = vpack.c.bf16 %v1893_v12, %v1892_v9  ;;  %v203_v14 = vld [vmem:[%s2433_s26 + $0x19] sm:$0xff]  ;;  %v204_v15 = vld [vmem:[%s2433_s26 + $0x21] sm:$0xff]  ;;  %v205_v20 = vld [vmem:[%s2433_s26 + $0x31] sm:$0xff]  ;;  %2102 = vmatpush3.bf16.msra.mxu1 %v2366_v6  ;;  %v2466_v25 = vpack.c.bf16 %v1895_v18, %v1894_v17 }
  0x14   : > { %2103 = vmatprep.mubr.msk.bf16.mxu1 %vm282_vm0, %v233_v11  ;;  %v206_v21 = vld [vmem:[%s2433_s26 + $0x39] sm:$0xff]  ;;  %v2462_v22 = vpack.c.bf16 %v204_v15, %v203_v14  ;;  %v1896_v23 = vld [vmem:[%s2433_s26 + $0x48] sm:$0xff]  ;;  %v1897_v24 = vld [vmem:[%s2433_s26 + $0x50] sm:$0xff]  ;;  %2182 = vmatpush3.bf16.msra.mxu0 %v2367_v10 }
  0x15   : > { %2183 = vmatprep.mubr.msk.bf16.mxu0 %vm282_vm0, %v2445_v13  ;;  %2135 = vmatprep.subr.bf16.mxu1 %v2368_v16  ;;  %v2468_v26 = vpack.c.bf16 %v206_v21, %v205_v20  ;;  %v2470_v27 = vpack.c.bf16 %v1897_v24, %v1896_v23  ;;  %v207_v28 = vld [vmem:[%s2433_s26 + $0x49] sm:$0xff]  ;;  %v208_v29 = vld [vmem:[%s2433_s26 + $0x51] sm:$0xff]  ;;  %v1898_v30 = vld [vmem:[%s2433_s26 + $0x60] sm:$0xff] }
  0x16   : > { %2215 = vmatprep.subr.bf16.mxu0 %v2369_v19  ;;  %2104 = vmatmul.mubr.msk.bf16.vlgmr.msra.gmra.mrb[0].mxu1 %vm282_vm0, %v2462_v22  ;;  %v1899_v33 = vld [vmem:[%s2433_s26 + $0x68] sm:$0xff]  ;;  %v1900_v36 = vld [vmem:[%s2433_s26 + $0x78] sm:$0xff]  ;;  %v1901_v37 = vld [vmem:[%s2433_s26 + $0x80] sm:$0xff]  ;;  %v2494_v38 = vpack.c.bf16 %v208_v29, %v207_v28 }
  0x17   : > { %2184 = vmatmul.mubr.msk.bf16.vlgmr.msra.gmra.mrb[0].mxu0 %vm282_vm0, %v2466_v25  ;;  %2136 = vmatpush3.bf16.msra.mxu1 %v2368_v16  ;;  %v209_v34 = vld [vmem:[%s2433_s26 + $0x61] sm:$0xff]  ;;  %v210_v35 = vld [vmem:[%s2433_s26 + $0x69] sm:$0xff]  ;;  %v2496_v39 = vpack.c.bf16 %v1899_v33, %v1898_v30  ;;  %v2500_v41 = vpack.c.bf16 %v1901_v37, %v1900_v36  ;;  %v211_v43 = vld [vmem:[%s2433_s26 + $0x79] sm:$0xff] }
  0x18   : > { %2216 = vmatpush3.bf16.msra.mxu0 %v2369_v19  ;;  %2107 = vmatprep.mubr.msk.bf16.mxu1 %vm282_vm0, %v2468_v26  ;;  %v2498_v40 = vpack.c.bf16 %v210_v35, %v209_v34  ;;  %v212_v44 = vld [vmem:[%s2433_s26 + $0x81] sm:$0xff]  ;;  %v1902_v45 = vld [vmem:[%s2433_s26 + $0x90] sm:$0xff]  ;;  %v1903_v47 = vld [vmem:[%s2433_s26 + $0x98] sm:$0xff] }
  0x19   : > { %2187 = vmatprep.mubr.msk.bf16.mxu0 %vm282_vm0, %v2470_v27  ;;  %2137 = vmatprep.subr.bf16.mxu1 %v2370_v31  ;;  %v213_v48 = vld [vmem:[%s2433_s26 + $0x91] sm:$0xff]  ;;  %v214_v49 = vld [vmem:[%s2433_s26 + $0x99] sm:$0xff]  ;;  %v1904_v50 = vld [vmem:[%s2433_s26 + $0xa8] sm:$0xff]  ;;  %v2524_v52 = vpack.c.bf16 %v212_v44, %v211_v43  ;;  %v2526_v53 = vpack.c.bf16 %v1903_v47, %v1902_v45 }
  0x1a   : > { %2217 = vmatprep.subr.bf16.mxu0 %v2371_v32  ;;  %v1905_v51 = vld [vmem:[%s2433_s26 + $0xb0] sm:$0xff]  ;;  %v2528_v54 = vpack.c.bf16 %v214_v49, %v213_v48  ;;  %v1906_v60 = vld [vmem:[%s2433_s26 + $0xc0] sm:$0xff]  ;;  %v1907_v61 = vld [vmem:[%s2433_s26 + $0xc8] sm:$0xff] }
  0x1b   : > { %2138 = vmatpush3.bf16.msra.mxu1 %v2370_v31  ;;  %v2530_v55 = vpack.c.bf16 %v1905_v51, %v1904_v50  ;;  %v215_v58 = vld [vmem:[%s2433_s26 + $0xa9] sm:$0xff]  ;;  %v216_v59 = vld [vmem:[%s2433_s26 + $0xb1] sm:$0xff]  ;;  %v217_v62 = vld [vmem:[%s2433_s26 + $0xc1] sm:$0xff]  ;;  %v2556_v3 = vpack.c.bf16 %v1907_v61, %v1906_v60 }
  0x1c   : > { %2218 = vmatpush3.bf16.msra.mxu0 %v2371_v32  ;;  %2139 = vmatprep.subr.bf16.mxu1 %v2372_v42  ;;  %v218_v63 = vld [vmem:[%s2433_s26 + $0xc9] sm:$0xff]  ;;  %v1908_v0 = vld [vmem:[%s2433_s26 + $0xd8] sm:$0xff]  ;;  %v1909_v1 = vld [vmem:[%s2433_s26 + $0xe0] sm:$0xff]  ;;  %v2554_v2 = vpack.c.bf16 %v216_v59, %v215_v58 }
  0x1d   : > { %2219 = vmatprep.subr.bf16.mxu0 %v2373_v46  ;;  %v2558_v4 = vpack.c.bf16 %v218_v63, %v217_v62  ;;  %v2560_v5 = vpack.c.bf16 %v1909_v1, %v1908_v0  ;;  %v219_v6 = vld [vmem:[%s2433_s26 + $0xd9] sm:$0xff]  ;;  %v220_v7 = vld [vmem:[%s2433_s26 + $0xe1] sm:$0xff]  ;;  %v1910_v8 = vld [vmem:[%s2433_s26 + $0xf0] sm:$0xff] }
  0x1e   : > { %2108 = vmatmul.mubr.msk.bf16.gmra.mrb[4].mxu1 %vm282_vm0, %v2494_v38  ;;  %v1911_v9 = vld [vmem:[%s2433_s26 + $0xf8] sm:$0xff]  ;;  %v1912_v12 = vld [vmem:[%s2433_s26 + $0x108] sm:$0xff]  ;;  %v1913_v14 = vld [vmem:[%s2433_s26 + $0x110] sm:$0xff]  ;;  %v2578_v15 = vpack.c.bf16 %v220_v7, %v219_v6 }
  0x1f   : > { %2188 = vmatmul.mubr.msk.bf16.gmra.mrb[4].mxu0 %vm282_vm0, %v2496_v39  ;;  %2111 = vmatprep.mubr.msk.bf16.mxu1 %vm282_vm0, %v2498_v40  ;;  %v221_v10 = vld [vmem:[%s2433_s26 + $0xf1] sm:$0xff]  ;;  %v222_v11 = vld [vmem:[%s2433_s26 + $0xf9] sm:$0xff]  ;;  %v2580_v16 = vpack.c.bf16 %v1911_v9, %v1910_v8  ;;  %v2584_v18 = vpack.c.bf16 %v1913_v14, %v1912_v12  ;;  %v223_v19 = vld [vmem:[%s2433_s26 + $0x109] sm:$0xff] }
  0x20   : > { %2191 = vmatprep.mubr.msk.bf16.mxu0 %vm282_vm0, %v2500_v41  ;;  %2140 = vmatpush3.bf16.msra.mxu1 %v2372_v42  ;;  %v2582_v17 = vpack.c.bf16 %v222_v11, %v221_v10  ;;  %v224_v20 = vld [vmem:[%s2433_s26 + $0x111] sm:$0xff]  ;;  %v1914_v21 = vld [vmem:[%s2433_s26 + $0x120] sm:$0xff]  ;;  %v1915_v23 = vld [vmem:[%s2433_s26 + $0x128] sm:$0xff] }
  0x21   : > { %2220 = vmatpush3.bf16.msra.mxu0 %v2373_v46  ;;  %2141 = vmatprep.subr.bf16.mxu1 %v2374_v56  ;;  %v225_v24 = vld [vmem:[%s2433_s26 + $0x121] sm:$0xff]  ;;  %v226_v28 = vld [vmem:[%s2433_s26 + $0x129] sm:$0xff]  ;;  %v1916_v29 = vld [vmem:[%s2433_s26 + $0x138] sm:$0xff]  ;;  %v244_v31 = vpack.c.bf16 %v224_v20, %v223_v19  ;;  %v769_v32 = vpack.c.bf16 %v1915_v23, %v1914_v21 }
  0x22   : > { %2221 = vmatprep.subr.bf16.mxu0 %v2375_v57  ;;  %v1917_v30 = vld [vmem:[%s2433_s26 + $0x140] sm:$0xff]  ;;  %v245_v33 = vpack.c.bf16 %v226_v28, %v225_v24  ;;  %v1918_v37 = vld [vmem:[%s2433_s26 + $0x150] sm:$0xff]  ;;  %v1919_v42 = vld [vmem:[%s2433_s26 + $0x158] sm:$0xff] }
  0x23   : > { %v770_v34 = vpack.c.bf16 %v1917_v30, %v1916_v29  ;;  %v227_v35 = vld [vmem:[%s2433_s26 + $0x139] sm:$0xff]  ;;  %v228_v36 = vld [vmem:[%s2433_s26 + $0x141] sm:$0xff]  ;;  %v229_v43 = vld [vmem:[%s2433_s26 + $0x151] sm:$0xff]  ;;  %v771_v48 = vpack.c.bf16 %v1919_v42, %v1918_v37 }
  0x24   : > { %2142 = vmatpush3.bf16.msra.mxu1 %v2374_v56  ;;  %v230_v44 = vld [vmem:[%s2433_s26 + $0x159] sm:$0xff]  ;;  %v1920_v45 = vld [vmem:[%s2433_s26 + $0x168] sm:$0xff]  ;;  %v1921_v46 = vld [vmem:[%s2433_s26 + $0x170] sm:$0xff]  ;;  %v246_v47 = vpack.c.bf16 %v228_v36, %v227_v35 }
  0x25   : > { %2222 = vmatpush3.bf16.msra.mxu0 %v2375_v57  ;;  %v247_v49 = vpack.c.bf16 %v230_v44, %v229_v43  ;;  %v772_v50 = vpack.c.bf16 %v1921_v46, %v1920_v45  ;;  %v231_v51 = vld [vmem:[%s2433_s26 + $0x169] sm:$0xff]  ;;  %v232_v56 = vld [vmem:[%s2433_s26 + $0x171] sm:$0xff]  ;;  %v1922_v57 = vld [vmem:[%s2433_s26 + $0x180] sm:$0xff] }
  0x26   : > { %2112 = vmatmul.mubr.msk.bf16.gmra.mrb[8].mxu1 %vm282_vm0, %v2524_v52  ;;  %v1923_v58 = vld [vmem:[%s2433_s26 + $0x188] sm:$0xff]  ;;  %v145_v59 = vld [vmem:[%s2433_s26] sm:$0xff]  ;;  %v248_v61 = vpack.c.bf16 %v232_v56, %v231_v51 }
  0x27   : > { %2192 = vmatmul.mubr.msk.bf16.gmra.mrb[8].mxu0 %vm282_vm0, %v2526_v53  ;;  %2115 = vmatprep.mubr.msk.bf16.mxu1 %vm282_vm0, %v2528_v54  ;;  %v146_v60 = vld [vmem:[%s2433_s26 + $0x8] sm:$0xff]  ;;  %v773_v62 = vpack.c.bf16 %v1923_v58, %v1922_v57 }
  0x28   : > { %2195 = vmatprep.mubr.msk.bf16.mxu0 %vm282_vm0, %v2530_v55  ;;  %v177_v63 = vpack.c.bf16 %v146_v60, %v145_v59 }
  0x2e   : > { %2116 = vmatmul.mubr.msk.bf16.gmra.mrb[12].mxu1 %vm282_vm0, %v2554_v2 }
  0x2f   : > { %2196 = vmatmul.mubr.msk.bf16.gmra.mrb[12].mxu0 %vm282_vm0, %v2556_v3  ;;  %2119 = vmatprep.mubr.msk.bf16.mxu1 %vm282_vm0, %v2558_v4 }
  0x30   : > { %2199 = vmatprep.mubr.msk.bf16.mxu0 %vm282_vm0, %v2560_v5 }
  0x36   : > { %2120 = vmatmul.mubr.msk.bf16.gmra.mrb[16].mxu1 %vm282_vm0, %v2578_v15 }
  0x37   : > { %2200 = vmatmul.mubr.msk.bf16.gmra.mrb[16].mxu0 %vm282_vm0, %v2580_v16  ;;  %2123 = vmatprep.mubr.msk.bf16.mxu1 %vm282_vm0, %v2582_v17 }
  0x38   : > { %2203 = vmatprep.mubr.msk.bf16.mxu0 %vm282_vm0, %v2584_v18 }
  0x3e   : > { %2124 = vmatmul.mubr.msk.bf16.gmra.mrb[20].mxu1 %vm282_vm0, %v244_v31 }
  0x3f   : > { %2204 = vmatmul.mubr.msk.bf16.gmra.mrb[20].mxu0 %vm282_vm0, %v769_v32  ;;  %2127 = vmatprep.mubr.msk.bf16.mxu1 %vm282_vm0, %v245_v33 }
  0x40   : > { %2207 = vmatprep.mubr.msk.bf16.mxu0 %vm282_vm0, %v770_v34 }
  0x46   : > { %2128 = vmatmul.mubr.msk.bf16.gmra.mrb[24].mxu1 %vm282_vm0, %v246_v47 }
  0x47   : > { %2208 = vmatmul.mubr.msk.bf16.gmra.mrb[24].mxu0 %vm282_vm0, %v771_v48  ;;  %2131 = vmatprep.mubr.msk.bf16.mxu1 %vm282_vm0, %v247_v49 }
  0x48   : > { %2211 = vmatprep.mubr.msk.bf16.mxu0 %vm282_vm0, %v772_v50 }
  0x4e   : > { %2132 = vmatmul.mubr.msk.bf16.gmra.mrb[28].mxu1 %vm282_vm0, %v248_v61 }
  0x4f   : > { %2212 = vmatmul.mubr.msk.bf16.gmra.mrb[28].mxu0 %vm282_vm0, %v773_v62  ;;  %2143 = vmatprep.mubr.msk.bf16.mxu1 %vm282_vm0, %v177_v63 }
  0x50   : > { %2223 = vmatprep.mubr.msk.bf16.mxu0 %vm282_vm0, %v2462_v22  ;;  %v1983_v22 = vld [vmem:[%s2433_s26 + $0x189] sm:$0xff] }
  0x56   : > { %2144 = vmatmul.mubr.msk.bf16.vlgmr.msra.gmra.mrb[0].mxu1 %vm282_vm0, %v2445_v13  ;;  %v1982_v13 = vld [vmem:[%s2433_s26 + $0x181] sm:$0xff] }
  0x57   : > { %2224 = vmatmul.mubr.msk.bf16.vlgmr.msra.gmra.mrb[0].mxu0 %vm282_vm0, %v2468_v26  ;;  %2147 = vmatprep.mubr.msk.bf16.mxu1 %vm282_vm0, %v2466_v25  ;;  %v1095_v25 = vpack.c.bf16 %v1983_v22, %v1982_v13 }
  0x58   : > { %2227 = vmatprep.mubr.msk.bf16.mxu0 %vm282_vm0, %v2494_v38 }
  0x5e   : > { %2148 = vmatmul.mubr.msk.bf16.gmra.mrb[4].mxu1 %vm282_vm0, %v2470_v27 }
  0x5f   : > { %2228 = vmatmul.mubr.msk.bf16.gmra.mrb[4].mxu0 %vm282_vm0, %v2498_v40  ;;  %2151 = vmatprep.mubr.msk.bf16.mxu1 %vm282_vm0, %v2496_v39 }
  0x60   : > { %2231 = vmatprep.mubr.msk.bf16.mxu0 %vm282_vm0, %v2524_v52 }
  0x66   : > { %2152 = vmatmul.mubr.msk.bf16.gmra.mrb[8].mxu1 %vm282_vm0, %v2500_v41 }
  0x67   : > { %2232 = vmatmul.mubr.msk.bf16.gmra.mrb[8].mxu0 %vm282_vm0, %v2528_v54  ;;  %2155 = vmatprep.mubr.msk.bf16.mxu1 %vm282_vm0, %v2526_v53 }
  0x68   : > { %2235 = vmatprep.mubr.msk.bf16.mxu0 %vm282_vm0, %v2554_v2 }
  0x6e   : > { %2156 = vmatmul.mubr.msk.bf16.gmra.mrb[12].mxu1 %vm282_vm0, %v2530_v55 }
  0x6f   : > { %2236 = vmatmul.mubr.msk.bf16.gmra.mrb[12].mxu0 %vm282_vm0, %v2558_v4  ;;  %2159 = vmatprep.mubr.msk.bf16.mxu1 %vm282_vm0, %v2556_v3 }
  0x70   : > { %2239 = vmatprep.mubr.msk.bf16.mxu0 %vm282_vm0, %v2578_v15 }
  0x76   : > { %2160 = vmatmul.mubr.msk.bf16.gmra.mrb[16].mxu1 %vm282_vm0, %v2560_v5 }
  0x77   : > { %2240 = vmatmul.mubr.msk.bf16.gmra.mrb[16].mxu0 %vm282_vm0, %v2582_v17  ;;  %2163 = vmatprep.mubr.msk.bf16.mxu1 %vm282_vm0, %v2580_v16 }
  0x78   : > { %2243 = vmatprep.mubr.msk.bf16.mxu0 %vm282_vm0, %v244_v31 }
  0x7e   : > { %2164 = vmatmul.mubr.msk.bf16.gmra.mrb[20].mxu1 %vm282_vm0, %v2584_v18 }
  0x7f   : > { %2244 = vmatmul.mubr.msk.bf16.gmra.mrb[20].mxu0 %vm282_vm0, %v245_v33  ;;  %2167 = vmatprep.mubr.msk.bf16.mxu1 %vm282_vm0, %v769_v32 }
  0x80   : > { %2247 = vmatprep.mubr.msk.bf16.mxu0 %vm282_vm0, %v246_v47 }
  0x86   : > { %2168 = vmatmul.mubr.msk.bf16.gmra.mrb[24].mxu1 %vm282_vm0, %v770_v34 }
  0x87   : > { %2248 = vmatmul.mubr.msk.bf16.gmra.mrb[24].mxu0 %vm282_vm0, %v247_v49  ;;  %2171 = vmatprep.mubr.msk.bf16.mxu1 %vm282_vm0, %v771_v48 }
  0x88   : > { %2251 = vmatprep.mubr.msk.bf16.mxu0 %vm282_vm0, %v248_v61 }
  0x8e   : > { %2172 = vmatmul.mubr.msk.bf16.gmra.mrb[28].mxu1 %vm282_vm0, %v772_v50 }
  0x8f   : > { %2252 = vmatmul.mubr.msk.bf16.gmra.mrb[28].mxu0 %vm282_vm0, %v1095_v25 }
 0x129   : > { %v2145_v26 = vpop.f32.mrb[0].mxu1 }
 0x12a   : > { %v2225_v27 = vpop.f32.mrb[0].mxu0  ;;  %v598_v38 = vpop.f32.mrb[1].mxu1 }
 0x12b   : > { %v2681_v39 = vadd.f32 %v2225_v27, %v2145_v26  ;;  %v1211_v40 = vpop.f32.mrb[1].mxu0  ;;  %v2146_v41 = vpop.f32.mrb[2].mxu1 }
 0x12c   : > { %v2683_v52 = vadd.f32 %v1211_v40, %v598_v38  ;;  %v2226_v53 = vpop.f32.mrb[2].mxu0  ;;  %v601_v54 = vpop.f32.mrb[3].mxu1 }
 0x12d   : > { %v2685_v55 = vadd.f32 %v2226_v53, %v2146_v41  ;;  %v1214_v0 = vpop.f32.mrb[3].mxu0  ;;  %v1444_v3 = vmul.f32 %v2681_v39, %v2681_v39  ;;  %v1374_v10 = vsel %vm1370_vm1, %v2681_v39, 0.0 }
 0x12e   : > { %v1442_v1 = vmul.f32 %v2683_v52, %v2683_v52  ;;  %v2689_v2 = vadd.f32 %v1214_v0, %v601_v54  ;;  %v1371_v4 = vsel %vm1370_vm1, %v2683_v52, 0.0 }
 0x12f   : > { %v1445_v7 = vmul.f32 %v2685_v55, %v2685_v55  ;;  %v1477_v21 = vsel %vm1370_vm1, %v1444_v3, 0.0  ;;  %v1376_v23 = vsel %vm1370_vm1, %v2685_v55, 0.0 }
 0x130   : > { %v1372_v5 = vsel %vm1370_vm1, %v2689_v2, 0.0  ;;  %v1443_v6 = vmul.f32 %v2689_v2, %v2689_v2  ;;  %v1474_v11 = vsel %vm1370_vm1, %v1442_v1, 0.0 }
 0x131   : > { %v1373_v8 = vadd.f32 %v1372_v5, %v1371_v4  ;;  %v2149_v9 = vpop.f32.mrb[4].mxu1  ;;  %v1479_v30 = vsel %vm1370_vm1, %v1445_v7, 0.0 }
 0x132   : > { %v1475_v12 = vsel %vm1370_vm1, %v1443_v6, 0.0  ;;  %v2229_v14 = vpop.f32.mrb[4].mxu0  ;;  %v614_v15 = vpop.f32.mrb[5].mxu1 }
 0x133   : > { %v1375_v16 = vadd.f32 %v1374_v10, %v1373_v8  ;;  %v1476_v17 = vadd.f32 %v1475_v12, %v1474_v11  ;;  %v2705_v18 = vadd.f32 %v2229_v14, %v2149_v9  ;;  %v1227_v19 = vpop.f32.mrb[5].mxu0  ;;  %v2150_v20 = vpop.f32.mrb[6].mxu1 }
 0x134   : > { %v2710_v24 = vadd.f32 %v1227_v19, %v614_v15  ;;  %v2230_v28 = vpop.f32.mrb[6].mxu0  ;;  %v617_v29 = vpop.f32.mrb[7].mxu1 }
 0x135   : > { %v1478_v31 = vadd.f32 %v1477_v21, %v1476_v17  ;;  %v1377_v32 = vadd.f32 %v1376_v23, %v1375_v16  ;;  %v1230_v33 = vpop.f32.mrb[7].mxu0  ;;  %v2717_v36 = vadd.f32 %v2230_v28, %v2150_v20  ;;  %v1448_v46 = vmul.f32 %v2705_v18, %v2705_v18 }
 0x136   : > { %v1378_v34 = vsel %vm1370_vm1, %v2710_v24, 0.0  ;;  %v1446_v35 = vmul.f32 %v2710_v24, %v2710_v24  ;;  %v2719_v37 = vadd.f32 %v1230_v33, %v617_v29  ;;  %v1382_v51 = vsel %vm1370_vm1, %v2705_v18, 0.0 }
 0x137   : > { %v1379_v42 = vadd.f32 %v1378_v34, %v1377_v32  ;;  %v1480_v43 = vadd.f32 %v1479_v30, %v1478_v31  ;;  %v1449_v58 = vmul.f32 %v2717_v36, %v2717_v36  ;;  %v1384_v13 = vsel %vm1370_vm1, %v2717_v36, 0.0 }
 0x138   : > { %v1481_v44 = vsel %vm1370_vm1, %v1446_v35, 0.0  ;;  %v1380_v45 = vsel %vm1370_vm1, %v2719_v37, 0.0  ;;  %v1447_v49 = vmul.f32 %v2719_v37, %v2719_v37  ;;  %v1485_v38 = vsel %vm1370_vm1, %v1448_v46, 0.0 }
 0x139   : > { %v1482_v47 = vadd.f32 %v1481_v44, %v1480_v43  ;;  %v1381_v48 = vadd.f32 %v1380_v45, %v1379_v42  ;;  %v2153_v50 = vpop.f32.mrb[8].mxu1  ;;  %v1487_v4 = vsel %vm1370_vm1, %v1449_v58, 0.0 }
 0x13a   : > { %v2233_v56 = vpop.f32.mrb[8].mxu0  ;;  %v630_v57 = vpop.f32.mrb[9].mxu1  ;;  %v1483_v60 = vsel %vm1370_vm1, %v1447_v49, 0.0 }
 0x13b   : > { %v1383_v59 = vadd.f32 %v1382_v51, %v1381_v48  ;;  %v2733_v61 = vadd.f32 %v2233_v56, %v2153_v50  ;;  %v1243_v62 = vpop.f32.mrb[9].mxu0  ;;  %v2154_v63 = vpop.f32.mrb[10].mxu1  ;;  %v1484_v22 = vadd.f32 %v1483_v60, %v1482_v47 }
 0x13c   : > { %v2737_v25 = vadd.f32 %v1243_v62, %v630_v57  ;;  %v2234_v26 = vpop.f32.mrb[10].mxu0  ;;  %v633_v27 = vpop.f32.mrb[11].mxu1 }
 0x13d   : > { %v1385_v40 = vadd.f32 %v1384_v13, %v1383_v59  ;;  %v2740_v41 = vadd.f32 %v2234_v26, %v2154_v63  ;;  %v1246_v53 = vpop.f32.mrb[11].mxu0  ;;  %v1486_v54 = vadd.f32 %v1485_v38, %v1484_v22  ;;  %v1452_v10 = vmul.f32 %v2733_v61, %v2733_v61 }
 0x13e   : > { %v1386_v0 = vsel %vm1370_vm1, %v2737_v25, 0.0  ;;  %v1450_v1 = vmul.f32 %v2737_v25, %v2737_v25  ;;  %v2746_v3 = vadd.f32 %v1246_v53, %v633_v27  ;;  %v1390_v14 = vsel %vm1370_vm1, %v2733_v61, 0.0 }
 0x13f   : > { %v1387_v5 = vadd.f32 %v1386_v0, %v1385_v40  ;;  %v1488_v6 = vadd.f32 %v1487_v4, %v1486_v54  ;;  %v1453_v20 = vmul.f32 %v2740_v41, %v2740_v41  ;;  %v1392_v30 = vsel %vm1370_vm1, %v2740_v41, 0.0 }
 0x140   : > { %v1489_v7 = vsel %vm1370_vm1, %v1450_v1, 0.0  ;;  %v1388_v8 = vsel %vm1370_vm1, %v2746_v3, 0.0  ;;  %v1451_v9 = vmul.f32 %v2746_v3, %v2746_v3  ;;  %v1493_v35 = vsel %vm1370_vm1, %v1452_v10, 0.0 }
 0x141   : > { %v1389_v11 = vadd.f32 %v1388_v8, %v1387_v5  ;;  %v2157_v12 = vpop.f32.mrb[12].mxu1  ;;  %v1490_v15 = vadd.f32 %v1489_v7, %v1488_v6  ;;  %v1495_v49 = vsel %vm1370_vm1, %v1453_v20, 0.0 }
 0x142   : > { %v1491_v16 = vsel %vm1370_vm1, %v1451_v9, 0.0  ;;  %v2237_v17 = vpop.f32.mrb[12].mxu0  ;;  %v646_v19 = vpop.f32.mrb[13].mxu1 }
 0x143   : > { %v1391_v21 = vadd.f32 %v1390_v14, %v1389_v11  ;;  %v2761_v23 = vadd.f32 %v2237_v17, %v2157_v12  ;;  %v1259_v28 = vpop.f32.mrb[13].mxu0  ;;  %v2158_v29 = vpop.f32.mrb[14].mxu1  ;;  %v1492_v31 = vadd.f32 %v1491_v16, %v1490_v15 }
 0x144   : > { %v2765_v32 = vadd.f32 %v1259_v28, %v646_v19  ;;  %v2238_v33 = vpop.f32.mrb[14].mxu0  ;;  %v649_v34 = vpop.f32.mrb[15].mxu1 }
 0x145   : > { %v1393_v42 = vadd.f32 %v1392_v30, %v1391_v21  ;;  %v2768_v43 = vadd.f32 %v2238_v33, %v2158_v29  ;;  %v1262_v44 = vpop.f32.mrb[15].mxu0  ;;  %v1494_v45 = vadd.f32 %v1493_v35, %v1492_v31  ;;  %v1456_v59 = vmul.f32 %v2761_v23, %v2761_v23 }
 0x146   : > { %v1394_v46 = vsel %vm1370_vm1, %v2765_v32, 0.0  ;;  %v1454_v47 = vmul.f32 %v2765_v32, %v2765_v32  ;;  %v2774_v48 = vadd.f32 %v1262_v44, %v649_v34  ;;  %v1398_v63 = vsel %vm1370_vm1, %v2761_v23, 0.0 }
 0x147   : > { %v1395_v50 = vadd.f32 %v1394_v46, %v1393_v42  ;;  %v1496_v51 = vadd.f32 %v1495_v49, %v1494_v45  ;;  %v1457_v38 = vmul.f32 %v2768_v43, %v2768_v43  ;;  %v1400_v1 = vsel %vm1370_vm1, %v2768_v43, 0.0 }
 0x148   : > { %v1497_v56 = vsel %vm1370_vm1, %v1454_v47, 0.0  ;;  %v1396_v57 = vsel %vm1370_vm1, %v2774_v48, 0.0  ;;  %v1455_v58 = vmul.f32 %v2774_v48, %v2774_v48  ;;  %v1501_v8 = vsel %vm1370_vm1, %v1456_v59, 0.0 }
 0x149   : > { %v1397_v60 = vadd.f32 %v1396_v57, %v1395_v50  ;;  %v2161_v62 = vpop.f32.mrb[16].mxu1  ;;  %v1498_v13 = vadd.f32 %v1497_v56, %v1496_v51  ;;  %v1503_v17 = vsel %vm1370_vm1, %v1457_v38, 0.0 }
 0x14a   : > { %v1499_v22 = vsel %vm1370_vm1, %v1455_v58, 0.0  ;;  %v2241_v26 = vpop.f32.mrb[16].mxu0  ;;  %v662_v27 = vpop.f32.mrb[17].mxu1 }
 0x14b   : > { %v1399_v40 = vadd.f32 %v1398_v63, %v1397_v60  ;;  %v2789_v53 = vadd.f32 %v2241_v26, %v2161_v62  ;;  %v1275_v54 = vpop.f32.mrb[17].mxu0  ;;  %v2162_v0 = vpop.f32.mrb[18].mxu1  ;;  %v1500_v4 = vadd.f32 %v1499_v22, %v1498_v13 }
 0x14c   : > { %v2793_v5 = vadd.f32 %v1275_v54, %v662_v27  ;;  %v2242_v6 = vpop.f32.mrb[18].mxu0  ;;  %v665_v7 = vpop.f32.mrb[19].mxu1 }
 0x14d   : > { %v1401_v9 = vadd.f32 %v1400_v1, %v1399_v40  ;;  %v2796_v10 = vadd.f32 %v2242_v6, %v2162_v0  ;;  %v1278_v11 = vpop.f32.mrb[19].mxu0  ;;  %v1502_v12 = vadd.f32 %v1501_v8, %v1500_v4  ;;  %v1460_v30 = vmul.f32 %v2789_v53, %v2789_v53 }
 0x14e   : > { %v1402_v14 = vsel %vm1370_vm1, %v2793_v5, 0.0  ;;  %v1458_v15 = vmul.f32 %v2793_v5, %v2793_v5  ;;  %v2802_v16 = vadd.f32 %v1278_v11, %v665_v7  ;;  %v1406_v34 = vsel %vm1370_vm1, %v2789_v53, 0.0 }
 0x14f   : > { %v1403_v19 = vadd.f32 %v1402_v14, %v1401_v9  ;;  %v1504_v20 = vadd.f32 %v1503_v17, %v1502_v12  ;;  %v1461_v46 = vmul.f32 %v2796_v10, %v2796_v10  ;;  %v1408_v56 = vsel %vm1370_vm1, %v2796_v10, 0.0 }
 0x150   : > { %v1505_v21 = vsel %vm1370_vm1, %v1458_v15, 0.0  ;;  %v1404_v28 = vsel %vm1370_vm1, %v2802_v16, 0.0  ;;  %v1459_v29 = vmul.f32 %v2802_v16, %v2802_v16  ;;  %v1509_v62 = vsel %vm1370_vm1, %v1460_v30, 0.0 }
 0x151   : > { %v1405_v31 = vadd.f32 %v1404_v28, %v1403_v19  ;;  %v2165_v33 = vpop.f32.mrb[20].mxu1  ;;  %v1506_v35 = vadd.f32 %v1505_v21, %v1504_v20  ;;  %v1511_v54 = vsel %vm1370_vm1, %v1461_v46, 0.0 }
 0x152   : > { %v1507_v42 = vsel %vm1370_vm1, %v1459_v29, 0.0  ;;  %v2245_v44 = vpop.f32.mrb[20].mxu0  ;;  %v678_v45 = vpop.f32.mrb[21].mxu1 }
 0x153   : > { %v1407_v47 = vadd.f32 %v1406_v34, %v1405_v31  ;;  %v2817_v49 = vadd.f32 %v2245_v44, %v2165_v33  ;;  %v1291_v50 = vpop.f32.mrb[21].mxu0  ;;  %v2166_v51 = vpop.f32.mrb[22].mxu1  ;;  %v1508_v57 = vadd.f32 %v1507_v42, %v1506_v35 }
 0x154   : > { %v2821_v58 = vadd.f32 %v1291_v50, %v678_v45  ;;  %v2246_v59 = vpop.f32.mrb[22].mxu0  ;;  %v681_v60 = vpop.f32.mrb[23].mxu1 }
 0x155   : > { %v1409_v63 = vadd.f32 %v1408_v56, %v1407_v47  ;;  %v2824_v13 = vadd.f32 %v2246_v59, %v2166_v51  ;;  %v1294_v22 = vpop.f32.mrb[23].mxu0  ;;  %v1510_v26 = vadd.f32 %v1509_v62, %v1508_v57  ;;  %v1464_v8 = vmul.f32 %v2817_v49, %v2817_v49 }
 0x156   : > { %v1410_v27 = vsel %vm1370_vm1, %v2821_v58, 0.0  ;;  %v1462_v38 = vmul.f32 %v2821_v58, %v2821_v58  ;;  %v2830_v40 = vadd.f32 %v1294_v22, %v681_v60  ;;  %v1414_v12 = vsel %vm1370_vm1, %v2817_v49, 0.0 }
 0x157   : > { %v1411_v0 = vadd.f32 %v1410_v27, %v1409_v63  ;;  %v1512_v1 = vadd.f32 %v1511_v54, %v1510_v26  ;;  %v1465_v20 = vmul.f32 %v2824_v13, %v2824_v13  ;;  %v1416_v31 = vsel %vm1370_vm1, %v2824_v13, 0.0 }
 0x158   : > { %v1513_v4 = vsel %vm1370_vm1, %v1462_v38, 0.0  ;;  %v1412_v6 = vsel %vm1370_vm1, %v2830_v40, 0.0  ;;  %v1463_v7 = vmul.f32 %v2830_v40, %v2830_v40  ;;  %v1517_v44 = vsel %vm1370_vm1, %v1464_v8, 0.0 }
 0x159   : > { %v1413_v9 = vadd.f32 %v1412_v6, %v1411_v0  ;;  %v2169_v11 = vpop.f32.mrb[24].mxu1  ;;  %v1514_v14 = vadd.f32 %v1513_v4, %v1512_v1  ;;  %v1519_v59 = vsel %vm1370_vm1, %v1465_v20, 0.0 }
 0x15a   : > { %v1515_v15 = vsel %vm1370_vm1, %v1463_v7, 0.0  ;;  %v2249_v17 = vpop.f32.mrb[24].mxu0  ;;  %v694_v19 = vpop.f32.mrb[25].mxu1 }
 0x15b   : > { %v1415_v21 = vadd.f32 %v1414_v12, %v1413_v9  ;;  %v2845_v28 = vadd.f32 %v2249_v17, %v2169_v11  ;;  %v1307_v29 = vpop.f32.mrb[25].mxu0  ;;  %v2170_v30 = vpop.f32.mrb[26].mxu1  ;;  %v1516_v33 = vadd.f32 %v1515_v15, %v1514_v14 }
 0x15c   : > { %v2849_v34 = vadd.f32 %v1307_v29, %v694_v19  ;;  %v2250_v35 = vpop.f32.mrb[26].mxu0  ;;  %v697_v42 = vpop.f32.mrb[27].mxu1 }
 0x15d   : > { %v1417_v45 = vadd.f32 %v1416_v31, %v1415_v21  ;;  %v2852_v46 = vadd.f32 %v2250_v35, %v2170_v30  ;;  %v1310_v47 = vpop.f32.mrb[27].mxu0  ;;  %v1518_v50 = vadd.f32 %v1517_v44, %v1516_v33  ;;  %v1468_v27 = vmul.f32 %v2845_v28, %v2845_v28 }
 0x15e   : > { %v1418_v51 = vsel %vm1370_vm1, %v2849_v34, 0.0  ;;  %v1466_v56 = vmul.f32 %v2849_v34, %v2849_v34  ;;  %v2858_v57 = vadd.f32 %v1310_v47, %v697_v42  ;;  %v1422_v0 = vsel %vm1370_vm1, %v2845_v28, 0.0 }
 0x15f   : > { %v1419_v60 = vadd.f32 %v1418_v51, %v1417_v45  ;;  %v1520_v62 = vadd.f32 %v1519_v59, %v1518_v50  ;;  %v1469_v8 = vmul.f32 %v2852_v46, %v2852_v46  ;;  %v1424_v15 = vsel %vm1370_vm1, %v2852_v46, 0.0 }
 0x160   : > { %v1521_v63 = vsel %vm1370_vm1, %v1466_v56, 0.0  ;;  %v1420_v22 = vsel %vm1370_vm1, %v2858_v57, 0.0  ;;  %v1467_v26 = vmul.f32 %v2858_v57, %v2858_v57  ;;  %v1525_v29 = vsel %vm1370_vm1, %v1468_v27, 0.0 }
 0x161   : > { %v1421_v38 = vadd.f32 %v1420_v22, %v1419_v60  ;;  %v2173_v54 = vpop.f32.mrb[28].mxu1  ;;  %v1522_v1 = vadd.f32 %v1521_v63, %v1520_v62  ;;  %v1527_v47 = vsel %vm1370_vm1, %v1469_v8, 0.0 }
 0x162   : > { %v1523_v4 = vsel %vm1370_vm1, %v1467_v26, 0.0  ;;  %v2253_v6 = vpop.f32.mrb[28].mxu0  ;;  %v710_v7 = vpop.f32.mrb[29].mxu1 }
 0x163   : > { %v1423_v9 = vadd.f32 %v1422_v0, %v1421_v38  ;;  %v2873_v11 = vadd.f32 %v2253_v6, %v2173_v54  ;;  %v1323_v12 = vpop.f32.mrb[29].mxu0  ;;  %v2174_v14 = vpop.f32.mrb[30].mxu1  ;;  %v1524_v17 = vadd.f32 %v1523_v4, %v1522_v1 }
 0x164   : > { %v2877_v19 = vadd.f32 %v1323_v12, %v710_v7  ;;  %v2254_v20 = vpop.f32.mrb[30].mxu0  ;;  %v713_v21 = vpop.f32.mrb[31].mxu1 }
 0x165   : > { %v1425_v30 = vadd.f32 %v1424_v15, %v1423_v9  ;;  %v2880_v31 = vadd.f32 %v2254_v20, %v2174_v14  ;;  %v1326_v33 = vpop.f32.mrb[31].mxu0  ;;  %v1526_v35 = vadd.f32 %v1525_v29, %v1524_v17  ;;  %v1472_v62 = vmul.f32 %v2873_v11, %v2873_v11 }
 0x166   : > { %v1426_v42 = vsel %vm1370_vm1, %v2877_v19, 0.0  ;;  %v1470_v44 = vmul.f32 %v2877_v19, %v2877_v19  ;;  %v2286_v45 = vadd.f32 %v1326_v33, %v713_v21  ;;  %v1430_v22 = vsel %vm1370_vm1, %v2873_v11, 0.0 }
 0x167   : > { %v1427_v50 = vadd.f32 %v1426_v42, %v1425_v30  ;;  %v1528_v51 = vadd.f32 %v1527_v47, %v1526_v35  ;;  %v1473_v38 = vmul.f32 %v2880_v31, %v2880_v31  ;;  %v1432_v0 = vsel %vm1370_vm1, %v2880_v31, 0.0 }
 0x168   : > { %v1529_v56 = vsel %vm1370_vm1, %v1470_v44, 0.0  ;;  %v1428_v59 = vsel %vm1370_vm1, %v2286_v45, 0.0  ;;  %v1471_v60 = vmul.f32 %v2286_v45, %v2286_v45  ;;  %v1533_v4 = vsel %vm1370_vm1, %v1472_v62, 0.0 }
 0x169   : > { %v1429_v63 = vadd.f32 %v1428_v59, %v1427_v50  ;;  %v1530_v26 = vadd.f32 %v1529_v56, %v1528_v51  ;;  %v1535_v8 = vsel %vm1370_vm1, %v1473_v38, 0.0 }
 0x16a   : > { %v1531_v27 = vsel %vm1370_vm1, %v1471_v60, 0.0 }
 0x16b   : > { %v1431_v54 = vadd.f32 %v1430_v22, %v1429_v63  ;;  %v1532_v1 = vadd.f32 %v1531_v27, %v1530_v26 }
 0x16d   : > { %v1433_v6 = vadd.f32 %v1432_v0, %v1431_v54  ;;  %v1534_v7 = vadd.f32 %v1533_v4, %v1532_v1 }
 0x16f   : > { %v1434_v9 = vrot.slane %v1433_v6, 4  ;;  %v1536_v12 = vadd.f32 %v1535_v8, %v1534_v7 }
 0x171   : > { %v1435_v14 = vadd.f32 %v1434_v9, %v1433_v6  ;;  %v1537_v15 = vrot.slane %v1536_v12, 4 }
 0x173   : > { %v1436_v17 = vrot.slane %v1435_v14, 2  ;;  %v1538_v20 = vadd.f32 %v1537_v15, %v1536_v12 }
 0x175   : > { %v1437_v21 = vadd.f32 %v1436_v17, %v1435_v14  ;;  %v1539_v29 = vrot.slane %v1538_v20, 2 }
 0x177   : > { %v1438_v30 = vrot.slane %v1437_v21, 1  ;;  %v1540_v33 = vadd.f32 %v1539_v29, %v1538_v20 }
 0x179   : > { %v1439_v35 = vadd.f32 %v1438_v30, %v1437_v21  ;;  %v1541_v42 = vrot.slane %v1540_v33, 1 }
 0x17b   : > { %v1441_v44 = vmul.f32 0.00390625, %v1439_v35  ;;  %v1542_v47 = vadd.f32 %v1541_v42, %v1540_v33 }
 0x17d   : > { %v1544_v50 = vmul.f32 %v1441_v44, %v1441_v44  ;;  %v1543_v51 = vmul.f32 0.00390625, %v1542_v47 }
 0x17f   : > { %v1545_v56 = vsub.f32 %v1543_v51, %v1544_v50 }
 0x181   : > { %v1546_v59 = vadd.f32 1e-05, %v1545_v56 }
 0x183   : > { %2376 = vrsqrt.f32 %v1546_v59 }
 0x18d   : > { %v2900_v60 = vpop.eup %2376 }
 0x18e   : > { %v2903_v62 = vmul.f32 %v2900_v60, %v2286_v45  ;;  %v2906_v63 = vmul.f32 %v2900_v60, %v1441_v44  ;;  %v1548_v22 = vmul.f32 %v2900_v60, %v2683_v52  ;;  %v1549_v26 = vmul.f32 %v2900_v60, %v2689_v2 }
 0x18f   : > { %v1550_v27 = vmul.f32 %v2900_v60, %v2681_v39  ;;  %v1551_v38 = vmul.f32 %v2900_v60, %v2685_v55  ;;  %v1564_v54 = vmul.f32 %v2900_v60, %v2793_v5  ;;  %v1565_v45 = vmul.f32 %v2900_v60, %v2802_v16 }
 0x190   : > { %v1566_v0 = vmul.f32 %v2900_v60, %v2789_v53  ;;  %v1567_v52 = vmul.f32 %v2900_v60, %v2796_v10  ;;  %v1568_v2 = vmul.f32 %v2900_v60, %v2821_v58  ;;  %v1569_v39 = vmul.f32 %v2900_v60, %v2830_v40 }
 0x191   : > { %v1570_v55 = vmul.f32 %v2900_v60, %v2817_v49  ;;  %v1571_v5 = vmul.f32 %v2900_v60, %v2824_v13  ;;  %v1572_v16 = vmul.f32 %v2900_v60, %v2849_v34  ;;  %v2936_v53 = vmul.f32 %v2900_v60, %v2858_v57 }
 0x192   : > { %v2940_v10 = vmul.f32 %v2900_v60, %v2845_v28  ;;  %v2944_v58 = vmul.f32 %v2900_v60, %v2852_v46  ;;  %v2948_v49 = vmul.f32 %v2900_v60, %v2877_v19  ;;  %v2952_v13 = vmul.f32 %v2900_v60, %v2873_v11 }
 0x193   : > { %v2956_v40 = vmul.f32 %v2900_v60, %v2880_v31  ;;  %v1597_v34 = vsub.f32 %v1564_v54, %v2906_v63  ;;  %v1581_v28 = vsub.f32 %v1548_v22, %v2906_v63  ;;  %v1598_v57 = vsub.f32 %v1565_v45, %v2906_v63 }
 0x194   : > { %v1582_v46 = vsub.f32 %v1549_v26, %v2906_v63  ;;  %v1599_v1 = vsub.f32 %v1566_v0, %v2906_v63  ;;  %v1583_v19 = vsub.f32 %v1550_v27, %v2906_v63  ;;  %v1600_v4 = vsub.f32 %v1567_v52, %v2906_v63 }
 0x195   : > { %vm1629_vm2 = vcmp.ge.f32.partialorder %v1597_v34, 0.0  ;;  %v1661_v11 = vmul.f32 0.4, %v1597_v34  ;;  %vm1613_vm3 = vcmp.ge.f32.partialorder %v1581_v28, 0.0  ;;  %v1645_v6 = vmul.f32 0.4, %v1581_v28 }
 0x196   : > { %v1552_v31 = vmul.f32 %v2900_v60, %v2710_v24  ;;  %v1553_v7 = vmul.f32 %v2900_v60, %v2719_v37  ;;  %v1662_v12 = vmul.f32 0.4, %v1598_v57  ;;  %v1646_v14 = vmul.f32 0.4, %v1582_v46 }
 0x197   : > { %v1693_v8 = vsel %vm1629_vm2, %v1597_v34, %v1661_v11  ;;  %v1677_v9 = vsel %vm1613_vm3, %v1581_v28, %v1645_v6  ;;  %vm1630_vm4 = vcmp.ge.f32.partialorder %v1598_v57, 0.0  ;;  %vm1614_vm5 = vcmp.ge.f32.partialorder %v1582_v46, 0.0 }
 0x198   : > { %1741 = vxpose.xlu1.b32.start [1/16] (narrow) %v1693_v8, 32  ;;  %1709 = vxpose.xlu0.b32.start [1/16] (narrow) %v1677_v9, 32  ;;  %v1554_v15 = vmul.f32 %v2900_v60, %v2705_v18  ;;  %vm1631_vm6 = vcmp.ge.f32.partialorder %v1599_v1, 0.0  ;;  %v1584_v17 = vsub.f32 %v1551_v38, %v2906_v63  ;;  %v1663_v20 = vmul.f32 0.4, %v1599_v1 }
 0x199   : > { %v1601_v24 = vsub.f32 %v1568_v2, %v2906_v63  ;;  %v1585_v21 = vsub.f32 %v1552_v31, %v2906_v63  ;;  %v1602_v37 = vsub.f32 %v1569_v39, %v2906_v63  ;;  %v1694_v29 = vsel %vm1630_vm4, %v1598_v57, %v1662_v12 }
 0x19a   : > { %v1678_v30 = vsel %vm1614_vm5, %v1582_v46, %v1646_v14  ;;  %v1647_v33 = vmul.f32 0.4, %v1583_v19  ;;  %v1586_v35 = vsub.f32 %v1553_v7, %v2906_v63  ;;  %v1555_v42 = vmul.f32 %v2900_v60, %v2717_v36 }
 0x19b   : > { %vm1615_vm7 = vcmp.ge.f32.partialorder %v1583_v19, 0.0  ;;  %v1603_v18 = vsub.f32 %v1570_v55, %v2906_v63  ;;  %v1556_v44 = vmul.f32 %v2900_v60, %v2737_v25  ;;  %v1695_v47 = vsel %vm1631_vm6, %v1599_v1, %v1663_v20 }
 0x19c   : > { %1742 = vxpose.xlu1.b32.cont [2/16] (narrow) %v1694_v29, 32  ;;  %1710 = vxpose.xlu0.b32.cont [2/16] (narrow) %v1678_v30, 32  ;;  %v1664_v50 = vmul.f32 0.4, %v1600_v4  ;;  %v1679_v51 = vsel %vm1615_vm7, %v1583_v19, %v1647_v33  ;;  %vm1632_vm8 = vcmp.ge.f32.partialorder %v1600_v4, 0.0  ;;  %v1587_v59 = vsub.f32 %v1554_v15, %v2906_v63 }
 0x19d   : > { %v1648_v56 = vmul.f32 0.4, %v1584_v17  ;;  %vm1616_vm9 = vcmp.ge.f32.partialorder %v1584_v17, 0.0  ;;  %v1604_v36 = vsub.f32 %v1571_v5, %v2906_v63  ;;  %v1588_v22 = vsub.f32 %v1555_v42, %v2906_v63 }
 0x19e   : > { %v1557_v26 = vmul.f32 %v2900_v60, %v2746_v3  ;;  %v2988_v25 = vsub.f32 %v1572_v16, %v2906_v63  ;;  %v1558_v27 = vmul.f32 %v2900_v60, %v2733_v61  ;;  %v1696_v38 = vsel %vm1632_vm8, %v1600_v4, %v1664_v50 }
 0x19f   : > { %v1680_v54 = vsel %vm1616_vm9, %v1584_v17, %v1648_v56  ;;  %v1665_v45 = vmul.f32 0.4, %v1601_v24  ;;  %v1649_v0 = vmul.f32 0.4, %v1585_v21  ;;  %v1589_v52 = vsub.f32 %v1556_v44, %v2906_v63 }
 0x1a0   : > { %1743 = vxpose.xlu1.b32.cont [3/16] (narrow) %v1695_v47, 32  ;;  %1711 = vxpose.xlu0.b32.cont [3/16] (narrow) %v1679_v51, 32  ;;  %vm1633_vm10 = vcmp.ge.f32.partialorder %v1601_v24, 0.0  ;;  %vm1617_vm11 = vcmp.ge.f32.partialorder %v1585_v21, 0.0  ;;  %v1606_v2 = vsub.f32 %v2936_v53, %v2906_v63  ;;  %v1559_v3 = vmul.f32 %v2900_v60, %v2740_v41 }
 0x1a1   : > { %v1560_v39 = vmul.f32 %v2900_v60, %v2765_v32  ;;  %v1666_v61 = vmul.f32 0.4, %v1602_v37  ;;  %v1590_v55 = vsub.f32 %v1557_v26, %v2906_v63  ;;  %v1561_v5 = vmul.f32 %v2900_v60, %v2774_v48 }
 0x1a2   : > { %vm1634_vm12 = vcmp.ge.f32.partialorder %v1602_v37, 0.0  ;;  %v1607_v16 = vsub.f32 %v2940_v10, %v2906_v63  ;;  %v1591_v34 = vsub.f32 %v1558_v27, %v2906_v63  ;;  %v1697_v28 = vsel %vm1633_vm10, %v1601_v24, %v1665_v45 }
 0x1a3   : > { %v1681_v53 = vsel %vm1617_vm11, %v1585_v21, %v1649_v0  ;;  %v1650_v57 = vmul.f32 0.4, %v1586_v35  ;;  %v3007_v41 = vsub.f32 %v2944_v58, %v2906_v63  ;;  %vm1618_vm13 = vcmp.ge.f32.partialorder %v1586_v35, 0.0 }
 0x1a4   : > { %1744 = vxpose.xlu1.b32.cont [4/16] (narrow) %v1696_v38, 32  ;;  %1712 = vxpose.xlu0.b32.cont [4/16] (narrow) %v1680_v54, 32  ;;  %v1698_v32 = vsel %vm1634_vm12, %v1602_v37, %v1666_v61  ;;  %v1667_v46 = vmul.f32 0.4, %v1603_v18  ;;  %v1592_v48 = vsub.f32 %v1559_v3, %v2906_v63  ;;  %v3012_v1 = vsub.f32 %v2948_v49, %v2906_v63 }
 0x1a5   : > { %v3015_v10 = vsub.f32 %v1560_v39, %v2906_v63  ;;  %v1682_v19 = vsel %vm1618_vm13, %v1586_v35, %v1650_v57  ;;  %v1651_v4 = vmul.f32 0.4, %v1587_v59  ;;  %v3019_v58 = vsub.f32 %v2903_v62, %v2906_v63 }
 0x1a6   : > { %v3022_v11 = vsub.f32 %v1561_v5, %v2906_v63  ;;  %v1562_v6 = vmul.f32 %v2900_v60, %v2761_v23  ;;  %vm1635_vm14 = vcmp.ge.f32.partialorder %v1603_v18, 0.0  ;;  %vm1619_vm15 = vcmp.ge.f32.partialorder %v1587_v59, 0.0 }
 0x1a7   : > { %v3028_v49 = vsub.f32 %v2952_v13, %v2906_v63  ;;  %v1563_v31 = vmul.f32 %v2900_v60, %v2768_v43  ;;  %v1699_v7 = vsel %vm1635_vm14, %v1603_v18, %v1667_v46  ;;  %v1683_v62 = vsel %vm1619_vm15, %v1587_v59, %v1651_v4 }
 0x1a8   : > { %1745 = vxpose.xlu1.b32.cont [5/16] (narrow) %v1697_v28, 32  ;;  %1713 = vxpose.xlu0.b32.cont [5/16] (narrow) %v1681_v53, 32  ;;  %v1668_v8 = vmul.f32 0.4, %v1604_v36  ;;  %v1652_v9 = vmul.f32 0.4, %v1588_v22  ;;  %v1595_v23 = vsub.f32 %v1562_v6, %v2906_v63  ;;  %v3035_v12 = vsub.f32 %v2956_v40, %v2906_v63 }
 0x1a9   : > { %vm1636_vm0 = vcmp.ge.f32.partialorder %v1604_v36, 0.0  ;;  %vm1620_vm1 = vcmp.ge.f32.partialorder %v1588_v22, 0.0  ;;  %v3038_v13 = vsub.f32 %v1563_v31, %v2906_v63  ;;  %v1669_v43 = vmul.f32 0.4, %v2988_v25 }
 0x1aa   : > { %v1700_v14 = vsel %vm1636_vm0, %v1604_v36, %v1668_v8  ;;  %v1684_v15 = vsel %vm1620_vm1, %v1588_v22, %v1652_v9  ;;  %v1653_v60 = vmul.f32 0.4, %v1589_v52  ;;  %vm1637_vm2 = vcmp.ge.f32.partialorder %v2988_v25, 0.0 }
 0x1ab   : > { %vm1621_vm3 = vcmp.ge.f32.partialorder %v1589_v52, 0.0  ;;  %v1701_v17 = vsel %vm1637_vm2, %v2988_v25, %v1669_v43  ;;  %v1670_v24 = vmul.f32 0.4, %v1606_v2  ;;  %v1654_v21 = vmul.f32 0.4, %v1590_v55 }
 0x1ac   : > { %1746 = vxpose.xlu1.b32.cont [6/16] (narrow) %v1698_v32, 32  ;;  %1714 = vxpose.xlu0.b32.cont [6/16] (narrow) %v1682_v19, 32  ;;  %v1685_v20 = vsel %vm1621_vm3, %v1589_v52, %v1653_v60  ;;  %vm1638_vm4 = vcmp.ge.f32.partialorder %v1606_v2, 0.0  ;;  %vm1622_vm5 = vcmp.ge.f32.partialorder %v1590_v55, 0.0  ;;  %v1671_v37 = vmul.f32 0.4, %v1607_v16 }
 0x1ad   : > { %v1702_v63 = vsel %vm1638_vm4, %v1606_v2, %v1670_v24  ;;  %v1686_v40 = vsel %vm1622_vm5, %v1590_v55, %v1654_v21  ;;  %v1655_v29 = vmul.f32 0.4, %v1591_v34  ;;  %vm1639_vm6 = vcmp.ge.f32.partialorder %v1607_v16, 0.0 }
 0x1ae   : > { %vm1623_vm7 = vcmp.ge.f32.partialorder %v1591_v34, 0.0  ;;  %v1703_v30 = vsel %vm1639_vm6, %v1607_v16, %v1671_v37  ;;  %v1672_v35 = vmul.f32 0.4, %v3007_v41  ;;  %v1656_v42 = vmul.f32 0.4, %v1592_v48 }
 0x1af   : > { %v1687_v33 = vsel %vm1623_vm7, %v1591_v34, %v1655_v29  ;;  %vm1640_vm8 = vcmp.ge.f32.partialorder %v3007_v41, 0.0  ;;  %vm1624_vm9 = vcmp.ge.f32.partialorder %v1592_v48, 0.0  ;;  %v1673_v47 = vmul.f32 0.4, %v3012_v1 }
 0x1b0   : > { %1747 = vxpose.xlu1.b32.cont [7/16] (narrow) %v1699_v7, 32  ;;  %1715 = vxpose.xlu0.b32.cont [7/16] (narrow) %v1683_v62, 32  ;;  %v1704_v18 = vsel %vm1640_vm8, %v3007_v41, %v1672_v35  ;;  %v1688_v44 = vsel %vm1624_vm9, %v1592_v48, %v1656_v42  ;;  %v1657_v50 = vmul.f32 0.4, %v3015_v10  ;;  %vm1641_vm10 = vcmp.ge.f32.partialorder %v3012_v1, 0.0 }
 0x1b1   : > { %vm1625_vm11 = vcmp.ge.f32.partialorder %v3015_v10, 0.0  ;;  %v1705_v51 = vsel %vm1641_vm10, %v3012_v1, %v1673_v47  ;;  %v1674_v59 = vmul.f32 0.4, %v3019_v58  ;;  %v1658_v36 = vmul.f32 0.4, %v3022_v11 }
 0x1b2   : > { %v1689_v56 = vsel %vm1625_vm11, %v3015_v10, %v1657_v50  ;;  %vm1642_vm12 = vcmp.ge.f32.partialorder %v3019_v58, 0.0  ;;  %vm1626_vm13 = vcmp.ge.f32.partialorder %v3022_v11, 0.0  ;;  %v1675_v25 = vmul.f32 0.4, %v3028_v49 }
 0x1b3   : > { %v1706_v22 = vsel %vm1642_vm12, %v3019_v58, %v1674_v59  ;;  %v1690_v26 = vsel %vm1626_vm13, %v3022_v11, %v1658_v36  ;;  %v1659_v27 = vmul.f32 0.4, %v1595_v23  ;;  %vm1643_vm14 = vcmp.ge.f32.partialorder %v3028_v49, 0.0 }
 0x1b4   : > { %1748 = vxpose.xlu1.b32.cont [8/16] (narrow) %v1700_v14, 32  ;;  %1716 = vxpose.xlu0.b32.cont [8/16] (narrow) %v1684_v15, 32  ;;  %vm1627_vm15 = vcmp.ge.f32.partialorder %v1595_v23, 0.0  ;;  %v1707_v38 = vsel %vm1643_vm14, %v3028_v49, %v1675_v25  ;;  %v1676_v45 = vmul.f32 0.4, %v3035_v12  ;;  %vm1644_vm0 = vcmp.ge.f32.partialorder %v3035_v12, 0.0 }
 0x1b5   : > { %v1691_v54 = vsel %vm1627_vm15, %v1595_v23, %v1659_v27  ;;  %v1660_v0 = vmul.f32 0.4, %v3038_v13  ;;  %vm1628_vm1 = vcmp.ge.f32.partialorder %v3038_v13, 0.0 }
 0x1b6   : > { %v1708_v52 = vsel %vm1644_vm0, %v3035_v12, %v1676_v45 }
 0x1b7   : > { %v1692_v2 = vsel %vm1628_vm1, %v3038_v13, %v1660_v0 }
 0x1b8   : > { %1749 = vxpose.xlu1.b32.cont [9/16] (narrow) %v1701_v17, 32  ;;  %1717 = vxpose.xlu0.b32.cont [9/16] (narrow) %v1685_v20, 32 }
 0x1bc   : > { %1750 = vxpose.xlu1.b32.cont [10/16] (narrow) %v1702_v63, 32  ;;  %1718 = vxpose.xlu0.b32.cont [10/16] (narrow) %v1686_v40, 32 }
 0x1c0   : > { %1751 = vxpose.xlu1.b32.cont [11/16] (narrow) %v1703_v30, 32  ;;  %1719 = vxpose.xlu0.b32.cont [11/16] (narrow) %v1687_v33, 32 }
 0x1c4   : > { %1752 = vxpose.xlu1.b32.cont [12/16] (narrow) %v1704_v18, 32  ;;  %1720 = vxpose.xlu0.b32.cont [12/16] (narrow) %v1688_v44, 32 }
 0x1c8   : > { %1753 = vxpose.xlu1.b32.cont [13/16] (narrow) %v1705_v51, 32  ;;  %1721 = vxpose.xlu0.b32.cont [13/16] (narrow) %v1689_v56, 32 }
 0x1cc   : > { %1754 = vxpose.xlu1.b32.cont [14/16] (narrow) %v1706_v22, 32  ;;  %1722 = vxpose.xlu0.b32.cont [14/16] (narrow) %v1690_v26, 32 }
 0x1d0   : > { %1755 = vxpose.xlu1.b32.cont [15/16] (narrow) %v1707_v38, 32  ;;  %1723 = vxpose.xlu0.b32.cont [15/16] (narrow) %v1691_v54, 32 }
 0x1d4   : > { %1756 = vxpose.xlu1.b32.end [16/16] (narrow) %v1708_v52, 32  ;;  %1724 = vxpose.xlu0.b32.end [16/16] (narrow) %v1692_v2, 32 }
 0x218   : > { %v1757_v3 = vpop.trf.xlu1  ;;  %v1725_v39 = vpop.trf.xlu0 }
 0x219   : > { %1774 = vst [vmem:[%s143_s24 + $0x8] sm:$0xff] %v1757_v3  ;;  %1773 = vst [vmem:[%s143_s24] sm:$0xff] %v1725_v39 }
 0x21c   : > { %v1758_v61 = vpop.trf.xlu1  ;;  %v1726_v55 = vpop.trf.xlu0 }
 0x21d   : > { %1776 = vst [vmem:[%s143_s24 + $0x18] sm:$0xff] %v1758_v61  ;;  %1775 = vst [vmem:[%s143_s24 + $0x10] sm:$0xff] %v1726_v55 }
 0x220   : > { %v1759_v5 = vpop.trf.xlu1  ;;  %v1727_v16 = vpop.trf.xlu0 }
 0x221   : > { %1778 = vst [vmem:[%s143_s24 + $0x28] sm:$0xff] %v1759_v5  ;;  %1777 = vst [vmem:[%s143_s24 + $0x20] sm:$0xff] %v1727_v16 }
 0x224   : > { %v1760_v34 = vpop.trf.xlu1  ;;  %v1728_v28 = vpop.trf.xlu0 }
 0x225   : > { %1780 = vst [vmem:[%s143_s24 + $0x38] sm:$0xff] %v1760_v34  ;;  %1779 = vst [vmem:[%s143_s24 + $0x30] sm:$0xff] %v1728_v28 }
 0x226 PF: > { %s12_s9 = sadd.s32 1, %s2384_s9  }
 0x227   : > { %p9_p4 = scmp.ge.s32.totalorder %s12_s9, 4  }
 0x229   :  { %11 = sbr.rel (!%p9_p4) target bundleno = 1 (0x1), region = 62 }

// kernel: encoder_forward.7
= control target key start
LH: loop header
LB: loop body
LE: loop exit
PB: predicated region body
PF: predicated region fallthrough
CT: control target
= control target key end

     0   :  { %s1265_s9 = smov 0   ;;  %s1502_s0 = inlined_call_operand.vmem [shape: f32[2,9,9,128], index: 0, kind: input, shape index: {}]   ;;  %s1503_s1 = inlined_call_operand.vmem [shape: bf16[4,128,64], index: 1, kind: input, shape index: {}]   ;;  %s1504_s2 = inlined_call_operand.vmem [shape: f32[2,64,64], index: 2, kind: output, shape index: {}]  }
   0x1 LB: > { %s923_s10 = sadd.s32 4294967295, %s1248_s9   ;;  %p927_p0 = scmp.ge.s32.totalorder %s1248_s9, 1  ;;  %s1248_s9 = sphi %s1265_s9, %s12_s9  }
   0x2   : > { %p112_p1 = scmp.lt.s32.totalorder %s1248_s9, 3 }
   0x4   : > { %p113_p2 = pnand %p927_p0, %p112_p1 }
   0x5   : > { %v1208_v0 = vld [vmem:[%s1503_s1 + $0x40] sm:$0xff] (!%p113_p2)   ;;  %p134_p3 = scmp.lt.s32.totalorder (!%p113_p2), %s923_s10, 1  ;;  %v1210_v2 = vld [vmem:[%s1503_s1 + $0x48] sm:$0xff] (!%p113_p2)   ;;  %v1212_v4 = vld [vmem:[%s1503_s1 + $0x50] sm:$0xff] (!%p113_p2)   ;;  %vm729_vm0 = vcmask (!%p113_p2), 523264  }
   0x6   : > { %116 = sbr.rel (%p113_p2) target bundleno = 499 (0x1f3), region = 28  ;;  %v1209_v1 = vld [vmem:[%s1503_s1 + $0x80] sm:$0xff] (!%p113_p2)   ;;  %1078 = vmatprep.subr.bf16.mxu1 (!%p113_p2), %v1208_v0  ;;  %v1211_v3 = vld [vmem:[%s1503_s1 + $0x88] sm:$0xff] (!%p113_p2)   ;;  %v1213_v5 = vld [vmem:[%s1503_s1 + $0x90] sm:$0xff] (!%p113_p2)  }
   0x7   : > { %1126 = vmatprep.subr.bf16.mxu0 (!%p113_p2), %v1209_v1  ;;  %1079 = vmatpush3.bf16.msra.mxu1 (!%p113_p2), %v1208_v0  ;;  %v1214_v6 = vld [vmem:[%s1503_s1 + $0x58] sm:$0xff] (!%p113_p2)   ;;  %v1216_v8 = vld [vmem:[%s1503_s1 + $0x60] sm:$0xff] (!%p113_p2)   ;;  %v1218_v10 = vld [vmem:[%s1503_s1 + $0x68] sm:$0xff] (!%p113_p2)  }
   0x8   : > { %1127 = vmatpush3.bf16.msra.mxu0 (!%p113_p2), %v1209_v1  ;;  %1080 = vmatprep.subr.bf16.mxu1 (!%p113_p2), %v1210_v2  ;;  %v1215_v7 = vld [vmem:[%s1503_s1 + $0x98] sm:$0xff] (!%p113_p2)   ;;  %v1217_v9 = vld [vmem:[%s1503_s1 + $0xa0] sm:$0xff] (!%p113_p2)   ;;  %v1219_v13 = vld [vmem:[%s1503_s1 + $0xa8] sm:$0xff] (!%p113_p2)  }
   0x9   : > { %1128 = vmatprep.subr.bf16.mxu0 (!%p113_p2), %v1211_v3  ;;  %v1220_v18 = vld [vmem:[%s1503_s1 + $0x70] sm:$0xff] (!%p113_p2)   ;;  %v1222_v20 = vld [vmem:[%s1503_s1 + $0x78] sm:$0xff] (!%p113_p2)   ;;  %v1224_v23 = vld [vmem:[%s1503_s1] sm:$0xff] (!%p113_p2)  }
   0xa   : > { %v1221_v19 = vld [vmem:[%s1503_s1 + $0xb0] sm:$0xff] (!%p113_p2)   ;;  %v1223_v21 = vld [vmem:[%s1503_s1 + $0xb8] sm:$0xff] (!%p113_p2)   ;;  %v1225_v27 = vld [vmem:[%s1503_s1 + $0xc0] sm:$0xff] (!%p113_p2)  }
   0xb   : > { %1081 = vmatpush3.bf16.msra.mxu1 (!%p113_p2), %v1210_v2  ;;  %v1226_v34 = vld [vmem:[%s1503_s1 + $0x8] sm:$0xff] (!%p113_p2)   ;;  %v1228_v38 = vld [vmem:[%s1503_s1 + $0x10] sm:$0xff] (!%p113_p2)   ;;  %v1230_v47 = vld [vmem:[%s1503_s1 + $0x18] sm:$0xff] (!%p113_p2)  }
   0xc   : > { %1129 = vmatpush3.bf16.msra.mxu0 (!%p113_p2), %v1211_v3  ;;  %1082 = vmatprep.subr.bf16.mxu1 (!%p113_p2), %v1212_v4  ;;  %v1227_v35 = vld [vmem:[%s1503_s1 + $0xc8] sm:$0xff] (!%p113_p2)   ;;  %v1229_v43 = vld [vmem:[%s1503_s1 + $0xd0] sm:$0xff] (!%p113_p2)   ;;  %v1231_v48 = vld [vmem:[%s1503_s1 + $0xd8] sm:$0xff] (!%p113_p2)  }
   0xd   : > { %s1506_s10 = smov (!%p134_p3, %s923_s10), 1  ;;  %1130 = vmatprep.subr.bf16.mxu0 %v1213_v5  ;;  %v1232_v51 = vld [vmem:[%s1503_s1 + $0x20] sm:$0xff]   ;;  %v1234_v53 = vld [vmem:[%s1503_s1 + $0x28] sm:$0xff]   ;;  %v1236_v55 = vld [vmem:[%s1503_s1 + $0x30] sm:$0xff]  }
   0xe   : > { %s1198_s27 = smul.u32 144, %s1506_s10  ;;  %v1233_v52 = vld [vmem:[%s1503_s1 + $0xe0] sm:$0xff]   ;;  %v1235_v54 = vld [vmem:[%s1503_s1 + $0xe8] sm:$0xff]   ;;  %v1237_v56 = vld [vmem:[%s1503_s1 + $0xf0] sm:$0xff]  }
   0xf   : > { %1083 = vmatpush3.bf16.msra.mxu1 %v1212_v4  ;;  %v1238_v57 = vld [vmem:[%s1503_s1 + $0x38] sm:$0xff]  }
  0x10   : > { %1131 = vmatpush3.bf16.msra.mxu0 %v1213_v5  ;;  %1084 = vmatprep.subr.bf16.mxu1 %v1214_v6  ;;  %s1309_s6 = scalar_lea.vmem %s1502_s0, %s1198_s27  ;;  %v1239_v58 = vld [vmem:[%s1503_s1 + $0xf8] sm:$0xff]  }
  0x11   : > { %1132 = vmatprep.subr.bf16.mxu0 %v1215_v7  ;;  %v173_v11 = vld [vmem:[%s1309_s6 + $0x1] sm:$0xff]  ;;  %v1316_v12 = vld [vmem:[%s1309_s6 + $0x11] sm:$0xff] }
  0x12   : > { %v181_v14 = vpack.c.bf16 %v1316_v12, %v173_v11  ;;  %v1323_v15 = vld [vmem:[%s1309_s6 + $0x10] sm:$0xff]  ;;  %v1326_v16 = vld [vmem:[%s1309_s6 + $0x20] sm:$0xff] }
  0x13   : > { %1085 = vmatpush3.bf16.msra.mxu1 %v1214_v6  ;;  %v437_v17 = vpack.c.bf16 %v1326_v16, %v1323_v15  ;;  %v175_v22 = vld [vmem:[%s1309_s6 + $0x21] sm:$0xff]  ;;  %v1347_v24 = vld [vmem:[%s1309_s6 + $0x31] sm:$0xff] }
  0x14   : > { %1133 = vmatpush3.bf16.msra.mxu0 %v1215_v7  ;;  %1086 = vmatprep.subr.bf16.mxu1 %v1216_v8  ;;  %v1350_v25 = vld [vmem:[%s1309_s6 + $0x30] sm:$0xff]  ;;  %v1353_v26 = vld [vmem:[%s1309_s6 + $0x40] sm:$0xff]  ;;  %v182_v28 = vpack.c.bf16 %v1347_v24, %v175_v22  ;;  %v587_v50 = vpack.c.bf16 %v175_v22, %v1316_v12 }
  0x15   : > { %1134 = vmatprep.subr.bf16.mxu0 %v1217_v9  ;;  %1094 = vmatprep.mubr.bf16.mxu1 %v181_v14  ;;  %v1360_v29 = vld [vmem:[%s1309_s6 + $0x41] sm:$0xff]  ;;  %v438_v30 = vpack.c.bf16 %v1353_v26, %v1350_v25  ;;  %v1365_v31 = vld [vmem:[%s1309_s6 + $0x51] sm:$0xff]  ;;  %v154_v59 = vpack.c.bf16 %v1350_v25, %v1326_v16 }
  0x16   : > { %1142 = vmatprep.mubr.bf16.mxu0 %v437_v17  ;;  %v1368_v32 = vld [vmem:[%s1309_s6 + $0x50] sm:$0xff]  ;;  %v1371_v33 = vld [vmem:[%s1309_s6 + $0x60] sm:$0xff]  ;;  %v183_v36 = vpack.c.bf16 %v1365_v31, %v1360_v29  ;;  %v588_v60 = vpack.c.bf16 %v1360_v29, %v1347_v24 }
  0x17   : > { %1087 = vmatpush3.bf16.msra.mxu1 %v1216_v8  ;;  %v1382_v37 = vld [vmem:[%s1309_s6 + $0x61] sm:$0xff]  ;;  %v439_v39 = vpack.c.bf16 %v1371_v33, %v1368_v32  ;;  %v1390_v40 = vld [vmem:[%s1309_s6 + $0x71] sm:$0xff]  ;;  %v155_v61 = vpack.c.bf16 %v1368_v32, %v1353_v26 }
  0x18   : > { %1135 = vmatpush3.bf16.msra.mxu0 %v1217_v9  ;;  %1088 = vmatprep.subr.bf16.mxu1 %v1218_v10  ;;  %v1393_v41 = vld [vmem:[%s1309_s6 + $0x70] sm:$0xff]  ;;  %v970_v42 = vld [vmem:[%s1309_s6 + $0x80] sm:$0xff]  ;;  %v184_v44 = vpack.c.bf16 %v1390_v40, %v1382_v37  ;;  %v589_v62 = vpack.c.bf16 %v1382_v37, %v1365_v31 }
  0x19   : > { %1136 = vmatprep.subr.bf16.mxu0 %v1219_v13  ;;  %v145_v45 = vld [vmem:[%s1309_s6] sm:$0xff]  ;;  %v440_v46 = vpack.c.bf16 %v970_v42, %v1393_v41  ;;  %v156_v0 = vpack.c.bf16 %v1393_v41, %v1371_v33 }
  0x1a   : > { %v153_v49 = vpack.c.bf16 %v1323_v15, %v145_v45  ;;  %v1002_v63 = vld [vmem:[%s1309_s6 + $0x81] sm:$0xff]  ;;  %s1029_s6 = sshll.u32 %s1506_s10, 6 }
  0x1b   : > { %1089 = vmatpush3.bf16.msra.mxu1 %v1218_v10  ;;  %v590_v1 = vpack.c.bf16 %v1002_v63, %v1390_v40  ;;  %s143_s30 = scalar_lea.vmem %s1504_s2, %s1029_s6 }
  0x1c   : > { %1137 = vmatpush3.bf16.msra.mxu0 %v1219_v13  ;;  %1090 = vmatprep.subr.bf16.mxu1 %v1220_v18 }
  0x1d   : > { %1138 = vmatprep.subr.bf16.mxu0 %v1221_v19 }
  0x1f   : > { %1091 = vmatpush3.bf16.msra.mxu1 %v1220_v18 }
  0x20   : > { %1139 = vmatpush3.bf16.msra.mxu0 %v1221_v19  ;;  %1092 = vmatprep.subr.bf16.mxu1 %v1222_v20 }
  0x21   : > { %1140 = vmatprep.subr.bf16.mxu0 %v1223_v21 }
  0x23   : > { %1093 = vmatpush3.bf16.msra.mxu1 %v1222_v20 }
  0x24   : > { %1141 = vmatpush3.bf16.msra.mxu0 %v1223_v21  ;;  %1102 = vmatprep.subr.bf16.mxu1 %v1224_v23 }
  0x25   : > { %1150 = vmatprep.subr.bf16.mxu0 %v1225_v27 }
  0x26   : > { %1095 = vmatmul.mubr.bf16.vlgmr.msra.gmra.mrb[0].mxu1 %v182_v28 }
  0x27   : > { %1103 = vmatpush3.bf16.msra.mxu1 %v1224_v23  ;;  %1143 = vmatmul.mubr.bf16.vlgmr.msra.gmra.mrb[0].mxu0 %v438_v30 }
  0x28   : > { %1151 = vmatpush3.bf16.msra.mxu0 %v1225_v27  ;;  %1104 = vmatprep.subr.bf16.mxu1 %v1226_v34 }
  0x29   : > { %1152 = vmatprep.subr.bf16.mxu0 %v1227_v35  ;;  %1098 = vmatprep.mubr.bf16.mxu1 %v183_v36 }
  0x2a   : > { %1146 = vmatprep.mubr.bf16.mxu0 %v439_v39 }
  0x2b   : > { %1105 = vmatpush3.bf16.msra.mxu1 %v1226_v34 }
  0x2c   : > { %1153 = vmatpush3.bf16.msra.mxu0 %v1227_v35  ;;  %1106 = vmatprep.subr.bf16.mxu1 %v1228_v38 }
  0x2d   : > { %1154 = vmatprep.subr.bf16.mxu0 %v1229_v43 }
  0x2e   : > { %1099 = vmatmul.mubr.bf16.gmra.mrb[4].mxu1 %v184_v44 }
  0x2f   : > { %1107 = vmatpush3.bf16.msra.mxu1 %v1228_v38  ;;  %1147 = vmatmul.mubr.bf16.gmra.mrb[4].mxu0 %v440_v46 }
  0x30   : > { %1155 = vmatpush3.bf16.msra.mxu0 %v1229_v43  ;;  %1108 = vmatprep.subr.bf16.mxu1 %v1230_v47 }
  0x31   : > { %1156 = vmatprep.subr.bf16.mxu0 %v1231_v48  ;;  %1118 = vmatprep.mubr.bf16.mxu1 %v153_v49 }
  0x32   : > { %1166 = vmatprep.mubr.bf16.mxu0 %v587_v50 }
  0x33   : > { %1109 = vmatpush3.bf16.msra.mxu1 %v1230_v47 }
  0x34   : > { %1157 = vmatpush3.bf16.msra.mxu0 %v1231_v48  ;;  %1110 = vmatprep.subr.bf16.mxu1 %v1232_v51 }
  0x35   : > { %1158 = vmatprep.subr.bf16.mxu0 %v1233_v52 }
  0x37   : > { %1111 = vmatpush3.bf16.msra.mxu1 %v1232_v51 }
  0x38   : > { %1159 = vmatpush3.bf16.msra.mxu0 %v1233_v52  ;;  %1112 = vmatprep.subr.bf16.mxu1 %v1234_v53 }
  0x39   : > { %1160 = vmatprep.subr.bf16.mxu0 %v1235_v54 }
  0x3b   : > { %1113 = vmatpush3.bf16.msra.mxu1 %v1234_v53 }
  0x3c   : > { %1161 = vmatpush3.bf16.msra.mxu0 %v1235_v54  ;;  %1114 = vmatprep.subr.bf16.mxu1 %v1236_v55 }
  0x3d   : > { %1162 = vmatprep.subr.bf16.mxu0 %v1237_v56 }
  0x3f   : > { %1115 = vmatpush3.bf16.msra.mxu1 %v1236_v55 }
  0x40   : > { %1163 = vmatpush3.bf16.msra.mxu0 %v1237_v56  ;;  %1116 = vmatprep.subr.bf16.mxu1 %v1238_v57 }
  0x41   : > { %1164 = vmatprep.subr.bf16.mxu0 %v1239_v58 }
  0x43   : > { %1117 = vmatpush3.bf16.msra.mxu1 %v1238_v57 }
  0x44   : > { %1165 = vmatpush3.bf16.msra.mxu0 %v1239_v58 }
  0x46   : > { %1119 = vmatmul.mubr.bf16.vlgmr.msra.gmra.mrb[0].mxu1 %v154_v59 }
  0x47   : > { %1167 = vmatmul.mubr.bf16.vlgmr.msra.gmra.mrb[0].mxu0 %v588_v60  ;;  %1122 = vmatprep.mubr.bf16.mxu1 %v155_v61 }
  0x48   : > { %1170 = vmatprep.mubr.bf16.mxu0 %v589_v62 }
  0x4e   : > { %1123 = vmatmul.mubr.bf16.gmra.mrb[4].mxu1 %v156_v0 }
  0x4f   : > { %1171 = vmatmul.mubr.bf16.gmra.mrb[4].mxu0 %v590_v1 }
 0x119   : > { %v1120_v2 = vpop.f32.mrb[0].mxu1 }
 0x11a   : > { %v1168_v3 = vpop.f32.mrb[0].mxu0  ;;  %v397_v4 = vpop.f32.mrb[1].mxu1 }
 0x11b   : > { %v1447_v5 = vadd.f32 %v1168_v3, %v1120_v2  ;;  %v690_v6 = vpop.f32.mrb[1].mxu0  ;;  %v1121_v7 = vpop.f32.mrb[2].mxu1 }
 0x11c   : > { %v1449_v8 = vadd.f32 %v690_v6, %v397_v4  ;;  %v1169_v9 = vpop.f32.mrb[2].mxu0  ;;  %v400_v10 = vpop.f32.mrb[3].mxu1 }
 0x11d   : > { %v1451_v11 = vadd.f32 %v1169_v9, %v1121_v7  ;;  %v693_v12 = vpop.f32.mrb[3].mxu0  ;;  %v755_v15 = vmul.f32 %v1447_v5, %v1447_v5  ;;  %v733_v22 = vsel %vm729_vm0, %v1447_v5, 0.0 }
 0x11e   : > { %v753_v13 = vmul.f32 %v1449_v8, %v1449_v8  ;;  %v1455_v14 = vadd.f32 %v693_v12, %v400_v10  ;;  %v730_v16 = vsel %vm729_vm0, %v1449_v8, 0.0 }
 0x11f   : > { %v756_v19 = vmul.f32 %v1451_v11, %v1451_v11  ;;  %v764_v32 = vsel %vm729_vm0, %v755_v15, 0.0  ;;  %v735_v33 = vsel %vm729_vm0, %v1451_v11, 0.0 }
 0x120   : > { %v731_v17 = vsel %vm729_vm0, %v1455_v14, 0.0  ;;  %v754_v18 = vmul.f32 %v1455_v14, %v1455_v14  ;;  %v761_v23 = vsel %vm729_vm0, %v753_v13, 0.0 }
 0x121   : > { %v732_v20 = vadd.f32 %v731_v17, %v730_v16  ;;  %v1124_v21 = vpop.f32.mrb[4].mxu1  ;;  %v766_v37 = vsel %vm729_vm0, %v756_v19, 0.0 }
 0x122   : > { %v762_v24 = vsel %vm729_vm0, %v754_v18, 0.0  ;;  %v1172_v25 = vpop.f32.mrb[4].mxu0  ;;  %v413_v26 = vpop.f32.mrb[5].mxu1 }
 0x123   : > { %v734_v27 = vadd.f32 %v733_v22, %v732_v20  ;;  %v763_v28 = vadd.f32 %v762_v24, %v761_v23  ;;  %v1178_v29 = vadd.f32 %v1172_v25, %v1124_v21  ;;  %v706_v30 = vpop.f32.mrb[5].mxu0  ;;  %v1125_v31 = vpop.f32.mrb[6].mxu1 }
 0x124   : > { %v1179_v34 = vadd.f32 %v706_v30, %v413_v26  ;;  %v1173_v35 = vpop.f32.mrb[6].mxu0  ;;  %v416_v36 = vpop.f32.mrb[7].mxu1 }
 0x125   : > { %v765_v38 = vadd.f32 %v764_v32, %v763_v28  ;;  %v736_v39 = vadd.f32 %v735_v33, %v734_v27  ;;  %v709_v40 = vpop.f32.mrb[7].mxu0  ;;  %v1180_v43 = vadd.f32 %v1173_v35, %v1125_v31  ;;  %v759_v49 = vmul.f32 %v1178_v29, %v1178_v29 }
 0x126   : > { %v737_v41 = vsel %vm729_vm0, %v1179_v34, 0.0  ;;  %v757_v42 = vmul.f32 %v1179_v34, %v1179_v34  ;;  %v1181_v44 = vadd.f32 %v709_v40, %v416_v36  ;;  %v741_v53 = vsel %vm729_vm0, %v1178_v29, 0.0 }
 0x127   : > { %v738_v45 = vadd.f32 %v737_v41, %v736_v39  ;;  %v767_v46 = vadd.f32 %v766_v37, %v765_v38  ;;  %v760_v54 = vmul.f32 %v1180_v43, %v1180_v43  ;;  %v743_v57 = vsel %vm729_vm0, %v1180_v43, 0.0 }
 0x128   : > { %v768_v47 = vsel %vm729_vm0, %v757_v42, 0.0  ;;  %v739_v48 = vsel %vm729_vm0, %v1181_v44, 0.0  ;;  %v758_v52 = vmul.f32 %v1181_v44, %v1181_v44  ;;  %v772_v59 = vsel %vm729_vm0, %v759_v49, 0.0 }
 0x129   : > { %v769_v50 = vadd.f32 %v768_v47, %v767_v46  ;;  %v740_v51 = vadd.f32 %v739_v48, %v738_v45  ;;  %v774_v62 = vsel %vm729_vm0, %v760_v54, 0.0 }
 0x12a   : > { %v770_v56 = vsel %vm729_vm0, %v758_v52, 0.0 }
 0x12b   : > { %v742_v55 = vadd.f32 %v741_v53, %v740_v51  ;;  %v771_v58 = vadd.f32 %v770_v56, %v769_v50 }
 0x12d   : > { %v744_v60 = vadd.f32 %v743_v57, %v742_v55  ;;  %v773_v61 = vadd.f32 %v772_v59, %v771_v58 }
 0x12f   : > { %v745_v63 = vrot.slane %v744_v60, 4  ;;  %v775_v0 = vadd.f32 %v774_v62, %v773_v61 }
 0x131   : > { %v746_v1 = vadd.f32 %v745_v63, %v744_v60  ;;  %v776_v2 = vrot.slane %v775_v0, 4 }
 0x133   : > { %v747_v3 = vrot.slane %v746_v1, 2  ;;  %v777_v4 = vadd.f32 %v776_v2, %v775_v0 }
 0x135   : > { %v748_v6 = vadd.f32 %v747_v3, %v746_v1  ;;  %v778_v7 = vrot.slane %v777_v4, 2 }
 0x137   : > { %v749_v9 = vrot.slane %v748_v6, 1  ;;  %v779_v10 = vadd.f32 %v778_v7, %v777_v4 }
 0x139   : > { %v750_v12 = vadd.f32 %v749_v9, %v748_v6  ;;  %v780_v13 = vrot.slane %v779_v10, 1 }
 0x13b   : > { %v752_v15 = vmul.f32 0.015625, %v750_v12  ;;  %v781_v16 = vadd.f32 %v780_v13, %v779_v10 }
 0x13d   : > { %v783_v17 = vmul.f32 %v752_v15, %v752_v15  ;;  %v782_v18 = vmul.f32 0.015625, %v781_v16 }
 0x13f   : > { %v784_v19 = vsub.f32 %v782_v18, %v783_v17 }
 0x141   : > { %v785_v20 = vadd.f32 1e-05, %v784_v19 }
 0x143   : > { %1240 = vrsqrt.f32 %v785_v20 }
 0x14d   : > { %v1241_v21 = vpop.eup %1240 }
 0x14e   : > { %v792_v22 = vmul.f32 %v1241_v21, %v1181_v44  ;;  %v795_v23 = vmul.f32 %v1241_v21, %v752_v15  ;;  %v787_v24 = vmul.f32 %v1241_v21, %v1449_v8  ;;  %v788_v25 = vmul.f32 %v1241_v21, %v1455_v14 }
 0x14f   : > { %v789_v26 = vmul.f32 %v1241_v21, %v1447_v5  ;;  %v790_v27 = vmul.f32 %v1241_v21, %v1451_v11  ;;  %v791_v28 = vmul.f32 %v1241_v21, %v1179_v34  ;;  %v793_v30 = vmul.f32 %v1241_v21, %v1178_v29 }
 0x150   : > { %v796_v31 = vsub.f32 %v787_v24, %v795_v23  ;;  %v797_v32 = vsub.f32 %v788_v25, %v795_v23  ;;  %v801_v33 = vsub.f32 %v792_v22, %v795_v23  ;;  %v794_v35 = vmul.f32 %v1241_v21, %v1180_v43 }
 0x151   : > { %v798_v36 = vsub.f32 %v789_v26, %v795_v23  ;;  %v799_v37 = vsub.f32 %v790_v27, %v795_v23  ;;  %v800_v38 = vsub.f32 %v791_v28, %v795_v23  ;;  %v802_v39 = vsub.f32 %v793_v30, %v795_v23 }
 0x152   : > { %vm804_vm1 = vcmp.ge.f32.partialorder %v796_v31, 0.0  ;;  %v812_v40 = vmul.f32 0.4, %v796_v31  ;;  %v813_v8 = vmul.f32 0.4, %v797_v32  ;;  %vm805_vm2 = vcmp.ge.f32.partialorder %v797_v32, 0.0 }
 0x153   : > { %v803_v14 = vsub.f32 %v794_v35, %v795_v23  ;;  %v814_v42 = vmul.f32 0.4, %v798_v36  ;;  %vm806_vm3 = vcmp.ge.f32.partialorder %v798_v36, 0.0  ;;  %v815_v29 = vmul.f32 0.4, %v799_v37 }
 0x154   : > { %v820_v41 = vsel %vm804_vm1, %v796_v31, %v812_v40  ;;  %v821_v5 = vsel %vm805_vm2, %v797_v32, %v813_v8  ;;  %vm807_vm4 = vcmp.ge.f32.partialorder %v799_v37, 0.0  ;;  %v816_v43 = vmul.f32 0.4, %v800_v38 }
 0x155   : > { %828 = vxpose.xlu0.b32.start [1/8] (short) (narrow) %v820_v41, 64  ;;  %v822_v11 = vsel %vm806_vm3, %v798_v36, %v814_v42  ;;  %v823_v34 = vsel %vm807_vm4, %v799_v37, %v815_v29  ;;  %vm808_vm5 = vcmp.ge.f32.partialorder %v800_v38, 0.0  ;;  %v817_v45 = vmul.f32 0.4, %v801_v33 }
 0x156   : > { %v824_v44 = vsel %vm808_vm5, %v800_v38, %v816_v43  ;;  %vm809_vm6 = vcmp.ge.f32.partialorder %v801_v33, 0.0  ;;  %v818_v47 = vmul.f32 0.4, %v802_v39  ;;  %vm810_vm7 = vcmp.ge.f32.partialorder %v802_v39, 0.0 }
 0x157   : > { %v825_v46 = vsel %vm809_vm6, %v801_v33, %v817_v45  ;;  %v819_v49 = vmul.f32 0.4, %v803_v14  ;;  %vm811_vm8 = vcmp.ge.f32.partialorder %v803_v14, 0.0 }
 0x158   : > { %v826_v48 = vsel %vm810_vm7, %v802_v39, %v818_v47 }
 0x159   : > { %829 = vxpose.xlu0.b32.cont [2/8] (short) (narrow) %v821_v5, 64  ;;  %v827_v50 = vsel %vm811_vm8, %v803_v14, %v819_v49 }
 0x15d   : > { %830 = vxpose.xlu0.b32.cont [3/8] (short) (narrow) %v822_v11, 64 }
 0x161   : > { %831 = vxpose.xlu0.b32.cont [4/8] (short) (narrow) %v823_v34, 64 }
 0x165   : > { %832 = vxpose.xlu0.b32.cont [5/8] (short) (narrow) %v824_v44, 64 }
 0x169   : > { %833 = vxpose.xlu0.b32.cont [6/8] (short) (narrow) %v825_v46, 64 }
 0x16d   : > { %834 = vxpose.xlu0.b32.cont [7/8] (short) (narrow) %v826_v48, 64 }
 0x171   : > { %835 = vxpose.xlu0.b32.end [8/8] (short) (narrow) %v827_v50, 64 }
 0x1d5   : > { %v844_v51 = vpop.trf.xlu0 }
 0x1d6   : > { %860 = vst.msk [vmem:[%s143_s30] sm:$0xff] %vm729_vm0, %v844_v51 }
 0x1d9   : > { %v845_v52 = vpop.trf.xlu0 }
 0x1da   : > { %861 = vst.msk [vmem:[%s143_s30 + $0x8] sm:$0xff] %vm729_vm0, %v845_v52 }
 0x1dd   : > { %v846_v53 = vpop.trf.xlu0 }
 0x1de   : > { %862 = vst.msk [vmem:[%s143_s30 + $0x10] sm:$0xff] %vm729_vm0, %v846_v53 }
 0x1e1   : > { %v847_v54 = vpop.trf.xlu0 }
 0x1e2   : > { %863 = vst.msk [vmem:[%s143_s30 + $0x18] sm:$0xff] %vm729_vm0, %v847_v54 }
 0x1e5   : > { %v848_v55 = vpop.trf.xlu0 }
 0x1e6   : > { %864 = vst.msk [vmem:[%s143_s30 + $0x20] sm:$0xff] %vm729_vm0, %v848_v55 }
 0x1e9   : > { %v849_v56 = vpop.trf.xlu0 }
 0x1ea   : > { %865 = vst.msk [vmem:[%s143_s30 + $0x28] sm:$0xff] %vm729_vm0, %v849_v56 }
 0x1ed   : > { %v850_v57 = vpop.trf.xlu0 }
 0x1ee   : > { %866 = vst.msk [vmem:[%s143_s30 + $0x30] sm:$0xff] %vm729_vm0, %v850_v57 }
 0x1f1   : > { %v851_v58 = vpop.trf.xlu0 }
 0x1f2   : > { %867 = vst.msk [vmem:[%s143_s30 + $0x38] sm:$0xff] %vm729_vm0, %v851_v58 }
 0x1f3 PF: > { %s12_s9 = sadd.s32 1, %s1248_s9  }
 0x1f4   : > { %p9_p4 = scmp.ge.s32.totalorder %s12_s9, 4  }
 0x1f6   :  { %11 = sbr.rel (!%p9_p4) target bundleno = 1 (0x1), region = 62 }

// kernel: encoder_forward.8
= control target key start
LH: loop header
LB: loop body
LE: loop exit
PB: predicated region body
PF: predicated region fallthrough
CT: control target
= control target key end

     0   :  { %s1422_s9 = smov 0   ;;  %s1689_s0 = inlined_call_operand.vmem [shape: f32[2,5,5,256], index: 0, kind: input, shape index: {}]   ;;  %s1690_s1 = inlined_call_operand.vmem [shape: bf16[4,256,128], index: 1, kind: input, shape index: {}]   ;;  %s1691_s2 = inlined_call_operand.vmem [shape: f32[2,16,128], index: 2, kind: output, shape index: {}]  }
   0x1 LB: > { %s1049_s10 = sadd.s32 4294967295, %s1405_s9   ;;  %p1053_p0 = scmp.ge.s32.totalorder %s1405_s9, 1  ;;  %s1405_s9 = sphi %s1422_s9, %s12_s9  }
   0x2   : > { %p112_p1 = scmp.lt.s32.totalorder %s1405_s9, 3 }
   0x4   : > { %p113_p2 = pnand %p1053_p0, %p112_p1 }
   0x5   : > { %v1333_v0 = vld [vmem:[%s1690_s1 + $0xc0] sm:$0xff] (!%p113_p2)   ;;  %v1337_v4 = vld [vmem:[%s1690_s1 + $0xc8] sm:$0xff] (!%p113_p2)   ;;  %v1341_v8 = vld [vmem:[%s1690_s1 + $0xd0] sm:$0xff] (!%p113_p2)   ;;  %p134_p3 = scmp.lt.s32.totalorder (!%p113_p2), %s1049_s10, 1  ;;  %vm165_vm0 = vcmask (!%p113_p2), 1043456  }
   0x6   : > { %116 = sbr.rel (%p113_p2) target bundleno = 333 (0x14d), region = 28  ;;  %v1334_v1 = vld [vmem:[%s1690_s1 + $0x40] sm:$0xff] (!%p113_p2)   ;;  %1236 = vmatprep.subr.bf16.mxu0 (!%p113_p2), %v1333_v0  ;;  %v1338_v5 = vld [vmem:[%s1690_s1 + $0x48] sm:$0xff] (!%p113_p2)   ;;  %v1342_v9 = vld [vmem:[%s1690_s1 + $0x50] sm:$0xff] (!%p113_p2)  }
   0x7   : > { %v1335_v2 = vld [vmem:[%s1690_s1 + $0x80] sm:$0xff] (!%p113_p2)   ;;  %1258 = vmatprep.subr.bf16.mxu1 (!%p113_p2), %v1334_v1  ;;  %v1339_v6 = vld [vmem:[%s1690_s1 + $0x88] sm:$0xff] (!%p113_p2)   ;;  %v1343_v10 = vld [vmem:[%s1690_s1 + $0x90] sm:$0xff] (!%p113_p2)  }
   0x8   : > { %v1336_v3 = vld [vmem:[%s1690_s1] sm:$0xff] (!%p113_p2)   ;;  %1237 = vmatpush3.bf16.msra.mxu0 (!%p113_p2), %v1335_v2  ;;  %v1340_v7 = vld [vmem:[%s1690_s1 + $0x8] sm:$0xff] (!%p113_p2)   ;;  %v1344_v11 = vld [vmem:[%s1690_s1 + $0x10] sm:$0xff] (!%p113_p2)  }
   0x9   : > { %1259 = vmatpush3.bf16.msra.mxu1 (!%p113_p2), %v1336_v3  ;;  %1238 = vmatprep.subr.bf16.mxu0 (!%p113_p2), %v1337_v4  ;;  %v1345_v12 = vld [vmem:[%s1690_s1 + $0xd8] sm:$0xff] (!%p113_p2)   ;;  %v1349_v16 = vld [vmem:[%s1690_s1 + $0xe0] sm:$0xff] (!%p113_p2)   ;;  %v1353_v20 = vld [vmem:[%s1690_s1 + $0xe8] sm:$0xff] (!%p113_p2)  }
   0xa   : > { %1260 = vmatprep.subr.bf16.mxu1 (!%p113_p2), %v1338_v5  ;;  %v1346_v13 = vld [vmem:[%s1690_s1 + $0x58] sm:$0xff] (!%p113_p2)   ;;  %v1350_v17 = vld [vmem:[%s1690_s1 + $0x60] sm:$0xff] (!%p113_p2)   ;;  %v1354_v21 = vld [vmem:[%s1690_s1 + $0x68] sm:$0xff] (!%p113_p2)  }
   0xb   : > { %v1347_v14 = vld [vmem:[%s1690_s1 + $0x98] sm:$0xff] (!%p113_p2)   ;;  %v1351_v18 = vld [vmem:[%s1690_s1 + $0xa0] sm:$0xff] (!%p113_p2)   ;;  %v1355_v22 = vld [vmem:[%s1690_s1 + $0xa8] sm:$0xff] (!%p113_p2)  }
   0xc   : > { %1239 = vmatpush3.bf16.msra.mxu0 (!%p113_p2), %v1339_v6  ;;  %v1348_v15 = vld [vmem:[%s1690_s1 + $0x18] sm:$0xff] (!%p113_p2)   ;;  %v1352_v19 = vld [vmem:[%s1690_s1 + $0x20] sm:$0xff] (!%p113_p2)   ;;  %v1356_v23 = vld [vmem:[%s1690_s1 + $0x28] sm:$0xff] (!%p113_p2)  }
   0xd   : > { %1261 = vmatpush3.bf16.msra.mxu1 %v1340_v7  ;;  %1240 = vmatprep.subr.bf16.mxu0 %v1341_v8  ;;  %s1693_s10 = smov (!%p134_p3, %s1049_s10), 1  ;;  %v1357_v24 = vld [vmem:[%s1690_s1 + $0xf0] sm:$0xff]   ;;  %v1361_v28 = vld [vmem:[%s1690_s1 + $0xf8] sm:$0xff]   ;;  %v1365_v39 = vld [vmem:[%s1690_s1 + $0x140] sm:$0xff]  }
   0xe   : > { %1262 = vmatprep.subr.bf16.mxu1 %v1342_v9  ;;  %v1358_v25 = vld [vmem:[%s1690_s1 + $0x70] sm:$0xff]   ;;  %s1324_s11 = smul.u32 80, %s1693_s10  ;;  %v1362_v29 = vld [vmem:[%s1690_s1 + $0x78] sm:$0xff]   ;;  %v1366_v43 = vld [vmem:[%s1690_s1 + $0x1c0] sm:$0xff]  }
   0xf   : > { %v1359_v26 = vld [vmem:[%s1690_s1 + $0xb0] sm:$0xff]   ;;  %v1363_v30 = vld [vmem:[%s1690_s1 + $0xb8] sm:$0xff]   ;;  %v1367_v4 = vld [vmem:[%s1690_s1 + $0x100] sm:$0xff]  }
  0x10   : > { %1241 = vmatpush3.bf16.msra.mxu0 %v1343_v10  ;;  %v1360_v27 = vld [vmem:[%s1690_s1 + $0x30] sm:$0xff]   ;;  %s1530_s22 = scalar_lea.vmem %s1689_s0, %s1324_s11  ;;  %v1364_v31 = vld [vmem:[%s1690_s1 + $0x38] sm:$0xff]   ;;  %v1368_v7 = vld [vmem:[%s1690_s1 + $0x180] sm:$0xff]  }
  0x11   : > { %1263 = vmatpush3.bf16.msra.mxu1 %v1344_v11  ;;  %1242 = vmatprep.subr.bf16.mxu0 %v1345_v12  ;;  %v205_v32 = vld [vmem:[%s1530_s22 + $0x8] sm:$0x1e]  ;;  %v207_v33 = vld [vmem:[%s1530_s22 + $0x18] sm:$0x1e]  ;;  %v204_v50 = vld [vmem:[%s1530_s22] sm:$0x1e] }
  0x12   : > { %1264 = vmatprep.subr.bf16.mxu1 %v1346_v13  ;;  %v209_v34 = vld [vmem:[%s1530_s22 + $0x28] sm:$0x1e]  ;;  %v211_v35 = vld [vmem:[%s1530_s22 + $0x38] sm:$0x1e]  ;;  %v215_v36 = vrot.slane %v205_v32, 1  ;;  %v221_v37 = vrot.slane %v207_v33, 5 }
  0x13   : > { %v227_v38 = vrot.slane %v209_v34, 1  ;;  %v233_v40 = vrot.slane %v211_v35, 5  ;;  %v146_v41 = vld [vmem:[%s1530_s22 + $0x8] sm:$0xf]  ;;  %v148_v42 = vld [vmem:[%s1530_s22 + $0x18] sm:$0xf] }
  0x14   : > { %1243 = vmatpush3.bf16.msra.mxu0 %v1347_v14  ;;  %v237_v44 = vsel %vm165_vm0, %v215_v36, %v221_v37  ;;  %v150_v45 = vld [vmem:[%s1530_s22 + $0x28] sm:$0xf]  ;;  %v152_v46 = vld [vmem:[%s1530_s22 + $0x38] sm:$0xf]  ;;  %v156_v47 = vrot.slane %v148_v42, 4  ;;  %v214_v56 = vrot.slane %v204_v50, 1 }
  0x15   : > { %1265 = vmatpush3.bf16.msra.mxu1 %v1348_v15  ;;  %1244 = vmatprep.subr.bf16.mxu0 %v1349_v16  ;;  %v239_v48 = vsel %vm165_vm0, %v227_v38, %v233_v40  ;;  %v162_v49 = vrot.slane %v152_v46, 4  ;;  %v206_v51 = vld [vmem:[%s1530_s22 + $0x10] sm:$0x1e]  ;;  %v208_v54 = vld [vmem:[%s1530_s22 + $0x20] sm:$0x1e]  ;;  %v1369_v8 = vld [vmem:[%s1690_s1 + $0x148] sm:$0xff]  }
  0x16   : > { %1266 = vmatprep.subr.bf16.mxu1 %v1350_v17  ;;  %v241_v52 = vpack.c.bf16 %v239_v48, %v237_v44  ;;  %v167_v53 = vsel %vm165_vm0, %v146_v41, %v156_v47  ;;  %v210_v55 = vld [vmem:[%s1530_s22 + $0x30] sm:$0x1e]  ;;  %v220_v57 = vrot.slane %v206_v51, 5  ;;  %v226_v59 = vrot.slane %v208_v54, 1  ;;  %v145_v61 = vld [vmem:[%s1530_s22] sm:$0xf] }
  0x17   : > { %v169_v58 = vsel %vm165_vm0, %v150_v45, %v162_v49  ;;  %v232_v60 = vrot.slane %v210_v55, 5  ;;  %v147_v62 = vld [vmem:[%s1530_s22 + $0x10] sm:$0xf]  ;;  %v149_v1 = vld [vmem:[%s1530_s22 + $0x20] sm:$0xf]  ;;  %v1370_v11 = vld [vmem:[%s1690_s1 + $0x1c8] sm:$0xff]  }
  0x18   : > { %1245 = vmatpush3.bf16.msra.mxu0 %v1351_v18  ;;  %403 = vmatprep.mubr.bf16.mxu0 %v241_v52  ;;  %v171_v63 = vpack.c.bf16 %v169_v58, %v167_v53  ;;  %v236_v0 = vsel %vm165_vm0, %v214_v56, %v220_v57  ;;  %v151_v2 = vld [vmem:[%s1530_s22 + $0x30] sm:$0xf]  ;;  %v155_v3 = vrot.slane %v147_v62, 4  ;;  %v1371_v14 = vld [vmem:[%s1690_s1 + $0x108] sm:$0xff]   ;;  %v1393_v36 = vld [vmem:[%s1690_s1 + $0x178] sm:$0xff]  }
  0x19   : > { %1267 = vmatpush3.bf16.msra.mxu1 %v1352_v19  ;;  %1246 = vmatprep.subr.bf16.mxu0 %v1353_v20  ;;  %v238_v5 = vsel %vm165_vm0, %v226_v59, %v232_v60  ;;  %v161_v6 = vrot.slane %v151_v2, 4  ;;  %v1372_v15 = vld [vmem:[%s1690_s1 + $0x188] sm:$0xff]   ;;  %v1373_v16 = vld [vmem:[%s1690_s1 + $0x150] sm:$0xff]   ;;  %v1377_v20 = vld [vmem:[%s1690_s1 + $0x158] sm:$0xff]  }
  0x1a   : > { %1268 = vmatprep.subr.bf16.mxu1 %v1354_v21  ;;  %540 = vmatprep.mubr.bf16.mxu1 %v171_v63  ;;  %v240_v9 = vpack.c.bf16 %v238_v5, %v236_v0  ;;  %v166_v10 = vsel %vm165_vm0, %v145_v61, %v155_v3  ;;  %v1374_v17 = vld [vmem:[%s1690_s1 + $0x1d0] sm:$0xff]   ;;  %v1378_v21 = vld [vmem:[%s1690_s1 + $0x1d8] sm:$0xff]   ;;  %v1124_v41 = vld [vmem:[%s1530_s22 + $0x28] sm:$0xf] }
  0x1b   : > { %v168_v12 = vsel %vm165_vm0, %v149_v1, %v161_v6  ;;  %v1375_v18 = vld [vmem:[%s1690_s1 + $0x110] sm:$0xff]   ;;  %v1394_v37 = vld [vmem:[%s1690_s1 + $0x1f8] sm:$0xff]   ;;  %v561_v44 = vrot.slane %v1124_v41, 4  ;;  %v1180_v47 = vld [vmem:[%s1530_s22 + $0x28] sm:$0x1e] }
  0x1c   : > { %1247 = vmatpush3.bf16.msra.mxu0 %v1355_v22  ;;  %v170_v13 = vpack.c.bf16 %v168_v12, %v166_v10  ;;  %v1376_v19 = vld [vmem:[%s1690_s1 + $0x190] sm:$0xff]   ;;  %v1379_v22 = vld [vmem:[%s1690_s1 + $0x118] sm:$0xff]   ;;  %v1184_v50 = vld [vmem:[%s1530_s22 + $0x48] sm:$0x1e]  ;;  %v765_v52 = vrot.slane %v1180_v47, 5 }
  0x1d   : > { %1269 = vmatpush3.bf16.msra.mxu1 %v1356_v23  ;;  %1248 = vmatprep.subr.bf16.mxu0 %v1357_v24  ;;  %v1380_v23 = vld [vmem:[%s1690_s1 + $0x198] sm:$0xff]   ;;  %v1381_v24 = vld [vmem:[%s1690_s1 + $0x160] sm:$0xff]   ;;  %v1389_v32 = vld [vmem:[%s1690_s1 + $0x170] sm:$0xff]   ;;  %v777_v55 = vrot.slane %v1184_v50, 5 }
  0x1e   : > { %1270 = vmatprep.subr.bf16.mxu1 %v1358_v25  ;;  %v1382_v25 = vld [vmem:[%s1690_s1 + $0x1e0] sm:$0xff]   ;;  %v1390_v33 = vld [vmem:[%s1690_s1 + $0x1f0] sm:$0xff]   ;;  %v1395_v38 = vld [vmem:[%s1690_s1 + $0x138] sm:$0xff]  }
  0x1f   : > { %v1391_v34 = vld [vmem:[%s1690_s1 + $0x130] sm:$0xff]   ;;  %v1122_v40 = vld [vmem:[%s1530_s22 + $0x18] sm:$0xf]  ;;  %v1123_v57 = vld [vmem:[%s1530_s22 + $0x20] sm:$0xf] }
  0x20   : > { %1249 = vmatpush3.bf16.msra.mxu0 %v1359_v26  ;;  %v1383_v26 = vld [vmem:[%s1690_s1 + $0x120] sm:$0xff]   ;;  %v1392_v35 = vld [vmem:[%s1690_s1 + $0x1b0] sm:$0xff]   ;;  %v1126_v42 = vld [vmem:[%s1530_s22 + $0x38] sm:$0xf]  ;;  %v571_v48 = vsel %vm165_vm0, %v1122_v40, %v561_v44  ;;  %v560_v62 = vrot.slane %v1123_v57, 4 }
  0x21   : > { %1271 = vmatpush3.bf16.msra.mxu1 %v1360_v27  ;;  %1250 = vmatprep.subr.bf16.mxu0 %v1361_v28  ;;  %v1384_v27 = vld [vmem:[%s1690_s1 + $0x1a0] sm:$0xff]   ;;  %v1385_v28 = vld [vmem:[%s1690_s1 + $0x168] sm:$0xff]   ;;  %v1178_v46 = vld [vmem:[%s1530_s22 + $0x18] sm:$0x1e] }
  0x22   : > { %1272 = vmatprep.subr.bf16.mxu1 %v1362_v29  ;;  %v1386_v29 = vld [vmem:[%s1690_s1 + $0x1e8] sm:$0xff]   ;;  %v1182_v49 = vld [vmem:[%s1530_s22 + $0x38] sm:$0x1e]  ;;  %v759_v51 = vrot.slane %v1178_v46, 1  ;;  %v1121_v56 = vld [vmem:[%s1530_s22 + $0x10] sm:$0xf] }
  0x23   : > { %v771_v54 = vrot.slane %v1182_v49, 1  ;;  %v1125_v60 = vld [vmem:[%s1530_s22 + $0x30] sm:$0xf]  ;;  %v1127_v61 = vld [vmem:[%s1530_s22 + $0x40] sm:$0xf] }
  0x24   : > { %1251 = vmatpush3.bf16.msra.mxu0 %v1363_v30  ;;  %v1387_v30 = vld [vmem:[%s1690_s1 + $0x128] sm:$0xff]   ;;  %v781_v59 = vsel %vm165_vm0, %v759_v51, %v765_v52  ;;  %v566_v0 = vrot.slane %v1127_v61, 4  ;;  %v1177_v1 = vld [vmem:[%s1530_s22 + $0x10] sm:$0x1e]  ;;  %v1179_v2 = vld [vmem:[%s1530_s22 + $0x20] sm:$0x1e] }
  0x25   : > { %1273 = vmatpush3.bf16.msra.mxu1 %v1364_v31  ;;  %1280 = vmatprep.subr.bf16.mxu0 %v1365_v39  ;;  %v1388_v31 = vld [vmem:[%s1690_s1 + $0x1a8] sm:$0xff]   ;;  %v1396_v39 = vld [vmem:[%s1690_s1 + $0x1b8] sm:$0xff]   ;;  %v783_v63 = vsel %vm165_vm0, %v771_v54, %v777_v55  ;;  %v1181_v5 = vld [vmem:[%s1530_s22 + $0x30] sm:$0x1e] }
  0x26   : > { %1302 = vmatprep.subr.bf16.mxu1 %v1366_v43  ;;  %v1128_v43 = vld [vmem:[%s1530_s22 + $0x48] sm:$0xf]  ;;  %v785_v3 = vpack.c.bf16 %v783_v63, %v781_v59  ;;  %v1183_v6 = vld [vmem:[%s1530_s22 + $0x40] sm:$0x1e]  ;;  %v770_v10 = vrot.slane %v1181_v5, 1  ;;  %s1235_s22 = sshll.u32 %s1693_s10, 4 }
  0x27   : > { %404 = vmatmul.mubr.bf16.vlgmr.msra.gmra.mrb[0].mxu0 %v240_v9  ;;  %v567_v45 = vrot.slane %v1128_v43, 4  ;;  %v572_v9 = vsel %vm165_vm0, %v1125_v60, %v566_v0  ;;  %s143_s17 = scalar_lea.vmem %s1691_s2, %s1235_s22 }
  0x28   : > { %1281 = vmatpush3.bf16.msra.mxu0 %v1367_v4  ;;  %541 = vmatmul.mubr.bf16.vlgmr.msra.gmra.mrb[0].mxu1 %v170_v13  ;;  %v570_v4 = vsel %vm165_vm0, %v1121_v56, %v560_v62 }
  0x29   : > { %1282 = vmatprep.subr.bf16.mxu0 %v1369_v8  ;;  %1303 = vmatpush3.bf16.msra.mxu1 %v1368_v7  ;;  %v573_v53 = vsel %vm165_vm0, %v1126_v42, %v567_v45  ;;  %v758_v7 = vrot.slane %v1177_v1, 1  ;;  %v764_v8 = vrot.slane %v1179_v2, 5  ;;  %v574_v12 = vpack.c.bf16 %v572_v9, %v570_v4 }
  0x2a   : > { %1304 = vmatprep.subr.bf16.mxu1 %v1370_v11  ;;  %v575_v58 = vpack.c.bf16 %v573_v53, %v571_v48  ;;  %v776_v11 = vrot.slane %v1183_v6, 5  ;;  %947 = vmatprep.mubr.bf16.mxu1 %v785_v3 }
  0x2b   : > { %v780_v13 = vsel %vm165_vm0, %v758_v7, %v764_v8 }
  0x2c   : > { %1283 = vmatpush3.bf16.msra.mxu0 %v1371_v14  ;;  %737 = vmatprep.mubr.bf16.mxu0 %v575_v58  ;;  %v782_v14 = vsel %vm165_vm0, %v770_v10, %v776_v11 }
  0x2d   : > { %1284 = vmatprep.subr.bf16.mxu0 %v1373_v16  ;;  %1305 = vmatpush3.bf16.msra.mxu1 %v1372_v15  ;;  %v784_v15 = vpack.c.bf16 %v782_v14, %v780_v13 }
  0x2e   : > { %1306 = vmatprep.subr.bf16.mxu1 %v1374_v17 }
  0x30   : > { %1285 = vmatpush3.bf16.msra.mxu0 %v1375_v18 }
  0x31   : > { %1286 = vmatprep.subr.bf16.mxu0 %v1377_v20  ;;  %1307 = vmatpush3.bf16.msra.mxu1 %v1376_v19 }
  0x32   : > { %1308 = vmatprep.subr.bf16.mxu1 %v1378_v21 }
  0x34   : > { %1287 = vmatpush3.bf16.msra.mxu0 %v1379_v22 }
  0x35   : > { %1288 = vmatprep.subr.bf16.mxu0 %v1381_v24  ;;  %1309 = vmatpush3.bf16.msra.mxu1 %v1380_v23 }
  0x36   : > { %1310 = vmatprep.subr.bf16.mxu1 %v1382_v25 }
  0x38   : > { %1289 = vmatpush3.bf16.msra.mxu0 %v1383_v26 }
  0x39   : > { %1290 = vmatprep.subr.bf16.mxu0 %v1385_v28  ;;  %1311 = vmatpush3.bf16.msra.mxu1 %v1384_v27 }
  0x3a   : > { %1312 = vmatprep.subr.bf16.mxu1 %v1386_v29 }
  0x3c   : > { %1291 = vmatpush3.bf16.msra.mxu0 %v1387_v30 }
  0x3d   : > { %1292 = vmatprep.subr.bf16.mxu0 %v1389_v32  ;;  %1313 = vmatpush3.bf16.msra.mxu1 %v1388_v31 }
  0x3e   : > { %1314 = vmatprep.subr.bf16.mxu1 %v1390_v33 }
  0x40   : > { %1293 = vmatpush3.bf16.msra.mxu0 %v1391_v34 }
  0x41   : > { %1294 = vmatprep.subr.bf16.mxu0 %v1393_v36  ;;  %1315 = vmatpush3.bf16.msra.mxu1 %v1392_v35 }
  0x42   : > { %1316 = vmatprep.subr.bf16.mxu1 %v1394_v37 }
  0x44   : > { %1295 = vmatpush3.bf16.msra.mxu0 %v1395_v38 }
  0x45   : > { %1317 = vmatpush3.bf16.msra.mxu1 %v1396_v39 }
  0x47   : > { %738 = vmatmul.mubr.bf16.vlgmr.msra.gmra.mrb[4].mxu0 %v574_v12 }
  0x48   : > { %948 = vmatmul.mubr.bf16.vlgmr.msra.gmra.mrb[4].mxu1 %v784_v15 }
  0xfa   : > { %v1252_v16 = vpop.f32.mrb[0].mxu0 }
  0xfb   : > { %v1253_v17 = vpop.f32.mrb[1].mxu0  ;;  %v1274_v18 = vpop.f32.mrb[0].mxu1 }
  0xfc   : > { %v1254_v19 = vadd.f32 %v1253_v17, %v1252_v16  ;;  %v1255_v20 = vpop.f32.mrb[2].mxu0  ;;  %v1275_v21 = vpop.f32.mrb[1].mxu1 }
  0xfd   : > { %v1256_v22 = vpop.f32.mrb[3].mxu0  ;;  %v1276_v23 = vadd.f32 %v1275_v21, %v1274_v18  ;;  %v1277_v24 = vpop.f32.mrb[2].mxu1 }
  0xfe   : > { %v1257_v25 = vadd.f32 %v1256_v22, %v1255_v20  ;;  %v1278_v26 = vpop.f32.mrb[3].mxu1 }
  0xff   : > { %v543_v27 = vadd.f32 %v1276_v23, %v1254_v19  ;;  %v1279_v28 = vadd.f32 %v1278_v26, %v1277_v24 }
 0x101   : > { %v546_v29 = vadd.f32 %v1279_v28, %v1257_v25 }
 0x11a   : > { %v1296_v30 = vpop.f32.mrb[4].mxu0 }
 0x11b   : > { %v1297_v31 = vpop.f32.mrb[5].mxu0  ;;  %v1318_v32 = vpop.f32.mrb[4].mxu1 }
 0x11c   : > { %v1298_v33 = vadd.f32 %v1297_v31, %v1296_v30  ;;  %v1299_v34 = vpop.f32.mrb[6].mxu0  ;;  %v1319_v35 = vpop.f32.mrb[5].mxu1 }
 0x11d   : > { %v1300_v36 = vpop.f32.mrb[7].mxu0  ;;  %v1320_v38 = vadd.f32 %v1319_v35, %v1318_v32  ;;  %v1321_v39 = vpop.f32.mrb[6].mxu1 }
 0x11e   : > { %v746_v37 = vadd.f32 %v1298_v33, %v543_v27  ;;  %v1301_v40 = vadd.f32 %v1300_v36, %v1299_v34  ;;  %v1322_v41 = vpop.f32.mrb[7].mxu1 }
 0x11f   : > { %v1323_v44 = vadd.f32 %v1322_v41, %v1321_v39 }
 0x120   : > { %v956_v42 = vadd.f32 %v1320_v38, %v746_v37  ;;  %v747_v43 = vadd.f32 %v1301_v40, %v546_v29 }
 0x122   : > { %v957_v45 = vadd.f32 %v1323_v44, %v747_v43  ;;  %v967_v46 = vmul.f32 %v956_v42, %v956_v42 }
 0x124   : > { %v958_v47 = vadd.f32 %v957_v45, %v956_v42  ;;  %v968_v48 = vmul.f32 %v957_v45, %v957_v45 }
 0x126   : > { %v959_v49 = vrot.slane %v958_v47, 4  ;;  %v969_v50 = vadd.f32 %v968_v48, %v967_v46 }
 0x128   : > { %v960_v51 = vadd.f32 %v959_v49, %v958_v47  ;;  %v970_v52 = vrot.slane %v969_v50, 4 }
 0x12a   : > { %v961_v53 = vrot.slane %v960_v51, 2  ;;  %v971_v54 = vadd.f32 %v970_v52, %v969_v50 }
 0x12c   : > { %v962_v55 = vadd.f32 %v961_v53, %v960_v51  ;;  %v972_v56 = vrot.slane %v971_v54, 2 }
 0x12e   : > { %v963_v57 = vrot.slane %v962_v55, 1  ;;  %v973_v58 = vadd.f32 %v972_v56, %v971_v54 }
 0x130   : > { %v964_v59 = vadd.f32 %v963_v57, %v962_v55  ;;  %v974_v60 = vrot.slane %v973_v58, 1 }
 0x132   : > { %v966_v61 = vmul.f32 0.0625, %v964_v59  ;;  %v975_v62 = vadd.f32 %v974_v60, %v973_v58 }
 0x134   : > { %v976_v63 = vmul.f32 0.0625, %v975_v62  ;;  %v977_v0 = vmul.f32 %v966_v61, %v966_v61 }
 0x136   : > { %v978_v1 = vsub.f32 %v976_v63, %v977_v0 }
 0x138   : > { %v979_v2 = vadd.f32 1e-05, %v978_v1 }
 0x13a   : > { %1397 = vrsqrt.f32 %v979_v2 }
 0x144   : > { %v1398_v3 = vpop.eup %1397 }
 0x145   : > { %v981_v4 = vmul.f32 %v1398_v3, %v956_v42  ;;  %v982_v5 = vmul.f32 %v1398_v3, %v957_v45  ;;  %v983_v6 = vmul.f32 %v1398_v3, %v966_v61 }
 0x147   : > { %v984_v7 = vsub.f32 %v981_v4, %v983_v6  ;;  %v985_v8 = vsub.f32 %v982_v5, %v983_v6 }
 0x149   : > { %vm986_vm1 = vcmp.ge.f32.partialorder %v984_v7, 0.0  ;;  %vm987_vm2 = vcmp.ge.f32.partialorder %v985_v8, 0.0  ;;  %v988_v9 = vmul.f32 0.4, %v984_v7  ;;  %v989_v10 = vmul.f32 0.4, %v985_v8 }
 0x14b   : > { %v990_v11 = vsel %vm986_vm1, %v984_v7, %v988_v9  ;;  %v991_v12 = vsel %vm987_vm2, %v985_v8, %v989_v10 }
 0x14c   : > { %992 = vst [vmem:[%s143_s17] sm:$0xff] %v990_v11  ;;  %993 = vst [vmem:[%s143_s17 + $0x8] sm:$0xff] %v991_v12 }
 0x14d PF: > { %s12_s9 = sadd.s32 1, %s1405_s9  }
 0x14e   : > { %p9_p4 = scmp.ge.s32.totalorder %s12_s9, 4  }
 0x150   :  { %11 = sbr.rel (!%p9_p4) target bundleno = 1 (0x1), region = 62 }

// kernel: encoder_forward.9
= control target key start
LH: loop header
LB: loop body
LE: loop exit
PB: predicated region body
PF: predicated region fallthrough
CT: control target
= control target key end

     0   :  { %s3194_s9 = smov 0   ;;  %s4085_s0 = inlined_call_operand.vmem [shape: f32[2,3,3,512], index: 0, kind: input, shape index: {}]   ;;  %s4086_s1 = inlined_call_operand.vmem [shape: bf16[4,512,256], index: 1, kind: input, shape index: {}]   ;;  %s4087_s2 = inlined_call_operand.vmem [shape: f32[2,4,256], index: 2, kind: output, shape index: {}]  }
   0x1 LB: > { %s2265_s10 = sadd.s32 4294967295, %s3177_s9   ;;  %p2269_p0 = scmp.ge.s32.totalorder %s3177_s9, 1  ;;  %s3177_s9 = sphi %s3194_s9, %s12_s9  }
   0x2   : > { %p112_p1 = scmp.lt.s32.totalorder %s3177_s9, 3 }
   0x4   : > { %p113_p2 = pnand %p2269_p0, %p112_p1 }
   0x5   : > { %v2767_v0 = vld [vmem:[%s4086_s1 + $0x204] ss:$8 sps:$4 sm:$0xff] (!%p113_p2)   ;;  %v2771_v2 = vld [vmem:[%s4086_s1 + $0x200] ss:$8 sps:$4 sm:$0xff] (!%p113_p2)   ;;  %v2773_v4 = vld [vmem:[%s4086_s1 + $0x214] ss:$8 sps:$4 sm:$0xff] (!%p113_p2)  }
   0x6   : > { %116 = sbr.rel (%p113_p2) target bundleno = 520 (0x208), region = 28  ;;  %v2769_v1 = vld [vmem:[%s4086_s1 + $0x404] ss:$8 sps:$4 sm:$0xff] (!%p113_p2)   ;;  %660 = vmatprep.subr.bf16.mxu1 (!%p113_p2), %v2767_v0  ;;  %v2772_v3 = vld [vmem:[%s4086_s1 + $0x400] ss:$8 sps:$4 sm:$0xff] (!%p113_p2)   ;;  %p134_p3 = scmp.lt.s32.totalorder (!%p113_p2), %s2265_s10, 1 }
   0x7   : > { %1560 = vmatprep.subr.bf16.mxu0 (!%p113_p2), %v2769_v1  ;;  %661 = vmatpush1.bf16.msra.mxu1 (!%p113_p2), %v2771_v2  ;;  %v2775_v5 = vld [vmem:[%s4086_s1 + $0x414] ss:$8 sps:$4 sm:$0xff] (!%p113_p2)   ;;  %v2777_v6 = vld [vmem:[%s4086_s1 + $0x210] ss:$8 sps:$4 sm:$0xff] (!%p113_p2)   ;;  %v2779_v8 = vld [vmem:[%s4086_s1 + $0x224] ss:$8 sps:$4 sm:$0xff] (!%p113_p2)  }
   0x8   : > { %1561 = vmatpush1.bf16.msra.mxu0 (!%p113_p2), %v2772_v3  ;;  %662 = vmatprep.subr.bf16.mxu1 (!%p113_p2), %v2773_v4  ;;  %v2778_v7 = vld [vmem:[%s4086_s1 + $0x410] ss:$8 sps:$4 sm:$0xff] (!%p113_p2)   ;;  %v2781_v9 = vld [vmem:[%s4086_s1 + $0x424] ss:$8 sps:$4 sm:$0xff] (!%p113_p2)   ;;  %v2783_v10 = vld [vmem:[%s4086_s1 + $0x220] ss:$8 sps:$4 sm:$0xff] (!%p113_p2)  }
   0x9   : > { %1562 = vmatprep.subr.bf16.mxu0 (!%p113_p2), %v2775_v5  ;;  %v2784_v11 = vld [vmem:[%s4086_s1 + $0x420] ss:$8 sps:$4 sm:$0xff] (!%p113_p2)   ;;  %v2785_v12 = vld [vmem:[%s4086_s1 + $0x234] ss:$8 sps:$4 sm:$0xff] (!%p113_p2)   ;;  %v2789_v14 = vld [vmem:[%s4086_s1 + $0x230] ss:$8 sps:$4 sm:$0xff] (!%p113_p2)  }
   0xa   : > { %v2787_v13 = vld [vmem:[%s4086_s1 + $0x434] ss:$8 sps:$4 sm:$0xff] (!%p113_p2)   ;;  %v2790_v15 = vld [vmem:[%s4086_s1 + $0x430] ss:$8 sps:$4 sm:$0xff] (!%p113_p2)   ;;  %v2791_v16 = vld [vmem:[%s4086_s1 + $0x244] ss:$8 sps:$4 sm:$0xff] (!%p113_p2)  }
   0xb   : > { %663 = vmatpush1.bf16.msra.mxu1 (!%p113_p2), %v2777_v6  ;;  %v2793_v17 = vld [vmem:[%s4086_s1 + $0x444] ss:$8 sps:$4 sm:$0xff] (!%p113_p2)   ;;  %v2795_v18 = vld [vmem:[%s4086_s1 + $0x240] ss:$8 sps:$4 sm:$0xff] (!%p113_p2)   ;;  %v2797_v20 = vld [vmem:[%s4086_s1 + $0x254] ss:$8 sps:$4 sm:$0xff] (!%p113_p2)  }
   0xc   : > { %1563 = vmatpush1.bf16.msra.mxu0 (!%p113_p2), %v2778_v7  ;;  %664 = vmatprep.subr.bf16.mxu1 (!%p113_p2), %v2779_v8  ;;  %v2796_v19 = vld [vmem:[%s4086_s1 + $0x440] ss:$8 sps:$4 sm:$0xff] (!%p113_p2)   ;;  %v2799_v21 = vld [vmem:[%s4086_s1 + $0x454] ss:$8 sps:$4 sm:$0xff] (!%p113_p2)   ;;  %v2801_v22 = vld [vmem:[%s4086_s1 + $0x250] ss:$8 sps:$4 sm:$0xff] (!%p113_p2)  }
   0xd   : > { %1564 = vmatprep.subr.bf16.mxu0 %v2781_v9  ;;  %v2802_v23 = vld [vmem:[%s4086_s1 + $0x450] ss:$8 sps:$4 sm:$0xff]   ;;  %v2803_v24 = vld [vmem:[%s4086_s1 + $0x264] ss:$8 sps:$4 sm:$0xff]   ;;  %v2807_v26 = vld [vmem:[%s4086_s1 + $0x260] ss:$8 sps:$4 sm:$0xff]  }
   0xe   : > { %v2805_v25 = vld [vmem:[%s4086_s1 + $0x464] ss:$8 sps:$4 sm:$0xff]   ;;  %v2808_v27 = vld [vmem:[%s4086_s1 + $0x460] ss:$8 sps:$4 sm:$0xff]   ;;  %v2809_v28 = vld [vmem:[%s4086_s1 + $0x274] ss:$8 sps:$4 sm:$0xff]  }
   0xf   : > { %665 = vmatpush1.bf16.msra.mxu1 %v2783_v10  ;;  %v2811_v29 = vld [vmem:[%s4086_s1 + $0x474] ss:$8 sps:$4 sm:$0xff]   ;;  %v2813_v30 = vld [vmem:[%s4086_s1 + $0x270] ss:$8 sps:$4 sm:$0xff]   ;;  %v2815_v32 = vld [vmem:[%s4086_s1 + $0x284] ss:$8 sps:$4 sm:$0xff]  }
  0x10   : > { %1565 = vmatpush1.bf16.msra.mxu0 %v2784_v11  ;;  %666 = vmatprep.subr.bf16.mxu1 %v2785_v12  ;;  %v2814_v31 = vld [vmem:[%s4086_s1 + $0x470] ss:$8 sps:$4 sm:$0xff]   ;;  %v2817_v33 = vld [vmem:[%s4086_s1 + $0x484] ss:$8 sps:$4 sm:$0xff]   ;;  %v2819_v34 = vld [vmem:[%s4086_s1 + $0x280] ss:$8 sps:$4 sm:$0xff]  }
  0x11   : > { %1566 = vmatprep.subr.bf16.mxu0 %v2787_v13  ;;  %v2820_v35 = vld [vmem:[%s4086_s1 + $0x480] ss:$8 sps:$4 sm:$0xff]   ;;  %s4089_s10 = smov (!%p134_p3, %s2265_s10), 1  ;;  %v2821_v36 = vld [vmem:[%s4086_s1 + $0x294] ss:$8 sps:$4 sm:$0xff]   ;;  %vm166_vm0 = vcmask 1041408  }
  0x12   : > { %v2823_v37 = vld [vmem:[%s4086_s1 + $0x494] ss:$8 sps:$4 sm:$0xff]   ;;  %v2825_v38 = vld [vmem:[%s4086_s1 + $0x290] ss:$8 sps:$4 sm:$0xff]   ;;  %s2758_s11 = smul.u32 48, %s4089_s10  ;;  %vm2149_vm1 = vcmask 1043456  }
  0x13   : > { %667 = vmatpush1.bf16.msra.mxu1 %v2789_v14  ;;  %v2826_v39 = vld [vmem:[%s4086_s1 + $0x490] ss:$8 sps:$4 sm:$0xff]   ;;  %v2827_v40 = vld [vmem:[%s4086_s1 + $0x2a4] ss:$8 sps:$4 sm:$0xff]   ;;  %v2831_v42 = vld [vmem:[%s4086_s1 + $0x2a0] ss:$8 sps:$4 sm:$0xff]  }
  0x14   : > { %1567 = vmatpush1.bf16.msra.mxu0 %v2790_v15  ;;  %668 = vmatprep.subr.bf16.mxu1 %v2791_v16  ;;  %v2829_v41 = vld [vmem:[%s4086_s1 + $0x4a4] ss:$8 sps:$4 sm:$0xff]   ;;  %v2832_v43 = vld [vmem:[%s4086_s1 + $0x4a0] ss:$8 sps:$4 sm:$0xff]   ;;  %s3344_s24 = scalar_lea.vmem %s4085_s0, %s2758_s11  ;;  %v2833_v44 = vld [vmem:[%s4086_s1 + $0x2b4] ss:$8 sps:$4 sm:$0xff]  }
  0x15   : > { %1568 = vmatprep.subr.bf16.mxu0 %v2793_v17  ;;  %v2835_v45 = vld [vmem:[%s4086_s1 + $0x4b4] ss:$8 sps:$4 sm:$0xff]   ;;  %v2837_v46 = vld [vmem:[%s4086_s1 + $0x2b0] ss:$8 sps:$4 sm:$0xff]   ;;  %v239_v48 = vld [vmem:[%s3344_s24] sm:$0x66] }
  0x16   : > { %v2838_v47 = vld [vmem:[%s4086_s1 + $0x4b0] ss:$8 sps:$4 sm:$0xff]   ;;  %v245_v50 = vcombine.high %v239_v48, %v239_v48  ;;  %v2839_v51 = vld [vmem:[%s4086_s1 + $0x2c4] ss:$8 sps:$4 sm:$0xff]   ;;  %v2843_v60 = vld [vmem:[%s4086_s1 + $0x2c0] ss:$8 sps:$4 sm:$0xff]  }
  0x17   : > { %669 = vmatpush1.bf16.msra.mxu1 %v2795_v18  ;;  %v241_v49 = vld [vmem:[%s3344_s24 + $0x10] sm:$0x66]  ;;  %v2841_v52 = vld [vmem:[%s4086_s1 + $0x4c4] ss:$8 sps:$4 sm:$0xff]   ;;  %v2844_v61 = vld [vmem:[%s4086_s1 + $0x4c0] ss:$8 sps:$4 sm:$0xff]  }
  0x18   : > { %1569 = vmatpush1.bf16.msra.mxu0 %v2796_v19  ;;  %670 = vmatprep.subr.bf16.mxu1 %v2797_v20  ;;  %v257_v53 = vcombine.high %v241_v49, %v241_v49  ;;  %v248_v54 = vrot.slane %v245_v50, 1  ;;  %v2465_v55 = vld [vmem:[%s3344_s24 + $0x10] sm:$0x33]  ;;  %v2467_v56 = vld [vmem:[%s3344_s24 + $0x20] sm:$0x33]  ;;  %v247_v11 = vrot.slane %v239_v48, 1 }
  0x19   : > { %1570 = vmatprep.subr.bf16.mxu0 %v2799_v21  ;;  %v1151_v58 = vcombine.high %v2465_v55, %v2465_v55  ;;  %v1157_v59 = vcombine.high %v2467_v56, %v2467_v56  ;;  %v2845_v0 = vld [vmem:[%s4086_s1 + $0x2d4] ss:$8 sps:$4 sm:$0xff]   ;;  %v2849_v4 = vld [vmem:[%s4086_s1 + $0x2d0] ss:$8 sps:$4 sm:$0xff]   ;;  %v2851_v7 = vld [vmem:[%s4086_s1 + $0x2e4] ss:$8 sps:$4 sm:$0xff]  }
  0x1a   : > { %v260_v57 = vrot.slane %v257_v53, 7  ;;  %v2847_v1 = vld [vmem:[%s4086_s1 + $0x4d4] ss:$8 sps:$4 sm:$0xff]   ;;  %v2850_v6 = vld [vmem:[%s4086_s1 + $0x4d0] ss:$8 sps:$4 sm:$0xff]   ;;  %v259_v12 = vrot.slane %v241_v49, 7 }
  0x1b   : > { %671 = vmatpush1.bf16.msra.mxu1 %v2801_v22  ;;  %v1160_v63 = vrot.slane %v1157_v59, 6  ;;  %v2853_v8 = vld [vmem:[%s4086_s1 + $0x4e4] ss:$8 sps:$4 sm:$0xff]   ;;  %v2855_v9 = vld [vmem:[%s4086_s1 + $0x2e0] ss:$8 sps:$4 sm:$0xff]   ;;  %v1159_v13 = vrot.slane %v2467_v56, 6 }
  0x1c   : > { %1571 = vmatpush1.bf16.msra.mxu0 %v2802_v23  ;;  %672 = vmatprep.subr.bf16.mxu1 %v2803_v24  ;;  %v268_v62 = vsel %vm166_vm0, %v248_v54, %v260_v57  ;;  %v2856_v10 = vld [vmem:[%s4086_s1 + $0x4e0] ss:$8 sps:$4 sm:$0xff]   ;;  %v2857_v14 = vld [vmem:[%s4086_s1 + $0x2f4] ss:$8 sps:$4 sm:$0xff]   ;;  %v2861_v16 = vld [vmem:[%s4086_s1 + $0x2f0] ss:$8 sps:$4 sm:$0xff]   ;;  %v267_v18 = vsel %vm166_vm0, %v247_v11, %v259_v12 }
  0x1d   : > { %1572 = vmatprep.subr.bf16.mxu0 %v2805_v25  ;;  %v272_v2 = vpack.c.bf16 %v268_v62, %v268_v62  ;;  %v1168_v3 = vsel %vm166_vm0, %v1151_v58, %v1160_v63  ;;  %v2859_v15 = vld [vmem:[%s4086_s1 + $0x4f4] ss:$8 sps:$4 sm:$0xff]   ;;  %v2862_v17 = vld [vmem:[%s4086_s1 + $0x4f0] ss:$8 sps:$4 sm:$0xff]   ;;  %v1167_v19 = vsel %vm166_vm0, %v2465_v55, %v1159_v13  ;;  %v2867_v20 = vld [vmem:[%s4086_s1 + $0x304] ss:$8 sps:$4 sm:$0xff]   ;;  %v271_v23 = vpack.c.bf16 %v267_v18, %v267_v18 }
  0x1e   : > { %v1172_v5 = vpack.c.bf16 %v1168_v3, %v1168_v3  ;;  %v2872_v21 = vld [vmem:[%s4086_s1 + $0x504] ss:$8 sps:$4 sm:$0xff]   ;;  %v2865_v22 = vld [vmem:[%s4086_s1 + $0x300] ss:$8 sps:$4 sm:$0xff]   ;;  %v1171_v24 = vpack.c.bf16 %v1167_v19, %v1167_v19  ;;  %v2914_v55 = vld [vmem:[%s4086_s1 + $0x574] ss:$8 sps:$4 sm:$0xff]  }
  0x1f   : > { %673 = vmatpush1.bf16.msra.mxu1 %v2807_v26  ;;  %692 = vmatprep.mubr.bf16.mxu1 %v272_v2  ;;  %v2870_v25 = vld [vmem:[%s4086_s1 + $0x500] ss:$8 sps:$4 sm:$0xff]   ;;  %v2875_v26 = vld [vmem:[%s4086_s1 + $0x314] ss:$8 sps:$4 sm:$0xff]   ;;  %v2909_v62 = vld [vmem:[%s4086_s1 + $0x370] ss:$8 sps:$4 sm:$0xff]  }
  0x20   : > { %1573 = vmatpush1.bf16.msra.mxu0 %v2808_v27  ;;  %674 = vmatprep.subr.bf16.mxu1 %v2809_v28  ;;  %v2878_v27 = vld [vmem:[%s4086_s1 + $0x514] ss:$8 sps:$4 sm:$0xff]   ;;  %v2873_v28 = vld [vmem:[%s4086_s1 + $0x310] ss:$8 sps:$4 sm:$0xff]   ;;  %v2903_v48 = vld [vmem:[%s4086_s1 + $0x360] ss:$8 sps:$4 sm:$0xff]  }
  0x21   : > { %1574 = vmatprep.subr.bf16.mxu0 %v2811_v29  ;;  %1592 = vmatprep.mubr.bf16.mxu0 %v1172_v5  ;;  %v2876_v29 = vld [vmem:[%s4086_s1 + $0x510] ss:$8 sps:$4 sm:$0xff]   ;;  %v2906_v49 = vld [vmem:[%s4086_s1 + $0x560] ss:$8 sps:$4 sm:$0xff]   ;;  %v2917_v2 = vld [vmem:[%s4086_s1 + $0x384] ss:$8 sps:$4 sm:$0xff]  }
  0x22   : > { %v3499_v50 = vld [vmem:[%s3344_s24 + $0x8] sm:$0x66]  ;;  %v3515_v56 = vld [vmem:[%s3344_s24 + $0x18] sm:$0x33]  ;;  %s2731_s17 = sshll.u32 %s4089_s10, 3 }
  0x23   : > { %675 = vmatpush1.bf16.msra.mxu1 %v2813_v30  ;;  %v2881_v30 = vld [vmem:[%s4086_s1 + $0x324] ss:$8 sps:$4 sm:$0xff]   ;;  %v246_v53 = vcombine.high %v3499_v50, %v3499_v50  ;;  %v2912_v63 = vld [vmem:[%s4086_s1 + $0x570] ss:$8 sps:$4 sm:$0xff]   ;;  %v2938_v18 = vld [vmem:[%s4086_s1 + $0x5b4] ss:$8 sps:$4 sm:$0xff]   ;;  %s143_s20 = scalar_lea.vmem %s4087_s2, %s2731_s17 }
  0x24   : > { %1575 = vmatpush1.bf16.msra.mxu0 %v2814_v31  ;;  %676 = vmatprep.subr.bf16.mxu1 %v2815_v32  ;;  %v2884_v31 = vld [vmem:[%s4086_s1 + $0x524] ss:$8 sps:$4 sm:$0xff]   ;;  %v2879_v32 = vld [vmem:[%s4086_s1 + $0x320] ss:$8 sps:$4 sm:$0xff]   ;;  %v2921_v11 = vld [vmem:[%s4086_s1 + $0x390] ss:$8 sps:$4 sm:$0xff]  }
  0x25   : > { %1576 = vmatprep.subr.bf16.mxu0 %v2817_v33  ;;  %v2882_v33 = vld [vmem:[%s4086_s1 + $0x520] ss:$8 sps:$4 sm:$0xff]   ;;  %v250_v58 = vrot.slane %v246_v53, 1  ;;  %v2920_v3 = vld [vmem:[%s4086_s1 + $0x584] ss:$8 sps:$4 sm:$0xff]  }
  0x26   : > { %v3518_v57 = vld [vmem:[%s3344_s24 + $0x28] sm:$0x33]  ;;  %v2924_v12 = vld [vmem:[%s4086_s1 + $0x590] ss:$8 sps:$4 sm:$0xff]  }
  0x27   : > { %677 = vmatpush1.bf16.msra.mxu1 %v2819_v34  ;;  %v2887_v34 = vld [vmem:[%s4086_s1 + $0x334] ss:$8 sps:$4 sm:$0xff]   ;;  %v2929_v13 = vld [vmem:[%s4086_s1 + $0x3a4] ss:$8 sps:$4 sm:$0xff]   ;;  %v2933_v19 = vld [vmem:[%s4086_s1 + $0x3b0] ss:$8 sps:$4 sm:$0xff]  }
  0x28   : > { %1577 = vmatpush1.bf16.msra.mxu0 %v2820_v35  ;;  %678 = vmatprep.subr.bf16.mxu1 %v2821_v36  ;;  %v2890_v35 = vld [vmem:[%s4086_s1 + $0x534] ss:$8 sps:$4 sm:$0xff]   ;;  %v2885_v36 = vld [vmem:[%s4086_s1 + $0x330] ss:$8 sps:$4 sm:$0xff]  }
  0x29   : > { %1578 = vmatprep.subr.bf16.mxu0 %v2823_v37  ;;  %v2888_v37 = vld [vmem:[%s4086_s1 + $0x530] ss:$8 sps:$4 sm:$0xff]  }
  0x2a   : > { %v3662_v53 = vld [vmem:[%s3344_s24 + $0x10] sm:$0x33] }
  0x2b   : > { %679 = vmatpush1.bf16.msra.mxu1 %v2825_v38  ;;  %v2893_v38 = vld [vmem:[%s4086_s1 + $0x344] ss:$8 sps:$4 sm:$0xff]  }
  0x2c   : > { %1579 = vmatpush1.bf16.msra.mxu0 %v2826_v39  ;;  %680 = vmatprep.subr.bf16.mxu1 %v2827_v40  ;;  %v2896_v39 = vld [vmem:[%s4086_s1 + $0x544] ss:$8 sps:$4 sm:$0xff]   ;;  %v2891_v40 = vld [vmem:[%s4086_s1 + $0x340] ss:$8 sps:$4 sm:$0xff]  }
  0x2d   : > { %1580 = vmatprep.subr.bf16.mxu0 %v2829_v41  ;;  %v2894_v41 = vld [vmem:[%s4086_s1 + $0x540] ss:$8 sps:$4 sm:$0xff]  }
  0x2f   : > { %681 = vmatpush1.bf16.msra.mxu1 %v2831_v42  ;;  %v2899_v42 = vld [vmem:[%s4086_s1 + $0x354] ss:$8 sps:$4 sm:$0xff]  }
  0x30   : > { %1581 = vmatpush1.bf16.msra.mxu0 %v2832_v43  ;;  %682 = vmatprep.subr.bf16.mxu1 %v2833_v44  ;;  %v2902_v43 = vld [vmem:[%s4086_s1 + $0x554] ss:$8 sps:$4 sm:$0xff]   ;;  %v2897_v44 = vld [vmem:[%s4086_s1 + $0x350] ss:$8 sps:$4 sm:$0xff]  }
  0x31   : > { %1582 = vmatprep.subr.bf16.mxu0 %v2835_v45  ;;  %v2900_v45 = vld [vmem:[%s4086_s1 + $0x550] ss:$8 sps:$4 sm:$0xff]  }
  0x33   : > { %683 = vmatpush1.bf16.msra.mxu1 %v2837_v46  ;;  %v2905_v46 = vld [vmem:[%s4086_s1 + $0x364] ss:$8 sps:$4 sm:$0xff]  }
  0x34   : > { %1583 = vmatpush1.bf16.msra.mxu0 %v2838_v47  ;;  %684 = vmatprep.subr.bf16.mxu1 %v2839_v51  ;;  %v2908_v47 = vld [vmem:[%s4086_s1 + $0x564] ss:$8 sps:$4 sm:$0xff]   ;;  %v3502_v51 = vld [vmem:[%s3344_s24 + $0x18] sm:$0x66] }
  0x35   : > { %1584 = vmatprep.subr.bf16.mxu0 %v2841_v52  ;;  %v2911_v52 = vld [vmem:[%s4086_s1 + $0x374] ss:$8 sps:$4 sm:$0xff]   ;;  %v258_v54 = vcombine.high %v3502_v51, %v3502_v51 }
  0x37   : > { %685 = vmatpush1.bf16.msra.mxu1 %v2843_v60  ;;  %v262_v59 = vrot.slane %v258_v54, 7  ;;  %v1152_v60 = vcombine.high %v3515_v56, %v3515_v56  ;;  %v2981_v54 = vld [vmem:[%s4086_s1 + $0x24] ss:$8 sps:$4 sm:$0xff]  }
  0x38   : > { %1585 = vmatpush1.bf16.msra.mxu0 %v2844_v61  ;;  %686 = vmatprep.subr.bf16.mxu1 %v2845_v0  ;;  %v1158_v61 = vcombine.high %v3518_v57, %v3518_v57 }
  0x39   : > { %1586 = vmatprep.subr.bf16.mxu0 %v2847_v1  ;;  %v270_v0 = vsel %vm166_vm0, %v250_v58, %v262_v59  ;;  %v3675_v58 = vld [vmem:[%s3344_s24 + $0x10] sm:$0x66]  ;;  %v3678_v59 = vld [vmem:[%s3344_s24 + $0x20] sm:$0x66] }
  0x3a   : > { %v1162_v1 = vrot.slane %v1158_v61, 6  ;;  %v1650_v61 = vcombine.high %v3675_v58, %v3675_v58 }
  0x3b   : > { %687 = vmatpush1.bf16.msra.mxu1 %v2849_v4  ;;  %v274_v4 = vpack.c.bf16 %v270_v0, %v270_v0  ;;  %v2982_v0 = vld [vmem:[%s4086_s1 + $0x620] ss:$8 sps:$4 sm:$0xff]  }
  0x3c   : > { %1587 = vmatpush1.bf16.msra.mxu0 %v2850_v6  ;;  %688 = vmatprep.subr.bf16.mxu1 %v2851_v7  ;;  %v1170_v5 = vsel %vm166_vm0, %v1152_v60, %v1162_v1  ;;  %v2915_v6 = vld [vmem:[%s4086_s1 + $0x380] ss:$8 sps:$4 sm:$0xff]  }
  0x3d   : > { %1588 = vmatprep.subr.bf16.mxu0 %v2853_v8  ;;  %v1174_v7 = vpack.c.bf16 %v1170_v5, %v1170_v5  ;;  %v2918_v8 = vld [vmem:[%s4086_s1 + $0x580] ss:$8 sps:$4 sm:$0xff]   ;;  %v2990_v5 = vld [vmem:[%s4086_s1 + $0x634] ss:$8 sps:$4 sm:$0xff]  }
  0x3f   : > { %689 = vmatpush1.bf16.msra.mxu1 %v2855_v9  ;;  %v2923_v9 = vld [vmem:[%s4086_s1 + $0x394] ss:$8 sps:$4 sm:$0xff]  }
  0x40   : > { %1589 = vmatpush1.bf16.msra.mxu0 %v2856_v10  ;;  %690 = vmatprep.subr.bf16.mxu1 %v2857_v14  ;;  %v2926_v10 = vld [vmem:[%s4086_s1 + $0x594] ss:$8 sps:$4 sm:$0xff]   ;;  %v2932_v14 = vld [vmem:[%s4086_s1 + $0x5a4] ss:$8 sps:$4 sm:$0xff]  }
  0x41   : > { %1590 = vmatprep.subr.bf16.mxu0 %v2859_v15  ;;  %v2927_v15 = vld [vmem:[%s4086_s1 + $0x3a0] ss:$8 sps:$4 sm:$0xff]  }
  0x43   : > { %691 = vmatpush1.bf16.msra.mxu1 %v2861_v16  ;;  %v2930_v16 = vld [vmem:[%s4086_s1 + $0x5a0] ss:$8 sps:$4 sm:$0xff]  }
  0x44   : > { %1591 = vmatpush1.bf16.msra.mxu0 %v2862_v17  ;;  %701 = vmatprep.subr.bf16.mxu1 %v2867_v20  ;;  %v2935_v17 = vld [vmem:[%s4086_s1 + $0x3b4] ss:$8 sps:$4 sm:$0xff]   ;;  %v2936_v20 = vld [vmem:[%s4086_s1 + $0x5b0] ss:$8 sps:$4 sm:$0xff]  }
  0x45   : > { %1601 = vmatprep.subr.bf16.mxu0 %v2872_v21  ;;  %v2941_v21 = vld [vmem:[%s4086_s1 + $0x3c4] ss:$8 sps:$4 sm:$0xff]  }
  0x46   : > { %693 = vmatmul.mubr.bf16.vlgmr.msra.gmra.mrb[0].mxu1 %v271_v23  ;;  %v2939_v23 = vld [vmem:[%s4086_s1 + $0x3c0] ss:$8 sps:$4 sm:$0xff]  }
  0x47   : > { %1593 = vmatmul.mubr.bf16.vlgmr.msra.gmra.mrb[0].mxu0 %v1171_v24  ;;  %702 = vmatpush1.bf16.msra.mxu1 %v2865_v22  ;;  %v2944_v22 = vld [vmem:[%s4086_s1 + $0x5c4] ss:$8 sps:$4 sm:$0xff]   ;;  %v2942_v24 = vld [vmem:[%s4086_s1 + $0x5c0] ss:$8 sps:$4 sm:$0xff]  }
  0x48   : > { %1602 = vmatpush1.bf16.msra.mxu0 %v2870_v25  ;;  %703 = vmatprep.subr.bf16.mxu1 %v2875_v26  ;;  %v2947_v25 = vld [vmem:[%s4086_s1 + $0x3d4] ss:$8 sps:$4 sm:$0xff]  }
  0x49   : > { %1603 = vmatprep.subr.bf16.mxu0 %v2878_v27  ;;  %733 = vmatprep.mubr.bf16.mxu1 %v274_v4  ;;  %v2950_v26 = vld [vmem:[%s4086_s1 + $0x5d4] ss:$8 sps:$4 sm:$0xff]   ;;  %v2945_v27 = vld [vmem:[%s4086_s1 + $0x3d0] ss:$8 sps:$4 sm:$0xff]  }
  0x4a   : > { %1633 = vmatprep.mubr.bf16.mxu0 %v1174_v7  ;;  %v2987_v4 = vld [vmem:[%s4086_s1 + $0x34] ss:$8 sps:$4 sm:$0xff]  }
  0x4b   : > { %704 = vmatpush1.bf16.msra.mxu1 %v2873_v28  ;;  %v2948_v28 = vld [vmem:[%s4086_s1 + $0x5d0] ss:$8 sps:$4 sm:$0xff]  }
  0x4c   : > { %1604 = vmatpush1.bf16.msra.mxu0 %v2876_v29  ;;  %705 = vmatprep.subr.bf16.mxu1 %v2881_v30  ;;  %v2953_v29 = vld [vmem:[%s4086_s1 + $0x3e4] ss:$8 sps:$4 sm:$0xff]  }
  0x4d   : > { %1605 = vmatprep.subr.bf16.mxu0 %v2884_v31  ;;  %v2956_v30 = vld [vmem:[%s4086_s1 + $0x5e4] ss:$8 sps:$4 sm:$0xff]   ;;  %v2951_v31 = vld [vmem:[%s4086_s1 + $0x3e0] ss:$8 sps:$4 sm:$0xff]  }
  0x4f   : > { %706 = vmatpush1.bf16.msra.mxu1 %v2879_v32  ;;  %v2954_v32 = vld [vmem:[%s4086_s1 + $0x5e0] ss:$8 sps:$4 sm:$0xff]  }
  0x50   : > { %1606 = vmatpush1.bf16.msra.mxu0 %v2882_v33  ;;  %707 = vmatprep.subr.bf16.mxu1 %v2887_v34  ;;  %v249_v33 = vrot.slane %v3499_v50, 1  ;;  %v261_v34 = vrot.slane %v3502_v51, 7  ;;  %v2973_v50 = vld [vmem:[%s4086_s1 + $0x10] ss:$8 sps:$4 sm:$0xff]  }
  0x51   : > { %1607 = vmatprep.subr.bf16.mxu0 %v2890_v35  ;;  %v1161_v35 = vrot.slane %v3518_v57, 6  ;;  %v2976_v51 = vld [vmem:[%s4086_s1 + $0x610] ss:$8 sps:$4 sm:$0xff]   ;;  %v156_v57 = vcombine.high %v3662_v53, %v3662_v53 }
  0x53   : > { %708 = vmatpush1.bf16.msra.mxu1 %v2885_v36  ;;  %v2959_v36 = vld [vmem:[%s4086_s1 + $0x3f4] ss:$8 sps:$4 sm:$0xff]   ;;  %v159_v60 = vrot.slane %v156_v57, 6  ;;  %v3056_v57 = vld [vmem:[%s4086_s1 + $0x6e4] ss:$8 sps:$4 sm:$0xff]  }
  0x54   : > { %1608 = vmatpush1.bf16.msra.mxu0 %v2888_v37  ;;  %709 = vmatprep.subr.bf16.mxu1 %v2893_v38  ;;  %v2962_v37 = vld [vmem:[%s4086_s1 + $0x5f4] ss:$8 sps:$4 sm:$0xff]   ;;  %v2957_v38 = vld [vmem:[%s4086_s1 + $0x3f0] ss:$8 sps:$4 sm:$0xff]  }
  0x55   : > { %1609 = vmatprep.subr.bf16.mxu0 %v2896_v39  ;;  %v2960_v39 = vld [vmem:[%s4086_s1 + $0x5f0] ss:$8 sps:$4 sm:$0xff]  }
  0x57   : > { %710 = vmatpush1.bf16.msra.mxu1 %v2891_v40  ;;  %v269_v40 = vsel %vm166_vm0, %v249_v33, %v261_v34  ;;  %v3021_v33 = vld [vmem:[%s4086_s1 + $0x90] ss:$8 sps:$4 sm:$0xff]  }
  0x58   : > { %1610 = vmatpush1.bf16.msra.mxu0 %v2894_v41  ;;  %711 = vmatprep.subr.bf16.mxu1 %v2899_v42  ;;  %v1169_v41 = vsel %vm166_vm0, %v3515_v56, %v1161_v35  ;;  %v2967_v42 = vld [vmem:[%s4086_s1 + $0x4] ss:$8 sps:$4 sm:$0xff]   ;;  %v3024_v34 = vld [vmem:[%s4086_s1 + $0x690] ss:$8 sps:$4 sm:$0xff]  }
  0x59   : > { %1611 = vmatprep.subr.bf16.mxu0 %v2902_v43  ;;  %v2972_v43 = vld [vmem:[%s4086_s1 + $0x604] ss:$8 sps:$4 sm:$0xff]  }
  0x5a   : > { %v3029_v35 = vld [vmem:[%s4086_s1 + $0xa4] ss:$8 sps:$4 sm:$0xff]  }
  0x5b   : > { %712 = vmatpush1.bf16.msra.mxu1 %v2897_v44  ;;  %v2965_v44 = vld [vmem:[%s4086_s1] ss:$8 sps:$4 sm:$0xff]  }
  0x5c   : > { %1612 = vmatpush1.bf16.msra.mxu0 %v2900_v45  ;;  %713 = vmatprep.subr.bf16.mxu1 %v2905_v46  ;;  %v273_v45 = vpack.c.bf16 %v269_v40, %v269_v40  ;;  %v1173_v46 = vpack.c.bf16 %v1169_v41, %v1169_v41  ;;  %v3038_v40 = vld [vmem:[%s4086_s1 + $0x6b4] ss:$8 sps:$4 sm:$0xff]   ;;  %v3033_v41 = vld [vmem:[%s4086_s1 + $0xb0] ss:$8 sps:$4 sm:$0xff]  }
  0x5d   : > { %1613 = vmatprep.subr.bf16.mxu0 %v2908_v47  ;;  %v2970_v47 = vld [vmem:[%s4086_s1 + $0x600] ss:$8 sps:$4 sm:$0xff]  }
  0x5f   : > { %714 = vmatpush1.bf16.msra.mxu1 %v2903_v48  ;;  %v2975_v48 = vld [vmem:[%s4086_s1 + $0x14] ss:$8 sps:$4 sm:$0xff]  }
  0x60   : > { %1614 = vmatpush1.bf16.msra.mxu0 %v2906_v49  ;;  %715 = vmatprep.subr.bf16.mxu1 %v2911_v52  ;;  %v2978_v49 = vld [vmem:[%s4086_s1 + $0x614] ss:$8 sps:$4 sm:$0xff]   ;;  %v3659_v52 = vld [vmem:[%s3344_s24] sm:$0x33] }
  0x61   : > { %1615 = vmatprep.subr.bf16.mxu0 %v2914_v55  ;;  %v2984_v55 = vld [vmem:[%s4086_s1 + $0x624] ss:$8 sps:$4 sm:$0xff]   ;;  %v150_v56 = vcombine.high %v3659_v52, %v3659_v52 }
  0x63   : > { %716 = vmatpush1.bf16.msra.mxu1 %v2909_v62  ;;  %v1662_v62 = vcombine.high %v3678_v59, %v3678_v59  ;;  %v168_v1 = vsel %vm166_vm0, %v150_v56, %v159_v60  ;;  %v3053_v56 = vld [vmem:[%s4086_s1 + $0xe4] ss:$8 sps:$4 sm:$0xff]   ;;  %v3051_v60 = vld [vmem:[%s4086_s1 + $0xe0] ss:$8 sps:$4 sm:$0xff]  }
  0x64   : > { %1616 = vmatpush1.bf16.msra.mxu0 %v2912_v63  ;;  %717 = vmatprep.subr.bf16.mxu1 %v2917_v2  ;;  %v2979_v63 = vld [vmem:[%s4086_s1 + $0x20] ss:$8 sps:$4 sm:$0xff]   ;;  %v1653_v2 = vrot.slane %v1650_v61, 1 }
  0x65   : > { %1617 = vmatprep.subr.bf16.mxu0 %v2920_v3  ;;  %v1665_v3 = vrot.slane %v1662_v62, 7  ;;  %v3054_v61 = vld [vmem:[%s4086_s1 + $0x6e0] ss:$8 sps:$4 sm:$0xff]  }
  0x67   : > { %718 = vmatpush1.bf16.msra.mxu1 %v2915_v6  ;;  %v172_v6 = vpack.c.bf16 %v168_v1, %v168_v1  ;;  %v1673_v7 = vsel %vm166_vm0, %v1653_v2, %v1665_v3  ;;  %v158_v1 = vrot.slane %v3662_v53, 6  ;;  %v1652_v2 = vrot.slane %v3675_v58, 1 }
  0x68   : > { %1618 = vmatpush1.bf16.msra.mxu0 %v2918_v8  ;;  %719 = vmatprep.subr.bf16.mxu1 %v2923_v9  ;;  %v2985_v8 = vld [vmem:[%s4086_s1 + $0x30] ss:$8 sps:$4 sm:$0xff]   ;;  %v1677_v9 = vpack.c.bf16 %v1673_v7, %v1673_v7  ;;  %v1664_v3 = vrot.slane %v3678_v59, 7 }
  0x69   : > { %1619 = vmatprep.subr.bf16.mxu0 %v2926_v10  ;;  %v2988_v10 = vld [vmem:[%s4086_s1 + $0x630] ss:$8 sps:$4 sm:$0xff]  }
  0x6a   : > { %v3057_v59 = vld [vmem:[%s4086_s1 + $0xf0] ss:$8 sps:$4 sm:$0xff]  }
  0x6b   : > { %720 = vmatpush1.bf16.msra.mxu1 %v2921_v11  ;;  %v2993_v11 = vld [vmem:[%s4086_s1 + $0x44] ss:$8 sps:$4 sm:$0xff]  }
  0x6c   : > { %1620 = vmatpush1.bf16.msra.mxu0 %v2924_v12  ;;  %721 = vmatprep.subr.bf16.mxu1 %v2929_v13  ;;  %v2996_v12 = vld [vmem:[%s4086_s1 + $0x644] ss:$8 sps:$4 sm:$0xff]   ;;  %v2991_v13 = vld [vmem:[%s4086_s1 + $0x40] ss:$8 sps:$4 sm:$0xff]  }
  0x6d   : > { %1621 = vmatprep.subr.bf16.mxu0 %v2932_v14  ;;  %v2994_v14 = vld [vmem:[%s4086_s1 + $0x640] ss:$8 sps:$4 sm:$0xff]  }
  0x6f   : > { %722 = vmatpush1.bf16.msra.mxu1 %v2927_v15  ;;  %v2999_v15 = vld [vmem:[%s4086_s1 + $0x54] ss:$8 sps:$4 sm:$0xff]  }
  0x70   : > { %1622 = vmatpush1.bf16.msra.mxu0 %v2930_v16  ;;  %723 = vmatprep.subr.bf16.mxu1 %v2935_v17  ;;  %v3002_v16 = vld [vmem:[%s4086_s1 + $0x654] ss:$8 sps:$4 sm:$0xff]   ;;  %v2997_v17 = vld [vmem:[%s4086_s1 + $0x50] ss:$8 sps:$4 sm:$0xff]  }
  0x71   : > { %1623 = vmatprep.subr.bf16.mxu0 %v2938_v18  ;;  %v3000_v18 = vld [vmem:[%s4086_s1 + $0x650] ss:$8 sps:$4 sm:$0xff]  }
  0x73   : > { %724 = vmatpush1.bf16.msra.mxu1 %v2933_v19  ;;  %v3005_v19 = vld [vmem:[%s4086_s1 + $0x64] ss:$8 sps:$4 sm:$0xff]  }
  0x74   : > { %1624 = vmatpush1.bf16.msra.mxu0 %v2936_v20  ;;  %725 = vmatprep.subr.bf16.mxu1 %v2941_v21  ;;  %v3008_v20 = vld [vmem:[%s4086_s1 + $0x664] ss:$8 sps:$4 sm:$0xff]   ;;  %v3003_v21 = vld [vmem:[%s4086_s1 + $0x60] ss:$8 sps:$4 sm:$0xff]  }
  0x75   : > { %1625 = vmatprep.subr.bf16.mxu0 %v2944_v22  ;;  %v3006_v22 = vld [vmem:[%s4086_s1 + $0x660] ss:$8 sps:$4 sm:$0xff]  }
  0x77   : > { %726 = vmatpush1.bf16.msra.mxu1 %v2939_v23  ;;  %v3011_v23 = vld [vmem:[%s4086_s1 + $0x74] ss:$8 sps:$4 sm:$0xff]  }
  0x78   : > { %1626 = vmatpush1.bf16.msra.mxu0 %v2942_v24  ;;  %727 = vmatprep.subr.bf16.mxu1 %v2947_v25  ;;  %v3014_v24 = vld [vmem:[%s4086_s1 + $0x674] ss:$8 sps:$4 sm:$0xff]   ;;  %v3009_v25 = vld [vmem:[%s4086_s1 + $0x70] ss:$8 sps:$4 sm:$0xff]  }
  0x79   : > { %1627 = vmatprep.subr.bf16.mxu0 %v2950_v26  ;;  %v3012_v26 = vld [vmem:[%s4086_s1 + $0x670] ss:$8 sps:$4 sm:$0xff]  }
  0x7b   : > { %728 = vmatpush1.bf16.msra.mxu1 %v2945_v27  ;;  %v3017_v27 = vld [vmem:[%s4086_s1 + $0x84] ss:$8 sps:$4 sm:$0xff]  }
  0x7c   : > { %1628 = vmatpush1.bf16.msra.mxu0 %v2948_v28  ;;  %729 = vmatprep.subr.bf16.mxu1 %v2953_v29  ;;  %v3020_v28 = vld [vmem:[%s4086_s1 + $0x684] ss:$8 sps:$4 sm:$0xff]   ;;  %v3015_v29 = vld [vmem:[%s4086_s1 + $0x80] ss:$8 sps:$4 sm:$0xff]  }
  0x7d   : > { %1629 = vmatprep.subr.bf16.mxu0 %v2956_v30  ;;  %v3018_v30 = vld [vmem:[%s4086_s1 + $0x680] ss:$8 sps:$4 sm:$0xff]  }
  0x7f   : > { %730 = vmatpush1.bf16.msra.mxu1 %v2951_v31  ;;  %v3023_v31 = vld [vmem:[%s4086_s1 + $0x94] ss:$8 sps:$4 sm:$0xff]  }
  0x80   : > { %1630 = vmatpush1.bf16.msra.mxu0 %v2954_v32  ;;  %731 = vmatprep.subr.bf16.mxu1 %v2959_v36  ;;  %v3026_v32 = vld [vmem:[%s4086_s1 + $0x694] ss:$8 sps:$4 sm:$0xff]   ;;  %v3032_v36 = vld [vmem:[%s4086_s1 + $0x6a4] ss:$8 sps:$4 sm:$0xff]  }
  0x81   : > { %1631 = vmatprep.subr.bf16.mxu0 %v2962_v37  ;;  %v3027_v37 = vld [vmem:[%s4086_s1 + $0xa0] ss:$8 sps:$4 sm:$0xff]  }
  0x83   : > { %732 = vmatpush1.bf16.msra.mxu1 %v2957_v38  ;;  %v3030_v38 = vld [vmem:[%s4086_s1 + $0x6a0] ss:$8 sps:$4 sm:$0xff]  }
  0x84   : > { %1632 = vmatpush1.bf16.msra.mxu0 %v2960_v39  ;;  %1062 = vmatprep.subr.bf16.mxu1 %v2967_v42  ;;  %v3035_v39 = vld [vmem:[%s4086_s1 + $0xb4] ss:$8 sps:$4 sm:$0xff]   ;;  %v3036_v42 = vld [vmem:[%s4086_s1 + $0x6b0] ss:$8 sps:$4 sm:$0xff]  }
  0x85   : > { %2065 = vmatprep.subr.bf16.mxu0 %v2972_v43  ;;  %v3041_v43 = vld [vmem:[%s4086_s1 + $0xc4] ss:$8 sps:$4 sm:$0xff]  }
  0x86   : > { %734 = vmatmul.mubr.bf16.vlgmr.msra.gmra.mrb[0].mxu1 %v273_v45  ;;  %v3039_v45 = vld [vmem:[%s4086_s1 + $0xc0] ss:$8 sps:$4 sm:$0xff]  }
  0x87   : > { %1634 = vmatmul.mubr.bf16.vlgmr.msra.gmra.mrb[0].mxu0 %v1173_v46  ;;  %1063 = vmatpush1.bf16.msra.mxu1 %v2965_v44  ;;  %v3044_v44 = vld [vmem:[%s4086_s1 + $0x6c4] ss:$8 sps:$4 sm:$0xff]   ;;  %v3042_v46 = vld [vmem:[%s4086_s1 + $0x6c0] ss:$8 sps:$4 sm:$0xff]  }
  0x88   : > { %2066 = vmatpush1.bf16.msra.mxu0 %v2970_v47  ;;  %1064 = vmatprep.subr.bf16.mxu1 %v2975_v48  ;;  %v3047_v47 = vld [vmem:[%s4086_s1 + $0xd4] ss:$8 sps:$4 sm:$0xff]  }
  0x89   : > { %2067 = vmatprep.subr.bf16.mxu0 %v2978_v49  ;;  %1094 = vmatprep.mubr.bf16.mxu1 %v172_v6  ;;  %v3050_v48 = vld [vmem:[%s4086_s1 + $0x6d4] ss:$8 sps:$4 sm:$0xff]   ;;  %v3045_v49 = vld [vmem:[%s4086_s1 + $0xd0] ss:$8 sps:$4 sm:$0xff]  }
  0x8a   : > { %2097 = vmatprep.mubr.bf16.mxu0 %v1677_v9  ;;  %v3062_v6 = vld [vmem:[%s4086_s1 + $0x6f4] ss:$8 sps:$4 sm:$0xff]   ;;  %v3060_v9 = vld [vmem:[%s4086_s1 + $0x6f0] ss:$8 sps:$4 sm:$0xff]  }
  0x8b   : > { %1065 = vmatpush1.bf16.msra.mxu1 %v2973_v50  ;;  %v3048_v50 = vld [vmem:[%s4086_s1 + $0x6d0] ss:$8 sps:$4 sm:$0xff]  }
  0x8c   : > { %2068 = vmatpush1.bf16.msra.mxu0 %v2976_v51  ;;  %1066 = vmatprep.subr.bf16.mxu1 %v2981_v54  ;;  %v3825_v51 = vld [vmem:[%s3344_s24 + $0x18] sm:$0x33] }
  0x8d   : > { %2069 = vmatprep.subr.bf16.mxu0 %v2984_v55  ;;  %v3828_v54 = vld [vmem:[%s3344_s24 + $0x18] sm:$0x66]  ;;  %v3831_v55 = vld [vmem:[%s3344_s24 + $0x28] sm:$0x66]  ;;  %v157_v62 = vcombine.high %v3825_v51, %v3825_v51 }
  0x8f   : > { %1067 = vmatpush1.bf16.msra.mxu1 %v2979_v63  ;;  %v1651_v63 = vcombine.high %v3828_v54, %v3828_v54  ;;  %v161_v53 = vrot.slane %v157_v62, 6  ;;  %v3121_v62 = vld [vmem:[%s4086_s1 + $0x190] ss:$8 sps:$4 sm:$0xff]  }
  0x90   : > { %2070 = vmatpush1.bf16.msra.mxu0 %v2982_v0  ;;  %1068 = vmatprep.subr.bf16.mxu1 %v2987_v4  ;;  %v1663_v0 = vcombine.high %v3831_v55, %v3831_v55  ;;  %v3855_v4 = vld [vmem:[%s3344_s24 + $0x8] sm:$0x33] }
  0x91   : > { %2071 = vmatprep.subr.bf16.mxu0 %v2990_v5  ;;  %v3059_v5 = vld [vmem:[%s4086_s1 + $0xf4] ss:$8 sps:$4 sm:$0xff]   ;;  %v151_v7 = vcombine.high %v3855_v4, %v3855_v4 }
  0x92   : > { %v1667_v58 = vrot.slane %v1663_v0, 7  ;;  %v3129_v0 = vld [vmem:[%s4086_s1 + $0x1a4] ss:$8 sps:$4 sm:$0xff]  }
  0x93   : > { %1069 = vmatpush1.bf16.msra.mxu1 %v2985_v8  ;;  %v1655_v8 = vrot.slane %v1651_v63, 1  ;;  %v3124_v63 = vld [vmem:[%s4086_s1 + $0x790] ss:$8 sps:$4 sm:$0xff]  }
  0x94   : > { %2072 = vmatpush1.bf16.msra.mxu0 %v2988_v10  ;;  %1070 = vmatprep.subr.bf16.mxu1 %v2993_v11  ;;  %v167_v10 = vsel %vm166_vm0, %v3659_v52, %v158_v1  ;;  %v1672_v11 = vsel %vm166_vm0, %v1652_v2, %v1664_v3  ;;  %v3065_v52 = vld [vmem:[%s4086_s1 + $0x100] ss:$8 sps:$4 sm:$0xff]   ;;  %v3132_v1 = vld [vmem:[%s4086_s1 + $0x7a4] ss:$8 sps:$4 sm:$0xff]  }
  0x95   : > { %2073 = vmatprep.subr.bf16.mxu0 %v2996_v12  ;;  %v3067_v12 = vld [vmem:[%s4086_s1 + $0x104] ss:$8 sps:$4 sm:$0xff]   ;;  %v3127_v2 = vld [vmem:[%s4086_s1 + $0x1a0] ss:$8 sps:$4 sm:$0xff]  }
  0x96   : > { %v3130_v3 = vld [vmem:[%s4086_s1 + $0x7a0] ss:$8 sps:$4 sm:$0xff]  }
  0x97   : > { %1071 = vmatpush1.bf16.msra.mxu1 %v2991_v13  ;;  %v3072_v13 = vld [vmem:[%s4086_s1 + $0x704] ss:$8 sps:$4 sm:$0xff]  }
  0x98   : > { %2074 = vmatpush1.bf16.msra.mxu0 %v2994_v14  ;;  %1072 = vmatprep.subr.bf16.mxu1 %v2999_v15  ;;  %v171_v14 = vpack.c.bf16 %v167_v10, %v167_v10  ;;  %v1676_v15 = vpack.c.bf16 %v1672_v11, %v1672_v11  ;;  %v3147_v10 = vld [vmem:[%s4086_s1 + $0x1d4] ss:$8 sps:$4 sm:$0xff]  }
  0x99   : > { %2075 = vmatprep.subr.bf16.mxu0 %v3002_v16  ;;  %v170_v16 = vsel %vm166_vm0, %v151_v7, %v161_v53  ;;  %v3133_v7 = vld [vmem:[%s4086_s1 + $0x1b0] ss:$8 sps:$4 sm:$0xff]   ;;  %v3150_v11 = vld [vmem:[%s4086_s1 + $0x7d4] ss:$8 sps:$4 sm:$0xff]  }
  0x9a   : > { %v3136_v53 = vld [vmem:[%s4086_s1 + $0x7b0] ss:$8 sps:$4 sm:$0xff]  }
  0x9b   : > { %1073 = vmatpush1.bf16.msra.mxu1 %v2997_v17  ;;  %v1675_v17 = vsel %vm166_vm0, %v1655_v8, %v1667_v58  ;;  %v3141_v8 = vld [vmem:[%s4086_s1 + $0x1c4] ss:$8 sps:$4 sm:$0xff]  }
  0x9c   : > { %2076 = vmatpush1.bf16.msra.mxu0 %v3000_v18  ;;  %1074 = vmatprep.subr.bf16.mxu1 %v3005_v19  ;;  %v3070_v18 = vld [vmem:[%s4086_s1 + $0x700] ss:$8 sps:$4 sm:$0xff]   ;;  %v3075_v19 = vld [vmem:[%s4086_s1 + $0x114] ss:$8 sps:$4 sm:$0xff]   ;;  %v3144_v58 = vld [vmem:[%s4086_s1 + $0x7c4] ss:$8 sps:$4 sm:$0xff]  }
  0x9d   : > { %2077 = vmatprep.subr.bf16.mxu0 %v3008_v20  ;;  %v3078_v20 = vld [vmem:[%s4086_s1 + $0x714] ss:$8 sps:$4 sm:$0xff]  }
  0x9f   : > { %1075 = vmatpush1.bf16.msra.mxu1 %v3003_v21  ;;  %v174_v21 = vpack.c.bf16 %v170_v16, %v170_v16  ;;  %v3151_v16 = vld [vmem:[%s4086_s1 + $0x1e0] ss:$8 sps:$4 sm:$0xff]  }
  0xa0   : > { %2078 = vmatpush1.bf16.msra.mxu0 %v3006_v22  ;;  %1076 = vmatprep.subr.bf16.mxu1 %v3011_v23  ;;  %v1679_v22 = vpack.c.bf16 %v1675_v17, %v1675_v17  ;;  %v3073_v23 = vld [vmem:[%s4086_s1 + $0x110] ss:$8 sps:$4 sm:$0xff]   ;;  %v3154_v17 = vld [vmem:[%s4086_s1 + $0x7e0] ss:$8 sps:$4 sm:$0xff]  }
  0xa1   : > { %2079 = vmatprep.subr.bf16.mxu0 %v3014_v24  ;;  %v3076_v24 = vld [vmem:[%s4086_s1 + $0x710] ss:$8 sps:$4 sm:$0xff]  }
  0xa3   : > { %1077 = vmatpush1.bf16.msra.mxu1 %v3009_v25  ;;  %v3081_v25 = vld [vmem:[%s4086_s1 + $0x124] ss:$8 sps:$4 sm:$0xff]  }
  0xa4   : > { %2080 = vmatpush1.bf16.msra.mxu0 %v3012_v26  ;;  %1078 = vmatprep.subr.bf16.mxu1 %v3017_v27  ;;  %v3084_v26 = vld [vmem:[%s4086_s1 + $0x724] ss:$8 sps:$4 sm:$0xff]   ;;  %v3079_v27 = vld [vmem:[%s4086_s1 + $0x120] ss:$8 sps:$4 sm:$0xff]  }
  0xa5   : > { %2081 = vmatprep.subr.bf16.mxu0 %v3020_v28  ;;  %v3082_v28 = vld [vmem:[%s4086_s1 + $0x720] ss:$8 sps:$4 sm:$0xff]  }
  0xa7   : > { %1079 = vmatpush1.bf16.msra.mxu1 %v3015_v29  ;;  %v3087_v29 = vld [vmem:[%s4086_s1 + $0x134] ss:$8 sps:$4 sm:$0xff]  }
  0xa8   : > { %2082 = vmatpush1.bf16.msra.mxu0 %v3018_v30  ;;  %1080 = vmatprep.subr.bf16.mxu1 %v3023_v31  ;;  %v3090_v30 = vld [vmem:[%s4086_s1 + $0x734] ss:$8 sps:$4 sm:$0xff]   ;;  %v3085_v31 = vld [vmem:[%s4086_s1 + $0x130] ss:$8 sps:$4 sm:$0xff]  }
  0xa9   : > { %2083 = vmatprep.subr.bf16.mxu0 %v3026_v32  ;;  %v3088_v32 = vld [vmem:[%s4086_s1 + $0x730] ss:$8 sps:$4 sm:$0xff]  }
  0xab   : > { %1081 = vmatpush1.bf16.msra.mxu1 %v3021_v33  ;;  %v3093_v33 = vld [vmem:[%s4086_s1 + $0x144] ss:$8 sps:$4 sm:$0xff]  }
  0xac   : > { %2084 = vmatpush1.bf16.msra.mxu0 %v3024_v34  ;;  %1082 = vmatprep.subr.bf16.mxu1 %v3029_v35  ;;  %v3096_v34 = vld [vmem:[%s4086_s1 + $0x744] ss:$8 sps:$4 sm:$0xff]   ;;  %v3091_v35 = vld [vmem:[%s4086_s1 + $0x140] ss:$8 sps:$4 sm:$0xff]  }
  0xad   : > { %2085 = vmatprep.subr.bf16.mxu0 %v3032_v36  ;;  %v3094_v36 = vld [vmem:[%s4086_s1 + $0x740] ss:$8 sps:$4 sm:$0xff]  }
  0xaf   : > { %1083 = vmatpush1.bf16.msra.mxu1 %v3027_v37  ;;  %v3099_v37 = vld [vmem:[%s4086_s1 + $0x154] ss:$8 sps:$4 sm:$0xff]  }
  0xb0   : > { %2086 = vmatpush1.bf16.msra.mxu0 %v3030_v38  ;;  %1084 = vmatprep.subr.bf16.mxu1 %v3035_v39  ;;  %v3102_v38 = vld [vmem:[%s4086_s1 + $0x754] ss:$8 sps:$4 sm:$0xff]   ;;  %v3097_v39 = vld [vmem:[%s4086_s1 + $0x150] ss:$8 sps:$4 sm:$0xff]  }
  0xb1   : > { %2087 = vmatprep.subr.bf16.mxu0 %v3038_v40  ;;  %v3100_v40 = vld [vmem:[%s4086_s1 + $0x750] ss:$8 sps:$4 sm:$0xff]  }
  0xb3   : > { %1085 = vmatpush1.bf16.msra.mxu1 %v3033_v41  ;;  %v3105_v41 = vld [vmem:[%s4086_s1 + $0x164] ss:$8 sps:$4 sm:$0xff]  }
  0xb4   : > { %2088 = vmatpush1.bf16.msra.mxu0 %v3036_v42  ;;  %1086 = vmatprep.subr.bf16.mxu1 %v3041_v43  ;;  %v3108_v42 = vld [vmem:[%s4086_s1 + $0x764] ss:$8 sps:$4 sm:$0xff]   ;;  %v3103_v43 = vld [vmem:[%s4086_s1 + $0x160] ss:$8 sps:$4 sm:$0xff]  }
  0xb5   : > { %2089 = vmatprep.subr.bf16.mxu0 %v3044_v44  ;;  %v3106_v44 = vld [vmem:[%s4086_s1 + $0x760] ss:$8 sps:$4 sm:$0xff]  }
  0xb7   : > { %1087 = vmatpush1.bf16.msra.mxu1 %v3039_v45  ;;  %v3111_v45 = vld [vmem:[%s4086_s1 + $0x174] ss:$8 sps:$4 sm:$0xff]  }
  0xb8   : > { %2090 = vmatpush1.bf16.msra.mxu0 %v3042_v46  ;;  %1088 = vmatprep.subr.bf16.mxu1 %v3047_v47  ;;  %v3114_v46 = vld [vmem:[%s4086_s1 + $0x774] ss:$8 sps:$4 sm:$0xff]   ;;  %v3109_v47 = vld [vmem:[%s4086_s1 + $0x170] ss:$8 sps:$4 sm:$0xff]  }
  0xb9   : > { %2091 = vmatprep.subr.bf16.mxu0 %v3050_v48  ;;  %v3112_v48 = vld [vmem:[%s4086_s1 + $0x770] ss:$8 sps:$4 sm:$0xff]  }
  0xbb   : > { %1089 = vmatpush1.bf16.msra.mxu1 %v3045_v49  ;;  %v3117_v49 = vld [vmem:[%s4086_s1 + $0x184] ss:$8 sps:$4 sm:$0xff]  }
  0xbc   : > { %2092 = vmatpush1.bf16.msra.mxu0 %v3048_v50  ;;  %1090 = vmatprep.subr.bf16.mxu1 %v3053_v56  ;;  %v3120_v50 = vld [vmem:[%s4086_s1 + $0x784] ss:$8 sps:$4 sm:$0xff]   ;;  %v3115_v56 = vld [vmem:[%s4086_s1 + $0x180] ss:$8 sps:$4 sm:$0xff]  }
  0xbd   : > { %2093 = vmatprep.subr.bf16.mxu0 %v3056_v57  ;;  %v3118_v57 = vld [vmem:[%s4086_s1 + $0x780] ss:$8 sps:$4 sm:$0xff]  }
  0xbf   : > { %1091 = vmatpush1.bf16.msra.mxu1 %v3051_v60  ;;  %v3123_v60 = vld [vmem:[%s4086_s1 + $0x194] ss:$8 sps:$4 sm:$0xff]  }
  0xc0   : > { %2094 = vmatpush1.bf16.msra.mxu0 %v3054_v61  ;;  %1092 = vmatprep.subr.bf16.mxu1 %v3059_v5  ;;  %v3126_v61 = vld [vmem:[%s4086_s1 + $0x794] ss:$8 sps:$4 sm:$0xff]  }
  0xc1   : > { %2095 = vmatprep.subr.bf16.mxu0 %v3062_v6  ;;  %v3135_v5 = vld [vmem:[%s4086_s1 + $0x1b4] ss:$8 sps:$4 sm:$0xff]  }
  0xc2   : > { %v3138_v6 = vld [vmem:[%s4086_s1 + $0x7b4] ss:$8 sps:$4 sm:$0xff]  }
  0xc3   : > { %1093 = vmatpush1.bf16.msra.mxu1 %v3057_v59  ;;  %v3139_v59 = vld [vmem:[%s4086_s1 + $0x1c0] ss:$8 sps:$4 sm:$0xff]  }
  0xc4   : > { %2096 = vmatpush1.bf16.msra.mxu0 %v3060_v9  ;;  %1103 = vmatprep.subr.bf16.mxu1 %v3067_v12  ;;  %v3142_v9 = vld [vmem:[%s4086_s1 + $0x7c0] ss:$8 sps:$4 sm:$0xff]   ;;  %v3145_v12 = vld [vmem:[%s4086_s1 + $0x1d0] ss:$8 sps:$4 sm:$0xff]  }
  0xc5   : > { %2106 = vmatprep.subr.bf16.mxu0 %v3072_v13  ;;  %v3148_v13 = vld [vmem:[%s4086_s1 + $0x7d0] ss:$8 sps:$4 sm:$0xff]  }
  0xc6   : > { %1095 = vmatmul.mubr.bf16.vlgmr.msra.gmra.mrb[0].mxu1 %v171_v14  ;;  %v3153_v14 = vld [vmem:[%s4086_s1 + $0x1e4] ss:$8 sps:$4 sm:$0xff]  }
  0xc7   : > { %2098 = vmatmul.mubr.bf16.vlgmr.msra.gmra.mrb[0].mxu0 %v1676_v15  ;;  %1104 = vmatpush1.bf16.msra.mxu1 %v3065_v52  ;;  %v3156_v15 = vld [vmem:[%s4086_s1 + $0x7e4] ss:$8 sps:$4 sm:$0xff]   ;;  %v160_v52 = vrot.slane %v3825_v51, 6  ;;  %v3157_v51 = vld [vmem:[%s4086_s1 + $0x1f0] ss:$8 sps:$4 sm:$0xff]  }
  0xc8   : > { %2107 = vmatpush1.bf16.msra.mxu0 %v3070_v18  ;;  %1105 = vmatprep.subr.bf16.mxu1 %v3075_v19  ;;  %v1654_v18 = vrot.slane %v3828_v54, 1  ;;  %v1666_v19 = vrot.slane %v3831_v55, 7  ;;  %v3160_v54 = vld [vmem:[%s4086_s1 + $0x7f0] ss:$8 sps:$4 sm:$0xff]  }
  0xc9   : > { %2108 = vmatprep.subr.bf16.mxu0 %v3078_v20  ;;  %1135 = vmatprep.mubr.bf16.mxu1 %v174_v21  ;;  %v3159_v20 = vld [vmem:[%s4086_s1 + $0x1f4] ss:$8 sps:$4 sm:$0xff]   ;;  %v169_v55 = vsel %vm166_vm0, %v3855_v4, %v160_v52 }
  0xca   : > { %2138 = vmatprep.mubr.bf16.mxu0 %v1679_v22  ;;  %v3162_v21 = vld [vmem:[%s4086_s1 + $0x7f4] ss:$8 sps:$4 sm:$0xff]   ;;  %v1674_v22 = vsel %vm166_vm0, %v1654_v18, %v1666_v19 }
  0xcb   : > { %1106 = vmatpush1.bf16.msra.mxu1 %v3073_v23  ;;  %v173_v23 = vpack.c.bf16 %v169_v55, %v169_v55 }
  0xcc   : > { %2109 = vmatpush1.bf16.msra.mxu0 %v3076_v24  ;;  %1107 = vmatprep.subr.bf16.mxu1 %v3081_v25  ;;  %v1678_v24 = vpack.c.bf16 %v1674_v22, %v1674_v22 }
  0xcd   : > { %2110 = vmatprep.subr.bf16.mxu0 %v3084_v26 }
  0xcf   : > { %1108 = vmatpush1.bf16.msra.mxu1 %v3079_v27 }
  0xd0   : > { %2111 = vmatpush1.bf16.msra.mxu0 %v3082_v28  ;;  %1109 = vmatprep.subr.bf16.mxu1 %v3087_v29 }
  0xd1   : > { %2112 = vmatprep.subr.bf16.mxu0 %v3090_v30 }
  0xd3   : > { %1110 = vmatpush1.bf16.msra.mxu1 %v3085_v31 }
  0xd4   : > { %2113 = vmatpush1.bf16.msra.mxu0 %v3088_v32  ;;  %1111 = vmatprep.subr.bf16.mxu1 %v3093_v33 }
  0xd5   : > { %2114 = vmatprep.subr.bf16.mxu0 %v3096_v34 }
  0xd7   : > { %1112 = vmatpush1.bf16.msra.mxu1 %v3091_v35 }
  0xd8   : > { %2115 = vmatpush1.bf16.msra.mxu0 %v3094_v36  ;;  %1113 = vmatprep.subr.bf16.mxu1 %v3099_v37 }
  0xd9   : > { %2116 = vmatprep.subr.bf16.mxu0 %v3102_v38 }
  0xdb   : > { %1114 = vmatpush1.bf16.msra.mxu1 %v3097_v39 }
  0xdc   : > { %2117 = vmatpush1.bf16.msra.mxu0 %v3100_v40  ;;  %1115 = vmatprep.subr.bf16.mxu1 %v3105_v41 }
  0xdd   : > { %2118 = vmatprep.subr.bf16.mxu0 %v3108_v42 }
  0xdf   : > { %1116 = vmatpush1.bf16.msra.mxu1 %v3103_v43 }
  0xe0   : > { %2119 = vmatpush1.bf16.msra.mxu0 %v3106_v44  ;;  %1117 = vmatprep.subr.bf16.mxu1 %v3111_v45 }
  0xe1   : > { %2120 = vmatprep.subr.bf16.mxu0 %v3114_v46 }
  0xe3   : > { %1118 = vmatpush1.bf16.msra.mxu1 %v3109_v47 }
  0xe4   : > { %2121 = vmatpush1.bf16.msra.mxu0 %v3112_v48  ;;  %1119 = vmatprep.subr.bf16.mxu1 %v3117_v49 }
  0xe5   : > { %2122 = vmatprep.subr.bf16.mxu0 %v3120_v50 }
  0xe7   : > { %1120 = vmatpush1.bf16.msra.mxu1 %v3115_v56 }
  0xe8   : > { %2123 = vmatpush1.bf16.msra.mxu0 %v3118_v57  ;;  %1121 = vmatprep.subr.bf16.mxu1 %v3123_v60 }
  0xe9   : > { %2124 = vmatprep.subr.bf16.mxu0 %v3126_v61 }
  0xeb   : > { %1122 = vmatpush1.bf16.msra.mxu1 %v3121_v62 }
  0xec   : > { %2125 = vmatpush1.bf16.msra.mxu0 %v3124_v63  ;;  %1123 = vmatprep.subr.bf16.mxu1 %v3129_v0 }
  0xed   : > { %2126 = vmatprep.subr.bf16.mxu0 %v3132_v1 }
  0xef   : > { %1124 = vmatpush1.bf16.msra.mxu1 %v3127_v2 }
  0xf0   : > { %2127 = vmatpush1.bf16.msra.mxu0 %v3130_v3  ;;  %1125 = vmatprep.subr.bf16.mxu1 %v3135_v5 }
  0xf1   : > { %2128 = vmatprep.subr.bf16.mxu0 %v3138_v6 }
  0xf3   : > { %1126 = vmatpush1.bf16.msra.mxu1 %v3133_v7 }
  0xf4   : > { %2129 = vmatpush1.bf16.msra.mxu0 %v3136_v53  ;;  %1127 = vmatprep.subr.bf16.mxu1 %v3141_v8 }
  0xf5   : > { %2130 = vmatprep.subr.bf16.mxu0 %v3144_v58 }
  0xf7   : > { %1128 = vmatpush1.bf16.msra.mxu1 %v3139_v59 }
  0xf8   : > { %2131 = vmatpush1.bf16.msra.mxu0 %v3142_v9  ;;  %1129 = vmatprep.subr.bf16.mxu1 %v3147_v10 }
  0xf9   : > { %2132 = vmatprep.subr.bf16.mxu0 %v3150_v11 }
  0xfb   : > { %1130 = vmatpush1.bf16.msra.mxu1 %v3145_v12 }
  0xfc   : > { %2133 = vmatpush1.bf16.msra.mxu0 %v3148_v13  ;;  %1131 = vmatprep.subr.bf16.mxu1 %v3153_v14 }
  0xfd   : > { %2134 = vmatprep.subr.bf16.mxu0 %v3156_v15 }
  0xff   : > { %1132 = vmatpush1.bf16.msra.mxu1 %v3151_v16 }
 0x100   : > { %2135 = vmatpush1.bf16.msra.mxu0 %v3154_v17  ;;  %1133 = vmatprep.subr.bf16.mxu1 %v3159_v20 }
 0x101   : > { %2136 = vmatprep.subr.bf16.mxu0 %v3162_v21 }
 0x103   : > { %1134 = vmatpush1.bf16.msra.mxu1 %v3157_v51 }
 0x104   : > { %2137 = vmatpush1.bf16.msra.mxu0 %v3160_v54 }
 0x106   : > { %1136 = vmatmul.mubr.bf16.vlgmr.msra.gmra.mrb[0].mxu1 %v173_v23 }
 0x107   : > { %2139 = vmatmul.mubr.bf16.vlgmr.msra.gmra.mrb[0].mxu0 %v1678_v24 }
 0x1d9   : > { %v1137_v25 = vpop.f32.mrb[0].mxu1 }
 0x1da   : > { %v2140_v26 = vpop.f32.mrb[0].mxu0  ;;  %v1139_v28 = vpop.f32.mrb[1].mxu1 }
 0x1db   : > { %v2732_v27 = vadd.f32 %v2140_v26, %v1137_v25  ;;  %v2142_v29 = vpop.f32.mrb[1].mxu0  ;;  %v1141_v31 = vpop.f32.mrb[2].mxu1 }
 0x1dc   : > { %v2733_v30 = vadd.f32 %v2142_v29, %v1139_v28  ;;  %v2144_v32 = vpop.f32.mrb[2].mxu0  ;;  %v1142_v34 = vpop.f32.mrb[3].mxu1 }
 0x1dd   : > { %v2150_v4 = vsel %vm2149_vm1, %v2732_v27, 0.0  ;;  %v2167_v33 = vmul.f32 %v2732_v27, %v2732_v27  ;;  %v2145_v35 = vpop.f32.mrb[3].mxu0 }
 0x1de   : > { %v2151_v36 = vrot.slane %v2150_v4, 4  ;;  %v2157_v37 = vsel %vm2149_vm1, %v2733_v30, 0.0  ;;  %v2168_v38 = vmul.f32 %v2733_v30, %v2733_v30 }
 0x1df   : > { %v2169_v39 = vsel %vm2149_vm1, %v2167_v33, 0.0  ;;  %v2158_v40 = vrot.slane %v2157_v37, 4 }
 0x1e0   : > { %v2152_v41 = vadd.f32 %v2151_v36, %v2150_v4  ;;  %v2170_v42 = vrot.slane %v2169_v39, 4  ;;  %v2176_v43 = vsel %vm2149_vm1, %v2168_v38, 0.0 }
 0x1e1   : > { %v2159_v44 = vadd.f32 %v2158_v40, %v2157_v37  ;;  %v2177_v45 = vrot.slane %v2176_v43, 4 }
 0x1e2   : > { %v2153_v46 = vrot.slane %v2152_v41, 2  ;;  %v2171_v47 = vadd.f32 %v2170_v42, %v2169_v39 }
 0x1e3   : > { %v2160_v48 = vrot.slane %v2159_v44, 2  ;;  %v2178_v49 = vadd.f32 %v2177_v45, %v2176_v43 }
 0x1e4   : > { %v2154_v50 = vadd.f32 %v2153_v46, %v2152_v41  ;;  %v2172_v56 = vrot.slane %v2171_v47, 2 }
 0x1e5   : > { %v2161_v57 = vadd.f32 %v2160_v48, %v2159_v44  ;;  %v2179_v60 = vrot.slane %v2178_v49, 2 }
 0x1e6   : > { %v2155_v61 = vrot.slane %v2154_v50, 1  ;;  %v2173_v62 = vadd.f32 %v2172_v56, %v2171_v47 }
 0x1e7   : > { %v2162_v63 = vrot.slane %v2161_v57, 1  ;;  %v2180_v0 = vadd.f32 %v2179_v60, %v2178_v49 }
 0x1e8   : > { %v2156_v1 = vadd.f32 %v2155_v61, %v2154_v50  ;;  %v2174_v2 = vrot.slane %v2173_v62, 1 }
 0x1e9   : > { %v2163_v3 = vadd.f32 %v2162_v63, %v2161_v57  ;;  %v2181_v5 = vrot.slane %v2180_v0, 1 }
 0x1ea   : > { %v2165_v6 = vmul.f32 0.25, %v2156_v1  ;;  %v2175_v7 = vadd.f32 %v2174_v2, %v2173_v62 }
 0x1eb   : > { %v2166_v53 = vmul.f32 0.25, %v2163_v3  ;;  %v2182_v8 = vadd.f32 %v2181_v5, %v2180_v0 }
 0x1ec   : > { %v2183_v58 = vmul.f32 0.25, %v2175_v7  ;;  %v2185_v59 = vmul.f32 %v2165_v6, %v2165_v6 }
 0x1ed   : > { %v2184_v9 = vmul.f32 0.25, %v2182_v8  ;;  %v2186_v10 = vmul.f32 %v2166_v53, %v2166_v53 }
 0x1ee   : > { %v2187_v11 = vsub.f32 %v2183_v58, %v2185_v59 }
 0x1ef   : > { %v2188_v12 = vsub.f32 %v2184_v9, %v2186_v10 }
 0x1f0   : > { %v2189_v13 = vadd.f32 1e-05, %v2187_v11 }
 0x1f1   : > { %v2190_v14 = vadd.f32 1e-05, %v2188_v12 }
 0x1f2   : > { %3167 = vrsqrt.f32 %v2189_v13 }
 0x1f3   : > { %3169 = vrsqrt.f32 %v2190_v14 }
 0x1fc   : > { %v3168_v15 = vpop.eup %3167 }
 0x1fd   : > { %v3170_v16 = vpop.eup %3169  ;;  %v2193_v17 = vmul.f32 %v3168_v15, %v2732_v27  ;;  %v2195_v52 = vmul.f32 %v3168_v15, %v2165_v6 }
 0x1fe   : > { %v2194_v18 = vmul.f32 %v3170_v16, %v2733_v30  ;;  %v2196_v19 = vmul.f32 %v3170_v16, %v2166_v53 }
 0x1ff   : > { %v2197_v20 = vsub.f32 %v2193_v17, %v2195_v52 }
 0x200   : > { %v2198_v21 = vsub.f32 %v2194_v18, %v2196_v19 }
 0x201   : > { %vm2199_vm2 = vcmp.ge.f32.partialorder %v2197_v20, 0.0  ;;  %v2201_v51 = vmul.f32 0.4, %v2197_v20 }
 0x202   : > { %vm2200_vm3 = vcmp.ge.f32.partialorder %v2198_v21, 0.0  ;;  %v2202_v54 = vmul.f32 0.4, %v2198_v21 }
 0x203   : > { %v2203_v55 = vsel %vm2199_vm2, %v2197_v20, %v2201_v51 }
 0x204   : > { %v2204_v22 = vsel %vm2200_vm3, %v2198_v21, %v2202_v54 }
 0x205   : > { %v2207_v23 = vcombine.low %v2203_v55, %v2204_v22 }
 0x207   : > { %2209 = vst [vmem:[%s143_s20] sm:$0xff] %v2207_v23 }
 0x208 PF: > { %s12_s9 = sadd.s32 1, %s3177_s9  }
 0x209   : > { %p9_p4 = scmp.ge.s32.totalorder %s12_s9, 4  }
 0x20b   :  { %11 = sbr.rel (!%p9_p4) target bundleno = 1 (0x1), region = 62 }

</bundles_post_ra>
